<compile_context>
chip_gen: v5e
topology: v5e:2x2
jax: 0.10.0
libtpu: 0.0.40
codegen_flags: <defaults>
</compile_context>

<pallas_src>
import functools
import math

import jax
import jax.numpy as jnp
from jax.experimental import pallas as pl
from jax.experimental.pallas import tpu as pltpu


# MXU operand dtype (accumulation stays f32 via preferred_element_type).
# Flip to jnp.float32 for bit-faithful matmuls vs the torch reference.
MATMUL_DTYPE = jnp.bfloat16

_VMEM_LIMIT_BYTES = 48 * 1024 * 1024


def _pick_hw_tile(hw, tm_max=512):
    """Largest lane tile <= tm_max that divides HW (multiple of 128), else HW."""
    if hw <= tm_max:
        return hw
    for cand in range(tm_max - tm_max % 128, 127, -128):
        if hw % cand == 0:
            return cand
    return hw  # single big tile fallback; fine for the shapes used here


# ----------------------------------------------------------------------------
# Kernel 1: erase_feature, fused, all in (C, HW):
#   masked softmax (f32, exact) + bmm(x, softmax) as a f32 weighted pool +
#   conv_erase (1x1, f32 matvec) + mask-mul + broadcast add.
#   Output is written channels-first in MATMUL_DTYPE (feeds the conv matmuls).
# ----------------------------------------------------------------------------
def _erase_kernel(x_ref, m_ref, s_ref, we_ref, be_ref, o_ref):
    x = x_ref[0]                               # (C, HW) f32
    m = m_ref[0]                               # (1, HW) f32
    s = s_ref[0]                               # (1, HW) f32

    # Masked softmax over HW, entirely f32 (feeds the argmax-based masks).
    sm = s - (1.0 - m) * 1.0e8
    sm = sm - jnp.max(sm, axis=1, keepdims=True)
    e = jnp.exp(sm)
    p = e / jnp.sum(e, axis=1, keepdims=True)  # (1, HW)

    # res = bmm(x, softmax): weighted pool over HW (VPU mul + XLU lane reduce).
    res = jnp.sum(x * p, axis=1, keepdims=True)                       # (C, 1)

    # conv_erase (1x1, bias): We @ res + be, tiny f32 matvec.
    erase = (jnp.dot(we_ref[...], res, preferred_element_type=jnp.float32)
             + be_ref[...])                                           # (C, 1)

    # x * mask (lane-dense row broadcast) + broadcast(erase); one bf16 cast.
    o_ref[0] = (x * m + erase).astype(o_ref.dtype)


def erase_feature(x_chw, m_row, s_row, we, be_col):
    """x_chw: (B, C, HW) f32; m_row/s_row: (B, 1, HW) f32; we: (C, C) f32;
    be_col: (C, 1) f32.  Returns (B, C, HW) activations in MATMUL_DTYPE."""
    b, c, hw = x_chw.shape
    return pl.pallas_call(
        _erase_kernel,
        out_shape=jax.ShapeDtypeStruct((b, c, hw), MATMUL_DTYPE),
        grid=(b,),
        in_specs=[
            pl.BlockSpec((1, c, hw), lambda i: (i, 0, 0)),
            pl.BlockSpec((1, 1, hw), lambda i: (i, 0, 0)),
            pl.BlockSpec((1, 1, hw), lambda i: (i, 0, 0)),
            pl.BlockSpec((c, c), lambda i: (0, 0)),
            pl.BlockSpec((c, 1), lambda i: (0, 0)),
        ],
        out_specs=pl.BlockSpec((1, c, hw), lambda i: (i, 0, 0)),
        compiler_params=pltpu.CompilerParams(
            dimension_semantics=("parallel",),
            vmem_limit_bytes=_VMEM_LIMIT_BYTES,
        ),
    )(x_chw, m_row, s_row, we, be_col)


# ----------------------------------------------------------------------------
# Kernel 2: fused layer4 (C -> 1024) + branch (1024 -> C), NCHW layout.
#   Variant A (branch0): also emits the per-batch global average pool of the
#     output as a second (B, C, 1) output, accumulated over the HW grid axis.
#   Variant B (branch1): adds a residual (y0) so y0 + y1 is produced directly,
#     already in NCHW — it is the module output.
# The (1024, tm) hidden activation is a local bf16 value (f32 accumulate,
# single cast); it lives only in VMEM.
# ----------------------------------------------------------------------------
def _l4_branch_gap_kernel(x_ref, w4_ref, b4_ref, wb_ref, bb_ref,
                          y_ref, gap_ref, *, inv_hw):
    i = pl.program_id(1)
    x = x_ref[0]                                            # (C, tm) bf16
    h = (jnp.dot(w4_ref[...], x, preferred_element_type=jnp.float32)
         + b4_ref[...]).astype(MATMUL_DTYPE)                # (1024, tm) bf16
    y = (jnp.dot(wb_ref[...], h, preferred_element_type=jnp.float32)
         + bb_ref[...])                                     # (C, tm) f32
    y_ref[0] = y

    part = jnp.sum(y, axis=1, keepdims=True) * inv_hw       # (C, 1)

    @pl.when(i == 0)
    def _():
        gap_ref[0] = part

    @pl.when(i > 0)
    def _():
        gap_ref[0] = gap_ref[0] + part


def _l4_branch_res_kernel(x_ref, w4_ref, b4_ref, wb_ref, bb_ref, r_ref, y_ref):
    x = x_ref[0]                                            # (C, tm) bf16
    h = (jnp.dot(w4_ref[...], x, preferred_element_type=jnp.float32)
         + b4_ref[...]).astype(MATMUL_DTYPE)                # (1024, tm) bf16
    y_ref[0] = (jnp.dot(wb_ref[...], h, preferred_element_type=jnp.float32)
                + bb_ref[...] + r_ref[0])                   # (C, tm) f32


def layer4_branch(x, w4, b4, wb, bb, *, residual=None, compute_gap=False,
                  tm_max=512):
    """x: (B, C, HW) in MATMUL_DTYPE; w4: (hidden, C); wb: (Cout, hidden);
    b4/bb: (hidden, 1)/(Cout, 1) f32 columns; residual: optional (B, Cout, HW)
    f32 added to the result.  Returns (B, Cout, HW) f32, plus the (B, Cout, 1)
    global average pool when compute_gap=True."""
    b, c, hw = x.shape
    hidden = w4.shape[0]
    cout = wb.shape[0]
    tm = _pick_hw_tile(hw, tm_max)
    n_i = hw // tm

    in_specs = [
        pl.BlockSpec((1, c, tm), lambda bi, i: (bi, 0, i)),
        pl.BlockSpec((hidden, c), lambda bi, i: (0, 0)),
        pl.BlockSpec((hidden, 1), lambda bi, i: (0, 0)),
        pl.BlockSpec((cout, hidden), lambda bi, i: (0, 0)),
        pl.BlockSpec((cout, 1), lambda bi, i: (0, 0)),
    ]
    args = [x, w4, b4, wb, bb]

    y_spec = pl.BlockSpec((1, cout, tm), lambda bi, i: (bi, 0, i))
    y_shape = jax.ShapeDtypeStruct((b, cout, hw), jnp.float32)

    if compute_gap:
        kernel = functools.partial(_l4_branch_gap_kernel, inv_hw=float(1.0 / hw))
        out_shape = (y_shape, jax.ShapeDtypeStruct((b, cout, 1), jnp.float32))
        out_specs = (y_spec,
                     pl.BlockSpec((1, cout, 1), lambda bi, i: (bi, 0, 0)))
        dims = ("parallel", "arbitrary")   # gap accumulates across the HW axis
    else:
        kernel = _l4_branch_res_kernel
        in_specs.append(pl.BlockSpec((1, cout, tm), lambda bi, i: (bi, 0, i)))
        args.append(residual)
        out_shape = y_shape
        out_specs = y_spec
        dims = ("parallel", "parallel")

    return pl.pallas_call(
        kernel,
        out_shape=out_shape,
        grid=(b, n_i),
        in_specs=in_specs,
        out_specs=out_specs,
        compiler_params=pltpu.CompilerParams(
            dimension_semantics=dims,
            vmem_limit_bytes=_VMEM_LIMIT_BYTES,
        ),
    )(*args)


# ----------------------------------------------------------------------------
# Kernel 3: correlation.  Only needs the fused GAP column, conv_reduce weight
# and rgb; the full y0 activation is never re-read.  All f32 (feeds argmax).
# ----------------------------------------------------------------------------
def _corr_kernel(gap_ref, wr_ref, rgb_ref, f_ref, *, inv_sqrt_c):
    gap = gap_ref[0]                                        # (C, 1) f32
    xr = jnp.dot(wr_ref[...], gap, preferred_element_type=jnp.float32)  # (C, 1)
    r = rgb_ref[0]                                          # (C, HW) f32
    f_ref[0] = jnp.sum(xr * r, axis=0, keepdims=True) * inv_sqrt_c      # (1, HW)


def correlation(gap_col, rgb_chw, wr):
    """gap_col: (B, C, 1) f32; rgb_chw: (B, C, HW) f32; wr: (C, C) f32.
    Returns (B, 1, HW) f32 correlation map."""
    b, c, _ = gap_col.shape
    hw = rgb_chw.shape[2]
    kernel = functools.partial(_corr_kernel, inv_sqrt_c=float(1.0 / math.sqrt(c)))
    return pl.pallas_call(
        kernel,
        out_shape=jax.ShapeDtypeStruct((b, 1, hw), jnp.float32),
        grid=(b,),
        in_specs=[
            pl.BlockSpec((1, c, 1), lambda i: (i, 0, 0)),
            pl.BlockSpec((c, c), lambda i: (0, 0)),
            pl.BlockSpec((1, c, hw), lambda i: (i, 0, 0)),
        ],
        out_specs=pl.BlockSpec((1, 1, hw), lambda i: (i, 0, 0)),
        compiler_params=pltpu.CompilerParams(
            dimension_semantics=("parallel",),
            vmem_limit_bytes=_VMEM_LIMIT_BYTES,
        ),
    )(gap_col, wr, rgb_chw)


# ----------------------------------------------------------------------------
# block_binarization: tiny (B, H)-sized argmax / one-hot mask logic, plain JAX.
# ----------------------------------------------------------------------------
def block_binarization(f, block_size=3):
    """f: (B, 1, H, W) -> (block_masks (B,1,H,1), soft_masks (B,1,H,W))."""
    b, t, h, w = f.shape
    fm = jnp.mean(f, axis=3).reshape(b * t, h)
    pad = block_size // 2
    fp = jnp.pad(fm, ((0, 0), (pad, pad)))
    score = sum(fp[:, i:i + h] for i in range(block_size))   # 3-tap box filter
    index = jnp.argmax(score, axis=1)                        # first max (torch)
    onehot = jax.nn.one_hot(index, h, dtype=jnp.float32)
    op = jnp.pad(onehot, ((0, 0), (pad, pad)))
    dil = jnp.max(
        jnp.stack([op[:, i:i + h] for i in range(block_size)], axis=0), axis=0
    )                                                        # max_pool dilation
    block_masks = (1.0 - dil).reshape(b, t, h, 1)
    return block_masks, f


# ----------------------------------------------------------------------------
# Full TSE forward (everything stays NCHW; zero transposes).
# ----------------------------------------------------------------------------
def tse_forward(fus, rgb, p):
    """fus, rgb: NCHW (B, C, H, W) f32.  Returns (B, C, H, W) f32."""
    b, c, h, w = fus.shape
    hw = h * w
    fus_f = fus.reshape(b, c, hw)
    rgb_f = rgb.reshape(b, c, hw)

    ones_row = jnp.ones((b, 1, hw), jnp.float32)

    # --- branch 0: x0 = erase(fus, 1, 1);  y0 = branch0(layer4(x0)) + GAP ---
    x0 = erase_feature(fus_f, ones_row, ones_row, p["We"], p["be"])
    y0, gap0 = layer4_branch(x0, p["W4"], p["b4"], p["Wb0"], p["bb0"],
                             compute_gap=True)               # (B,C,HW), (B,C,1)

    # --- correlation (y0.detach() is a forward no-op) + block masks ---------
    f = correlation(gap0, rgb_f, p["Wr"]).reshape(b, 1, h, w)
    block_masks, soft_masks = block_binarization(f, block_size=3)
    masks = block_masks[:, 0]                                # (B, H, 1)
    m_row = jnp.broadcast_to(masks, (b, h, w)).reshape(b, 1, hw)
    s_row = soft_masks[:, 0].reshape(b, 1, hw)

    # --- branch 1 (y0 residual fused): y0 + branch1(layer4(x1)) -------------
    x1 = erase_feature(rgb_f, m_row, s_row, p["We"], p["be"])
    y = layer4_branch(x1, p["W4"], p["b4"], p["Wb1"], p["bb1"],
                      residual=y0)                           # (B, C, HW) f32
    return y.reshape(b, c, h, w)


# ----------------------------------------------------------------------------
# Deterministic synthetic parameters (shapes per TSE.__init__, channel=c).
# All 1x1 conv weights keep the natural torch layout: (Cout, Cin) = W[:,:,0,0];
# biases are (Cout, 1) columns.  conv_reduce / conv_erase stay f32 (they feed
# the argmax-based mask selection).
# ----------------------------------------------------------------------------
def init_params(c, hidden=1024, key=jax.random.PRNGKey(42),
                matmul_dtype=MATMUL_DTYPE):
    ks = jax.random.split(key, 9)
    f32 = jnp.float32
    return {
        # layer4: Conv2d(c, 1024, 1)
        "W4": (jax.random.normal(ks[0], (hidden, c), f32)
               / math.sqrt(c)).astype(matmul_dtype),
        "b4": jax.random.normal(ks[1], (hidden, 1), f32) * 0.01,
        # branch0 / branch1: Conv2d(1024, c, 1)
        "Wb0": (jax.random.normal(ks[2], (c, hidden), f32)
                / math.sqrt(hidden)).astype(matmul_dtype),
        "bb0": jax.random.normal(ks[3], (c, 1), f32) * 0.01,
        "Wb1": (jax.random.normal(ks[4], (c, hidden), f32)
                / math.sqrt(hidden)).astype(matmul_dtype),
        "bb1": jax.random.normal(ks[5], (c, 1), f32) * 0.01,
        # conv_reduce: Conv2d(c, c, 1, bias=False), N(0, sqrt(2/c)) init.
        "Wr": jax.random.normal(ks[6], (c, c), f32) * math.sqrt(2.0 / c),
        # conv_erase: Conv2d(c, c, 1, bias=True), N(0, sqrt(2/c)) init.
        "We": jax.random.normal(ks[7], (c, c), f32) * math.sqrt(2.0 / c),
        "be": jax.random.normal(ks[8], (c, 1), f32) * 0.01,
    }


if __name__ == "__main__":
    # Small but TPU-layout-friendly shapes: C=128 keeps every tile lane/sublane
    # dense; hidden=1024 matches the module definition.
    b, c, h, w = 2, 128, 16, 16
    key = jax.random.PRNGKey(0)
    k1, k2 = jax.random.split(key)
    fus = jax.random.normal(k1, (b, c, h, w), jnp.float32)
    rgb = jax.random.normal(k2, (b, c, h, w), jnp.float32)

    params = init_params(c)
    out = jax.jit(tse_forward)(fus, rgb, params)
    out = jax.block_until_ready(out)

    assert out.shape == (b, c, h, w), out.shape
    assert bool(jnp.all(jnp.isfinite(out)))
    print("KERNEL_OK")
</pallas_src>

<mosaic_0001>
module attributes {stable_mosaic.version = 11 : i64} {
  func.func @_corr_kernel(%arg0: i32, %arg1: memref<1x128x1xf32, #tpu.memory_space<vmem>>, %arg2: memref<128x128xf32, #tpu.memory_space<vmem>>, %arg3: memref<1x128x256xf32, #tpu.memory_space<vmem>>, %arg4: memref<1x1x256xf32, #tpu.memory_space<vmem>>) attributes {dimension_semantics = [#tpu.dimension_semantics<parallel>], iteration_bounds = array<i64: 2>, scalar_prefetch = 0 : i64, scratch_operands = 0 : i64, tpu.core_type = #tpu.core_type<tc>, window_params = [{transform_indices = @transform_0, window_bounds = array<i64: 1, 128, 1>}, {pipeline_mode = #tpu.pipeline_mode<synchronous>, transform_indices = @transform_1, window_bounds = array<i64: 128, 128>}, {transform_indices = @transform_2, window_bounds = array<i64: 1, 128, 256>}, {transform_indices = @transform_3, window_bounds = array<i64: 1, 1, 256>}]} {
    %c0 = arith.constant 0 : index
    %c0_0 = arith.constant 0 : index
    %c0_1 = arith.constant 0 : index
    %0 = vector.load %arg1[%c0, %c0_0, %c0_1] : memref<1x128x1xf32, #tpu.memory_space<vmem>>, vector<1x128x1xf32>
    %1 = vector.shape_cast %0 : vector<1x128x1xf32> to vector<128x1xf32>
    %c0_2 = arith.constant 0 : index
    %c0_3 = arith.constant 0 : index
    %2 = vector.load %arg2[%c0_2, %c0_3] : memref<128x128xf32, #tpu.memory_space<vmem>>, vector<128x128xf32>
    %cst = arith.constant dense<0.000000e+00> : vector<128x1xf32>
    %3 = tpu.matmul %2, %1, %cst {dimension_numbers = #tpu.dot_dimension_numbers<[1], [0], [0], [1], [0, 0, 1, 1], [], []>} : vector<128x128xf32>, vector<128x1xf32>, vector<128x1xf32> -> vector<128x1xf32>
    %c0_4 = arith.constant 0 : index
    %c0_5 = arith.constant 0 : index
    %c0_6 = arith.constant 0 : index
    %4 = vector.load %arg3[%c0_4, %c0_5, %c0_6] : memref<1x128x256xf32, #tpu.memory_space<vmem>>, vector<1x128x256xf32>
    %5 = vector.shape_cast %4 : vector<1x128x256xf32> to vector<128x256xf32>
    %6 = vector.broadcast %3 : vector<128x1xf32> to vector<128x256xf32>
    %7 = arith.mulf %6, %5 : vector<128x256xf32>
    %cst_7 = arith.constant dense<0.000000e+00> : vector<256xf32>
    %8 = vector.multi_reduction <add>, %7, %cst_7 [0] : vector<128x256xf32> to vector<256xf32>
    %9 = vector.shape_cast %8 : vector<256xf32> to vector<1x256xf32>
    %cst_8 = arith.constant 0.0883883461 : f32
    %10 = vector.broadcast %cst_8 : f32 to vector<1x256xf32>
    %11 = arith.mulf %9, %10 : vector<1x256xf32>
    %c0_9 = arith.constant 0 : index
    %c0_10 = arith.constant 0 : index
    %c0_11 = arith.constant 0 : index
    %12 = vector.load %arg4[%c0_9, %c0_10, %c0_11] : memref<1x1x256xf32, #tpu.memory_space<vmem>>, vector<1x1x256xf32>
    %13 = vector.shape_cast %12 : vector<1x1x256xf32> to vector<1x256xf32>
    %14 = vector.shape_cast %11 : vector<1x256xf32> to vector<1x1x256xf32>
    tpu.vector_store %arg4[%c0_9, %c0_10, %c0_11], %14 {strides = array<i32>} : memref<1x1x256xf32, #tpu.memory_space<vmem>>, vector<1x1x256xf32>,
    return
  }
  func.func @transform_0(%arg0: i32) -> (i32, i32, i32) {
    %c0_i32 = arith.constant 0 : i32
    %c0_i32_0 = arith.constant 0 : i32
    %c0_i32_1 = arith.constant 0 : i32
    return %arg0, %c0_i32, %c0_i32_0 : i32, i32, i32
  }
  func.func @transform_1(%arg0: i32) -> (i32, i32) {
    %c0_i32 = arith.constant 0 : i32
    %c0_i32_0 = arith.constant 0 : i32
    %c0_i32_1 = arith.constant 0 : i32
    return %c0_i32, %c0_i32_0 : i32, i32
  }
  func.func @transform_2(%arg0: i32) -> (i32, i32, i32) {
    %c0_i32 = arith.constant 0 : i32
    %c0_i32_0 = arith.constant 0 : i32
    %c0_i32_1 = arith.constant 0 : i32
    return %arg0, %c0_i32, %c0_i32_0 : i32, i32, i32
  }
  func.func @transform_3(%arg0: i32) -> (i32, i32, i32) {
    %c0_i32 = arith.constant 0 : i32
    %c0_i32_0 = arith.constant 0 : i32
    %c0_i32_1 = arith.constant 0 : i32
    return %arg0, %c0_i32, %c0_i32_0 : i32, i32, i32
  }
}

module attributes {stable_mosaic.version = 11 : i64} {
  func.func @_l4_branch_gap_kernel(%arg0: i32, %arg1: i32, %arg2: memref<1x128x256xbf16, #tpu.memory_space<vmem>>, %arg3: memref<1024x128xbf16, #tpu.memory_space<vmem>>, %arg4: memref<1024x1xf32, #tpu.memory_space<vmem>>, %arg5: memref<128x1024xbf16, #tpu.memory_space<vmem>>, %arg6: memref<128x1xf32, #tpu.memory_space<vmem>>, %arg7: memref<1x128x256xf32, #tpu.memory_space<vmem>>, %arg8: memref<1x128x1xf32, #tpu.memory_space<vmem>>) attributes {dimension_semantics = [#tpu.dimension_semantics<parallel>, #tpu.dimension_semantics<arbitrary>], iteration_bounds = array<i64: 2, 1>, scalar_prefetch = 0 : i64, scratch_operands = 0 : i64, tpu.core_type = #tpu.core_type<tc>, window_params = [{transform_indices = @transform_0, window_bounds = array<i64: 1, 128, 256>}, {pipeline_mode = #tpu.pipeline_mode<synchronous>, transform_indices = @transform_1, window_bounds = array<i64: 1024, 128>}, {pipeline_mode = #tpu.pipeline_mode<synchronous>, transform_indices = @transform_2, window_bounds = array<i64: 1024, 1>}, {pipeline_mode = #tpu.pipeline_mode<synchronous>, transform_indices = @transform_3, window_bounds = array<i64: 128, 1024>}, {pipeline_mode = #tpu.pipeline_mode<synchronous>, transform_indices = @transform_4, window_bounds = array<i64: 128, 1>}, {transform_indices = @transform_5, window_bounds = array<i64: 1, 128, 256>}, {transform_indices = @transform_6, window_bounds = array<i64: 1, 128, 1>}]} {
    %c0 = arith.constant 0 : index
    %c0_0 = arith.constant 0 : index
    %c0_1 = arith.constant 0 : index
    %0 = vector.load %arg2[%c0, %c0_0, %c0_1] : memref<1x128x256xbf16, #tpu.memory_space<vmem>>, vector<1x128x256xbf16>
    %1 = vector.shape_cast %0 : vector<1x128x256xbf16> to vector<128x256xbf16>
    %c0_2 = arith.constant 0 : index
    %c0_3 = arith.constant 0 : index
    %2 = vector.load %arg3[%c0_2, %c0_3] : memref<1024x128xbf16, #tpu.memory_space<vmem>>, vector<1024x128xbf16>
    %cst = arith.constant dense<0.000000e+00> : vector<1024x256xf32>
    %3 = tpu.matmul %2, %1, %cst {dimension_numbers = #tpu.dot_dimension_numbers<[1], [0], [0], [1], [0, 0, 1, 1], [], []>} : vector<1024x128xbf16>, vector<128x256xbf16>, vector<1024x256xf32> -> vector<1024x256xf32>
    %c0_4 = arith.constant 0 : index
    %c0_5 = arith.constant 0 : index
    %4 = vector.load %arg4[%c0_4, %c0_5] : memref<1024x1xf32, #tpu.memory_space<vmem>>, vector<1024x1xf32>
    %5 = vector.broadcast %4 : vector<1024x1xf32> to vector<1024x256xf32>
    %6 = arith.addf %3, %5 : vector<1024x256xf32>
    %7 = arith.truncf %6 : vector<1024x256xf32> to vector<1024x256xbf16>
    %c0_6 = arith.constant 0 : index
    %c0_7 = arith.constant 0 : index
    %8 = vector.load %arg5[%c0_6, %c0_7] : memref<128x1024xbf16, #tpu.memory_space<vmem>>, vector<128x1024xbf16>
    %cst_8 = arith.constant dense<0.000000e+00> : vector<128x256xf32>
    %9 = tpu.matmul %8, %7, %cst_8 {dimension_numbers = #tpu.dot_dimension_numbers<[1], [0], [0], [1], [0, 0, 1, 1], [], []>} : vector<128x1024xbf16>, vector<1024x256xbf16>, vector<128x256xf32> -> vector<128x256xf32>
    %c0_9 = arith.constant 0 : index
    %c0_10 = arith.constant 0 : index
    %10 = vector.load %arg6[%c0_9, %c0_10] : memref<128x1xf32, #tpu.memory_space<vmem>>, vector<128x1xf32>
    %11 = vector.broadcast %10 : vector<128x1xf32> to vector<128x256xf32>
    %12 = arith.addf %9, %11 : vector<128x256xf32>
    %c0_11 = arith.constant 0 : index
    %c0_12 = arith.constant 0 : index
    %c0_13 = arith.constant 0 : index
    %13 = vector.load %arg7[%c0_11, %c0_12, %c0_13] : memref<1x128x256xf32, #tpu.memory_space<vmem>>, vector<1x128x256xf32>
    %14 = vector.shape_cast %13 : vector<1x128x256xf32> to vector<128x256xf32>
    %15 = vector.shape_cast %12 : vector<128x256xf32> to vector<1x128x256xf32>
    tpu.vector_store %arg7[%c0_11, %c0_12, %c0_13], %15 {strides = array<i32>} : memref<1x128x256xf32, #tpu.memory_space<vmem>>, vector<1x128x256xf32>,
    %cst_14 = arith.constant dense<0.000000e+00> : vector<128xf32>
    %16 = vector.multi_reduction <add>, %12, %cst_14 [1] : vector<128x256xf32> to vector<128xf32>
    %17 = vector.shape_cast %16 : vector<128xf32> to vector<128x1xf32>
    %cst_15 = arith.constant 3.906250e-03 : f32
    %18 = vector.broadcast %cst_15 : f32 to vector<128x1xf32>
    %19 = arith.mulf %17, %18 : vector<128x1xf32>
    %c0_i32 = arith.constant 0 : i32
    %20 = arith.cmpi eq, %arg1, %c0_i32 : i32
    %21 = arith.extui %20 : i1 to i32
    %c0_i32_16 = arith.constant 0 : i32
    %22 = arith.cmpi ne, %21, %c0_i32_16 : i32
    scf.if %22 {
      %c0_19 = arith.constant 0 : index
      %c0_20 = arith.constant 0 : index
      %c0_21 = arith.constant 0 : index
      %26 = vector.load %arg8[%c0_19, %c0_20, %c0_21] : memref<1x128x1xf32, #tpu.memory_space<vmem>>, vector<1x128x1xf32>
      %27 = vector.shape_cast %26 : vector<1x128x1xf32> to vector<128x1xf32>
      %28 = vector.shape_cast %19 : vector<128x1xf32> to vector<1x128x1xf32>
      tpu.vector_store %arg8[%c0_19, %c0_20, %c0_21], %28 {strides = array<i32>} : memref<1x128x1xf32, #tpu.memory_space<vmem>>, vector<1x128x1xf32>,
    } else {
    }
    %c0_i32_17 = arith.constant 0 : i32
    %23 = arith.cmpi sgt, %arg1, %c0_i32_17 : i32
    %24 = arith.extui %23 : i1 to i32
    %c0_i32_18 = arith.constant 0 : i32
    %25 = arith.cmpi ne, %24, %c0_i32_18 : i32
    scf.if %25 {
      %c0_19 = arith.constant 0 : index
      %c0_20 = arith.constant 0 : index
      %c0_21 = arith.constant 0 : index
      %26 = vector.load %arg8[%c0_19, %c0_20, %c0_21] : memref<1x128x1xf32, #tpu.memory_space<vmem>>, vector<1x128x1xf32>
      %27 = vector.shape_cast %26 : vector<1x128x1xf32> to vector<128x1xf32>
      %28 = arith.addf %27, %19 : vector<128x1xf32>
      %c0_22 = arith.constant 0 : index
      %c0_23 = arith.constant 0 : index
      %c0_24 = arith.constant 0 : index
      %29 = vector.load %arg8[%c0_22, %c0_23, %c0_24] : memref<1x128x1xf32, #tpu.memory_space<vmem>>, vector<1x128x1xf32>
      %30 = vector.shape_cast %29 : vector<1x128x1xf32> to vector<128x1xf32>
      %31 = vector.shape_cast %28 : vector<128x1xf32> to vector<1x128x1xf32>
      tpu.vector_store %arg8[%c0_22, %c0_23, %c0_24], %31 {strides = array<i32>} : memref<1x128x1xf32, #tpu.memory_space<vmem>>, vector<1x128x1xf32>,
    } else {
    }
    return
  }
  func.func @transform_0(%arg0: i32, %arg1: i32) -> (i32, i32, i32) {
    %c0_i32 = arith.constant 0 : i32
    %c0_i32_0 = arith.constant 0 : i32
    return %arg0, %c0_i32, %arg1 : i32, i32, i32
  }
  func.func @transform_1(%arg0: i32, %arg1: i32) -> (i32, i32) {
    %c0_i32 = arith.constant 0 : i32
    %c0_i32_0 = arith.constant 0 : i32
    %c0_i32_1 = arith.constant 0 : i32
    return %c0_i32, %c0_i32_0 : i32, i32
  }
  func.func @transform_2(%arg0: i32, %arg1: i32) -> (i32, i32) {
    %c0_i32 = arith.constant 0 : i32
    %c0_i32_0 = arith.constant 0 : i32
    %c0_i32_1 = arith.constant 0 : i32
    return %c0_i32, %c0_i32_0 : i32, i32
  }
  func.func @transform_3(%arg0: i32, %arg1: i32) -> (i32, i32) {
    %c0_i32 = arith.constant 0 : i32
    %c0_i32_0 = arith.constant 0 : i32
    %c0_i32_1 = arith.constant 0 : i32
    return %c0_i32, %c0_i32_0 : i32, i32
  }
  func.func @transform_4(%arg0: i32, %arg1: i32) -> (i32, i32) {
    %c0_i32 = arith.constant 0 : i32
    %c0_i32_0 = arith.constant 0 : i32
    %c0_i32_1 = arith.constant 0 : i32
    return %c0_i32, %c0_i32_0 : i32, i32
  }
  func.func @transform_5(%arg0: i32, %arg1: i32) -> (i32, i32, i32) {
    %c0_i32 = arith.constant 0 : i32
    %c0_i32_0 = arith.constant 0 : i32
    return %arg0, %c0_i32, %arg1 : i32, i32, i32
  }
  func.func @transform_6(%arg0: i32, %arg1: i32) -> (i32, i32, i32) {
    %c0_i32 = arith.constant 0 : i32
    %c0_i32_0 = arith.constant 0 : i32
    %c0_i32_1 = arith.constant 0 : i32
    return %arg0, %c0_i32, %c0_i32_0 : i32, i32, i32
  }
}

module attributes {stable_mosaic.version = 11 : i64} {
  func.func @_erase_kernel(%arg0: i32, %arg1: memref<1x128x256xf32, #tpu.memory_space<vmem>>, %arg2: memref<1x1x256xf32, #tpu.memory_space<vmem>>, %arg3: memref<1x1x256xf32, #tpu.memory_space<vmem>>, %arg4: memref<128x128xf32, #tpu.memory_space<vmem>>, %arg5: memref<128x1xf32, #tpu.memory_space<vmem>>, %arg6: memref<1x128x256xbf16, #tpu.memory_space<vmem>>) attributes {dimension_semantics = [#tpu.dimension_semantics<parallel>], iteration_bounds = array<i64: 2>, scalar_prefetch = 0 : i64, scratch_operands = 0 : i64, tpu.core_type = #tpu.core_type<tc>, window_params = [{transform_indices = @transform_0, window_bounds = array<i64: 1, 128, 256>}, {transform_indices = @transform_1, window_bounds = array<i64: 1, 1, 256>}, {transform_indices = @transform_2, window_bounds = array<i64: 1, 1, 256>}, {pipeline_mode = #tpu.pipeline_mode<synchronous>, transform_indices = @transform_3, window_bounds = array<i64: 128, 128>}, {pipeline_mode = #tpu.pipeline_mode<synchronous>, transform_indices = @transform_4, window_bounds = array<i64: 128, 1>}, {transform_indices = @transform_5, window_bounds = array<i64: 1, 128, 256>}]} {
    %c0 = arith.constant 0 : index
    %c0_0 = arith.constant 0 : index
    %c0_1 = arith.constant 0 : index
    %0 = vector.load %arg1[%c0, %c0_0, %c0_1] : memref<1x128x256xf32, #tpu.memory_space<vmem>>, vector<1x128x256xf32>
    %1 = vector.shape_cast %0 : vector<1x128x256xf32> to vector<128x256xf32>
    %c0_2 = arith.constant 0 : index
    %c0_3 = arith.constant 0 : index
    %c0_4 = arith.constant 0 : index
    %2 = vector.load %arg2[%c0_2, %c0_3, %c0_4] : memref<1x1x256xf32, #tpu.memory_space<vmem>>, vector<1x1x256xf32>
    %3 = vector.shape_cast %2 : vector<1x1x256xf32> to vector<1x256xf32>
    %c0_5 = arith.constant 0 : index
    %c0_6 = arith.constant 0 : index
    %c0_7 = arith.constant 0 : index
    %4 = vector.load %arg3[%c0_5, %c0_6, %c0_7] : memref<1x1x256xf32, #tpu.memory_space<vmem>>, vector<1x1x256xf32>
    %5 = vector.shape_cast %4 : vector<1x1x256xf32> to vector<1x256xf32>
    %cst = arith.constant 1.000000e+00 : f32
    %6 = vector.broadcast %cst : f32 to vector<1x256xf32>
    %7 = arith.subf %6, %3 : vector<1x256xf32>
    %cst_8 = arith.constant 1.000000e+08 : f32
    %8 = vector.broadcast %cst_8 : f32 to vector<1x256xf32>
    %9 = arith.mulf %7, %8 : vector<1x256xf32>
    %10 = arith.subf %5, %9 : vector<1x256xf32>
    %cst_9 = arith.constant dense<0xFF800000> : vector<1xf32>
    %11 = vector.multi_reduction <maximumf>, %10, %cst_9 [1] : vector<1x256xf32> to vector<1xf32>
    %12 = vector.shape_cast %11 : vector<1xf32> to vector<1x1xf32>
    %13 = vector.broadcast %12 : vector<1x1xf32> to vector<1x256xf32>
    %14 = arith.subf %10, %13 : vector<1x256xf32>
    %15 = math.exp %14 : vector<1x256xf32>
    %cst_10 = arith.constant dense<0.000000e+00> : vector<1xf32>
    %16 = vector.multi_reduction <add>, %15, %cst_10 [1] : vector<1x256xf32> to vector<1xf32>
    %17 = vector.shape_cast %16 : vector<1xf32> to vector<1x1xf32>
    %18 = vector.broadcast %17 : vector<1x1xf32> to vector<1x256xf32>
    %19 = arith.divf %15, %18 : vector<1x256xf32>
    %20 = vector.broadcast %19 : vector<1x256xf32> to vector<128x256xf32>
    %21 = arith.mulf %1, %20 : vector<128x256xf32>
    %cst_11 = arith.constant dense<0.000000e+00> : vector<128xf32>
    %22 = vector.multi_reduction <add>, %21, %cst_11 [1] : vector<128x256xf32> to vector<128xf32>
    %23 = vector.shape_cast %22 : vector<128xf32> to vector<128x1xf32>
    %c0_12 = arith.constant 0 : index
    %c0_13 = arith.constant 0 : index
    %24 = vector.load %arg4[%c0_12, %c0_13] : memref<128x128xf32, #tpu.memory_space<vmem>>, vector<128x128xf32>
    %cst_14 = arith.constant dense<0.000000e+00> : vector<128x1xf32>
    %25 = tpu.matmul %24, %23, %cst_14 {dimension_numbers = #tpu.dot_dimension_numbers<[1], [0], [0], [1], [0, 0, 1, 1], [], []>} : vector<128x128xf32>, vector<128x1xf32>, vector<128x1xf32> -> vector<128x1xf32>
    %c0_15 = arith.constant 0 : index
    %c0_16 = arith.constant 0 : index
    %26 = vector.load %arg5[%c0_15, %c0_16] : memref<128x1xf32, #tpu.memory_space<vmem>>, vector<128x1xf32>
    %27 = arith.addf %25, %26 : vector<128x1xf32>
    %28 = vector.broadcast %3 : vector<1x256xf32> to vector<128x256xf32>
    %29 = arith.mulf %1, %28 : vector<128x256xf32>
    %30 = vector.broadcast %27 : vector<128x1xf32> to vector<128x256xf32>
    %31 = arith.addf %29, %30 : vector<128x256xf32>
    %32 = arith.truncf %31 : vector<128x256xf32> to vector<128x256xbf16>
    %c0_17 = arith.constant 0 : index
    %c0_18 = arith.constant 0 : index
    %c0_19 = arith.constant 0 : index
    %33 = vector.load %arg6[%c0_17, %c0_18, %c0_19] : memref<1x128x256xbf16, #tpu.memory_space<vmem>>, vector<1x128x256xbf16>
    %34 = vector.shape_cast %33 : vector<1x128x256xbf16> to vector<128x256xbf16>
    %35 = vector.shape_cast %32 : vector<128x256xbf16> to vector<1x128x256xbf16>
    tpu.vector_store %arg6[%c0_17, %c0_18, %c0_19], %35 {strides = array<i32>} : memref<1x128x256xbf16, #tpu.memory_space<vmem>>, vector<1x128x256xbf16>,
    return
  }
  func.func @transform_0(%arg0: i32) -> (i32, i32, i32) {
    %c0_i32 = arith.constant 0 : i32
    %c0_i32_0 = arith.constant 0 : i32
    %c0_i32_1 = arith.constant 0 : i32
    return %arg0, %c0_i32, %c0_i32_0 : i32, i32, i32
  }
  func.func @transform_1(%arg0: i32) -> (i32, i32, i32) {
    %c0_i32 = arith.constant 0 : i32
    %c0_i32_0 = arith.constant 0 : i32
    %c0_i32_1 = arith.constant 0 : i32
    return %arg0, %c0_i32, %c0_i32_0 : i32, i32, i32
  }
  func.func @transform_2(%arg0: i32) -> (i32, i32, i32) {
    %c0_i32 = arith.constant 0 : i32
    %c0_i32_0 = arith.constant 0 : i32
    %c0_i32_1 = arith.constant 0 : i32
    return %arg0, %c0_i32, %c0_i32_0 : i32, i32, i32
  }
  func.func @transform_3(%arg0: i32) -> (i32, i32) {
    %c0_i32 = arith.constant 0 : i32
    %c0_i32_0 = arith.constant 0 : i32
    %c0_i32_1 = arith.constant 0 : i32
    return %c0_i32, %c0_i32_0 : i32, i32
  }
  func.func @transform_4(%arg0: i32) -> (i32, i32) {
    %c0_i32 = arith.constant 0 : i32
    %c0_i32_0 = arith.constant 0 : i32
    %c0_i32_1 = arith.constant 0 : i32
    return %c0_i32, %c0_i32_0 : i32, i32
  }
  func.func @transform_5(%arg0: i32) -> (i32, i32, i32) {
    %c0_i32 = arith.constant 0 : i32
    %c0_i32_0 = arith.constant 0 : i32
    %c0_i32_1 = arith.constant 0 : i32
    return %arg0, %c0_i32, %c0_i32_0 : i32, i32, i32
  }
}

module attributes {stable_mosaic.version = 11 : i64} {
  func.func @_l4_branch_res_kernel(%arg0: i32, %arg1: i32, %arg2: memref<1x128x256xbf16, #tpu.memory_space<vmem>>, %arg3: memref<1024x128xbf16, #tpu.memory_space<vmem>>, %arg4: memref<1024x1xf32, #tpu.memory_space<vmem>>, %arg5: memref<128x1024xbf16, #tpu.memory_space<vmem>>, %arg6: memref<128x1xf32, #tpu.memory_space<vmem>>, %arg7: memref<1x128x256xf32, #tpu.memory_space<vmem>>, %arg8: memref<1x128x256xf32, #tpu.memory_space<vmem>>) attributes {dimension_semantics = [#tpu.dimension_semantics<parallel>, #tpu.dimension_semantics<parallel>], iteration_bounds = array<i64: 2, 1>, scalar_prefetch = 0 : i64, scratch_operands = 0 : i64, tpu.core_type = #tpu.core_type<tc>, window_params = [{transform_indices = @transform_0, window_bounds = array<i64: 1, 128, 256>}, {pipeline_mode = #tpu.pipeline_mode<synchronous>, transform_indices = @transform_1, window_bounds = array<i64: 1024, 128>}, {pipeline_mode = #tpu.pipeline_mode<synchronous>, transform_indices = @transform_2, window_bounds = array<i64: 1024, 1>}, {pipeline_mode = #tpu.pipeline_mode<synchronous>, transform_indices = @transform_3, window_bounds = array<i64: 128, 1024>}, {pipeline_mode = #tpu.pipeline_mode<synchronous>, transform_indices = @transform_4, window_bounds = array<i64: 128, 1>}, {transform_indices = @transform_5, window_bounds = array<i64: 1, 128, 256>}, {transform_indices = @transform_6, window_bounds = array<i64: 1, 128, 256>}]} {
    %c0 = arith.constant 0 : index
    %c0_0 = arith.constant 0 : index
    %c0_1 = arith.constant 0 : index
    %0 = vector.load %arg2[%c0, %c0_0, %c0_1] : memref<1x128x256xbf16, #tpu.memory_space<vmem>>, vector<1x128x256xbf16>
    %1 = vector.shape_cast %0 : vector<1x128x256xbf16> to vector<128x256xbf16>
    %c0_2 = arith.constant 0 : index
    %c0_3 = arith.constant 0 : index
    %2 = vector.load %arg3[%c0_2, %c0_3] : memref<1024x128xbf16, #tpu.memory_space<vmem>>, vector<1024x128xbf16>
    %cst = arith.constant dense<0.000000e+00> : vector<1024x256xf32>
    %3 = tpu.matmul %2, %1, %cst {dimension_numbers = #tpu.dot_dimension_numbers<[1], [0], [0], [1], [0, 0, 1, 1], [], []>} : vector<1024x128xbf16>, vector<128x256xbf16>, vector<1024x256xf32> -> vector<1024x256xf32>
    %c0_4 = arith.constant 0 : index
    %c0_5 = arith.constant 0 : index
    %4 = vector.load %arg4[%c0_4, %c0_5] : memref<1024x1xf32, #tpu.memory_space<vmem>>, vector<1024x1xf32>
    %5 = vector.broadcast %4 : vector<1024x1xf32> to vector<1024x256xf32>
    %6 = arith.addf %3, %5 : vector<1024x256xf32>
    %7 = arith.truncf %6 : vector<1024x256xf32> to vector<1024x256xbf16>
    %c0_6 = arith.constant 0 : index
    %c0_7 = arith.constant 0 : index
    %8 = vector.load %arg5[%c0_6, %c0_7] : memref<128x1024xbf16, #tpu.memory_space<vmem>>, vector<128x1024xbf16>
    %cst_8 = arith.constant dense<0.000000e+00> : vector<128x256xf32>
    %9 = tpu.matmul %8, %7, %cst_8 {dimension_numbers = #tpu.dot_dimension_numbers<[1], [0], [0], [1], [0, 0, 1, 1], [], []>} : vector<128x1024xbf16>, vector<1024x256xbf16>, vector<128x256xf32> -> vector<128x256xf32>
    %c0_9 = arith.constant 0 : index
    %c0_10 = arith.constant 0 : index
    %10 = vector.load %arg6[%c0_9, %c0_10] : memref<128x1xf32, #tpu.memory_space<vmem>>, vector<128x1xf32>
    %11 = vector.broadcast %10 : vector<128x1xf32> to vector<128x256xf32>
    %12 = arith.addf %9, %11 : vector<128x256xf32>
    %c0_11 = arith.constant 0 : index
    %c0_12 = arith.constant 0 : index
    %c0_13 = arith.constant 0 : index
    %13 = vector.load %arg7[%c0_11, %c0_12, %c0_13] : memref<1x128x256xf32, #tpu.memory_space<vmem>>, vector<1x128x256xf32>
    %14 = vector.shape_cast %13 : vector<1x128x256xf32> to vector<128x256xf32>
    %15 = arith.addf %12, %14 : vector<128x256xf32>
    %c0_14 = arith.constant 0 : index
    %c0_15 = arith.constant 0 : index
    %c0_16 = arith.constant 0 : index
    %16 = vector.load %arg8[%c0_14, %c0_15, %c0_16] : memref<1x128x256xf32, #tpu.memory_space<vmem>>, vector<1x128x256xf32>
    %17 = vector.shape_cast %16 : vector<1x128x256xf32> to vector<128x256xf32>
    %18 = vector.shape_cast %15 : vector<128x256xf32> to vector<1x128x256xf32>
    tpu.vector_store %arg8[%c0_14, %c0_15, %c0_16], %18 {strides = array<i32>} : memref<1x128x256xf32, #tpu.memory_space<vmem>>, vector<1x128x256xf32>,
    return
  }
  func.func @transform_0(%arg0: i32, %arg1: i32) -> (i32, i32, i32) {
    %c0_i32 = arith.constant 0 : i32
    %c0_i32_0 = arith.constant 0 : i32
    return %arg0, %c0_i32, %arg1 : i32, i32, i32
  }
  func.func @transform_1(%arg0: i32, %arg1: i32) -> (i32, i32) {
    %c0_i32 = arith.constant 0 : i32
    %c0_i32_0 = arith.constant 0 : i32
    %c0_i32_1 = arith.constant 0 : i32
    return %c0_i32, %c0_i32_0 : i32, i32
  }
  func.func @transform_2(%arg0: i32, %arg1: i32) -> (i32, i32) {
    %c0_i32 = arith.constant 0 : i32
    %c0_i32_0 = arith.constant 0 : i32
    %c0_i32_1 = arith.constant 0 : i32
    return %c0_i32, %c0_i32_0 : i32, i32
  }
  func.func @transform_3(%arg0: i32, %arg1: i32) -> (i32, i32) {
    %c0_i32 = arith.constant 0 : i32
    %c0_i32_0 = arith.constant 0 : i32
    %c0_i32_1 = arith.constant 0 : i32
    return %c0_i32, %c0_i32_0 : i32, i32
  }
  func.func @transform_4(%arg0: i32, %arg1: i32) -> (i32, i32) {
    %c0_i32 = arith.constant 0 : i32
    %c0_i32_0 = arith.constant 0 : i32
    %c0_i32_1 = arith.constant 0 : i32
    return %c0_i32, %c0_i32_0 : i32, i32
  }
  func.func @transform_5(%arg0: i32, %arg1: i32) -> (i32, i32, i32) {
    %c0_i32 = arith.constant 0 : i32
    %c0_i32_0 = arith.constant 0 : i32
    return %arg0, %c0_i32, %arg1 : i32, i32, i32
  }
  func.func @transform_6(%arg0: i32, %arg1: i32) -> (i32, i32, i32) {
    %c0_i32 = arith.constant 0 : i32
    %c0_i32_0 = arith.constant 0 : i32
    return %arg0, %c0_i32, %arg1 : i32, i32, i32
  }
}

</mosaic_0001>

<bundles_post_ra>
// kernel: tse_forward.7
= control target key start
LH: loop header
LB: loop body
LE: loop exit
PB: predicated region body
PF: predicated region fallthrough
CT: control target
= control target key end

     0   :  { %s653_s12 = smov 0   ;;  %s778_s0 = inlined_call_operand.vmem [shape: f32[2,128,1], index: 0, kind: input, shape index: {}]   ;;  %s779_s1 = inlined_call_operand.vmem [shape: f32[128,128], index: 1, kind: input, shape index: {}]   ;;  %s780_s2 = inlined_call_operand.vmem [shape: f32[2,128,256], index: 2, kind: input, shape index: {}]   ;;  %s781_s3 = inlined_call_operand.vmem [shape: f32[2,1,256], index: 3, kind: output, shape index: {}]  }
   0x1 LB: > { %s550_s13 = sadd.s32 4294967295, %s630_s12   ;;  %p554_p0 = scmp.ge.s32.totalorder %s630_s12, 1  ;;  %s630_s12 = sphi %s653_s12, %s13_s12  }
   0x2   : > { %p147_p1 = scmp.lt.s32.totalorder %s630_s12, 3 }
   0x4   : > { %p148_p2 = pnand %p554_p0, %p147_p1 }
   0x5   : > { %p175_p3 = scmp.lt.s32.totalorder (!%p148_p2), %s550_s13, 1 }
   0x6   : > { %151 = sbr.rel (%p148_p2) target bundleno = 361 (0x169), region = 32 }
   0xb   : > { %s783_s13 = smov (!%p175_p3, %s550_s13), 1  ;;  %v205_v16 = vld [vmem:[%s779_s1] sm:$0xff]  ;;  %v632_v20 = vmov 0   ;;  %v206_v21 = vld [vmem:[%s779_s1 + $0x8] sm:$0xff]  ;;  %v207_v25 = vld [vmem:[%s779_s1 + $0x10] sm:$0xff]  ;;  %vm477_vm0 = vcmask 1040384  }
   0xc   : > { %s562_s14 = sshll.u32 %s783_s13, 7  ;;  %v209_v17 = vld [vmem:[%s779_s1 + $0x20] sm:$0xff]  ;;  %621 = vset.pattern.permute.xlu0 %v632_v20  ;;  %622 = vset.pattern.permute.xlu2 %v632_v20  ;;  %v210_v22 = vld [vmem:[%s779_s1 + $0x28] sm:$0xff]  ;;  %v211_v26 = vld [vmem:[%s779_s1 + $0x30] sm:$0xff]  ;;  %s563_s25 = sshll.u32 %s783_s13, 8 }
   0xd   : > { %s667_s17 = scalar_lea.vmem %s778_s0, %s562_s14  ;;  %v213_v18 = vld [vmem:[%s779_s1 + $0x40] sm:$0xff]  ;;  %623 = vset.pattern.permute.xlu1 %v632_v20  ;;  %v214_v23 = vld [vmem:[%s779_s1 + $0x48] sm:$0xff]  ;;  %v215_v27 = vld [vmem:[%s779_s1 + $0x50] sm:$0xff]  ;;  %s737_s28 = scalar_lea.vmem %s780_s2, %s563_s25 }
   0xe   : > { %v204_v0 = vld [vmem:[%s667_s17 + $0x78] sm:$0xff]  ;;  %v203_v1 = vld [vmem:[%s667_s17 + $0x70] sm:$0xff]  ;;  %v202_v2 = vld [vmem:[%s667_s17 + $0x68] sm:$0xff]  ;;  %s559_s29 = sshll.u32 %s783_s13, 1 }
   0xf   : > { %221 = vmatpush.msra.mxu0 %v204_v0  ;;  %564 = vmatpush.msra.mxu1 %v204_v0  ;;  %v201_v3 = vld [vmem:[%s667_s17 + $0x60] sm:$0xff]  ;;  %v200_v4 = vld [vmem:[%s667_s17 + $0x58] sm:$0xff]  ;;  %v199_v5 = vld [vmem:[%s667_s17 + $0x50] sm:$0xff]  ;;  %s188_s5 = scalar_lea.vmem %s781_s3, %s559_s29 }
  0x10   : > { %565 = vmatpush.msra.mxu2 %v204_v0  ;;  %566 = vmatpush.msra.mxu3 %v204_v0  ;;  %v198_v6 = vld [vmem:[%s667_s17 + $0x48] sm:$0xff]  ;;  %v197_v7 = vld [vmem:[%s667_s17 + $0x40] sm:$0xff]  ;;  %v196_v8 = vld [vmem:[%s667_s17 + $0x38] sm:$0xff] }
  0x11   : > { %222 = vmatpush.msra.mxu0 %v203_v1  ;;  %567 = vmatpush.msra.mxu1 %v203_v1  ;;  %v195_v9 = vld [vmem:[%s667_s17 + $0x30] sm:$0xff]  ;;  %v194_v10 = vld [vmem:[%s667_s17 + $0x28] sm:$0xff]  ;;  %v193_v11 = vld [vmem:[%s667_s17 + $0x20] sm:$0xff] }
  0x12   : > { %568 = vmatpush.msra.mxu2 %v203_v1  ;;  %569 = vmatpush.msra.mxu3 %v203_v1  ;;  %v192_v12 = vld [vmem:[%s667_s17 + $0x18] sm:$0xff]  ;;  %v191_v13 = vld [vmem:[%s667_s17 + $0x10] sm:$0xff]  ;;  %v190_v14 = vld [vmem:[%s667_s17 + $0x8] sm:$0xff] }
  0x13   : > { %223 = vmatpush.msra.mxu0 %v202_v2  ;;  %570 = vmatpush.msra.mxu1 %v202_v2  ;;  %v189_v15 = vld [vmem:[%s667_s17] sm:$0xff]  ;;  %v218_v24 = vld [vmem:[%s779_s1 + $0x68] sm:$0xff]  ;;  %v219_v28 = vld [vmem:[%s779_s1 + $0x70] sm:$0xff] }
  0x14   : > { %571 = vmatpush.msra.mxu2 %v202_v2  ;;  %572 = vmatpush.msra.mxu3 %v202_v2  ;;  %v217_v19 = vld [vmem:[%s779_s1 + $0x60] sm:$0xff]  ;;  %v208_v29 = vld [vmem:[%s779_s1 + $0x18] sm:$0xff]  ;;  %v288_v52 = vld [vmem:[%s737_s28 + $0x10] sm:$0xff] }
  0x15   : > { %224 = vmatpush.msra.mxu0 %v201_v3  ;;  %573 = vmatpush.msra.mxu1 %v201_v3  ;;  %v212_v30 = vld [vmem:[%s779_s1 + $0x38] sm:$0xff]  ;;  %v286_v55 = vld [vmem:[%s737_s28] sm:$0xff]  ;;  %v287_v56 = vld [vmem:[%s737_s28 + $0x8] sm:$0xff] }
  0x16   : > { %574 = vmatpush.msra.mxu2 %v201_v3  ;;  %575 = vmatpush.msra.mxu3 %v201_v3  ;;  %v216_v31 = vld [vmem:[%s779_s1 + $0x58] sm:$0xff]  ;;  %v290_v57 = vld [vmem:[%s737_s28 + $0x20] sm:$0xff]  ;;  %v291_v58 = vld [vmem:[%s737_s28 + $0x28] sm:$0xff] }
  0x17   : > { %225 = vmatpush.msra.mxu0 %v200_v4  ;;  %576 = vmatpush.msra.mxu1 %v200_v4  ;;  %v220_v32 = vld [vmem:[%s779_s1 + $0x78] sm:$0xff]  ;;  %v292_v3 = vld [vmem:[%s737_s28 + $0x30] sm:$0xff]  ;;  %v298_v20 = vld [vmem:[%s737_s28 + $0x60] sm:$0xff] }
  0x18   : > { %577 = vmatpush.msra.mxu2 %v200_v4  ;;  %578 = vmatpush.msra.mxu3 %v200_v4  ;;  %v289_v53 = vld [vmem:[%s737_s28 + $0x18] sm:$0xff] }
  0x19   : > { %226 = vmatpush.msra.mxu0 %v199_v5  ;;  %579 = vmatpush.msra.mxu1 %v199_v5  ;;  %v293_v4 = vld [vmem:[%s737_s28 + $0x38] sm:$0xff] }
  0x1a   : > { %580 = vmatpush.msra.mxu2 %v199_v5  ;;  %581 = vmatpush.msra.mxu3 %v199_v5 }
  0x1b   : > { %227 = vmatpush.msra.mxu0 %v198_v6  ;;  %582 = vmatpush.msra.mxu1 %v198_v6 }
  0x1c   : > { %583 = vmatpush.msra.mxu2 %v198_v6  ;;  %584 = vmatpush.msra.mxu3 %v198_v6 }
  0x1d   : > { %228 = vmatpush.msra.mxu0 %v197_v7  ;;  %585 = vmatpush.msra.mxu1 %v197_v7 }
  0x1e   : > { %586 = vmatpush.msra.mxu2 %v197_v7  ;;  %587 = vmatpush.msra.mxu3 %v197_v7  ;;  %v294_v7 = vld [vmem:[%s737_s28 + $0x40] sm:$0xff] }
  0x1f   : > { %229 = vmatpush.msra.mxu0 %v196_v8  ;;  %588 = vmatpush.msra.mxu1 %v196_v8 }
  0x20   : > { %589 = vmatpush.msra.mxu2 %v196_v8  ;;  %590 = vmatpush.msra.mxu3 %v196_v8  ;;  %v295_v8 = vld [vmem:[%s737_s28 + $0x48] sm:$0xff] }
  0x21   : > { %230 = vmatpush.msra.mxu0 %v195_v9  ;;  %591 = vmatpush.msra.mxu1 %v195_v9 }
  0x22   : > { %592 = vmatpush.msra.mxu2 %v195_v9  ;;  %593 = vmatpush.msra.mxu3 %v195_v9 }
  0x23   : > { %231 = vmatpush.msra.mxu0 %v194_v10  ;;  %594 = vmatpush.msra.mxu1 %v194_v10 }
  0x24   : > { %595 = vmatpush.msra.mxu2 %v194_v10  ;;  %596 = vmatpush.msra.mxu3 %v194_v10 }
  0x25   : > { %232 = vmatpush.msra.mxu0 %v193_v11  ;;  %597 = vmatpush.msra.mxu1 %v193_v11 }
  0x26   : > { %598 = vmatpush.msra.mxu2 %v193_v11  ;;  %599 = vmatpush.msra.mxu3 %v193_v11 }
  0x27   : > { %233 = vmatpush.msra.mxu0 %v192_v12  ;;  %600 = vmatpush.msra.mxu1 %v192_v12 }
  0x28   : > { %601 = vmatpush.msra.mxu2 %v192_v12  ;;  %602 = vmatpush.msra.mxu3 %v192_v12 }
  0x29   : > { %234 = vmatpush.msra.mxu0 %v191_v13  ;;  %603 = vmatpush.msra.mxu1 %v191_v13 }
  0x2a   : > { %604 = vmatpush.msra.mxu2 %v191_v13  ;;  %605 = vmatpush.msra.mxu3 %v191_v13 }
  0x2b   : > { %235 = vmatpush.msra.mxu0 %v190_v14  ;;  %606 = vmatpush.msra.mxu1 %v190_v14 }
  0x2c   : > { %607 = vmatpush.msra.mxu2 %v190_v14  ;;  %608 = vmatpush.msra.mxu3 %v190_v14  ;;  %v296_v14 = vld [vmem:[%s737_s28 + $0x50] sm:$0xff] }
  0x2d   : > { %236 = vmatpush.msra.mxu0 %v189_v15  ;;  %609 = vmatpush.msra.mxu1 %v189_v15 }
  0x2e   : > { %237 = vmatmul.f32.vlgmr.msra.gmra.mxu0 %v205_v16  ;;  %249 = vmatmul.f32.vlgmr.msra.gmra.mxu1 %v209_v17 }
  0x2f   : > { %610 = vmatpush.msra.mxu2 %v189_v15  ;;  %611 = vmatpush.msra.mxu3 %v189_v15  ;;  %v297_v15 = vld [vmem:[%s737_s28 + $0x58] sm:$0xff] }
  0x30   : > { %261 = vmatmul.f32.vlgmr.msra.gmra.mxu2 %v213_v18  ;;  %273 = vmatmul.f32.vlgmr.msra.gmra.mxu3 %v217_v19 }
  0x36   : > { %240 = vmatmul.f32.gmra.mxu0 %v206_v21  ;;  %252 = vmatmul.f32.gmra.mxu1 %v210_v22  ;;  %v299_v21 = vld [vmem:[%s737_s28 + $0x68] sm:$0xff] }
  0x38   : > { %264 = vmatmul.f32.gmra.mxu2 %v214_v23  ;;  %276 = vmatmul.f32.gmra.mxu3 %v218_v24 }
  0x3e   : > { %243 = vmatmul.f32.gmra.mxu0 %v207_v25  ;;  %255 = vmatmul.f32.gmra.mxu1 %v211_v26 }
  0x40   : > { %267 = vmatmul.f32.gmra.mxu2 %v215_v27  ;;  %279 = vmatmul.f32.gmra.mxu3 %v219_v28 }
  0x46   : > { %246 = vmatmul.f32.gmra.mxu0 %v208_v29  ;;  %258 = vmatmul.f32.gmra.mxu1 %v212_v30  ;;  %v300_v30 = vld [vmem:[%s737_s28 + $0x70] sm:$0xff] }
  0x48   : > { %270 = vmatmul.f32.gmra.mxu2 %v216_v31  ;;  %282 = vmatmul.f32.gmra.mxu3 %v220_v32  ;;  %v301_v31 = vld [vmem:[%s737_s28 + $0x78] sm:$0xff] }
  0xab   : > { %v238_v33 = vpop.f32.mrf.mxu0  ;;  %v250_v34 = vpop.f32.mrf.mxu1 }
  0xac   : > { %320 = vperm.xlu0 %621, %v238_v33   ;;  %340 = vperm.xlu2 %622, %v250_v34  }
  0xb3   : > { %v241_v35 = vpop.f32.mrf.mxu0  ;;  %v253_v36 = vpop.f32.mrf.mxu1 }
  0xb4   : > { %325 = vperm.xlu0 %621, %v241_v35   ;;  %v262_v37 = vpop.f32.mrf.mxu2  ;;  %v274_v38 = vpop.f32.mrf.mxu3  ;;  %345 = vperm.xlu2 %622, %v253_v36   ;;  %v302_v35 = vld [vmem:[%s737_s28 + $0x80] sm:$0xff]  ;;  %v303_v36 = vld [vmem:[%s737_s28 + $0x88] sm:$0xff] }
  0xbb   : > { %v244_v39 = vpop.f32.mrf.mxu0  ;;  %v256_v40 = vpop.f32.mrf.mxu1 }
  0xbc   : > { %350 = vperm.xlu0 %621, %v256_v40   ;;  %330 = vperm.xlu1 %623, %v244_v39   ;;  %v265_v41 = vpop.f32.mrf.mxu2  ;;  %v277_v42 = vpop.f32.mrf.mxu3 }
  0xbd   : > { %360 = vperm.xlu2 %622, %v262_v37  }
  0xc3   : > { %v247_v43 = vpop.f32.mrf.mxu0  ;;  %v259_v46 = vpop.f32.mrf.mxu1 }
  0xc4   : > { %365 = vperm.xlu0 %621, %v265_v41   ;;  %335 = vperm.xlu1 %623, %v247_v43   ;;  %v268_v44 = vpop.f32.mrf.mxu2  ;;  %v280_v45 = vpop.f32.mrf.mxu3  ;;  %v304_v43 = vld [vmem:[%s737_s28 + $0x90] sm:$0xff] }
  0xcc   : > { %380 = vperm.xlu0 %621, %v274_v38   ;;  %355 = vperm.xlu1 %623, %v259_v46   ;;  %v271_v47 = vpop.f32.mrf.mxu2  ;;  %v283_v48 = vpop.f32.mrf.mxu3 }
  0xcd   : > { %375 = vperm.xlu2 %622, %v271_v47  }
  0xd4   : > { %395 = vperm.xlu0 %621, %v283_v48   ;;  %370 = vperm.xlu1 %623, %v268_v44   ;;  %v305_v44 = vld [vmem:[%s737_s28 + $0x98] sm:$0xff] }
  0xd5   : > { %390 = vperm.xlu2 %622, %v280_v45  }
  0xdc   : > { %385 = vperm.xlu1 %623, %v277_v42  }
 0x106   : > { %v341_v50 = vpop.permute.xlu2 %340 }
 0x107   : > { %v406_v16 = vmul.f32 %v341_v50, %v294_v7  ;;  %v407_v17 = vmul.f32 %v341_v50, %v295_v8  ;;  %v306_v50 = vld [vmem:[%s737_s28 + $0xa0] sm:$0xff]  ;;  %v313_v7 = vld [vmem:[%s737_s28 + $0xd8] sm:$0xff] }
 0x10e   : > { %v346_v61 = vpop.permute.xlu2 %345 }
 0x10f   : > { %v408_v22 = vmul.f32 %v346_v61, %v296_v14  ;;  %v409_v23 = vmul.f32 %v346_v61, %v297_v15 }
 0x117   : > { %v361_v26 = vpop.permute.xlu2 %360 }
 0x118   : > { %v414_v41 = vmul.f32 %v361_v26, %v302_v35  ;;  %v415_v42 = vmul.f32 %v361_v26, %v303_v36 }
 0x11e   : > { %v321_v49 = vpop.permute.xlu0 %320 }
 0x11f   : > { %v398_v63 = vmul.f32 %v321_v49, %v286_v55  ;;  %v399_v0 = vmul.f32 %v321_v49, %v287_v56  ;;  %v309_v55 = vld [vmem:[%s737_s28 + $0xb8] sm:$0xff] }
 0x126   : > { %v326_v51 = vpop.permute.xlu0 %325 }
 0x127   : > { %v400_v59 = vmul.f32 %v326_v51, %v288_v52  ;;  %v401_v60 = vmul.f32 %v326_v51, %v289_v53  ;;  %v376_v47 = vpop.permute.xlu2 %375  ;;  %v307_v51 = vld [vmem:[%s737_s28 + $0xa8] sm:$0xff] }
 0x129   : > { %v430_v5 = vadd.f32 %v400_v59, %v398_v63  ;;  %v451_v6 = vadd.f32 %v401_v60, %v399_v0  ;;  %v421_v63 = vmul.f32 %v376_v47, %v309_v55 }
 0x12e   : > { %v331_v54 = vpop.permute.xlu1 %330  ;;  %v351_v62 = vpop.permute.xlu0 %350 }
 0x12f   : > { %v402_v1 = vmul.f32 %v331_v54, %v290_v57  ;;  %v403_v2 = vmul.f32 %v331_v54, %v291_v58  ;;  %v410_v28 = vmul.f32 %v351_v62, %v298_v20  ;;  %v411_v29 = vmul.f32 %v351_v62, %v299_v21  ;;  %v308_v54 = vld [vmem:[%s737_s28 + $0xb0] sm:$0xff] }
 0x130   : > { %v420_v62 = vmul.f32 %v376_v47, %v308_v54 }
 0x131   : > { %v431_v10 = vadd.f32 %v430_v5, %v402_v1  ;;  %v452_v11 = vadd.f32 %v451_v6, %v403_v2  ;;  %v310_v2 = vld [vmem:[%s737_s28 + $0xc0] sm:$0xff]  ;;  %v312_v6 = vld [vmem:[%s737_s28 + $0xd0] sm:$0xff] }
 0x136   : > { %v336_v9 = vpop.permute.xlu1 %335  ;;  %v366_v27 = vpop.permute.xlu0 %365 }
 0x137   : > { %v404_v12 = vmul.f32 %v336_v9, %v292_v3  ;;  %v405_v13 = vmul.f32 %v336_v9, %v293_v4  ;;  %v416_v52 = vmul.f32 %v366_v27, %v304_v43  ;;  %v417_v53 = vmul.f32 %v366_v27, %v305_v44  ;;  %v311_v3 = vld [vmem:[%s737_s28 + $0xc8] sm:$0xff] }
 0x139   : > { %v432_v18 = vadd.f32 %v431_v10, %v404_v12  ;;  %v453_v19 = vadd.f32 %v452_v11, %v405_v13  ;;  %v314_v10 = vld [vmem:[%s737_s28 + $0xe0] sm:$0xff]  ;;  %v315_v11 = vld [vmem:[%s737_s28 + $0xe8] sm:$0xff]  ;;  %v391_v12 = vpop.permute.xlu2 %390 }
 0x13a   : > { %v426_v21 = vmul.f32 %v391_v12, %v314_v10 }
 0x13b   : > { %v433_v24 = vadd.f32 %v432_v18, %v406_v16  ;;  %v454_v25 = vadd.f32 %v453_v19, %v407_v17  ;;  %v316_v18 = vld [vmem:[%s737_s28 + $0xf0] sm:$0xff]  ;;  %v317_v19 = vld [vmem:[%s737_s28 + $0xf8] sm:$0xff] }
 0x13d   : > { %v434_v32 = vadd.f32 %v433_v24, %v408_v22  ;;  %v455_v33 = vadd.f32 %v454_v25, %v409_v23  ;;  %v427_v22 = vmul.f32 %v391_v12, %v315_v11 }
 0x13e   : > { %v356_v34 = vpop.permute.xlu1 %355  ;;  %v381_v56 = vpop.permute.xlu0 %380 }
 0x13f   : > { %v435_v37 = vadd.f32 %v434_v32, %v410_v28  ;;  %v456_v38 = vadd.f32 %v455_v33, %v411_v29  ;;  %v412_v39 = vmul.f32 %v356_v34, %v300_v30  ;;  %v413_v40 = vmul.f32 %v356_v34, %v301_v31 }
 0x140   : > { %v422_v8 = vmul.f32 %v381_v56, %v310_v2  ;;  %v423_v9 = vmul.f32 %v381_v56, %v311_v3 }
 0x141   : > { %v436_v45 = vadd.f32 %v435_v37, %v412_v39  ;;  %v457_v46 = vadd.f32 %v456_v38, %v413_v40 }
 0x143   : > { %v437_v48 = vadd.f32 %v436_v45, %v414_v41  ;;  %v458_v49 = vadd.f32 %v457_v46, %v415_v42  ;;  %v480_v41 = vlaneseq }
 0x145   : > { %v438_v58 = vadd.f32 %v437_v48, %v416_v52  ;;  %v459_v59 = vadd.f32 %v458_v49, %v417_v53  ;;  %vm482_vm1 = vcmp.lt.s32.totalorder %v480_v41, 256 }
 0x146   : > { %v371_v57 = vpop.permute.xlu1 %370  ;;  %v396_v20 = vpop.permute.xlu0 %395 }
 0x147   : > { %v418_v60 = vmul.f32 %v371_v57, %v306_v50  ;;  %v419_v61 = vmul.f32 %v371_v57, %v307_v51  ;;  %v428_v25 = vmul.f32 %v396_v20, %v316_v18  ;;  %v429_v26 = vmul.f32 %v396_v20, %v317_v19 }
 0x149   : > { %v439_v0 = vadd.f32 %v438_v58, %v418_v60  ;;  %v460_v1 = vadd.f32 %v459_v59, %v419_v61 }
 0x14b   : > { %v440_v4 = vadd.f32 %v439_v0, %v420_v62  ;;  %v461_v5 = vadd.f32 %v460_v1, %v421_v63 }
 0x14d   : > { %v441_v14 = vadd.f32 %v440_v4, %v422_v8  ;;  %v462_v15 = vadd.f32 %v461_v5, %v423_v9 }
 0x14e   : > { %v386_v13 = vpop.permute.xlu1 %385 }
 0x14f   : > { %v424_v16 = vmul.f32 %v386_v13, %v312_v6  ;;  %v425_v17 = vmul.f32 %v386_v13, %v313_v7 }
 0x151   : > { %v442_v23 = vadd.f32 %v441_v14, %v424_v16  ;;  %v463_v24 = vadd.f32 %v462_v15, %v425_v17 }
 0x153   : > { %v443_v27 = vadd.f32 %v442_v23, %v426_v21  ;;  %v464_v28 = vadd.f32 %v463_v24, %v427_v22 }
 0x155   : > { %v444_v29 = vadd.f32 %v443_v27, %v428_v25  ;;  %v465_v30 = vadd.f32 %v464_v28, %v429_v26 }
 0x157   : > { %v445_v31 = vrot.slane %v444_v29, 4  ;;  %v466_v32 = vrot.slane %v465_v30, 4 }
 0x159   : > { %v446_v33 = vadd.f32 %v445_v31, %v444_v29  ;;  %v467_v34 = vadd.f32 %v466_v32, %v465_v30 }
 0x15b   : > { %v447_v35 = vrot.slane %v446_v33, 2  ;;  %v468_v36 = vrot.slane %v467_v34, 2 }
 0x15d   : > { %v448_v37 = vadd.f32 %v447_v35, %v446_v33  ;;  %v469_v38 = vadd.f32 %v468_v36, %v467_v34 }
 0x15f   : > { %v449_v39 = vrot.slane %v448_v37, 1  ;;  %v470_v40 = vrot.slane %v469_v38, 1 }
 0x161   : > { %v450_v42 = vadd.f32 %v449_v39, %v448_v37  ;;  %v471_v43 = vadd.f32 %v470_v40, %v469_v38 }
 0x163   : > { %v473_v44 = vmul.f32 0.088388346, %v471_v43  ;;  %v472_v45 = vmul.f32 0.088388346, %v450_v42 }
 0x165   : > { %v476_v46 = vrot.slane %v473_v44, 7 }
 0x167   : > { %v478_v47 = vsel %vm477_vm0, %v472_v45, %v476_v46 }
 0x168   : > { %484 = vst.msk [vmem:[%s188_s5] sm:$0x3] %vm482_vm1, %v478_v47 }
 0x169 PF: > { %s13_s12 = sadd.s32 1, %s630_s12  }
 0x16a   : > { %p10_p4 = scmp.ge.s32.totalorder %s13_s12, 4  }
 0x16c   :  { %12 = sbr.rel (!%p10_p4) target bundleno = 1 (0x1), region = 65 }

// kernel: tse_forward.5
= control target key start
LH: loop header
LB: loop body
LE: loop exit
PB: predicated region body
PF: predicated region fallthrough
CT: control target
= control target key end

     0   :  { %s901_s18 = smov 0   ;;  %s1286_s0 = inlined_call_operand.vmem [shape: f32[2,128,256], index: 0, kind: input, shape index: {}]   ;;  %s1287_s1 = inlined_call_operand.vmem [shape: f32[2,1,256], index: 1, kind: input, shape index: {}, may-alias: {1,2}]   ;;  %s1288_s2 = inlined_call_operand.vmem [shape: f32[2,1,256], index: 2, kind: input, shape index: {}, may-alias: {1,2}]   ;;  %s1289_s3 = inlined_call_operand.vmem [shape: f32[128,128], index: 3, kind: input, shape index: {}]   ;;  %s1290_s4 = inlined_call_operand.vmem [shape: f32[128,1], index: 4, kind: input, shape index: {}]   ;;  %s1291_s5 = inlined_call_operand.vmem [shape: bf16[2,128,256], index: 5, kind: output, shape index: {}]  }
   0x1 LB: > { %s783_s19 = sadd.s32 4294967295, %s868_s18   ;;  %p787_p0 = scmp.ge.s32.totalorder %s868_s18, 1  ;;  %s868_s18 = sphi %s901_s18, %s15_s18  }
   0x2   : > { %p205_p1 = scmp.lt.s32.totalorder %s868_s18, 3 }
   0x4   : > { %p206_p2 = pnand %p787_p0, %p205_p1 }
   0x5   : > { %p241_p3 = scmp.lt.s32.totalorder (!%p206_p2), %s783_s19, 1 }
   0x6   : > { %209 = sbr.rel (%p206_p2) target bundleno = 751 (0x2ef), region = 40 }
   0xb   : > { %s1293_s19 = smov (!%p241_p3, %s783_s19), 1  ;;  %vm301_vm0 = vcmask 1040384  }
   0xc   : > { %s790_s20 = sshll.u32 %s1293_s19, 1  ;;  %s796_s27 = sshll.u32 %s1293_s19, 8 }
   0xd   : > { %s249_s23 = scalar_lea.vmem %s1287_s1, %s790_s20  ;;  %s253_s26 = scalar_lea.vmem %s1288_s2, %s790_s20 }
   0xe   : > { %v918_v0 = vld [vmem:[%s249_s23] sm:$0x3]  ;;  %s929_s30 = scalar_lea.vmem %s1286_s0, %s796_s27 }
   0xf   : > { %v293_v1 = vsub.f32 1.0, %v918_v0  ;;  %v292_v2 = vld [vmem:[%s253_s26] sm:$0x3]  ;;  %v932_v33 = vld [vmem:[%s929_s30 + $0xf0] sm:$0xff]  ;;  %v935_v34 = vld [vmem:[%s929_s30 + $0xf8] sm:$0xff]  ;;  %s797_s26 = sshll.u32 %s1293_s19, 7 }
  0x10   : > { %v938_v35 = vld [vmem:[%s929_s30 + $0xd0] sm:$0xff]  ;;  %v941_v36 = vld [vmem:[%s929_s30 + $0xd8] sm:$0xff]  ;;  %v966_v49 = vld [vmem:[%s929_s30 + $0xe0] sm:$0xff]  ;;  %s1205_s29 = scalar_lea.vmem %s1291_s5, %s797_s26 }
  0x11   : > { %v294_v3 = vmul.f32 1e+08, %v293_v1  ;;  %v948_v39 = vld [vmem:[%s929_s30 + $0xb0] sm:$0xff]  ;;  %v951_v40 = vld [vmem:[%s929_s30 + $0xb8] sm:$0xff]  ;;  %v969_v51 = vld [vmem:[%s929_s30 + $0xe8] sm:$0xff] }
  0x12   : > { %v972_v52 = vld [vmem:[%s929_s30 + $0xc0] sm:$0xff]  ;;  %v975_v53 = vld [vmem:[%s929_s30 + $0xc8] sm:$0xff] }
  0x13   : > { %v295_v4 = vsub.f32 %v292_v2, %v294_v3  ;;  %v978_v54 = vld [vmem:[%s929_s30 + $0x80] sm:$0xff]  ;;  %v981_v55 = vld [vmem:[%s929_s30 + $0x88] sm:$0xff] }
  0x14   : > { %v996_v1 = vld [vmem:[%s929_s30 + $0xa0] sm:$0xff]  ;;  %v999_v3 = vld [vmem:[%s929_s30 + $0xa8] sm:$0xff] }
  0x15   : > { %v297_v5 = vperm.slane %v295_v4, 0  ;;  %v298_v6 = vperm.slane %v295_v4, 1 }
  0x17   : > { %v302_v7 = vsel %vm301_vm0, %v297_v5, -inf  ;;  %v303_v8 = vsel %vm301_vm0, %v298_v6, -inf  ;;  %v1005_v5 = vld [vmem:[%s929_s30 + $0x98] sm:$0xff]  ;;  %v1008_v6 = vld [vmem:[%s929_s30 + $0x50] sm:$0xff] }
  0x18   : > { %v304_v9 = vmax.f32 %v302_v7, %v303_v8  ;;  %v1011_v7 = vld [vmem:[%s929_s30 + $0x58] sm:$0xff] }
  0x1a   : > { %305 = vmax.xlane.f32.xlu0 %v304_v9 }
  0x8d   : > { %v306_v10 = vpop.xlane.xlu0 %305 }
  0x8e   : > { %v308_v11 = vperm.slane %v306_v10, 0 }
  0x90   : > { %v310_v12 = vsub.f32 %v295_v4, %v308_v11  ;;  %v1002_v4 = vld [vmem:[%s929_s30 + $0x90] sm:$0xff] }
  0x92   : > { %v311_v13 = vmul.f32 1.442695, %v310_v12 }
  0x94   : > { %858 = vpow2.f32 %v311_v13 }
  0x9a   : > { %v859_v14 = vpop.eup %858 }
  0x9b   : > { %v314_v15 = vperm.slane %v859_v14, 0  ;;  %v315_v16 = vperm.slane %v859_v14, 1 }
  0x9d   : > { %v318_v17 = vsel %vm301_vm0, %v314_v15, 0.0  ;;  %v319_v18 = vsel %vm301_vm0, %v315_v16, 0.0  ;;  %v1026_v16 = vld [vmem:[%s929_s30 + $0x70] sm:$0xff] }
  0x9e   : > { %v320_v19 = vadd.f32 %v319_v18, %v318_v17  ;;  %v1029_v18 = vld [vmem:[%s929_s30 + $0x78] sm:$0xff] }
  0xa0   : > { %321 = vadd.xlane.f32.xlu0 %v320_v19  ;;  %v1032_v19 = vld [vmem:[%s929_s30 + $0x60] sm:$0xff] }
 0x113   : > { %v322_v20 = vpop.xlane.xlu0 %321 }
 0x114   : > { %v324_v21 = vperm.slane %v322_v20, 0  ;;  %v1035_v20 = vld [vmem:[%s929_s30 + $0x68] sm:$0xff] }
 0x116   : > { %860 = vrcp.f32 %v324_v21  ;;  %v337_v25 = vand.u32 2147483648, %v324_v21  ;;  %v335_v27 = vand.u32 2147483647, %v324_v21  ;;  %vm331_vm2 = vweird.f32 %v324_v21 }
 0x118   : > { %v338_v29 = vor.u32 1.1754944e-38, %v337_v25  ;;  %vm336_vm4 = vcmp.eq.f32.partialorder %v335_v27, 8.507059e+37 }
 0x11c   : > { %v861_v22 = vpop.eup %860 }
 0x11d   : > { %v327_v23 = vmul.f32 %v861_v22, %v324_v21  ;;  %vm332_vm1 = vweird.f32 %v861_v22  ;;  %v1038_v21 = vld [vmem:[%s929_s30 + $0x20] sm:$0xff] }
 0x11e   : > { %vm333_vm3 = vmor %vm331_vm2, %vm332_vm1 }
 0x11f   : > { %v328_v24 = vsub.f32 1.0, %v327_v23 }
 0x121   : > { %v329_v26 = vmul.f32 %v861_v22, %v328_v24 }
 0x123   : > { %v330_v28 = vadd.f32 %v861_v22, %v329_v26 }
 0x125   : > { %v334_v30 = vsel %vm333_vm3, %v861_v22, %v330_v28  ;;  %v1041_v22 = vld [vmem:[%s929_s30 + $0x28] sm:$0xff] }
 0x126   : > { %v339_v31 = vsel %vm336_vm4, %v338_v29, %v334_v30 }
 0x127   : > { %v340_v32 = vmul.f32 %v859_v14, %v339_v31  ;;  %v1056_v31 = vld [vmem:[%s929_s30 + $0x40] sm:$0xff] }
 0x129   : > { %v943_v37 = vperm.slane %v340_v32, 0  ;;  %v945_v38 = vperm.slane %v340_v32, 1 }
 0x12b   : > { %v376_v41 = vmul.f32 %v943_v37, %v932_v33  ;;  %v377_v42 = vmul.f32 %v945_v38, %v935_v34  ;;  %v372_v43 = vmul.f32 %v943_v37, %v938_v35  ;;  %v373_v44 = vmul.f32 %v945_v38, %v941_v36 }
 0x12c   : > { %v368_v45 = vmul.f32 %v943_v37, %v948_v39  ;;  %v369_v46 = vmul.f32 %v945_v38, %v951_v40  ;;  %v374_v56 = vmul.f32 %v943_v37, %v966_v49  ;;  %v375_v57 = vmul.f32 %v945_v38, %v969_v51 }
 0x12d   : > { %v423_v47 = vadd.f32 %v377_v42, %v376_v41  ;;  %v417_v48 = vadd.f32 %v373_v44, %v372_v43  ;;  %v370_v58 = vmul.f32 %v943_v37, %v972_v52  ;;  %v371_v59 = vmul.f32 %v945_v38, %v975_v53  ;;  %v1059_v41 = vld [vmem:[%s929_s30 + $0x48] sm:$0xff]  ;;  %v1062_v42 = vld [vmem:[%s929_s30 + $0x30] sm:$0xff]  ;;  %v1065_v43 = vld [vmem:[%s929_s30 + $0x38] sm:$0xff] }
 0x12e   : > { %v411_v50 = vadd.f32 %v369_v46, %v368_v45  ;;  %v362_v60 = vmul.f32 %v943_v37, %v978_v54  ;;  %v363_v61 = vmul.f32 %v945_v38, %v981_v55  ;;  %v420_v62 = vadd.f32 %v375_v57, %v374_v56  ;;  %v1076_v56 = vld [vmem:[%s929_s30 + $0x10] sm:$0xff]  ;;  %v1079_v57 = vld [vmem:[%s929_s30 + $0x18] sm:$0xff] }
 0x12f   : > { %424 = vadd.xlane.f32.xlu1 %v423_v47  ;;  %418 = vadd.xlane.f32.xlu2 %v417_v48  ;;  %v414_v63 = vadd.f32 %v371_v59, %v370_v58  ;;  %v366_v8 = vmul.f32 %v943_v37, %v996_v1  ;;  %v367_v9 = vmul.f32 %v945_v38, %v999_v3  ;;  %v1082_v58 = vld [vmem:[%s929_s30] sm:$0xff]  ;;  %v1085_v59 = vld [vmem:[%s929_s30 + $0x8] sm:$0xff] }
 0x130   : > { %412 = vadd.xlane.f32.xlu0 %v411_v50  ;;  %v402_v2 = vadd.f32 %v363_v61, %v362_v60  ;;  %v364_v10 = vmul.f32 %v943_v37, %v1002_v4  ;;  %v365_v11 = vmul.f32 %v945_v38, %v1005_v5  ;;  %v356_v12 = vmul.f32 %v943_v37, %v1008_v6 }
 0x131   : > { %v357_v13 = vmul.f32 %v945_v38, %v1011_v7  ;;  %v408_v14 = vadd.f32 %v367_v9, %v366_v8  ;;  %v360_v23 = vmul.f32 %v943_v37, %v1026_v16  ;;  %v361_v24 = vmul.f32 %v945_v38, %v1029_v18 }
 0x132   : > { %v405_v15 = vadd.f32 %v365_v11, %v364_v10  ;;  %v358_v25 = vmul.f32 %v943_v37, %v1032_v19  ;;  %v359_v26 = vmul.f32 %v945_v38, %v1035_v20  ;;  %v350_v27 = vmul.f32 %v943_v37, %v1038_v21 }
 0x133   : > { %v393_v17 = vadd.f32 %v357_v13, %v356_v12  ;;  %v351_v28 = vmul.f32 %v945_v38, %v1041_v22  ;;  %v399_v29 = vadd.f32 %v361_v24, %v360_v23  ;;  %v354_v44 = vmul.f32 %v943_v37, %v1056_v31 }
 0x134   : > { %v396_v30 = vadd.f32 %v359_v26, %v358_v25  ;;  %v355_v45 = vmul.f32 %v945_v38, %v1059_v41  ;;  %v352_v46 = vmul.f32 %v943_v37, %v1062_v42  ;;  %v353_v47 = vmul.f32 %v945_v38, %v1065_v43 }
 0x135   : > { %v384_v32 = vadd.f32 %v351_v28, %v350_v27  ;;  %v348_v60 = vmul.f32 %v943_v37, %v1076_v56  ;;  %v349_v61 = vmul.f32 %v945_v38, %v1079_v57 }
 0x136   : > { %v390_v48 = vadd.f32 %v355_v45, %v354_v44  ;;  %v387_v50 = vadd.f32 %v353_v47, %v352_v46  ;;  %v426_v44 = vld [vmem:[%s1289_s3] sm:$0xff]  ;;  %v435_v45 = vld [vmem:[%s1289_s3 + $0x48] sm:$0xff] }
 0x137   : > { %421 = vadd.xlane.f32.xlu1 %v420_v62  ;;  %415 = vadd.xlane.f32.xlu2 %v414_v63  ;;  %v346_v62 = vmul.f32 %v943_v37, %v1082_v58  ;;  %v347_v63 = vmul.f32 %v945_v38, %v1085_v59  ;;  %v431_v46 = vld [vmem:[%s1289_s3 + $0x28] sm:$0xff] }
 0x138   : > { %403 = vadd.xlane.f32.xlu0 %v402_v2  ;;  %v381_v2 = vadd.f32 %v349_v61, %v348_v60  ;;  %v427_v47 = vld [vmem:[%s1289_s3 + $0x8] sm:$0xff]  ;;  %v432_v60 = vld [vmem:[%s1289_s3 + $0x30] sm:$0xff] }
 0x139   : > { %v378_v8 = vadd.f32 %v347_v63, %v346_v62  ;;  %v428_v61 = vld [vmem:[%s1289_s3 + $0x10] sm:$0xff]  ;;  %v433_v63 = vld [vmem:[%s1289_s3 + $0x38] sm:$0xff] }
 0x13a   : > { %v440_v62 = vld [vmem:[%s1289_s3 + $0x70] sm:$0xff] }
 0x13f   : > { %409 = vadd.xlane.f32.xlu1 %v408_v14  ;;  %406 = vadd.xlane.f32.xlu2 %v405_v15 }
 0x140   : > { %394 = vadd.xlane.f32.xlu0 %v393_v17 }
 0x147   : > { %400 = vadd.xlane.f32.xlu1 %v399_v29  ;;  %397 = vadd.xlane.f32.xlu2 %v396_v30  ;;  %v430_v29 = vld [vmem:[%s1289_s3 + $0x20] sm:$0xff] }
 0x148   : > { %385 = vadd.xlane.f32.xlu0 %v384_v32  ;;  %v434_v30 = vld [vmem:[%s1289_s3 + $0x40] sm:$0xff] }
 0x149   : > { %v438_v32 = vld [vmem:[%s1289_s3 + $0x60] sm:$0xff] }
 0x14f   : > { %391 = vadd.xlane.f32.xlu1 %v390_v48  ;;  %388 = vadd.xlane.f32.xlu2 %v387_v50  ;;  %v439_v48 = vld [vmem:[%s1289_s3 + $0x68] sm:$0xff]  ;;  %v436_v50 = vld [vmem:[%s1289_s3 + $0x50] sm:$0xff] }
 0x157   : > { %382 = vadd.xlane.f32.xlu1 %v381_v2  ;;  %379 = vadd.xlane.f32.xlu2 %v378_v8  ;;  %v437_v2 = vld [vmem:[%s1289_s3 + $0x58] sm:$0xff] }
 0x158   : > { %v429_v8 = vld [vmem:[%s1289_s3 + $0x18] sm:$0xff] }
 0x1a2   : > { %v425_v9 = vpop.xlane.xlu1 %424  ;;  %v419_v10 = vpop.xlane.xlu2 %418 }
 0x1a3   : > { %458 = vmatpush.msra.mxu0 %v425_v9  ;;  %798 = vmatpush.msra.mxu1 %v425_v9  ;;  %v413_v11 = vpop.xlane.xlu0 %412 }
 0x1a4   : > { %799 = vmatpush.msra.mxu2 %v425_v9  ;;  %800 = vmatpush.msra.mxu3 %v425_v9  ;;  %v441_v9 = vld [vmem:[%s1289_s3 + $0x78] sm:$0xff] }
 0x1aa   : > { %v422_v12 = vpop.xlane.xlu1 %421  ;;  %v416_v13 = vpop.xlane.xlu2 %415 }
 0x1ab   : > { %459 = vmatpush.msra.mxu0 %v422_v12  ;;  %801 = vmatpush.msra.mxu1 %v422_v12  ;;  %v404_v37 = vpop.xlane.xlu0 %403 }
 0x1ac   : > { %802 = vmatpush.msra.mxu2 %v422_v12  ;;  %803 = vmatpush.msra.mxu3 %v422_v12  ;;  %v442_v12 = vld [vmem:[%s1290_s4] sm:$0xff] }
 0x1ad   : > { %460 = vmatpush.msra.mxu0 %v419_v10  ;;  %804 = vmatpush.msra.mxu1 %v419_v10 }
 0x1ae   : > { %805 = vmatpush.msra.mxu2 %v419_v10  ;;  %806 = vmatpush.msra.mxu3 %v419_v10  ;;  %v870_v10 = vmov 0  }
 0x1af   : > { %461 = vmatpush.msra.mxu0 %v416_v13  ;;  %807 = vmatpush.msra.mxu1 %v416_v13 }
 0x1b0   : > { %808 = vmatpush.msra.mxu2 %v416_v13  ;;  %809 = vmatpush.msra.mxu3 %v416_v13 }
 0x1b1   : > { %462 = vmatpush.msra.mxu0 %v413_v11  ;;  %810 = vmatpush.msra.mxu1 %v413_v11 }
 0x1b2   : > { %811 = vmatpush.msra.mxu2 %v413_v11  ;;  %812 = vmatpush.msra.mxu3 %v413_v11  ;;  %v410_v38 = vpop.xlane.xlu1 %409  ;;  %v407_v14 = vpop.xlane.xlu2 %406  ;;  %v446_v11 = vld [vmem:[%s1290_s4 + $0x20] sm:$0xff] }
 0x1b3   : > { %463 = vmatpush.msra.mxu0 %v410_v38  ;;  %813 = vmatpush.msra.mxu1 %v410_v38  ;;  %v395_v23 = vpop.xlane.xlu0 %394 }
 0x1b4   : > { %814 = vmatpush.msra.mxu2 %v410_v38  ;;  %815 = vmatpush.msra.mxu3 %v410_v38 }
 0x1b5   : > { %464 = vmatpush.msra.mxu0 %v407_v14  ;;  %816 = vmatpush.msra.mxu1 %v407_v14 }
 0x1b6   : > { %817 = vmatpush.msra.mxu2 %v407_v14  ;;  %818 = vmatpush.msra.mxu3 %v407_v14 }
 0x1b7   : > { %465 = vmatpush.msra.mxu0 %v404_v37  ;;  %819 = vmatpush.msra.mxu1 %v404_v37 }
 0x1b8   : > { %820 = vmatpush.msra.mxu2 %v404_v37  ;;  %821 = vmatpush.msra.mxu3 %v404_v37 }
 0x1b9   : > { %856 = vset.pattern.permute.xlu1 %v870_v10  ;;  %857 = vset.pattern.permute.xlu2 %v870_v10 }
 0x1ba   : > { %v401_v15 = vpop.xlane.xlu1 %400  ;;  %v398_v17 = vpop.xlane.xlu2 %397  ;;  %855 = vset.pattern.permute.xlu0 %v870_v10  ;;  %v445_v10 = vld [vmem:[%s1290_s4 + $0x18] sm:$0xff] }
 0x1bb   : > { %466 = vmatpush.msra.mxu0 %v401_v15  ;;  %822 = vmatpush.msra.mxu1 %v401_v15  ;;  %v386_v26 = vpop.xlane.xlu0 %385 }
 0x1bc   : > { %823 = vmatpush.msra.mxu2 %v401_v15  ;;  %824 = vmatpush.msra.mxu3 %v401_v15  ;;  %v450_v15 = vld [vmem:[%s1290_s4 + $0x40] sm:$0xff] }
 0x1bd   : > { %467 = vmatpush.msra.mxu0 %v398_v17  ;;  %825 = vmatpush.msra.mxu1 %v398_v17 }
 0x1be   : > { %826 = vmatpush.msra.mxu2 %v398_v17  ;;  %827 = vmatpush.msra.mxu3 %v398_v17  ;;  %v454_v17 = vld [vmem:[%s1290_s4 + $0x60] sm:$0xff] }
 0x1bf   : > { %468 = vmatpush.msra.mxu0 %v395_v23  ;;  %828 = vmatpush.msra.mxu1 %v395_v23 }
 0x1c0   : > { %829 = vmatpush.msra.mxu2 %v395_v23  ;;  %830 = vmatpush.msra.mxu3 %v395_v23 }
 0x1c2   : > { %v392_v24 = vpop.xlane.xlu1 %391  ;;  %v389_v25 = vpop.xlane.xlu2 %388 }
 0x1c3   : > { %469 = vmatpush.msra.mxu0 %v392_v24  ;;  %831 = vmatpush.msra.mxu1 %v392_v24 }
 0x1c4   : > { %832 = vmatpush.msra.mxu2 %v392_v24  ;;  %833 = vmatpush.msra.mxu3 %v392_v24 }
 0x1c5   : > { %470 = vmatpush.msra.mxu0 %v389_v25  ;;  %834 = vmatpush.msra.mxu1 %v389_v25 }
 0x1c6   : > { %835 = vmatpush.msra.mxu2 %v389_v25  ;;  %836 = vmatpush.msra.mxu3 %v389_v25 }
 0x1c7   : > { %471 = vmatpush.msra.mxu0 %v386_v26  ;;  %837 = vmatpush.msra.mxu1 %v386_v26 }
 0x1c8   : > { %838 = vmatpush.msra.mxu2 %v386_v26  ;;  %839 = vmatpush.msra.mxu3 %v386_v26 }
 0x1ca   : > { %v383_v27 = vpop.xlane.xlu1 %382  ;;  %v380_v28 = vpop.xlane.xlu2 %379 }
 0x1cb   : > { %472 = vmatpush.msra.mxu0 %v383_v27  ;;  %840 = vmatpush.msra.mxu1 %v383_v27 }
 0x1cc   : > { %841 = vmatpush.msra.mxu2 %v383_v27  ;;  %842 = vmatpush.msra.mxu3 %v383_v27 }
 0x1cd   : > { %473 = vmatpush.msra.mxu0 %v380_v28  ;;  %843 = vmatpush.msra.mxu1 %v380_v28 }
 0x1ce   : > { %844 = vmatpush.msra.mxu2 %v380_v28  ;;  %845 = vmatpush.msra.mxu3 %v380_v28 }
 0x1cf   : > { %486 = vmatmul.f32.vlgmr.msra.gmra.mxu1 %v430_v29  ;;  %498 = vmatmul.f32.vlgmr.msra.gmra.mxu2 %v434_v30  ;;  %v447_v29 = vld [vmem:[%s1290_s4 + $0x28] sm:$0xff] }
 0x1d0   : > { %510 = vmatmul.f32.vlgmr.msra.gmra.mxu3 %v438_v32  ;;  %474 = vmatmul.f32.vlgmr.msra.gmra.mxu0 %v426_v44  ;;  %v443_v30 = vld [vmem:[%s1290_s4 + $0x8] sm:$0xff] }
 0x1d7   : > { %501 = vmatmul.f32.gmra.mxu2 %v435_v45  ;;  %489 = vmatmul.f32.gmra.mxu1 %v431_v46 }
 0x1d8   : > { %477 = vmatmul.f32.gmra.mxu0 %v427_v47  ;;  %513 = vmatmul.f32.gmra.mxu3 %v439_v48 }
 0x1df   : > { %504 = vmatmul.f32.gmra.mxu2 %v436_v50  ;;  %492 = vmatmul.f32.gmra.mxu1 %v432_v60  ;;  %v444_v50 = vld [vmem:[%s1290_s4 + $0x10] sm:$0xff] }
 0x1e0   : > { %480 = vmatmul.f32.gmra.mxu0 %v428_v61  ;;  %516 = vmatmul.f32.gmra.mxu3 %v440_v62  ;;  %v452_v60 = vld [vmem:[%s1290_s4 + $0x50] sm:$0xff]  ;;  %v451_v62 = vld [vmem:[%s1290_s4 + $0x48] sm:$0xff] }
 0x1e7   : > { %495 = vmatmul.f32.gmra.mxu1 %v433_v63  ;;  %507 = vmatmul.f32.gmra.mxu2 %v437_v2 }
 0x1e8   : > { %483 = vmatmul.f32.gmra.mxu0 %v429_v8  ;;  %519 = vmatmul.f32.gmra.mxu3 %v441_v9 }
 0x24c   : > { %v487_v13 = vpop.f32.mrf.mxu1 }
 0x24d   : > { %v488_v37 = vadd.f32 %v487_v13, %v446_v11  ;;  %v475_v38 = vpop.f32.mrf.mxu0 }
 0x24e   : > { %v476_v14 = vadd.f32 %v475_v38, %v442_v12  ;;  %v449_v12 = vld [vmem:[%s1290_s4 + $0x38] sm:$0xff] }
 0x24f   : > { %582 = vperm.xlu1 %856, %v488_v37  }
 0x250   : > { %562 = vperm.xlu0 %855, %v476_v14   ;;  %v448_v14 = vld [vmem:[%s1290_s4 + $0x30] sm:$0xff] }
 0x252   : > { %v499_v23 = vpop.f32.mrf.mxu2 }
 0x253   : > { %v500_v24 = vadd.f32 %v499_v23, %v450_v15  ;;  %v511_v25 = vpop.f32.mrf.mxu3 }
 0x254   : > { %v512_v26 = vadd.f32 %v511_v25, %v454_v17  ;;  %v490_v27 = vpop.f32.mrf.mxu1  ;;  %v453_v17 = vld [vmem:[%s1290_s4 + $0x58] sm:$0xff] }
 0x255   : > { %602 = vperm.xlu2 %857, %v500_v24   ;;  %v478_v28 = vpop.f32.mrf.mxu0  ;;  %v491_v32 = vadd.f32 %v490_v27, %v447_v29  ;;  %v455_v24 = vld [vmem:[%s1290_s4 + $0x68] sm:$0xff]  ;;  %v457_v25 = vld [vmem:[%s1290_s4 + $0x78] sm:$0xff] }
 0x256   : > { %v479_v45 = vadd.f32 %v478_v28, %v443_v30  ;;  %v456_v30 = vld [vmem:[%s1290_s4 + $0x70] sm:$0xff] }
 0x257   : > { %622 = vperm.xlu1 %856, %v512_v26  }
 0x25a   : > { %v502_v44 = vpop.f32.mrf.mxu2 }
 0x25b   : > { %v514_v46 = vpop.f32.mrf.mxu3  ;;  %v503_v8 = vadd.f32 %v502_v44, %v451_v62  ;;  %v1192_v44 = vperm.slane %v918_v0, 0 }
 0x25c   : > { %v493_v47 = vpop.f32.mrf.mxu1  ;;  %v515_v28 = vadd.f32 %v514_v46, %v455_v24 }
 0x25d   : > { %587 = vperm.xlu2 %857, %v491_v32   ;;  %v481_v48 = vpop.f32.mrf.mxu0  ;;  %v494_v15 = vadd.f32 %v493_v47, %v448_v14  ;;  %v544_v47 = vmul.f32 %v1192_v44, %v978_v54  ;;  %v552_v24 = vmul.f32 %v1192_v44, %v972_v52 }
 0x25e   : > { %v482_v61 = vadd.f32 %v481_v48, %v444_v50 }
 0x25f   : > { %567 = vperm.xlu1 %856, %v479_v45   ;;  %v1195_v45 = vperm.slane %v918_v0, 1  ;;  %v538_v0 = vmul.f32 %v1192_v44, %v1008_v6 }
 0x261   : > { %v545_v46 = vmul.f32 %v1195_v45, %v981_v55  ;;  %v539_v54 = vmul.f32 %v1195_v45, %v1011_v7  ;;  %v537_v6 = vmul.f32 %v1195_v45, %v1059_v41  ;;  %v528_v7 = vmul.f32 %v1192_v44, %v1082_v58 }
 0x262   : > { %v505_v63 = vpop.f32.mrf.mxu2  ;;  %v534_v58 = vmul.f32 %v1192_v44, %v1062_v42  ;;  %v551_v52 = vmul.f32 %v1195_v45, %v951_v40 }
 0x263   : > { %v506_v2 = vadd.f32 %v505_v63, %v452_v60  ;;  %v517_v9 = vpop.f32.mrf.mxu3 }
 0x264   : > { %v496_v13 = vpop.f32.mrf.mxu1  ;;  %v518_v32 = vadd.f32 %v517_v9, %v456_v30  ;;  %v533_v9 = vmul.f32 %v1195_v45, %v1041_v22 }
 0x265   : > { %572 = vperm.xlu2 %857, %v482_v61   ;;  %612 = vperm.xlu0 %855, %v506_v2   ;;  %v484_v11 = vpop.f32.mrf.mxu0  ;;  %v497_v38 = vadd.f32 %v496_v13, %v449_v12  ;;  %v529_v12 = vmul.f32 %v1195_v45, %v1085_v59 }
 0x266   : > { %v485_v37 = vadd.f32 %v484_v11, %v445_v10  ;;  %v536_v10 = vmul.f32 %v1192_v44, %v1056_v31 }
 0x267   : > { %607 = vperm.xlu1 %856, %v503_v8   ;;  %v532_v8 = vmul.f32 %v1192_v44, %v1038_v21 }
 0x26a   : > { %v508_v23 = vpop.f32.mrf.mxu2 }
 0x26b   : > { %v520_v26 = vpop.f32.mrf.mxu3  ;;  %v509_v27 = vadd.f32 %v508_v23, %v453_v17  ;;  %v535_v23 = vmul.f32 %v1195_v45, %v1065_v43 }
 0x26c   : > { %v521_v29 = vadd.f32 %v520_v26, %v457_v25  ;;  %v553_v25 = vmul.f32 %v1195_v45, %v975_v53  ;;  %v530_v53 = vmul.f32 %v1192_v44, %v1076_v56  ;;  %v548_v56 = vmul.f32 %v1192_v44, %v996_v1 }
 0x26d   : > { %577 = vperm.xlu2 %857, %v485_v37   ;;  %597 = vperm.xlu0 %855, %v497_v38  }
 0x26f   : > { %592 = vperm.xlu1 %856, %v494_v15  }
 0x275   : > { %617 = vperm.xlu2 %857, %v509_v27   ;;  %627 = vperm.xlu0 %855, %v515_v28  }
 0x277   : > { %637 = vperm.xlu1 %856, %v521_v29  }
 0x27d   : > { %632 = vperm.xlu2 %857, %v518_v32  }
 0x2af   : > { %v603_v48 = vpop.permute.xlu2 %602 }
 0x2b0   : > { %v656_v50 = vadd.f32 %v603_v48, %v544_v47  ;;  %v657_v60 = vadd.f32 %v603_v48, %v545_v46  ;;  %v550_v47 = vmul.f32 %v1192_v44, %v948_v39  ;;  %v531_v46 = vmul.f32 %v1195_v45, %v1079_v57 }
 0x2b1   : > { %v556_v39 = vmul.f32 %v1192_v44, %v966_v49  ;;  %v549_v57 = vmul.f32 %v1195_v45, %v999_v3 }
 0x2b2   : > { %v680_v61 = vpack.c.bf16 %v657_v60, %v656_v50 }
 0x2b4   : > { %696 = vst [vmem:[%s1205_s29 + $0x40] sm:$0xff] %v680_v61 }
 0x2b7   : > { %v588_v55 = vpop.permute.xlu2 %587 }
 0x2b8   : > { %v650_v62 = vadd.f32 %v588_v55, %v538_v0  ;;  %v651_v63 = vadd.f32 %v588_v55, %v539_v54 }
 0x2ba   : > { %v677_v2 = vpack.c.bf16 %v651_v63, %v650_v62  ;;  %v557_v62 = vmul.f32 %v1195_v45, %v969_v51  ;;  %v546_v63 = vmul.f32 %v1192_v44, %v1002_v4  ;;  %v542_v4 = vmul.f32 %v1192_v44, %v1026_v16 }
 0x2bc   : > { %693 = vst [vmem:[%s1205_s29 + $0x28] sm:$0xff] %v677_v2  ;;  %v547_v2 = vmul.f32 %v1195_v45, %v1005_v5  ;;  %v543_v5 = vmul.f32 %v1195_v45, %v1029_v18 }
 0x2bf   : > { %v573_v11 = vpop.permute.xlu2 %572 }
 0x2c0   : > { %v644_v13 = vadd.f32 %v573_v11, %v532_v8  ;;  %v645_v21 = vadd.f32 %v573_v11, %v533_v9 }
 0x2c1   : > { %v583_v37 = vpop.permute.xlu1 %582 }
 0x2c2   : > { %v674_v38 = vpack.c.bf16 %v645_v21, %v644_v13  ;;  %v648_v22 = vadd.f32 %v583_v37, %v536_v10  ;;  %v649_v14 = vadd.f32 %v583_v37, %v537_v6  ;;  %v563_v15 = vpop.permute.xlu0 %562  ;;  %v540_v21 = vmul.f32 %v1192_v44, %v1032_v19 }
 0x2c3   : > { %v640_v31 = vadd.f32 %v563_v15, %v528_v7  ;;  %v641_v17 = vadd.f32 %v563_v15, %v529_v12  ;;  %v541_v37 = vmul.f32 %v1195_v45, %v1035_v20  ;;  %v555_v19 = vmul.f32 %v1195_v45, %v941_v36 }
 0x2c4   : > { %690 = vst [vmem:[%s1205_s29 + $0x10] sm:$0xff] %v674_v38  ;;  %v676_v41 = vpack.c.bf16 %v649_v14, %v648_v22  ;;  %v558_v20 = vmul.f32 %v1192_v44, %v932_v33 }
 0x2c5   : > { %v672_v59 = vpack.c.bf16 %v641_v17, %v640_v31 }
 0x2c6   : > { %692 = vst [vmem:[%s1205_s29 + $0x20] sm:$0xff] %v676_v41  ;;  %v554_v41 = vmul.f32 %v1192_v44, %v938_v35 }
 0x2c7   : > { %v578_v26 = vpop.permute.xlu2 %577  ;;  %688 = vst [vmem:[%s1205_s29] sm:$0xff] %v672_v59 }
 0x2c8   : > { %v646_v27 = vadd.f32 %v578_v26, %v534_v58  ;;  %v647_v28 = vadd.f32 %v578_v26, %v535_v23  ;;  %v559_v58 = vmul.f32 %v1195_v45, %v935_v34 }
 0x2c9   : > { %v623_v29 = vpop.permute.xlu1 %622 }
 0x2ca   : > { %v675_v30 = vpack.c.bf16 %v647_v28, %v646_v27  ;;  %v664_v32 = vadd.f32 %v623_v29, %v552_v24  ;;  %v665_v42 = vadd.f32 %v623_v29, %v553_v25 }
 0x2cc   : > { %691 = vst [vmem:[%s1205_s29 + $0x18] sm:$0xff] %v675_v30  ;;  %v684_v43 = vpack.c.bf16 %v665_v42, %v664_v32 }
 0x2ce   : > { %700 = vst [vmem:[%s1205_s29 + $0x60] sm:$0xff] %v684_v43 }
 0x2cf   : > { %v618_v48 = vpop.permute.xlu2 %617 }
 0x2d0   : > { %v662_v50 = vadd.f32 %v618_v48, %v550_v47  ;;  %v663_v60 = vadd.f32 %v618_v48, %v551_v52 }
 0x2d1   : > { %v568_v61 = vpop.permute.xlu1 %567 }
 0x2d2   : > { %v683_v0 = vpack.c.bf16 %v663_v60, %v662_v50  ;;  %v642_v54 = vadd.f32 %v568_v61, %v530_v53  ;;  %v643_v55 = vadd.f32 %v568_v61, %v531_v46 }
 0x2d4   : > { %699 = vst [vmem:[%s1205_s29 + $0x58] sm:$0xff] %v683_v0  ;;  %v673_v40 = vpack.c.bf16 %v643_v55, %v642_v54 }
 0x2d6   : > { %689 = vst [vmem:[%s1205_s29 + $0x8] sm:$0xff] %v673_v40 }
 0x2d7   : > { %v633_v49 = vpop.permute.xlu2 %632  ;;  %v613_v8 = vpop.permute.xlu0 %612 }
 0x2d8   : > { %v668_v9 = vadd.f32 %v633_v49, %v556_v39  ;;  %v669_v51 = vadd.f32 %v633_v49, %v557_v62  ;;  %v660_v10 = vadd.f32 %v613_v8, %v548_v56  ;;  %v661_v6 = vadd.f32 %v613_v8, %v549_v57 }
 0x2d9   : > { %v608_v1 = vpop.permute.xlu1 %607 }
 0x2da   : > { %v686_v11 = vpack.c.bf16 %v669_v51, %v668_v9  ;;  %v682_v7 = vpack.c.bf16 %v661_v6, %v660_v10  ;;  %v658_v12 = vadd.f32 %v608_v1, %v546_v63  ;;  %v659_v3 = vadd.f32 %v608_v1, %v547_v2 }
 0x2dc   : > { %702 = vst [vmem:[%s1205_s29 + $0x70] sm:$0xff] %v686_v11  ;;  %v681_v13 = vpack.c.bf16 %v659_v3, %v658_v12 }
 0x2dd   : > { %698 = vst [vmem:[%s1205_s29 + $0x50] sm:$0xff] %v682_v7 }
 0x2de   : > { %697 = vst [vmem:[%s1205_s29 + $0x48] sm:$0xff] %v681_v13 }
 0x2df   : > { %v598_v38 = vpop.permute.xlu0 %597 }
 0x2e0   : > { %v654_v22 = vadd.f32 %v598_v38, %v542_v4  ;;  %v655_v14 = vadd.f32 %v598_v38, %v543_v5 }
 0x2e1   : > { %v593_v15 = vpop.permute.xlu1 %592 }
 0x2e2   : > { %v679_v31 = vpack.c.bf16 %v655_v14, %v654_v22  ;;  %v652_v17 = vadd.f32 %v593_v15, %v540_v21  ;;  %v653_v16 = vadd.f32 %v593_v15, %v541_v37 }
 0x2e4   : > { %695 = vst [vmem:[%s1205_s29 + $0x38] sm:$0xff] %v679_v31  ;;  %v678_v18 = vpack.c.bf16 %v653_v16, %v652_v17 }
 0x2e6   : > { %694 = vst [vmem:[%s1205_s29 + $0x30] sm:$0xff] %v678_v18 }
 0x2e7   : > { %v628_v23 = vpop.permute.xlu0 %627 }
 0x2e8   : > { %v666_v59 = vadd.f32 %v628_v23, %v554_v41  ;;  %v667_v24 = vadd.f32 %v628_v23, %v555_v19 }
 0x2e9   : > { %v638_v25 = vpop.permute.xlu1 %637 }
 0x2ea   : > { %v685_v26 = vpack.c.bf16 %v667_v24, %v666_v59  ;;  %v670_v27 = vadd.f32 %v638_v25, %v558_v20  ;;  %v671_v28 = vadd.f32 %v638_v25, %v559_v58 }
 0x2ec   : > { %701 = vst [vmem:[%s1205_s29 + $0x68] sm:$0xff] %v685_v26  ;;  %v687_v29 = vpack.c.bf16 %v671_v28, %v670_v27 }
 0x2ee   : > { %703 = vst [vmem:[%s1205_s29 + $0x78] sm:$0xff] %v687_v29 }
 0x2ef PF: > { %s15_s18 = sadd.s32 1, %s868_s18  }
 0x2f0   : > { %p12_p4 = scmp.ge.s32.totalorder %s15_s18, 4  }
 0x2f2   :  { %14 = sbr.rel (!%p12_p4) target bundleno = 1 (0x1), region = 76 }

// kernel: tse_forward.6
= control target key start
LH: loop header
LB: loop body
LE: loop exit
PB: predicated region body
PF: predicated region fallthrough
CT: control target
= control target key end

     0   :  { %s4844_s21 = smov 0   ;;  %s4846_s22 = smov 0   ;;  %s8213_s0 = inlined_call_operand.vmem [shape: bf16[2,128,256], index: 0, kind: input, shape index: {}]   ;;  %s8214_s1 = inlined_call_operand.vmem [shape: bf16[1024,128], index: 1, kind: input, shape index: {}]   ;;  %s8215_s2 = inlined_call_operand.vmem [shape: f32[1024,1], index: 2, kind: input, shape index: {}]   ;;  %s8216_s3 = inlined_call_operand.vmem [shape: bf16[128,1024], index: 3, kind: input, shape index: {}]   ;;  %s8217_s4 = inlined_call_operand.vmem [shape: f32[128,1], index: 4, kind: input, shape index: {}]   ;;  %s8218_s5 = inlined_call_operand.vmem [shape: f32[2,128,256], index: 5, kind: output, shape index: {0}]   ;;  %s8219_s6 = inlined_call_operand.vmem [shape: f32[2,128,1], index: 6, kind: output, shape index: {1}]  }
   0x1   :  { %s4848_s23 = smov 0  }
   0x2 LB: > { %s29_s24 = sadd.s32 1, %s4802_s22  ;;  %p4024_p0 = scmp.ge.s32.totalorder %s4806_s23, 1  ;;  %s4806_s23 = sphi %s4848_s23, %s17_s23   ;;  %s4802_s22 = sphi %s4846_s22, %s9077_s22   ;;  %s4798_s21 = sphi %s4844_s21, %s9076_s21  }
   0x3   : > { %p31_p1 = scmp.ge.s32.totalorder %s29_s24, 2  ;;  %p236_p2 = scmp.lt.s32.totalorder %s4806_s23, 3 }
   0x5   : > { %s9079_s24 = smov (%p31_p1, %s29_s24), 0  ;;  %p237_p3 = pnand %p4024_p0, %p236_p2 }
   0x7   : > { %240 = sbr.rel (%p237_p3) target bundleno = 2115 (0x843), region = 40 }
   0xc   : > { %v478_v0 = vld [vmem:[%s8215_s2 + $0xf0] sm:$0xff]  ;;  %p280_p4 = scmp.lt.s32.totalorder %s4798_s21, 1  ;;  %v4808_v2 = vmov 0   ;;  %v460_v3 = vld [vmem:[%s8215_s2 + $0x60] sm:$0xff]  ;;  %v479_v4 = vld [vmem:[%s8215_s2 + $0xf8] sm:$0xff]  ;;  %vm3830_vm0 = vcmask 7168  }
   0xd   : > { %v462_v1 = vld [vmem:[%s8215_s2 + $0x70] sm:$0xff]  ;;  %4782 = vset.pattern.permute.xlu1 %v4808_v2  ;;  %4781 = vset.pattern.permute.xlu0 %v4808_v2  ;;  %v463_v13 = vld [vmem:[%s8215_s2 + $0x78] sm:$0xff]  ;;  %v461_v17 = vld [vmem:[%s8215_s2 + $0x68] sm:$0xff] }
   0xe   : > { %728 = vperm.xlu1 %4782, %v478_v0   ;;  %648 = vperm.xlu0 %4781, %v462_v1   ;;  %s9081_s21 = smov (!%p280_p4, %s4798_s21), 1  ;;  %v477_v27 = vld [vmem:[%s8215_s2 + $0xe8] sm:$0xff]  ;;  %v476_v30 = vld [vmem:[%s8215_s2 + $0xe0] sm:$0xff]  ;;  %v458_v32 = vld [vmem:[%s8215_s2 + $0x50] sm:$0xff] }
   0xf   : > { %4783 = vset.pattern.permute.xlu2 %v4808_v2  ;;  %s4609_s7 = sshll.u32 %s9081_s21, 7  ;;  %v474_v42 = vld [vmem:[%s8215_s2 + $0xd0] sm:$0xff]  ;;  %v459_v45 = vld [vmem:[%s8215_s2 + $0x58] sm:$0xff]  ;;  %v457_v57 = vld [vmem:[%s8215_s2 + $0x48] sm:$0xff]  ;;  %s4610_s13 = sshll.u32 %s9081_s21, 8 }
  0x10   : > { %638 = vperm.xlu2 %4783, %v460_v3   ;;  %s4879_s10 = scalar_lea.vmem %s8213_s0, %s4609_s7  ;;  %v475_v47 = vld [vmem:[%s8215_s2 + $0xd8] sm:$0xff]  ;;  %v456_v60 = vld [vmem:[%s8215_s2 + $0x40] sm:$0xff]  ;;  %v454_v1 = vld [vmem:[%s8215_s2 + $0x30] sm:$0xff]  ;;  %s7707_s16 = scalar_lea.vmem %s8218_s5, %s4610_s13 }
  0x11   : > { %v4345_v5 = vld [vmem:[%s4879_s10 + $0x70] sm:$0xf]  ;;  %v4627_v6 = vld [vmem:[%s4879_s10 + $0x74] sm:$0xf0]  ;;  %v4626_v7 = vld [vmem:[%s4879_s10 + $0x74] sm:$0xf] }
  0x12   : > { %v4346_v8 = vor.u32 %v4627_v6, %v4345_v5  ;;  %v4347_v9 = vld [vmem:[%s4879_s10 + $0x78] sm:$0xf0]  ;;  %v4337_v10 = vld [vmem:[%s4879_s10 + $0x60] sm:$0xf]  ;;  %v4625_v11 = vld [vmem:[%s4879_s10 + $0x64] sm:$0xf0] }
  0x13   : > { %v4350_v12 = vor.u32 %v4626_v7, %v4347_v9  ;;  %v4624_v14 = vld [vmem:[%s4879_s10 + $0x64] sm:$0xf]  ;;  %v4339_v15 = vld [vmem:[%s4879_s10 + $0x68] sm:$0xf0]  ;;  %v4338_v16 = vor.u32 %v4625_v11, %v4337_v10  ;;  %v4329_v19 = vld [vmem:[%s4879_s10 + $0x50] sm:$0xf] }
  0x14   : > { %1680 = vmatpush.bf16.msra.mxu0 %v4346_v8  ;;  %v4342_v18 = vor.u32 %v4624_v14, %v4339_v15  ;;  %v4623_v20 = vld [vmem:[%s4879_s10 + $0x54] sm:$0xf0]  ;;  %v4622_v21 = vld [vmem:[%s4879_s10 + $0x54] sm:$0xf]  ;;  %v4331_v22 = vld [vmem:[%s4879_s10 + $0x58] sm:$0xf0] }
  0x15   : > { %2009 = vmatpush.bf16.msra.mxu1 %v4350_v12  ;;  %v4330_v23 = vor.u32 %v4623_v20, %v4329_v19  ;;  %v4334_v24 = vor.u32 %v4622_v21, %v4331_v22  ;;  %v4321_v25 = vld [vmem:[%s4879_s10 + $0x40] sm:$0xf]  ;;  %v4621_v26 = vld [vmem:[%s4879_s10 + $0x44] sm:$0xf0]  ;;  %v4620_v28 = vld [vmem:[%s4879_s10 + $0x44] sm:$0xf] }
  0x16   : > { %733 = vperm.xlu1 %4782, %v479_v4   ;;  %653 = vperm.xlu0 %4781, %v463_v13   ;;  %v4323_v29 = vld [vmem:[%s4879_s10 + $0x48] sm:$0xf0]  ;;  %v4322_v31 = vor.u32 %v4621_v26, %v4321_v25  ;;  %v4313_v34 = vld [vmem:[%s4879_s10 + $0x30] sm:$0xf]  ;;  %v4619_v35 = vld [vmem:[%s4879_s10 + $0x34] sm:$0xf0] }
  0x17   : > { %v4326_v33 = vor.u32 %v4620_v28, %v4323_v29  ;;  %v4618_v36 = vld [vmem:[%s4879_s10 + $0x34] sm:$0xf]  ;;  %v4315_v37 = vld [vmem:[%s4879_s10 + $0x38] sm:$0xf0]  ;;  %v4314_v38 = vor.u32 %v4619_v35, %v4313_v34  ;;  %v4305_v40 = vld [vmem:[%s4879_s10 + $0x20] sm:$0xf] }
  0x18   : > { %643 = vperm.xlu2 %4783, %v461_v17   ;;  %1681 = vmatpush.bf16.msra.mxu0 %v4338_v16  ;;  %v4318_v39 = vor.u32 %v4618_v36, %v4315_v37  ;;  %v4617_v41 = vld [vmem:[%s4879_s10 + $0x24] sm:$0xf0]  ;;  %v4616_v43 = vld [vmem:[%s4879_s10 + $0x24] sm:$0xf]  ;;  %v4307_v44 = vld [vmem:[%s4879_s10 + $0x28] sm:$0xf0] }
  0x19   : > { %2010 = vmatpush.bf16.msra.mxu1 %v4342_v18  ;;  %v4306_v46 = vor.u32 %v4617_v41, %v4305_v40  ;;  %v4310_v48 = vor.u32 %v4616_v43, %v4307_v44  ;;  %v4297_v49 = vld [vmem:[%s4879_s10 + $0x10] sm:$0xf]  ;;  %v4615_v50 = vld [vmem:[%s4879_s10 + $0x14] sm:$0xf0]  ;;  %v4614_v51 = vld [vmem:[%s4879_s10 + $0x14] sm:$0xf] }
  0x1a   : > { %v4299_v52 = vld [vmem:[%s4879_s10 + $0x18] sm:$0xf0]  ;;  %v4298_v53 = vor.u32 %v4615_v50, %v4297_v49  ;;  %v4289_v55 = vld [vmem:[%s4879_s10] sm:$0xf]  ;;  %v4613_v56 = vld [vmem:[%s4879_s10 + $0x4] sm:$0xf0] }
  0x1b   : > { %v4302_v54 = vor.u32 %v4614_v51, %v4299_v52  ;;  %v4612_v58 = vld [vmem:[%s4879_s10 + $0x4] sm:$0xf]  ;;  %v4291_v59 = vld [vmem:[%s4879_s10 + $0x8] sm:$0xf0]  ;;  %v4290_v61 = vor.u32 %v4613_v56, %v4289_v55  ;;  %v455_v3 = vld [vmem:[%s8215_s2 + $0x38] sm:$0xff]  ;;  %s8168_s10 = scalar_lea.vmem %s8219_s6, %s4609_s7 }
  0x1c   : > { %1682 = vmatpush.bf16.msra.mxu0 %v4330_v23  ;;  %v472_v62 = vld [vmem:[%s8215_s2 + $0xc0] sm:$0xff]  ;;  %v4294_v63 = vor.u32 %v4612_v58, %v4291_v59  ;;  %v473_v2 = vld [vmem:[%s8215_s2 + $0xc8] sm:$0xff]  ;;  %v471_v4 = vld [vmem:[%s8215_s2 + $0xb8] sm:$0xff] }
  0x1d   : > { %2011 = vmatpush.bf16.msra.mxu1 %v4334_v24  ;;  %v4628_v0 = vld [vmem:[%s8214_s1] sm:$0xff]  ;;  %v470_v5 = vld [vmem:[%s8215_s2 + $0xb0] sm:$0xff]  ;;  %v4629_v7 = vld [vmem:[%s8214_s1 + $0x8] sm:$0xff] }
  0x1e   : > { %723 = vperm.xlu1 %4782, %v477_v27   ;;  %718 = vperm.xlu0 %4781, %v476_v30   ;;  %v452_v6 = vld [vmem:[%s8215_s2 + $0x20] sm:$0xff]  ;;  %v453_v9 = vld [vmem:[%s8215_s2 + $0x28] sm:$0xff]  ;;  %v451_v11 = vld [vmem:[%s8215_s2 + $0x18] sm:$0xff] }
  0x1f   : > { %v468_v8 = vld [vmem:[%s8215_s2 + $0xa0] sm:$0xff]  ;;  %v469_v10 = vld [vmem:[%s8215_s2 + $0xa8] sm:$0xff]  ;;  %v450_v12 = vld [vmem:[%s8215_s2 + $0x10] sm:$0xff] }
  0x20   : > { %628 = vperm.xlu2 %4783, %v458_v32   ;;  %1683 = vmatpush.bf16.msra.mxu0 %v4322_v31  ;;  %v466_v13 = vld [vmem:[%s8215_s2 + $0x90] sm:$0xff]  ;;  %v448_v15 = vld [vmem:[%s8215_s2] sm:$0xff]  ;;  %v449_v16 = vld [vmem:[%s8215_s2 + $0x8] sm:$0xff] }
  0x21   : > { %2012 = vmatpush.bf16.msra.mxu1 %v4326_v33  ;;  %v4630_v14 = vld [vmem:[%s8214_s1 + $0x10] sm:$0xff]  ;;  %v4631_v17 = vld [vmem:[%s8214_s1 + $0x18] sm:$0xff]  ;;  %v4632_v19 = vld [vmem:[%s8214_s1 + $0x20] sm:$0xff] }
  0x22   : > { %v4633_v24 = vld [vmem:[%s8214_s1 + $0x28] sm:$0xff]  ;;  %v4634_v29 = vld [vmem:[%s8214_s1 + $0x30] sm:$0xff]  ;;  %v467_v32 = vld [vmem:[%s8215_s2 + $0x98] sm:$0xff] }
  0x23   : > { %v464_v35 = vld [vmem:[%s8215_s2 + $0x80] sm:$0xff]  ;;  %v465_v40 = vld [vmem:[%s8215_s2 + $0x88] sm:$0xff] }
  0x24   : > { %1684 = vmatpush.bf16.msra.mxu0 %v4314_v38  ;;  %v4635_v38 = vld [vmem:[%s8214_s1 + $0x38] sm:$0xff]  ;;  %v4637_v56 = vld [vmem:[%s8214_s1 + $0x48] sm:$0xff] }
  0x25   : > { %2013 = vmatpush.bf16.msra.mxu1 %v4318_v39 }
  0x26   : > { %708 = vperm.xlu1 %4782, %v474_v42   ;;  %633 = vperm.xlu0 %4781, %v459_v45   ;;  %v4636_v45 = vld [vmem:[%s8214_s1 + $0x40] sm:$0xff] }
  0x28   : > { %713 = vperm.xlu2 %4783, %v475_v47   ;;  %1685 = vmatpush.bf16.msra.mxu0 %v4306_v46 }
  0x29   : > { %2014 = vmatpush.bf16.msra.mxu1 %v4310_v48 }
  0x2c   : > { %1686 = vmatpush.bf16.msra.mxu0 %v4298_v53 }
  0x2d   : > { %2015 = vmatpush.bf16.msra.mxu1 %v4302_v54 }
  0x2e   : > { %623 = vperm.xlu1 %4782, %v457_v57   ;;  %618 = vperm.xlu0 %4781, %v456_v60  }
  0x30   : > { %698 = vperm.xlu2 %4783, %v472_v62   ;;  %1687 = vmatpush.bf16.msra.mxu0 %v4290_v61 }
  0x31   : > { %2016 = vmatpush.bf16.msra.mxu1 %v4294_v63 }
  0x33   : > { %1688 = vmatmul.bf16.vlgmr.msra.gmra.mxu0 %v4628_v0 }
  0x34   : > { %2017 = vmatmul.bf16.vlgmr.msra.gmra.mxu1 %v4628_v0 }
  0x36   : > { %608 = vperm.xlu1 %4782, %v454_v1   ;;  %703 = vperm.xlu0 %4781, %v473_v2  }
  0x38   : > { %613 = vperm.xlu2 %4783, %v455_v3  }
  0x3e   : > { %693 = vperm.xlu1 %4782, %v471_v4   ;;  %688 = vperm.xlu0 %4781, %v470_v5  }
  0x40   : > { %598 = vperm.xlu2 %4783, %v452_v6  }
  0x43   : > { %1693 = vmatmul.bf16.gmra.mxu0 %v4629_v7 }
  0x44   : > { %2022 = vmatmul.bf16.gmra.mxu1 %v4629_v7 }
  0x46   : > { %678 = vperm.xlu1 %4782, %v468_v8   ;;  %603 = vperm.xlu0 %4781, %v453_v9  }
  0x48   : > { %683 = vperm.xlu2 %4783, %v469_v10  }
  0x4e   : > { %593 = vperm.xlu1 %4782, %v451_v11   ;;  %588 = vperm.xlu0 %4781, %v450_v12   ;;  %v4638_v12 = vld [vmem:[%s8214_s1 + $0x50] sm:$0xff]  ;;  %v480_v11 = vld [vmem:[%s8215_s2 + $0x100] sm:$0xff] }
  0x50   : > { %668 = vperm.xlu2 %4783, %v466_v13  }
  0x53   : > { %1698 = vmatmul.bf16.gmra.mxu0 %v4630_v14 }
  0x54   : > { %2027 = vmatmul.bf16.gmra.mxu1 %v4630_v14 }
  0x56   : > { %578 = vperm.xlu1 %4782, %v448_v15   ;;  %673 = vperm.xlu0 %4781, %v467_v32  }
  0x58   : > { %583 = vperm.xlu2 %4783, %v449_v16   ;;  %v495_v16 = vld [vmem:[%s8215_s2 + $0x178] sm:$0xff] }
  0x5e   : > { %658 = vperm.xlu0 %4781, %v464_v35   ;;  %663 = vperm.xlu1 %4782, %v465_v40   ;;  %v492_v40 = vld [vmem:[%s8215_s2 + $0x160] sm:$0xff] }
  0x63   : > { %1703 = vmatmul.bf16.gmra.mxu0 %v4631_v17 }
  0x64   : > { %2032 = vmatmul.bf16.gmra.mxu1 %v4631_v17 }
  0x66   : > { %813 = vperm.xlu0 %4781, %v495_v16  }
  0x6a   : > { %v5003_v18 = vpop.permute.xlu2 %638 }
  0x6e   : > { %798 = vperm.xlu0 %4781, %v492_v40  }
  0x72   : > { %v5008_v20 = vpop.permute.xlu2 %643 }
  0x73   : > { %1708 = vmatmul.bf16.gmra.mxu0 %v4632_v19 }
  0x74   : > { %2037 = vmatmul.bf16.gmra.mxu1 %v4632_v19 }
  0x7a   : > { %v5010_v21 = vpop.permute.xlu2 %628 }
  0x80   : > { %v5012_v22 = vpop.permute.xlu1 %728  ;;  %v5014_v23 = vpop.permute.xlu0 %648 }
  0x82   : > { %v5023_v27 = vpop.permute.xlu2 %713 }
  0x83   : > { %1713 = vmatmul.bf16.gmra.mxu0 %v4633_v24 }
  0x84   : > { %2042 = vmatmul.bf16.gmra.mxu1 %v4633_v24 }
  0x88   : > { %v5019_v25 = vpop.permute.xlu1 %733  ;;  %v5021_v26 = vpop.permute.xlu0 %653 }
  0x8a   : > { %v5032_v31 = vpop.permute.xlu2 %698 }
  0x90   : > { %v5025_v28 = vpop.permute.xlu1 %723  ;;  %v5030_v30 = vpop.permute.xlu0 %718 }
  0x92   : > { %v5044_v36 = vpop.permute.xlu2 %613 }
  0x93   : > { %1718 = vmatmul.bf16.gmra.mxu0 %v4634_v29 }
  0x94   : > { %2047 = vmatmul.bf16.gmra.mxu1 %v4634_v29 }
  0x98   : > { %v5037_v33 = vpop.permute.xlu1 %708  ;;  %v5039_v34 = vpop.permute.xlu0 %633 }
  0x9a   : > { %v599_v41 = vpop.permute.xlu2 %598 }
  0xa0   : > { %v5046_v37 = vpop.permute.xlu1 %623  ;;  %v5051_v39 = vpop.permute.xlu0 %618 }
  0xa2   : > { %v5065_v47 = vpop.permute.xlu2 %683 }
  0xa3   : > { %1723 = vmatmul.bf16.gmra.mxu0 %v4635_v38 }
  0xa4   : > { %2052 = vmatmul.bf16.gmra.mxu1 %v4635_v38  ;;  %v488_v38 = vld [vmem:[%s8215_s2 + $0x140] sm:$0xff] }
  0xa8   : > { %v5056_v42 = vpop.permute.xlu1 %608  ;;  %v5058_v43 = vpop.permute.xlu0 %703 }
  0xaa   : > { %v5071_v53 = vpop.permute.xlu2 %668 }
  0xb0   : > { %v5060_v44 = vpop.permute.xlu1 %693  ;;  %v1689_v46 = vpop.f32.mrf.mxu0 }
  0xb1   : > { %v2018_v48 = vpop.f32.mrf.mxu1  ;;  %v5067_v49 = vpop.permute.xlu0 %688 }
  0xb2   : > { %v584_v59 = vpop.permute.xlu2 %583 }
  0xb3   : > { %1728 = vmatmul.bf16.gmra.mxu0 %v4636_v45 }
  0xb4   : > { %2057 = vmatmul.bf16.gmra.mxu1 %v4636_v45  ;;  %v4639_v45 = vld [vmem:[%s8214_s1 + $0x58] sm:$0xff] }
  0xb8   : > { %v5069_v50 = vpop.permute.xlu1 %678  ;;  %v1691_v51 = vpop.f32.mrf.mxu0 }
  0xb9   : > { %v2020_v52 = vpop.f32.mrf.mxu1  ;;  %v604_v54 = vpop.permute.xlu0 %603  ;;  %v5078_v63 = vadd.f32 %v1691_v51, %v584_v59 }
  0xba   : > { %v5076_v60 = vadd.f32 %v2020_v52, %v584_v59  ;;  %v509_v52 = vld [vmem:[%s8215_s2 + $0x1e8] sm:$0xff] }
  0xbb   : > { %883 = vperm.xlu0 %4781, %v509_v52  }
  0xbc   : > { %8444 = vst [vmem:[#allocation2_spill] sm:$0xff] %v5076_v60 }
  0xc0   : > { %v594_v55 = vpop.permute.xlu1 %593  ;;  %v1694_v57 = vpop.f32.mrf.mxu0 }
  0xc1   : > { %v2023_v58 = vpop.f32.mrf.mxu1  ;;  %v589_v61 = vpop.permute.xlu0 %588 }
  0xc2   : > { %v5080_v0 = vadd.f32 %v2023_v58, %v589_v61  ;;  %v5086_v4 = vadd.f32 %v1694_v57, %v589_v61 }
  0xc3   : > { %1733 = vmatmul.bf16.gmra.mxu0 %v4637_v56 }
  0xc4   : > { %2062 = vmatmul.bf16.gmra.mxu1 %v4637_v56  ;;  %8445 = vst [vmem:[#allocation3_spill] sm:$0xff] %v5080_v0 }
  0xc8   : > { %v579_v62 = vpop.permute.xlu1 %578  ;;  %v1696_v3 = vpop.f32.mrf.mxu0 }
  0xc9   : > { %v5082_v1 = vadd.f32 %v1689_v46, %v579_v62  ;;  %v5084_v2 = vadd.f32 %v2018_v48, %v579_v62  ;;  %v5088_v5 = vadd.f32 %v1696_v3, %v594_v55  ;;  %v2025_v6 = vpop.f32.mrf.mxu1  ;;  %v506_v3 = vld [vmem:[%s8215_s2 + $0x1d0] sm:$0xff]  ;;  %v481_v62 = vld [vmem:[%s8215_s2 + $0x108] sm:$0xff] }
  0xca   : > { %v5092_v8 = vadd.f32 %v2025_v6, %v594_v55  ;;  %868 = vperm.xlu0 %4781, %v506_v3   ;;  %v487_v3 = vld [vmem:[%s8215_s2 + $0x138] sm:$0xff] }
  0xcb   : > { %8446 = vst [vmem:[#allocation4_spill] sm:$0xff] %v5084_v2 }
  0xcc   : > { %8447 = vst [vmem:[#allocation5_spill] sm:$0xff] %v5092_v8 }
  0xd0   : > { %v1699_v13 = vpop.f32.mrf.mxu0 }
  0xd1   : > { %v2028_v14 = vpop.f32.mrf.mxu1  ;;  %v5108_v19 = vadd.f32 %v1699_v13, %v599_v41  ;;  %v489_v13 = vld [vmem:[%s8215_s2 + $0x148] sm:$0xff] }
  0xd2   : > { %v5103_v15 = vadd.f32 %v2028_v14, %v599_v41  ;;  %v510_v41 = vld [vmem:[%s8215_s2 + $0x1f0] sm:$0xff]  ;;  %v507_v14 = vld [vmem:[%s8215_s2 + $0x1d8] sm:$0xff]  ;;  %783 = vperm.xlu0 %4781, %v489_v13  }
  0xd3   : > { %1738 = vmatmul.bf16.gmra.mxu0 %v4638_v12  ;;  %888 = vperm.xlu1 %4782, %v510_v41  }
  0xd4   : > { %8448 = vst [vmem:[#allocation6_spill] sm:$0xff] %v5103_v15  ;;  %2067 = vmatmul.bf16.gmra.mxu1 %v4638_v12 }
  0xd8   : > { %v1701_v17 = vpop.f32.mrf.mxu0 }
  0xd9   : > { %v5110_v24 = vadd.f32 %v1701_v17, %v604_v54  ;;  %v2030_v29 = vpop.f32.mrf.mxu1 }
  0xda   : > { %v5112_v32 = vadd.f32 %v2030_v29, %v604_v54  ;;  %v493_v54 = vld [vmem:[%s8215_s2 + $0x168] sm:$0xff] }
  0xdb   : > { %v2342_v35 = vpack.c.bf16 %v5110_v24, %v5108_v19  ;;  %803 = vperm.xlu1 %4782, %v493_v54  }
  0xdc   : > { %8449 = vst [vmem:[#allocation7_spill] sm:$0xff] %v5112_v32 }
  0xe0   : > { %v1704_v46 = vpop.f32.mrf.mxu0 }
  0xe1   : > { %v2033_v48 = vpop.f32.mrf.mxu1  ;;  %v5137_v56 = vadd.f32 %v1704_v46, %v5056_v42  ;;  %v504_v46 = vld [vmem:[%s8215_s2 + $0x1c0] sm:$0xff] }
  0xe2   : > { %v5128_v51 = vadd.f32 %v2033_v48, %v5056_v42  ;;  %v490_v42 = vld [vmem:[%s8215_s2 + $0x150] sm:$0xff]  ;;  %v4641_v48 = vld [vmem:[%s8214_s1 + $0x68] sm:$0xff] }
  0xe3   : > { %1743 = vmatmul.bf16.gmra.mxu0 %v4639_v45  ;;  %788 = vperm.xlu1 %4782, %v490_v42  }
  0xe4   : > { %8450 = vst [vmem:[#allocation8_spill] sm:$0xff] %v5128_v51  ;;  %2072 = vmatmul.bf16.gmra.mxu1 %v4639_v45  ;;  %v486_v45 = vld [vmem:[%s8215_s2 + $0x130] sm:$0xff] }
  0xe5   : > { %768 = vperm.xlu0 %4781, %v486_v45   ;;  %v511_v45 = vld [vmem:[%s8215_s2 + $0x1f8] sm:$0xff] }
  0xe8   : > { %v1706_v55 = vpop.f32.mrf.mxu0 }
  0xe9   : > { %v5140_v57 = vadd.f32 %v1706_v55, %v5044_v36  ;;  %v2035_v58 = vpop.f32.mrf.mxu1  ;;  %v503_v55 = vld [vmem:[%s8215_s2 + $0x1b8] sm:$0xff] }
  0xea   : > { %v5143_v59 = vadd.f32 %v2035_v58, %v5044_v36  ;;  %v4640_v36 = vld [vmem:[%s8214_s1 + $0x60] sm:$0xff]  ;;  %v494_v58 = vld [vmem:[%s8215_s2 + $0x170] sm:$0xff] }
  0xeb   : > { %v2344_v61 = vpack.c.bf16 %v5140_v57, %v5137_v56  ;;  %873 = vperm.xlu1 %4782, %v507_v14   ;;  %808 = vperm.xlu2 %4783, %v494_v58   ;;  %v483_v58 = vld [vmem:[%s8215_s2 + $0x118] sm:$0xff]  ;;  %v8462_v56 = vpack.c.bf16 %v5088_v5, %v5086_v4 }
  0xec   : > { %8451 = vst [vmem:[#allocation9_spill] sm:$0xff] %v5143_v59 }
  0xed   : > { %853 = vperm.xlu0 %4781, %v503_v55  }
  0xf0   : > { %v5158_v6 = vpop.f32.mrf.mxu0 }
  0xf1   : > { %v2038_v12 = vpop.f32.mrf.mxu1 }
  0xf2   : > { %v5167_v16 = vadd.f32 %v2038_v12, %v5051_v39 }
  0xf3   : > { %1748 = vmatmul.bf16.gmra.mxu0 %v4640_v36  ;;  %858 = vperm.xlu1 %4782, %v504_v46   ;;  %v484_v46 = vld [vmem:[%s8215_s2 + $0x120] sm:$0xff] }
  0xf4   : > { %2077 = vmatmul.bf16.gmra.mxu1 %v4640_v36  ;;  %8452 = vst [vmem:[#allocation10_spill] sm:$0xff] %v5167_v16  ;;  %893 = vperm.xlu2 %4783, %v511_v45  }
  0xf8   : > { %v5169_v17 = vpop.f32.mrf.mxu0 }
  0xf9   : > { %v2040_v29 = vpop.f32.mrf.mxu1 }
  0xfa   : > { %v5172_v40 = vadd.f32 %v2040_v29, %v5046_v37  ;;  %v500_v29 = vld [vmem:[%s8215_s2 + $0x1a0] sm:$0xff] }
  0xfb   : > { %773 = vperm.xlu1 %4782, %v487_v3   ;;  %838 = vperm.xlu0 %4781, %v500_v29   ;;  %v508_v3 = vld [vmem:[%s8215_s2 + $0x1e0] sm:$0xff] }
  0xfc   : > { %8453 = vst [vmem:[#allocation11_spill] sm:$0xff] %v5172_v40  ;;  %878 = vperm.xlu2 %4783, %v508_v3   ;;  %v4643_v3 = vld [vmem:[%s8214_s1 + $0x78] sm:$0xff] }
 0x100   : > { %v5185_v52 = vpop.f32.mrf.mxu0 }
 0x101   : > { %v2043_v54 = vpop.f32.mrf.mxu1 }
 0x102   : > { %v5197_v42 = vadd.f32 %v2043_v54, %v5010_v21 }
 0x103   : > { %1753 = vmatmul.bf16.gmra.mxu0 %v4641_v48  ;;  %758 = vperm.xlu1 %4782, %v484_v46  }
 0x104   : > { %2082 = vmatmul.bf16.gmra.mxu1 %v4641_v48  ;;  %8454 = vst [vmem:[#allocation12_spill] sm:$0xff] %v5197_v42  ;;  %v4642_v48 = vld [vmem:[%s8214_s1 + $0x70] sm:$0xff]  ;;  %753 = vperm.xlu0 %4781, %v483_v58   ;;  %v491_v58 = vld [vmem:[%s8215_s2 + $0x158] sm:$0xff] }
 0x105   : > { %793 = vperm.xlu2 %4783, %v491_v58  }
 0x108   : > { %v1716_v36 = vpop.f32.mrf.mxu0 }
 0x109   : > { %v2045_v12 = vpop.f32.mrf.mxu1 }
 0x10a   : > { %v5200_v13 = vadd.f32 %v2045_v12, %v5039_v34  ;;  %v501_v12 = vld [vmem:[%s8215_s2 + $0x1a8] sm:$0xff] }
 0x10b   : > { %843 = vperm.xlu1 %4782, %v501_v12  }
 0x10c   : > { %8455 = vst [vmem:[#allocation13_spill] sm:$0xff] %v5200_v13  ;;  %738 = vperm.xlu0 %4781, %v480_v11   ;;  %v674_v11 = vpop.permute.xlu0 %673 }
 0x10d   : > { %778 = vperm.xlu2 %4783, %v488_v38  }
 0x110   : > { %v1719_v54 = vpop.f32.mrf.mxu0 }
 0x111   : > { %v2048_v55 = vpop.f32.mrf.mxu1 }
 0x112   : > { %v5226_v29 = vadd.f32 %v2048_v55, %v5003_v18  ;;  %v498_v55 = vld [vmem:[%s8215_s2 + $0x190] sm:$0xff] }
 0x113   : > { %1758 = vmatmul.bf16.gmra.mxu0 %v4642_v48  ;;  %828 = vperm.xlu1 %4782, %v498_v55  }
 0x114   : > { %2087 = vmatmul.bf16.gmra.mxu1 %v4642_v48  ;;  %8456 = vst [vmem:[#allocation14_spill] sm:$0xff] %v5226_v29 }
 0x118   : > { %v1721_v45 = vpop.f32.mrf.mxu0 }
 0x119   : > { %v2050_v46 = vpop.f32.mrf.mxu1  ;;  %v1722_v9 = vadd.f32 %v1721_v45, %v5008_v20  ;;  %v659_v45 = vpop.permute.xlu0 %658 }
 0x11a   : > { %v5229_v48 = vadd.f32 %v2050_v46, %v5008_v20 }
 0x11b   : > { %743 = vperm.xlu1 %4782, %v481_v62   ;;  %v505_v62 = vld [vmem:[%s8215_s2 + $0x1c8] sm:$0xff] }
 0x11c   : > { %8457 = vst [vmem:[#allocation15_spill] sm:$0xff] %v5229_v48  ;;  %863 = vperm.xlu2 %4783, %v505_v62   ;;  %v2542_v48 = vld [vmem:[%s8217_s4 + $0x60] sm:$0xff] }
 0x120   : > { %v1724_v12 = vpop.f32.mrf.mxu0 }
 0x121   : > { %v2053_v46 = vpop.f32.mrf.mxu1  ;;  %v1725_v55 = vadd.f32 %v1724_v12, %v5014_v23 }
 0x122   : > { %v5252_v58 = vadd.f32 %v2053_v46, %v5014_v23  ;;  %v1720_v46 = vadd.f32 %v1719_v54, %v5003_v18  ;;  %v1717_v23 = vadd.f32 %v1716_v36, %v5039_v34  ;;  %v1712_v18 = vadd.f32 %v5169_v17, %v5046_v37  ;;  %v502_v34 = vld [vmem:[%s8215_s2 + $0x1b0] sm:$0xff] }
 0x123   : > { %1763 = vmatmul.bf16.gmra.mxu0 %v4643_v3 }
 0x124   : > { %2092 = vmatmul.bf16.gmra.mxu1 %v4643_v3  ;;  %8458 = vst [vmem:[#allocation16_spill] sm:$0xff] %v5252_v58  ;;  %848 = vperm.xlu2 %4783, %v502_v34  }
 0x128   : > { %v1726_v41 = vpop.f32.mrf.mxu0 }
 0x129   : > { %v1727_v14 = vadd.f32 %v1726_v41, %v5021_v26  ;;  %v2055_v3 = vpop.f32.mrf.mxu1  ;;  %v2350_v41 = vpack.c.bf16 %v1722_v9, %v1720_v46  ;;  %v1710_v9 = vadd.f32 %v5158_v6, %v5051_v39  ;;  %v485_v39 = vld [vmem:[%s8215_s2 + $0x128] sm:$0xff] }
 0x12a   : > { %v5257_v7 = vadd.f32 %v2055_v3, %v5021_v26  ;;  %v4644_v26 = vld [vmem:[%s8214_s1 + $0x80] sm:$0xff]  ;;  %v4645_v6 = vld [vmem:[%s8214_s1 + $0x88] sm:$0xff] }
 0x12b   : > { %v2352_v10 = vpack.c.bf16 %v1727_v14, %v1725_v55  ;;  %v1715_v14 = vadd.f32 %v5185_v52, %v5010_v21  ;;  %v664_v21 = vpop.permute.xlu1 %663  ;;  %v2346_v52 = vpack.c.bf16 %v1712_v18, %v1710_v9  ;;  %v5341_v9 = vpop.permute.xlu0 %813 }
 0x12c   : > { %8459 = vst [vmem:[#allocation17_spill] sm:$0xff] %v5257_v7  ;;  %763 = vperm.xlu2 %4783, %v485_v39   ;;  %v4665_v7 = vld [vmem:[%s8214_s1 + $0x128] sm:$0xff] }
 0x12d   : > { %2946 = vmatpush.bf16.msra.mxu2 %v2352_v10  ;;  %v2348_v10 = vpack.c.bf16 %v1717_v23, %v1715_v14 }
 0x130   : > { %v1729_v20 = vpop.f32.mrf.mxu0 }
 0x131   : > { %v2058_v12 = vpop.f32.mrf.mxu1  ;;  %2947 = vmatpush.bf16.msra.mxu2 %v2350_v41  ;;  %v5281_v54 = vadd.f32 %v1729_v20, %v659_v45 }
 0x132   : > { %v5272_v55 = vadd.f32 %v2058_v12, %v659_v45 }
 0x133   : > { %1768 = vmatmul.bf16.gmra.mxu0 %v4644_v26 }
 0x134   : > { %8460 = vst [vmem:[#allocation18_spill] sm:$0xff] %v5272_v55  ;;  %2097 = vmatmul.bf16.gmra.mxu1 %v4644_v26  ;;  %v482_v26 = vld [vmem:[%s8215_s2 + $0x110] sm:$0xff] }
 0x135   : > { %2948 = vmatpush.bf16.msra.mxu2 %v2348_v10  ;;  %748 = vperm.xlu2 %4783, %v482_v26   ;;  %v526_v55 = vld [vmem:[%s8215_s2 + $0x270] sm:$0xff] }
 0x136   : > { %968 = vperm.xlu1 %4782, %v526_v55   ;;  %v543_v55 = vld [vmem:[%s8215_s2 + $0x2f8] sm:$0xff] }
 0x138   : > { %v1731_v36 = vpop.f32.mrf.mxu0 }
 0x139   : > { %v5283_v3 = vadd.f32 %v1731_v36, %v664_v21  ;;  %v2060_v37 = vpop.f32.mrf.mxu1  ;;  %2949 = vmatpush.bf16.msra.mxu2 %v2346_v52 }
 0x13a   : > { %v5285_v17 = vadd.f32 %v2060_v37, %v664_v21 }
 0x13c   : > { %8461 = vst [vmem:[#allocation19_spill] sm:$0xff] %v5285_v17 }
 0x13d   : > { %2950 = vmatpush.bf16.msra.mxu2 %v2344_v61 }
 0x13e   : > { %1053 = vperm.xlu1 %4782, %v543_v55   ;;  %v540_v55 = vld [vmem:[%s8215_s2 + $0x2e0] sm:$0xff] }
 0x140   : > { %v1734_v23 = vpop.f32.mrf.mxu0 }
 0x141   : > { %v2063_v41 = vpop.f32.mrf.mxu1  ;;  %2951 = vmatpush.bf16.msra.mxu2 %v2342_v35  ;;  %v5313_v20 = vadd.f32 %v1734_v23, %v5071_v53  ;;  %v8464_v35 = vpack.c.bf16 %v5078_v63, %v5082_v1 }
 0x142   : > { %v5310_v57 = vadd.f32 %v2063_v41, %v5071_v53  ;;  %v4646_v53 = vld [vmem:[%s8214_s1 + $0x90] sm:$0xff] }
 0x143   : > { %1773 = vmatmul.bf16.gmra.mxu0 %v4645_v6 }
 0x144   : > { %2102 = vmatmul.bf16.gmra.mxu1 %v4645_v6  ;;  %8463 = vst [vmem:[#allocation20_spill] sm:$0xff] %v5310_v57 }
 0x145   : > { %2952 = vmatpush.bf16.msra.mxu2 %v8462_v56  ;;  %v5347_v36 = vpop.permute.xlu1 %888 }
 0x146   : > { %1038 = vperm.xlu1 %4782, %v540_v55  }
 0x148   : > { %v1736_v61 = vpop.f32.mrf.mxu0 }
 0x149   : > { %v5315_v19 = vadd.f32 %v1736_v61, %v674_v11  ;;  %v2065_v24 = vpop.f32.mrf.mxu1  ;;  %2953 = vmatpush.bf16.msra.mxu2 %v8464_v35 }
 0x14a   : > { %v5320_v14 = vadd.f32 %v2065_v24, %v674_v11 }
 0x14c   : > { %8465 = vst [vmem:[#allocation21_spill] sm:$0xff] %v5320_v14 }
 0x14d   : > { %v5354_v6 = vpop.permute.xlu1 %803 }
 0x150   : > { %v1739_v45 = vpop.f32.mrf.mxu0 }
 0x151   : > { %v2068_v12 = vpop.f32.mrf.mxu1  ;;  %v5333_v1 = vadd.f32 %v1739_v45, %v5069_v50  ;;  %v4648_v45 = vld [vmem:[%s8214_s1 + $0xa0] sm:$0xff] }
 0x152   : > { %v5330_v18 = vadd.f32 %v2068_v12, %v5069_v50  ;;  %v4647_v50 = vld [vmem:[%s8214_s1 + $0x98] sm:$0xff] }
 0x153   : > { %1778 = vmatmul.bf16.gmra.mxu0 %v4646_v53 }
 0x154   : > { %2107 = vmatmul.bf16.gmra.mxu1 %v4646_v53  ;;  %8466 = vst [vmem:[#allocation22_spill] sm:$0xff] %v5330_v18 }
 0x158   : > { %v1741_v63 = vpop.f32.mrf.mxu0 }
 0x159   : > { %v5336_v11 = vadd.f32 %v1741_v63, %v5065_v47  ;;  %v2070_v10 = vpop.f32.mrf.mxu1  ;;  %v5379_v63 = vpop.permute.xlu1 %788 }
 0x15a   : > { %v5339_v34 = vadd.f32 %v2070_v10, %v5065_v47  ;;  %v5352_v47 = vpop.permute.xlu0 %798 }
 0x15c   : > { %8467 = vst [vmem:[#allocation23_spill] sm:$0xff] %v5339_v34 }
 0x160   : > { %v1744_v37 = vpop.f32.mrf.mxu0 }
 0x161   : > { %v2073_v39 = vpop.f32.mrf.mxu1  ;;  %v5360_v26 = vadd.f32 %v1744_v37, %v5067_v49  ;;  %v5393_v46 = vpop.permute.xlu1 %873 }
 0x162   : > { %v5357_v23 = vadd.f32 %v2073_v39, %v5067_v49  ;;  %v5375_v12 = vpop.permute.xlu0 %883 }
 0x163   : > { %1783 = vmatmul.bf16.gmra.mxu0 %v4647_v50 }
 0x164   : > { %2112 = vmatmul.bf16.gmra.mxu1 %v4647_v50  ;;  %8468 = vst [vmem:[#allocation24_spill] sm:$0xff] %v5357_v23  ;;  %v5381_v50 = vpop.permute.xlu2 %808 }
 0x168   : > { %v1746_v41 = vpop.f32.mrf.mxu0 }
 0x169   : > { %v5363_v56 = vadd.f32 %v1746_v41, %v5060_v44  ;;  %v2075_v61 = vpop.f32.mrf.mxu1 }
 0x16a   : > { %v5366_v24 = vadd.f32 %v2075_v61, %v5060_v44  ;;  %v5388_v41 = vpop.permute.xlu0 %868 }
 0x16c   : > { %8469 = vst [vmem:[#allocation25_spill] sm:$0xff] %v5366_v24  ;;  %v5395_v5 = vpop.permute.xlu2 %893 }
 0x170   : > { %v5377_v49 = vpop.f32.mrf.mxu0 }
 0x171   : > { %v2078_v10 = vpop.f32.mrf.mxu1 }
 0x172   : > { %v5384_v44 = vadd.f32 %v2078_v10, %v5032_v31  ;;  %v5404_v38 = vpop.permute.xlu0 %783 }
 0x173   : > { %1788 = vmatmul.bf16.gmra.mxu0 %v4648_v45 }
 0x174   : > { %2117 = vmatmul.bf16.gmra.mxu1 %v4648_v45  ;;  %8470 = vst [vmem:[#allocation26_spill] sm:$0xff] %v5384_v44  ;;  %v4649_v45 = vld [vmem:[%s8214_s1 + $0xa8] sm:$0xff]  ;;  %v5408_v62 = vpop.permute.xlu2 %878 }
 0x178   : > { %v5386_v37 = vpop.f32.mrf.mxu0 }
 0x179   : > { %v2080_v39 = vpop.f32.mrf.mxu1 }
 0x17a   : > { %v5391_v61 = vadd.f32 %v2080_v39, %v5058_v43  ;;  %v5406_v39 = vpop.permute.xlu1 %858  ;;  %v5420_v17 = vpop.permute.xlu0 %768 }
 0x17c   : > { %8471 = vst [vmem:[#allocation27_spill] sm:$0xff] %v5391_v61  ;;  %v5427_v14 = vpop.permute.xlu2 %793 }
 0x180   : > { %v5402_v10 = vpop.f32.mrf.mxu0 }
 0x181   : > { %v2083_v53 = vpop.f32.mrf.mxu1 }
 0x182   : > { %v5411_v4 = vadd.f32 %v2083_v53, %v5037_v33  ;;  %v5422_v57 = vpop.permute.xlu1 %773  ;;  %v5435_v34 = vpop.permute.xlu0 %853 }
 0x183   : > { %1793 = vmatmul.bf16.gmra.mxu0 %v4649_v45 }
 0x184   : > { %2122 = vmatmul.bf16.gmra.mxu1 %v4649_v45  ;;  %8472 = vst [vmem:[#allocation28_spill] sm:$0xff] %v5411_v4  ;;  %v4650_v45 = vld [vmem:[%s8214_s1 + $0xb0] sm:$0xff]  ;;  %v5442_v4 = vpop.permute.xlu2 %778 }
 0x188   : > { %v5413_v21 = vpop.f32.mrf.mxu0 }
 0x189   : > { %v2085_v52 = vpop.f32.mrf.mxu1 }
 0x18a   : > { %v5416_v35 = vadd.f32 %v2085_v52, %v5023_v27  ;;  %v497_v52 = vld [vmem:[%s8215_s2 + $0x188] sm:$0xff]  ;;  %v5440_v44 = vpop.permute.xlu1 %758  ;;  %v5461_v0 = vpop.permute.xlu0 %838 }
 0x18b   : > { %823 = vperm.xlu0 %4781, %v497_v52   ;;  %v542_v52 = vld [vmem:[%s8215_s2 + $0x2f0] sm:$0xff] }
 0x18c   : > { %8473 = vst [vmem:[#allocation29_spill] sm:$0xff] %v5416_v35 }
 0x190   : > { %v1759_v53 = vpop.f32.mrf.mxu0 }
 0x191   : > { %v2088_v18 = vpop.f32.mrf.mxu1  ;;  %v1760_v16 = vadd.f32 %v1759_v53, %v5030_v30 }
 0x192   : > { %v5438_v23 = vadd.f32 %v2088_v18, %v5030_v30  ;;  %v5463_v8 = vpop.permute.xlu1 %843  ;;  %v5471_v18 = vpop.permute.xlu2 %863  ;;  %v1755_v30 = vadd.f32 %v5402_v10, %v5037_v33  ;;  %v1750_v33 = vadd.f32 %v5377_v49, %v5032_v31  ;;  %v4385_v49 = vld [vmem:[%s8216_s3 + $0x40] sm:$0xf] }
 0x193   : > { %1798 = vmatmul.bf16.gmra.mxu0 %v4650_v45  ;;  %1048 = vperm.xlu0 %4781, %v542_v52   ;;  %v525_v52 = vld [vmem:[%s8215_s2 + $0x268] sm:$0xff] }
 0x194   : > { %2127 = vmatmul.bf16.gmra.mxu1 %v4650_v45  ;;  %8474 = vst [vmem:[#allocation30_spill] sm:$0xff] %v5438_v23  ;;  %v4651_v45 = vld [vmem:[%s8214_s1 + $0xb8] sm:$0xff] }
 0x198   : > { %v1761_v24 = vpop.f32.mrf.mxu0 }
 0x199   : > { %v2090_v61 = vpop.f32.mrf.mxu1 }
 0x19a   : > { %v5445_v35 = vadd.f32 %v2090_v61, %v5025_v28  ;;  %v499_v61 = vld [vmem:[%s8215_s2 + $0x198] sm:$0xff]  ;;  %v5503_v55 = vpop.permute.xlu1 %828 }
 0x19b   : > { %833 = vperm.xlu2 %4783, %v499_v61   ;;  %963 = vperm.xlu0 %4781, %v525_v52   ;;  %v522_v52 = vld [vmem:[%s8215_s2 + $0x250] sm:$0xff] }
 0x19c   : > { %8475 = vst [vmem:[#allocation31_spill] sm:$0xff] %v5445_v35  ;;  %v496_v35 = vld [vmem:[%s8215_s2 + $0x180] sm:$0xff] }
 0x1a0   : > { %v1764_v2 = vpop.f32.mrf.mxu0 }
 0x1a1   : > { %v2093_v60 = vpop.f32.mrf.mxu1  ;;  %v1765_v15 = vadd.f32 %v1764_v2, %v5012_v22 }
 0x1a2   : > { %v5474_v61 = vadd.f32 %v2093_v60, %v5012_v22  ;;  %v4696_v60 = vld [vmem:[%s8216_s3 + $0x1c] sm:$0xf0]  ;;  %v1762_v22 = vadd.f32 %v1761_v24, %v5025_v28  ;;  %v5506_v28 = vpop.permute.xlu2 %848 }
 0x1a3   : > { %1803 = vmatmul.bf16.gmra.mxu0 %v4651_v45  ;;  %818 = vperm.xlu2 %4783, %v496_v35   ;;  %v4652_v24 = vld [vmem:[%s8214_s1 + $0xc0] sm:$0xff] }
 0x1a4   : > { %2132 = vmatmul.bf16.gmra.mxu1 %v4651_v45  ;;  %8476 = vst [vmem:[#allocation32_spill] sm:$0xff] %v5474_v61  ;;  %v4353_v45 = vld [vmem:[%s8216_s3] sm:$0xf]  ;;  %948 = vperm.xlu0 %4781, %v522_v52   ;;  %v550_v61 = vld [vmem:[%s8215_s2 + $0x330] sm:$0xff] }
 0x1a8   : > { %v1766_v23 = vpop.f32.mrf.mxu0 }
 0x1a9   : > { %v1767_v32 = vadd.f32 %v1766_v23, %v5019_v25  ;;  %v2095_v51 = vpop.f32.mrf.mxu1  ;;  %v5494_v23 = vor.u32 %v4696_v60, %v4353_v45  ;;  %v527_v60 = vld [vmem:[%s8215_s2 + $0x278] sm:$0xff] }
 0x1aa   : > { %v5482_v59 = vadd.f32 %v2095_v51, %v5019_v25  ;;  %v523_v25 = vld [vmem:[%s8215_s2 + $0x258] sm:$0xff]  ;;  %v5499_v51 = vpop.permute.xlu0 %753 }
 0x1ab   : > { %v2368_v2 = vpack.c.bf16 %v1767_v32, %v1765_v15  ;;  %8478 = vst [vmem:[#allocation34_spill] sm:$0xff] %v5494_v23  ;;  %953 = vperm.xlu1 %4782, %v523_v25   ;;  %2954 = vmatmul.bf16.vlgmr.msra.gmra.mxu2 %v5494_v23  ;;  %v1757_v15 = vadd.f32 %v5413_v21, %v5023_v27  ;;  %v539_v27 = vld [vmem:[%s8215_s2 + $0x2d8] sm:$0xff]  ;;  %v569_v23 = vld [vmem:[%s8215_s2 + $0x3c8] sm:$0xff] }
 0x1ac   : > { %8477 = vst [vmem:[#allocation33_spill] sm:$0xff] %v5482_v59  ;;  %v2366_v32 = vpack.c.bf16 %v1762_v22, %v1760_v16  ;;  %973 = vperm.xlu2 %4783, %v527_v60   ;;  %v520_v16 = vld [vmem:[%s8215_s2 + $0x240] sm:$0xff]  ;;  %v1752_v21 = vadd.f32 %v5386_v37, %v5058_v43  ;;  %1033 = vperm.xlu0 %4781, %v539_v27   ;;  %v744_v22 = vpop.permute.xlu1 %743  ;;  %v537_v27 = vld [vmem:[%s8215_s2 + $0x2c8] sm:$0xff] }
 0x1ad   : > { %2995 = vmatpush.bf16.msra.mxu3 %v2368_v2  ;;  %v2364_v52 = vpack.c.bf16 %v1757_v15, %v1755_v30  ;;  %v5529_v2 = vpop.permute.xlu2 %763  ;;  %v524_v43 = vld [vmem:[%s8215_s2 + $0x260] sm:$0xff] }
 0x1ae   : > { %v2362_v25 = vpack.c.bf16 %v1752_v21, %v1750_v33  ;;  %v4704_v30 = vld [vmem:[%s8216_s3 + $0x5c] sm:$0xf0]  ;;  %v4653_v33 = vld [vmem:[%s8214_s1 + $0xc8] sm:$0xff] }
 0x1b0   : > { %v1769_v45 = vpop.f32.mrf.mxu0 }
 0x1b1   : > { %v2098_v53 = vpop.f32.mrf.mxu1  ;;  %2996 = vmatpush.bf16.msra.mxu3 %v2366_v32 }
 0x1b2   : > { %v739_v10 = vpop.permute.xlu0 %738 }
 0x1b3   : > { %1808 = vmatmul.bf16.gmra.mxu0 %v4652_v24  ;;  %938 = vperm.xlu1 %4782, %v520_v16   ;;  %v5531_v32 = vadd.f32 %v2098_v53, %v739_v10  ;;  %v5536_v37 = vadd.f32 %v1769_v45, %v739_v10  ;;  %v536_v45 = vld [vmem:[%s8215_s2 + $0x2c0] sm:$0xff]  ;;  %v5551_v53 = vor.u32 %v4704_v30, %v4385_v49 }
 0x1b4   : > { %2137 = vmatmul.bf16.gmra.mxu1 %v4652_v24  ;;  %958 = vperm.xlu2 %4783, %v524_v43   ;;  %v8483_v43 = vpack.c.bf16 %v5336_v11, %v5333_v1  ;;  %v8485_v49 = vpack.c.bf16 %v5315_v19, %v5313_v20  ;;  %v538_v11 = vld [vmem:[%s8215_s2 + $0x2d0] sm:$0xff]  ;;  %v4417_v20 = vld [vmem:[%s8216_s3 + $0x80] sm:$0xf] }
 0x1b5   : > { %2997 = vmatpush.bf16.msra.mxu3 %v2364_v52  ;;  %8479 = vst [vmem:[#allocation35_spill] sm:$0xff] %v5531_v32  ;;  %1018 = vperm.xlu0 %4781, %v536_v45   ;;  %v8482_v52 = vpack.c.bf16 %v5363_v56, %v5360_v26  ;;  %v519_v56 = vld [vmem:[%s8215_s2 + $0x238] sm:$0xff]  ;;  %v4712_v19 = vld [vmem:[%s8216_s3 + $0x9c] sm:$0xf0] }
 0x1b6   : > { %8481 = vst [vmem:[#allocation37_spill] sm:$0xff] %v5551_v53  ;;  %v556_v16 = vld [vmem:[%s8215_s2 + $0x360] sm:$0xff] }
 0x1b8   : > { %v1771_v60 = vpop.f32.mrf.mxu0 }
 0x1b9   : > { %v5538_v15 = vadd.f32 %v1771_v60, %v744_v22  ;;  %v2100_v24 = vpop.f32.mrf.mxu1  ;;  %2998 = vmatpush.bf16.msra.mxu3 %v2362_v25  ;;  %v749_v25 = vpop.permute.xlu2 %748 }
 0x1ba   : > { %v5540_v31 = vadd.f32 %v2100_v24, %v744_v22  ;;  %v541_v22 = vld [vmem:[%s8215_s2 + $0x2e8] sm:$0xff]  ;;  %v534_v24 = vld [vmem:[%s8215_s2 + $0x2b0] sm:$0xff] }
 0x1bb   : > { %1023 = vperm.xlu1 %4782, %v537_v27   ;;  %2959 = vmatmul.bf16.gmra.mxu2 %v5551_v53  ;;  %v4658_v53 = vld [vmem:[%s8214_s1 + $0xf0] sm:$0xff] }
 0x1bc   : > { %8480 = vst [vmem:[#allocation36_spill] sm:$0xff] %v5540_v31  ;;  %1043 = vperm.xlu2 %4783, %v541_v22   ;;  %v5607_v22 = vor.u32 %v4712_v19, %v4417_v20 }
 0x1bd   : > { %2999 = vmatpush.bf16.msra.mxu3 %v8482_v52  ;;  %933 = vperm.xlu0 %4781, %v519_v56   ;;  %v8486_v52 = vpack.c.bf16 %v5283_v3, %v5281_v54  ;;  %v517_v3 = vld [vmem:[%s8215_s2 + $0x228] sm:$0xff] }
 0x1be   : > { %8488 = vst [vmem:[#allocation40_spill] sm:$0xff] %v5607_v22 }
 0x1c0   : > { %v1774_v10 = vpop.f32.mrf.mxu0 }
 0x1c1   : > { %v2103_v60 = vpop.f32.mrf.mxu1  ;;  %3000 = vmatpush.bf16.msra.mxu3 %v8483_v43  ;;  %v5587_v30 = vadd.f32 %v1774_v10, %v749_v25  ;;  %v516_v10 = vld [vmem:[%s8215_s2 + $0x220] sm:$0xff]  ;;  %v521_v43 = vld [vmem:[%s8215_s2 + $0x248] sm:$0xff] }
 0x1c2   : > { %v5573_v26 = vadd.f32 %v2103_v60, %v749_v25  ;;  %v4654_v25 = vld [vmem:[%s8214_s1 + $0xd0] sm:$0xff] }
 0x1c3   : > { %1813 = vmatmul.bf16.gmra.mxu0 %v4653_v33  ;;  %1008 = vperm.xlu1 %4782, %v534_v24   ;;  %v533_v24 = vld [vmem:[%s8215_s2 + $0x2a8] sm:$0xff] }
 0x1c4   : > { %8484 = vst [vmem:[#allocation38_spill] sm:$0xff] %v5573_v26  ;;  %2142 = vmatmul.bf16.gmra.mxu1 %v4653_v33  ;;  %1028 = vperm.xlu2 %4783, %v538_v11  }
 0x1c5   : > { %3001 = vmatpush.bf16.msra.mxu3 %v8485_v49  ;;  %918 = vperm.xlu0 %4781, %v516_v10   ;;  %v514_v49 = vld [vmem:[%s8215_s2 + $0x210] sm:$0xff] }
 0x1c8   : > { %v1776_v1 = vpop.f32.mrf.mxu0 }
 0x1c9   : > { %v5590_v45 = vadd.f32 %v1776_v1, %v5499_v51  ;;  %v2105_v27 = vpop.f32.mrf.mxu1  ;;  %3002 = vmatpush.bf16.msra.mxu3 %v8486_v52 }
 0x1ca   : > { %v5596_v33 = vadd.f32 %v2105_v27, %v5499_v51  ;;  %v518_v27 = vld [vmem:[%s8215_s2 + $0x230] sm:$0xff] }
 0x1cb   : > { %923 = vperm.xlu1 %4782, %v517_v3   ;;  %2964 = vmatmul.bf16.gmra.mxu2 %v5607_v22  ;;  %v4449_v3 = vld [vmem:[%s8216_s3 + $0xc0] sm:$0xf] }
 0x1cc   : > { %8487 = vst [vmem:[#allocation39_spill] sm:$0xff] %v5596_v33  ;;  %943 = vperm.xlu2 %4783, %v521_v43  }
 0x1cd   : > { %1003 = vperm.xlu0 %4781, %v533_v24   ;;  %v4655_v24 = vld [vmem:[%s8214_s1 + $0xd8] sm:$0xff] }
 0x1d0   : > { %v1779_v60 = vpop.f32.mrf.mxu0 }
 0x1d1   : > { %v2108_v56 = vpop.f32.mrf.mxu1  ;;  %v5636_v52 = vadd.f32 %v1779_v60, %v5440_v44 }
 0x1d2   : > { %v5630_v1 = vadd.f32 %v2108_v56, %v5440_v44  ;;  %v530_v44 = vld [vmem:[%s8215_s2 + $0x290] sm:$0xff] }
 0x1d3   : > { %1818 = vmatmul.bf16.gmra.mxu0 %v4654_v25  ;;  %908 = vperm.xlu1 %4782, %v514_v49   ;;  %v4692_v49 = vld [vmem:[%s8216_s3 + $0x4] sm:$0xf] }
 0x1d4   : > { %2147 = vmatmul.bf16.gmra.mxu1 %v4654_v25  ;;  %8489 = vst [vmem:[#allocation41_spill] sm:$0xff] %v5630_v1  ;;  %928 = vperm.xlu2 %4783, %v518_v27   ;;  %v4720_v25 = vld [vmem:[%s8216_s3 + $0xdc] sm:$0xf0] }
 0x1d5   : > { %v5653_v60 = vor.u32 %v4720_v25, %v4449_v3  ;;  %988 = vperm.xlu0 %4781, %v530_v44   ;;  %v513_v44 = vld [vmem:[%s8215_s2 + $0x208] sm:$0xff] }
 0x1d7   : > { %8491 = vst [vmem:[#allocation43_spill] sm:$0xff] %v5653_v60 }
 0x1d8   : > { %v1781_v11 = vpop.f32.mrf.mxu0 }
 0x1d9   : > { %v5639_v20 = vadd.f32 %v1781_v11, %v5529_v2  ;;  %v2110_v19 = vpop.f32.mrf.mxu1  ;;  %v4355_v11 = vld [vmem:[%s8216_s3 + $0x20] sm:$0xf0] }
 0x1da   : > { %v5642_v10 = vadd.f32 %v2110_v19, %v5529_v2  ;;  %v531_v2 = vld [vmem:[%s8215_s2 + $0x298] sm:$0xff]  ;;  %v5675_v3 = vor.u32 %v4692_v49, %v4355_v11  ;;  %v532_v11 = vld [vmem:[%s8215_s2 + $0x2a0] sm:$0xff] }
 0x1db   : > { %993 = vperm.xlu1 %4782, %v531_v2   ;;  %2969 = vmatmul.bf16.gmra.mxu2 %v5653_v60  ;;  %v535_v19 = vld [vmem:[%s8215_s2 + $0x2b8] sm:$0xff]  ;;  %v528_v2 = vld [vmem:[%s8215_s2 + $0x280] sm:$0xff] }
 0x1dc   : > { %8490 = vst [vmem:[#allocation42_spill] sm:$0xff] %v5642_v10  ;;  %1013 = vperm.xlu2 %4783, %v535_v19   ;;  %3003 = vmatmul.bf16.vlgmr.msra.gmra.mxu3 %v5675_v3  ;;  %v549_v10 = vld [vmem:[%s8215_s2 + $0x328] sm:$0xff] }
 0x1dd   : > { %8492 = vst [vmem:[#allocation44_spill] sm:$0xff] %v5675_v3  ;;  %903 = vperm.xlu0 %4781, %v513_v44   ;;  %v555_v3 = vld [vmem:[%s8215_s2 + $0x358] sm:$0xff] }
 0x1e0   : > { %v1784_v27 = vpop.f32.mrf.mxu0 }
 0x1e1   : > { %v2113_v25 = vpop.f32.mrf.mxu1  ;;  %v5691_v19 = vadd.f32 %v1784_v27, %v5420_v17 }
 0x1e2   : > { %v5685_v35 = vadd.f32 %v2113_v25, %v5420_v17  ;;  %v4728_v25 = vld [vmem:[%s8216_s3 + $0x11c] sm:$0xf0]  ;;  %v558_v17 = vld [vmem:[%s8215_s2 + $0x370] sm:$0xff] }
 0x1e3   : > { %1823 = vmatmul.bf16.gmra.mxu0 %v4655_v24  ;;  %978 = vperm.xlu1 %4782, %v528_v2   ;;  %v4657_v2 = vld [vmem:[%s8214_s1 + $0xe8] sm:$0xff] }
 0x1e4   : > { %2152 = vmatmul.bf16.gmra.mxu1 %v4655_v24  ;;  %8493 = vst [vmem:[#allocation45_spill] sm:$0xff] %v5685_v35  ;;  %998 = vperm.xlu2 %4783, %v532_v11   ;;  %v4481_v24 = vld [vmem:[%s8216_s3 + $0x100] sm:$0xf]  ;;  %v4700_v11 = vld [vmem:[%s8216_s3 + $0x44] sm:$0xf] }
 0x1e5   : > { %v5708_v27 = vor.u32 %v4728_v25, %v4481_v24  ;;  %1128 = vperm.xlu0 %4781, %v558_v17   ;;  %v4387_v24 = vld [vmem:[%s8216_s3 + $0x60] sm:$0xf0]  ;;  %v515_v17 = vld [vmem:[%s8215_s2 + $0x218] sm:$0xff] }
 0x1e6   : > { %v564_v35 = vld [vmem:[%s8215_s2 + $0x3a0] sm:$0xff] }
 0x1e7   : > { %8495 = vst [vmem:[#allocation47_spill] sm:$0xff] %v5708_v27 }
 0x1e8   : > { %v1786_v49 = vpop.f32.mrf.mxu0 }
 0x1e9   : > { %v5694_v21 = vadd.f32 %v1786_v49, %v5422_v57  ;;  %v2115_v51 = vpop.f32.mrf.mxu1  ;;  %v4656_v49 = vld [vmem:[%s8214_s1 + $0xe0] sm:$0xff] }
 0x1ea   : > { %v5697_v44 = vadd.f32 %v2115_v51, %v5422_v57  ;;  %v559_v57 = vld [vmem:[%s8215_s2 + $0x378] sm:$0xff] }
 0x1eb   : > { %1133 = vperm.xlu1 %4782, %v559_v57   ;;  %2974 = vmatmul.bf16.gmra.mxu2 %v5708_v27  ;;  %v5732_v57 = vor.u32 %v4700_v11, %v4387_v24  ;;  %v575_v51 = vld [vmem:[%s8215_s2 + $0x3f8] sm:$0xff]  ;;  %v512_v24 = vld [vmem:[%s8215_s2 + $0x200] sm:$0xff] }
 0x1ec   : > { %8494 = vst [vmem:[#allocation46_spill] sm:$0xff] %v5697_v44  ;;  %913 = vperm.xlu2 %4783, %v515_v17  }
 0x1ed   : > { %8496 = vst [vmem:[#allocation48_spill] sm:$0xff] %v5732_v57  ;;  %3008 = vmatmul.bf16.gmra.mxu3 %v5732_v57  ;;  %1213 = vperm.xlu0 %4781, %v575_v51   ;;  %v4513_v51 = vld [vmem:[%s8216_s3 + $0x140] sm:$0xf] }
 0x1f0   : > { %v5727_v25 = vpop.f32.mrf.mxu0 }
 0x1f1   : > { %v2118_v56 = vpop.f32.mrf.mxu1 }
 0x1f2   : > { %v5742_v54 = vadd.f32 %v2118_v56, %v5442_v4  ;;  %v572_v56 = vld [vmem:[%s8215_s2 + $0x3e0] sm:$0xff] }
 0x1f3   : > { %1828 = vmatmul.bf16.gmra.mxu0 %v4656_v49  ;;  %1118 = vperm.xlu1 %4782, %v556_v16   ;;  %v4736_v16 = vld [vmem:[%s8216_s3 + $0x15c] sm:$0xf0] }
 0x1f4   : > { %2157 = vmatmul.bf16.gmra.mxu1 %v4656_v49  ;;  %8497 = vst [vmem:[#allocation49_spill] sm:$0xff] %v5742_v54  ;;  %898 = vperm.xlu2 %4783, %v512_v24   ;;  %v5761_v49 = vor.u32 %v4736_v16, %v4513_v51  ;;  %v573_v24 = vld [vmem:[%s8215_s2 + $0x3e8] sm:$0xff]  ;;  %v4708_v51 = vld [vmem:[%s8216_s3 + $0x84] sm:$0xf] }
 0x1f5   : > { %1198 = vperm.xlu0 %4781, %v572_v56   ;;  %v4419_v16 = vld [vmem:[%s8216_s3 + $0xa0] sm:$0xf0]  ;;  %v5858_v31 = vpop.permute.xlu2 %833 }
 0x1f6   : > { %8499 = vst [vmem:[#allocation51_spill] sm:$0xff] %v5761_v49  ;;  %v5780_v57 = vor.u32 %v4708_v51, %v4419_v16  ;;  %v5792_v51 = vpop.permute.xlu1 %968  ;;  %v568_v54 = vld [vmem:[%s8215_s2 + $0x3c0] sm:$0xff] }
 0x1f8   : > { %v5744_v11 = vpop.f32.mrf.mxu0  ;;  %8500 = vst [vmem:[#allocation52_spill] sm:$0xff] %v5780_v57 }
 0x1f9   : > { %v2120_v17 = vpop.f32.mrf.mxu1 }
 0x1fa   : > { %v5750_v43 = vadd.f32 %v2120_v17, %v5404_v38 }
 0x1fb   : > { %1203 = vperm.xlu1 %4782, %v573_v24   ;;  %2979 = vmatmul.bf16.gmra.mxu2 %v5761_v49  ;;  %v529_v24 = vld [vmem:[%s8215_s2 + $0x288] sm:$0xff]  ;;  %v570_v49 = vld [vmem:[%s8215_s2 + $0x3d0] sm:$0xff] }
 0x1fc   : > { %8498 = vst [vmem:[#allocation50_spill] sm:$0xff] %v5750_v43  ;;  %983 = vperm.xlu2 %4783, %v529_v24  }
 0x1fd   : > { %3013 = vmatmul.bf16.gmra.mxu3 %v5780_v57  ;;  %1113 = vperm.xlu0 %4781, %v555_v3   ;;  %v574_v57 = vld [vmem:[%s8215_s2 + $0x3f0] sm:$0xff]  ;;  %v4545_v3 = vld [vmem:[%s8216_s3 + $0x180] sm:$0xf]  ;;  %v5877_v26 = vpop.permute.xlu0 %823 }
 0x1fe   : > { %v5822_v22 = vpop.permute.xlu1 %1053 }
 0x1ff   : > { %8504 = vst [vmem:[#allocation56_spill] sm:$0xff] %v5822_v22 }
 0x200   : > { %v5778_v56 = vpop.f32.mrf.mxu0 }
 0x201   : > { %v2123_v17 = vpop.f32.mrf.mxu1 }
 0x202   : > { %v5795_v16 = vadd.f32 %v2123_v17, %v5379_v63 }
 0x203   : > { %1833 = vmatmul.bf16.gmra.mxu0 %v4657_v2  ;;  %1188 = vperm.xlu1 %4782, %v570_v49   ;;  %v552_v49 = vld [vmem:[%s8215_s2 + $0x340] sm:$0xff] }
 0x204   : > { %2162 = vmatmul.bf16.gmra.mxu1 %v4657_v2  ;;  %8501 = vst [vmem:[#allocation53_spill] sm:$0xff] %v5795_v16  ;;  %1208 = vperm.xlu2 %4783, %v574_v57   ;;  %v4744_v2 = vld [vmem:[%s8216_s3 + $0x19c] sm:$0xf0] }
 0x205   : > { %v5814_v17 = vor.u32 %v4744_v2, %v4545_v3  ;;  %1098 = vperm.xlu0 %4781, %v552_v49   ;;  %v4716_v3 = vld [vmem:[%s8216_s3 + $0xc4] sm:$0xf] }
 0x206   : > { %v4451_v2 = vld [vmem:[%s8216_s3 + $0xe0] sm:$0xf0] }
 0x207   : > { %8503 = vst [vmem:[#allocation55_spill] sm:$0xff] %v5814_v17  ;;  %v5835_v57 = vor.u32 %v4716_v3, %v4451_v2  ;;  %v5847_v3 = vpop.permute.xlu1 %1038 }
 0x208   : > { %v5797_v24 = vpop.f32.mrf.mxu0  ;;  %8506 = vst [vmem:[#allocation58_spill] sm:$0xff] %v5847_v3 }
 0x209   : > { %v2125_v27 = vpop.f32.mrf.mxu1  ;;  %8505 = vst [vmem:[#allocation57_spill] sm:$0xff] %v5835_v57 }
 0x20a   : > { %v5803_v60 = vadd.f32 %v2125_v27, %v5427_v14  ;;  %v553_v27 = vld [vmem:[%s8215_s2 + $0x348] sm:$0xff] }
 0x20b   : > { %1103 = vperm.xlu1 %4782, %v553_v27   ;;  %2984 = vmatmul.bf16.gmra.mxu2 %v5814_v17  ;;  %v557_v27 = vld [vmem:[%s8215_s2 + $0x368] sm:$0xff] }
 0x20c   : > { %8502 = vst [vmem:[#allocation54_spill] sm:$0xff] %v5803_v60  ;;  %1123 = vperm.xlu2 %4783, %v557_v27  }
 0x20d   : > { %3018 = vmatmul.bf16.gmra.mxu3 %v5835_v57  ;;  %1183 = vperm.xlu0 %4781, %v569_v23   ;;  %v554_v57 = vld [vmem:[%s8215_s2 + $0x350] sm:$0xff]  ;;  %v4752_v23 = vld [vmem:[%s8216_s3 + $0x1dc] sm:$0xf0] }
 0x210   : > { %v5833_v49 = vpop.f32.mrf.mxu0 }
 0x211   : > { %v2128_v17 = vpop.f32.mrf.mxu1 }
 0x212   : > { %v5850_v2 = vadd.f32 %v2128_v17, %v5352_v47 }
 0x213   : > { %1838 = vmatmul.bf16.gmra.mxu0 %v4658_v53  ;;  %1088 = vperm.xlu1 %4782, %v550_v61   ;;  %v4577_v61 = vld [vmem:[%s8216_s3 + $0x1c0] sm:$0xf] }
 0x214   : > { %2167 = vmatmul.bf16.gmra.mxu1 %v4658_v53  ;;  %8507 = vst [vmem:[#allocation59_spill] sm:$0xff] %v5850_v2  ;;  %1108 = vperm.xlu2 %4783, %v554_v57   ;;  %v566_v53 = vld [vmem:[%s8215_s2 + $0x3b0] sm:$0xff]  ;;  %v5869_v17 = vor.u32 %v4752_v23, %v4577_v61  ;;  %v4659_v61 = vld [vmem:[%s8214_s1 + $0xf8] sm:$0xff]  ;;  %v4724_v23 = vld [vmem:[%s8216_s3 + $0x104] sm:$0xf] }
 0x215   : > { %1168 = vperm.xlu0 %4781, %v566_v53   ;;  %v4483_v53 = vld [vmem:[%s8216_s3 + $0x120] sm:$0xf0]  ;;  %v547_v2 = vld [vmem:[%s8215_s2 + $0x318] sm:$0xff] }
 0x216   : > { %8509 = vst [vmem:[#allocation61_spill] sm:$0xff] %v5869_v17 }
 0x218   : > { %v1801_v27 = vpop.f32.mrf.mxu0 }
 0x219   : > { %v2130_v59 = vpop.f32.mrf.mxu1 }
 0x21a   : > { %v5856_v32 = vadd.f32 %v2130_v59, %v5354_v6  ;;  %v567_v59 = vld [vmem:[%s8215_s2 + $0x3b8] sm:$0xff] }
 0x21b   : > { %1173 = vperm.xlu1 %4782, %v567_v59   ;;  %2989 = vmatmul.bf16.gmra.mxu2 %v5869_v17  ;;  %v5890_v59 = vor.u32 %v4724_v23, %v4483_v53  ;;  %v571_v17 = vld [vmem:[%s8215_s2 + $0x3d8] sm:$0xff]  ;;  %v819_v23 = vpop.permute.xlu2 %818 }
 0x21c   : > { %8508 = vst [vmem:[#allocation60_spill] sm:$0xff] %v5856_v32  ;;  %1193 = vperm.xlu2 %4783, %v571_v17  }
 0x21d   : > { %v5879_v33 = vpop.permute.xlu1 %953  ;;  %8510 = vst [vmem:[#allocation62_spill] sm:$0xff] %v5890_v59  ;;  %3023 = vmatmul.bf16.gmra.mxu3 %v5890_v59  ;;  %1083 = vperm.xlu0 %4781, %v549_v10   ;;  %v5907_v59 = vpop.permute.xlu0 %1048 }
 0x21e   : > { %8512 = vst [vmem:[#allocation64_spill] sm:$0xff] %v5907_v59 }
 0x220   : > { %v1804_v57 = vpop.f32.mrf.mxu0 }
 0x221   : > { %v2133_v1 = vpop.f32.mrf.mxu1  ;;  %v1805_v43 = vadd.f32 %v1804_v57, %v5381_v50 }
 0x222   : > { %v5905_v44 = vadd.f32 %v2133_v1, %v5381_v50  ;;  %v546_v1 = vld [vmem:[%s8215_s2 + $0x310] sm:$0xff]  ;;  %v548_v50 = vld [vmem:[%s8215_s2 + $0x320] sm:$0xff] }
 0x223   : > { %1843 = vmatmul.bf16.gmra.mxu0 %v4659_v61  ;;  %1158 = vperm.xlu1 %4782, %v564_v35  }
 0x224   : > { %2172 = vmatmul.bf16.gmra.mxu1 %v4659_v61  ;;  %8511 = vst [vmem:[#allocation63_spill] sm:$0xff] %v5905_v44  ;;  %1178 = vperm.xlu2 %4783, %v568_v54   ;;  %v1802_v61 = vadd.f32 %v1801_v27, %v5354_v6  ;;  %v5928_v54 = vpop.permute.xlu2 %973  ;;  %v1797_v6 = vadd.f32 %v5797_v24, %v5427_v14  ;;  %v551_v14 = vld [vmem:[%s8215_s2 + $0x338] sm:$0xff] }
 0x225   : > { %v5902_v53 = vpop.permute.xlu1 %938  ;;  %1068 = vperm.xlu0 %4781, %v546_v1   ;;  %v1795_v24 = vadd.f32 %v5778_v56, %v5379_v63  ;;  %v5954_v1 = vpop.permute.xlu0 %963  ;;  %v1792_v63 = vadd.f32 %v5744_v11, %v5404_v38 }
 0x227   : > { %v2380_v56 = vpack.c.bf16 %v1797_v6, %v1795_v24  ;;  %v8528_v24 = vpack.c.bf16 %v5538_v15, %v5536_v37  ;;  %v545_v37 = vld [vmem:[%s8215_s2 + $0x308] sm:$0xff] }
 0x228   : > { %v1806_v17 = vpop.f32.mrf.mxu0 }
 0x229   : > { %v1807_v16 = vadd.f32 %v1806_v17, %v5341_v9  ;;  %v2135_v10 = vpop.f32.mrf.mxu1 }
 0x22a   : > { %v5915_v35 = vadd.f32 %v2135_v10, %v5341_v9  ;;  %v1800_v9 = vadd.f32 %v5833_v49, %v5352_v47  ;;  %v4515_v47 = vld [vmem:[%s8216_s3 + $0x160] sm:$0xf0] }
 0x22b   : > { %v2384_v60 = vpack.c.bf16 %v1807_v16, %v1805_v43  ;;  %1073 = vperm.xlu1 %4782, %v547_v2   ;;  %v4660_v16 = vld [vmem:[%s8214_s1 + $0x100] sm:$0xff] }
 0x22c   : > { %8513 = vst [vmem:[#allocation65_spill] sm:$0xff] %v5915_v35  ;;  %v2382_v43 = vpack.c.bf16 %v1802_v61, %v1800_v9  ;;  %v4732_v2 = vld [vmem:[%s8216_s3 + $0x144] sm:$0xf]  ;;  %1093 = vperm.xlu2 %4783, %v551_v14   ;;  %v563_v61 = vld [vmem:[%s8215_s2 + $0x398] sm:$0xff] }
 0x22d   : > { %3044 = vmatpush.bf16.msrb.mxu2 %v2384_v60  ;;  %v5930_v57 = vpop.permute.xlu1 %1023  ;;  %v5945_v27 = vor.u32 %v4732_v2, %v4515_v47  ;;  %v544_v9 = vld [vmem:[%s8215_s2 + $0x300] sm:$0xff]  ;;  %1153 = vperm.xlu0 %4781, %v563_v61   ;;  %v5994_v61 = vpop.permute.xlu0 %948 }
 0x22e   : > { %8514 = vst [vmem:[#allocation66_spill] sm:$0xff] %v5930_v57  ;;  %v5943_v49 = vpop.f32.mrf.mxu2 }
 0x22f   : > { %8515 = vst [vmem:[#allocation67_spill] sm:$0xff] %v5945_v27  ;;  %3028 = vmatmul.bf16.gmra.mxu3 %v5945_v27 }
 0x230   : > { %v1809_v60 = vpop.f32.mrf.mxu0 }
 0x231   : > { %v2138_v17 = vpop.f32.mrf.mxu1  ;;  %3045 = vmatpush.bf16.msrb.mxu2 %v2382_v43  ;;  %v1790_v43 = vadd.f32 %v5727_v25, %v5442_v4  ;;  %v5974_v38 = vadd.f32 %v1809_v60, %v819_v23  ;;  %v560_v25 = vld [vmem:[%s8215_s2 + $0x380] sm:$0xff] }
 0x232   : > { %v5952_v10 = vadd.f32 %v2138_v17, %v819_v23  ;;  %v5969_v17 = vpop.permute.xlu2 %958  ;;  %v561_v23 = vld [vmem:[%s8215_s2 + $0x388] sm:$0xff] }
 0x233   : > { %1848 = vmatmul.bf16.gmra.mxu0 %v4660_v16  ;;  %1058 = vperm.xlu1 %4782, %v544_v9   ;;  %v2378_v47 = vpack.c.bf16 %v1792_v63, %v1790_v43  ;;  %v4661_v9 = vld [vmem:[%s8214_s1 + $0x108] sm:$0xff]  ;;  %v4740_v63 = vld [vmem:[%s8216_s3 + $0x184] sm:$0xf] }
 0x234   : > { %8516 = vst [vmem:[#allocation68_spill] sm:$0xff] %v5952_v10  ;;  %2177 = vmatmul.bf16.gmra.mxu1 %v4660_v16  ;;  %1078 = vperm.xlu2 %4783, %v548_v50  }
 0x235   : > { %3046 = vmatpush.bf16.msrb.mxu2 %v2380_v56  ;;  %v5967_v2 = vpop.permute.xlu1 %1008  ;;  %1138 = vperm.xlu0 %4781, %v560_v25   ;;  %v4547_v56 = vld [vmem:[%s8216_s3 + $0x1a0] sm:$0xf0]  ;;  %v2531_v25 = vld [vmem:[%s8217_s4 + $0x8] sm:$0xff] }
 0x236   : > { %8517 = vst [vmem:[#allocation69_spill] sm:$0xff] %v5967_v2  ;;  %v5979_v16 = vpop.f32.mrf.mxu2 }
 0x237   : > { %8518 = vst [vmem:[#allocation70_spill] sm:$0xff] %v5979_v16 }
 0x238   : > { %v1811_v14 = vpop.f32.mrf.mxu0 }
 0x239   : > { %v5977_v11 = vadd.f32 %v1811_v14, %v5877_v26  ;;  %v2140_v6 = vpop.f32.mrf.mxu1  ;;  %3047 = vmatpush.bf16.msrb.mxu2 %v2378_v47  ;;  %v6010_v47 = vor.u32 %v4740_v63, %v4547_v56  ;;  %v8522_v14 = vpack.c.bf16 %v5639_v20, %v5636_v52  ;;  %v8524_v52 = vpack.c.bf16 %v5590_v45, %v5587_v30  ;;  %v4361_v20 = vld [vmem:[%s8216_s3 + $0x8] sm:$0xf]  ;;  %v6038_v56 = vpop.permute.xlu0 %1033  ;;  %v562_v30 = vld [vmem:[%s8215_s2 + $0x390] sm:$0xff] }
 0x23a   : > { %v5982_v4 = vadd.f32 %v2140_v6, %v5877_v26  ;;  %v8520_v26 = vpack.c.bf16 %v5694_v21, %v5691_v19  ;;  %v565_v21 = vld [vmem:[%s8215_s2 + $0x3a8] sm:$0xff]  ;;  %v6018_v6 = vpop.permute.xlu2 %1043  ;;  %8525 = vst [vmem:[#allocation74_spill] sm:$0xff] %v6038_v56 }
 0x23b   : > { %1143 = vperm.xlu1 %4782, %v561_v23   ;;  %8521 = vst [vmem:[#allocation72_spill] sm:$0xff] %v6010_v47  ;;  %v2532_v23 = vld [vmem:[%s8217_s4 + $0x10] sm:$0xff]  ;;  %v4697_v63 = vld [vmem:[%s8216_s3 + $0x24] sm:$0xf0] }
 0x23c   : > { %8519 = vst [vmem:[#allocation71_spill] sm:$0xff] %v5982_v4  ;;  %1163 = vperm.xlu2 %4783, %v565_v21   ;;  %v4521_v56 = vld [vmem:[%s8216_s3 + $0x148] sm:$0xf] }
 0x23d   : > { %3048 = vmatpush.bf16.msrb.mxu2 %v8520_v26  ;;  %v5999_v50 = vpop.permute.xlu1 %923  ;;  %8523 = vst [vmem:[#allocation73_spill] sm:$0xff] %v6018_v6  ;;  %2553 = vperm.xlu0 %4781, %v2531_v25   ;;  %v6045_v25 = vor.u32 %v4697_v63, %v4361_v20  ;;  %v2534_v20 = vld [vmem:[%s8217_s4 + $0x20] sm:$0xff]  ;;  %v4662_v63 = vld [vmem:[%s8214_s1 + $0x110] sm:$0xff] }
 0x23e   : > { %v6027_v26 = vpop.f32.mrf.mxu2 }
 0x23f   : > { %3033 = vmatmul.bf16.gmra.mxu3 %v6010_v47  ;;  %8527 = vst [vmem:[#allocation76_spill] sm:$0xff] %v6045_v25  ;;  %v2538_v47 = vld [vmem:[%s8217_s4 + $0x40] sm:$0xff] }
 0x240   : > { %v1814_v43 = vpop.f32.mrf.mxu0 }
 0x241   : > { %v2143_v19 = vpop.f32.mrf.mxu1  ;;  %3049 = vmatpush.bf16.msrb.mxu2 %v8522_v14  ;;  %v6051_v45 = vadd.f32 %v1814_v43, %v5503_v55  ;;  %v2535_v43 = vld [vmem:[%s8217_s4 + $0x28] sm:$0xff] }
 0x242   : > { %v6043_v14 = vadd.f32 %v2143_v19, %v5503_v55  ;;  %v6073_v15 = vpop.permute.xlu2 %1028  ;;  %v2537_v55 = vld [vmem:[%s8217_s4 + $0x38] sm:$0xff] }
 0x243   : > { %1853 = vmatmul.bf16.gmra.mxu0 %v4661_v9  ;;  %2558 = vperm.xlu1 %4782, %v2532_v23   ;;  %8530 = vst [vmem:[#allocation78_spill] sm:$0xff] %v6073_v15 }
 0x244   : > { %2182 = vmatmul.bf16.gmra.mxu1 %v4661_v9  ;;  %8526 = vst [vmem:[#allocation75_spill] sm:$0xff] %v6043_v14  ;;  %1148 = vperm.xlu2 %4783, %v562_v30   ;;  %v4579_v30 = vld [vmem:[%s8216_s3 + $0x1e0] sm:$0xf0] }
 0x245   : > { %3050 = vmatpush.bf16.msrb.mxu2 %v8524_v52  ;;  %v6040_v21 = vpop.permute.xlu1 %908  ;;  %2568 = vperm.xlu0 %4781, %v2534_v20   ;;  %v6088_v20 = vpop.permute.xlu0 %1018 }
 0x246   : > { %8532 = vst [vmem:[#allocation80_spill] sm:$0xff] %v6088_v20 }
 0x248   : > { %v1816_v9 = vpop.f32.mrf.mxu0 }
 0x249   : > { %v6054_v23 = vadd.f32 %v1816_v9, %v5858_v31  ;;  %v2145_v52 = vpop.f32.mrf.mxu1  ;;  %3051 = vmatpush.bf16.msrb.mxu2 %v8528_v24  ;;  %v4748_v9 = vld [vmem:[%s8216_s3 + $0x1c4] sm:$0xf] }
 0x24a   : > { %v6060_v19 = vadd.f32 %v2145_v52, %v5858_v31  ;;  %v6075_v31 = vpop.f32.mrf.mxu2 }
 0x24b   : > { %2573 = vperm.xlu1 %4782, %v2535_v43   ;;  %8531 = vst [vmem:[#allocation79_spill] sm:$0xff] %v6075_v31  ;;  %v6090_v43 = vor.u32 %v4748_v9, %v4579_v30  ;;  %v4393_v9 = vld [vmem:[%s8216_s3 + $0x48] sm:$0xf]  ;;  %v6108_v30 = vpop.permute.xlu2 %943 }
 0x24c   : > { %8529 = vst [vmem:[#allocation77_spill] sm:$0xff] %v6060_v19  ;;  %3052 = vmatmul.bf16.vlgmr.msrb.gmra.mxu2 %v6045_v25  ;;  %1063 = vperm.xlu2 %4783, %v545_v37   ;;  %v4705_v37 = vld [vmem:[%s8216_s3 + $0x64] sm:$0xf0] }
 0x24d   : > { %v6077_v24 = vpop.permute.xlu1 %993  ;;  %8533 = vst [vmem:[#allocation81_spill] sm:$0xff] %v6090_v43  ;;  %2583 = vperm.xlu0 %4781, %v2537_v55   ;;  %v4425_v19 = vld [vmem:[%s8216_s3 + $0x88] sm:$0xf] }
 0x24f   : > { %3038 = vmatmul.bf16.gmra.mxu3 %v6090_v43 }
 0x250   : > { %v1819_v52 = vpop.f32.mrf.mxu0 }
 0x251   : > { %v2148_v60 = vpop.f32.mrf.mxu1  ;;  %v6123_v25 = vadd.f32 %v1819_v52, %v5461_v0  ;;  %v2544_v52 = vld [vmem:[%s8217_s4 + $0x70] sm:$0xff] }
 0x252   : > { %v6112_v27 = vpop.f32.mrf.mxu2  ;;  %v6115_v31 = vadd.f32 %v2148_v60, %v5461_v0  ;;  %v6131_v60 = vpop.permute.xlu0 %933  ;;  %v2541_v0 = vld [vmem:[%s8217_s4 + $0x58] sm:$0xff] }
 0x253   : > { %1858 = vmatmul.bf16.gmra.mxu0 %v4662_v63  ;;  %2588 = vperm.xlu1 %4782, %v2538_v47   ;;  %8534 = vst [vmem:[#allocation82_spill] sm:$0xff] %v6112_v27  ;;  %v2530_v47 = vld [vmem:[%s8217_s4] sm:$0xff] }
 0x254   : > { %2187 = vmatmul.bf16.gmra.mxu1 %v4662_v63  ;;  %8535 = vst [vmem:[#allocation83_spill] sm:$0xff] %v6115_v31  ;;  %v6117_v63 = vor.u32 %v4705_v37, %v4393_v9  ;;  %2548 = vperm.xlu2 %4783, %v2530_v47   ;;  %v2540_v9 = vld [vmem:[%s8217_s4 + $0x50] sm:$0xff]  ;;  %v6149_v47 = vpop.permute.xlu2 %928 }
 0x255   : > { %v6110_v43 = vpop.permute.xlu1 %978  ;;  %2598 = vperm.xlu0 %4781, %v2540_v9   ;;  %v2533_v9 = vld [vmem:[%s8217_s4 + $0x18] sm:$0xff] }
 0x256   : > { %8536 = vst [vmem:[#allocation84_spill] sm:$0xff] %v6117_v63 }
 0x258   : > { %v1821_v55 = vpop.f32.mrf.mxu0 }
 0x259   : > { %v6126_v16 = vadd.f32 %v1821_v55, %v5463_v8  ;;  %v2150_v10 = vpop.f32.mrf.mxu1 }
 0x25a   : > { %v6129_v4 = vadd.f32 %v2150_v10, %v5463_v8  ;;  %v4663_v10 = vld [vmem:[%s8214_s1 + $0x118] sm:$0xff]  ;;  %v6154_v14 = vpop.f32.mrf.mxu2 }
 0x25b   : > { %2603 = vperm.xlu1 %4782, %v2541_v0   ;;  %8539 = vst [vmem:[#allocation87_spill] sm:$0xff] %v6154_v14  ;;  %v2543_v0 = vld [vmem:[%s8217_s4 + $0x68] sm:$0xff] }
 0x25c   : > { %8537 = vst [vmem:[#allocation85_spill] sm:$0xff] %v6129_v4  ;;  %3057 = vmatmul.bf16.gmra.mxu2 %v6117_v63  ;;  %2563 = vperm.xlu2 %4783, %v2533_v9   ;;  %v6162_v63 = vpop.permute.xlu0 %918  ;;  %v4713_v9 = vld [vmem:[%s8216_s3 + $0xa4] sm:$0xf0] }
 0x25d   : > { %v6144_v8 = vpop.permute.xlu1 %1133  ;;  %2613 = vperm.xlu0 %4781, %v2543_v0  }
 0x25e   : > { %8538 = vst [vmem:[#allocation86_spill] sm:$0xff] %v6144_v8 }
 0x25f   : > { %v6170_v14 = vpop.f32.mrf.mxu3 }
 0x260   : > { %v1824_v55 = vpop.f32.mrf.mxu0 }
 0x261   : > { %v2153_v37 = vpop.f32.mrf.mxu1  ;;  %v6183_v32 = vadd.f32 %v1824_v55, %v5506_v28 }
 0x262   : > { %v6175_v4 = vadd.f32 %v2153_v37, %v5506_v28  ;;  %v6191_v37 = vpop.permute.xlu2 %1013  ;;  %v6193_v42 = vpop.f32.mrf.mxu2 }
 0x263   : > { %1863 = vmatmul.bf16.gmra.mxu0 %v4663_v10  ;;  %2618 = vperm.xlu1 %4782, %v2544_v52   ;;  %v2536_v52 = vld [vmem:[%s8217_s4 + $0x30] sm:$0xff]  ;;  %8544 = vst [vmem:[#allocation92_spill] sm:$0xff] %v6191_v37 }
 0x264   : > { %2192 = vmatmul.bf16.gmra.mxu1 %v4663_v10  ;;  %8541 = vst [vmem:[#allocation89_spill] sm:$0xff] %v6175_v4  ;;  %v6177_v10 = vor.u32 %v4713_v9, %v4425_v19  ;;  %2578 = vperm.xlu2 %4783, %v2536_v52   ;;  %v6202_v55 = vpop.permute.xlu0 %1003  ;;  %v2539_v52 = vld [vmem:[%s8217_s4 + $0x48] sm:$0xff] }
 0x265   : > { %v6172_v31 = vpop.permute.xlu1 %1118  ;;  %8545 = vst [vmem:[#allocation93_spill] sm:$0xff] %v6193_v42 }
 0x266   : > { %8540 = vst [vmem:[#allocation88_spill] sm:$0xff] %v6172_v31 }
 0x267   : > { %8542 = vst [vmem:[#allocation90_spill] sm:$0xff] %v6177_v10  ;;  %v6200_v28 = vpop.f32.mrf.mxu3 }
 0x268   : > { %v1826_v0 = vpop.f32.mrf.mxu0  ;;  %8546 = vst [vmem:[#allocation94_spill] sm:$0xff] %v6200_v28  ;;  %v4721_v28 = vld [vmem:[%s8216_s3 + $0xe4] sm:$0xf0] }
 0x269   : > { %v6186_v44 = vadd.f32 %v1826_v0, %v5435_v34  ;;  %v2155_v35 = vpop.f32.mrf.mxu1  ;;  %8547 = vst [vmem:[#allocation95_spill] sm:$0xff] %v6202_v55 }
 0x26a   : > { %v6189_v40 = vadd.f32 %v2155_v35, %v5435_v34  ;;  %v4664_v34 = vld [vmem:[%s8214_s1 + $0x120] sm:$0xff]  ;;  %v6214_v9 = vpop.permute.xlu2 %998  ;;  %v6222_v4 = vpop.f32.mrf.mxu2 }
 0x26b   : > { %8549 = vst [vmem:[#allocation97_spill] sm:$0xff] %v6222_v4 }
 0x26c   : > { %8543 = vst [vmem:[#allocation91_spill] sm:$0xff] %v6189_v40  ;;  %3062 = vmatmul.bf16.gmra.mxu2 %v6177_v10  ;;  %2593 = vperm.xlu2 %4783, %v2539_v52   ;;  %v4457_v10 = vld [vmem:[%s8216_s3 + $0xc8] sm:$0xf]  ;;  %v6235_v29 = vpop.permute.xlu0 %988 }
 0x26d   : > { %v6204_v0 = vpop.permute.xlu1 %1203  ;;  %v6233_v13 = vor.u32 %v4721_v28, %v4457_v10 }
 0x26e   : > { %8548 = vst [vmem:[#allocation96_spill] sm:$0xff] %v6204_v0 }
 0x26f   : > { %8553 = vst [vmem:[#allocation101_spill] sm:$0xff] %v6233_v13 }
 0x270   : > { %v6209_v35 = vpop.f32.mrf.mxu0  ;;  %v6224_v40 = vpop.f32.mrf.mxu3 }
 0x271   : > { %v2158_v19 = vpop.f32.mrf.mxu1  ;;  %8550 = vst [vmem:[#allocation98_spill] sm:$0xff] %v6224_v40 }
 0x272   : > { %v6229_v52 = vadd.f32 %v2158_v19, %v5406_v39  ;;  %v6248_v10 = vpop.permute.xlu2 %913  ;;  %v6255_v31 = vpop.f32.mrf.mxu2 }
 0x273   : > { %1868 = vmatmul.bf16.gmra.mxu0 %v4664_v34 }
 0x274   : > { %2197 = vmatmul.bf16.gmra.mxu1 %v4664_v34  ;;  %8552 = vst [vmem:[#allocation100_spill] sm:$0xff] %v6229_v52  ;;  %2608 = vperm.xlu2 %4783, %v2542_v48   ;;  %v4729_v52 = vld [vmem:[%s8216_s3 + $0x124] sm:$0xf0] }
 0x275   : > { %v6226_v0 = vpop.permute.xlu1 %1188 }
 0x276   : > { %8551 = vst [vmem:[#allocation99_spill] sm:$0xff] %v6226_v0 }
 0x278   : > { %v6231_v34 = vpop.f32.mrf.mxu0  ;;  %v6246_v19 = vpop.f32.mrf.mxu3 }
 0x279   : > { %v2160_v58 = vpop.f32.mrf.mxu1  ;;  %8555 = vst [vmem:[#allocation103_spill] sm:$0xff] %v6246_v19  ;;  %v4489_v19 = vld [vmem:[%s8216_s3 + $0x108] sm:$0xf] }
 0x27a   : > { %v6241_v4 = vadd.f32 %v2160_v58, %v5471_v18  ;;  %v2545_v58 = vld [vmem:[%s8217_s4 + $0x78] sm:$0xff]  ;;  %v6277_v22 = vor.u32 %v4729_v52, %v4489_v19  ;;  %v6279_v59 = vpop.permute.xlu2 %898  ;;  %v6281_v6 = vpop.f32.mrf.mxu2  ;;  %v4666_v52 = vld [vmem:[%s8214_s1 + $0x130] sm:$0xff] }
 0x27b   : > { %8561 = vst [vmem:[#allocation109_spill] sm:$0xff] %v6281_v6 }
 0x27c   : > { %8554 = vst [vmem:[#allocation102_spill] sm:$0xff] %v6241_v4  ;;  %3067 = vmatmul.bf16.gmra.mxu2 %v6233_v13  ;;  %2623 = vperm.xlu2 %4783, %v2545_v58   ;;  %v6262_v13 = vpop.permute.xlu0 %903 }
 0x27d   : > { %v6250_v28 = vpop.permute.xlu1 %1103  ;;  %8560 = vst [vmem:[#allocation108_spill] sm:$0xff] %v6277_v22 }
 0x27e   : > { %8556 = vst [vmem:[#allocation104_spill] sm:$0xff] %v6250_v28 }
 0x280   : > { %v6257_v48 = vpop.f32.mrf.mxu0  ;;  %v6270_v4 = vpop.f32.mrf.mxu3 }
 0x281   : > { %v2163_v0 = vpop.f32.mrf.mxu1  ;;  %8557 = vst [vmem:[#allocation105_spill] sm:$0xff] %v6270_v4  ;;  %v4553_v4 = vld [vmem:[%s8216_s3 + $0x188] sm:$0xf] }
 0x282   : > { %v6275_v8 = vadd.f32 %v2163_v0, %v5388_v41  ;;  %v6298_v57 = vpop.permute.xlu2 %983 }
 0x283   : > { %1873 = vmatmul.bf16.gmra.mxu0 %v4665_v7 }
 0x284   : > { %2202 = vmatmul.bf16.gmra.mxu1 %v4665_v7  ;;  %8559 = vst [vmem:[#allocation107_spill] sm:$0xff] %v6275_v8 }
 0x285   : > { %v6272_v28 = vpop.permute.xlu1 %1088 }
 0x286   : > { %8558 = vst [vmem:[#allocation106_spill] sm:$0xff] %v6272_v28  ;;  %v6289_v28 = vpop.permute.xlu0 %1128 }
 0x287   : > { %8563 = vst [vmem:[#allocation111_spill] sm:$0xff] %v6289_v28 }
 0x288   : > { %v1836_v58 = vpop.f32.mrf.mxu0  ;;  %v6291_v0 = vpop.f32.mrf.mxu3 }
 0x289   : > { %v2165_v7 = vpop.f32.mrf.mxu1  ;;  %8564 = vst [vmem:[#allocation112_spill] sm:$0xff] %v6291_v0 }
 0x28a   : > { %v6284_v3 = vadd.f32 %v2165_v7, %v5393_v46  ;;  %v6300_v7 = vpop.f32.mrf.mxu2 }
 0x28c   : > { %8562 = vst [vmem:[#allocation110_spill] sm:$0xff] %v6284_v3  ;;  %3072 = vmatmul.bf16.gmra.mxu2 %v6277_v22  ;;  %v4737_v22 = vld [vmem:[%s8216_s3 + $0x164] sm:$0xf0] }
 0x28d   : > { %v6293_v15 = vpop.permute.xlu1 %1173  ;;  %v6317_v20 = vor.u32 %v4737_v22, %v4521_v56  ;;  %v4667_v22 = vld [vmem:[%s8214_s1 + $0x138] sm:$0xff] }
 0x28e   : > { %8565 = vst [vmem:[#allocation113_spill] sm:$0xff] %v6293_v15  ;;  %v6310_v8 = vpop.permute.xlu0 %1213 }
 0x28f   : > { %8567 = vst [vmem:[#allocation115_spill] sm:$0xff] %v6310_v8 }
 0x290   : > { %v1839_v19 = vpop.f32.mrf.mxu0  ;;  %v6308_v0 = vpop.f32.mrf.mxu3  ;;  %8570 = vst [vmem:[#allocation118_spill] sm:$0xff] %v6317_v20 }
 0x291   : > { %v2168_v6 = vpop.f32.mrf.mxu1  ;;  %8566 = vst [vmem:[#allocation114_spill] sm:$0xff] %v6308_v0  ;;  %v6325_v0 = vpop.permute.xlu2 %1208 }
 0x292   : > { %v6315_v15 = vadd.f32 %v2168_v6, %v5408_v62  ;;  %8572 = vst [vmem:[#allocation120_spill] sm:$0xff] %v6325_v0  ;;  %v6327_v8 = vpop.f32.mrf.mxu2 }
 0x293   : > { %1878 = vmatmul.bf16.gmra.mxu0 %v4666_v52  ;;  %8573 = vst [vmem:[#allocation121_spill] sm:$0xff] %v6327_v8 }
 0x294   : > { %2207 = vmatmul.bf16.gmra.mxu1 %v4666_v52  ;;  %8569 = vst [vmem:[#allocation117_spill] sm:$0xff] %v6315_v15 }
 0x295   : > { %v6312_v3 = vpop.permute.xlu1 %1158 }
 0x296   : > { %8568 = vst [vmem:[#allocation116_spill] sm:$0xff] %v6312_v3 }
 0x298   : > { %v1841_v28 = vpop.f32.mrf.mxu0  ;;  %v6329_v3 = vpop.f32.mrf.mxu3 }
 0x299   : > { %v2170_v52 = vpop.f32.mrf.mxu1  ;;  %8574 = vst [vmem:[#allocation122_spill] sm:$0xff] %v6329_v3  ;;  %v6346_v3 = vpop.permute.xlu2 %1123 }
 0x29a   : > { %v6320_v42 = vadd.f32 %v2170_v52, %v5375_v12  ;;  %v6336_v52 = vpop.permute.xlu0 %1198  ;;  %8577 = vst [vmem:[#allocation125_spill] sm:$0xff] %v6346_v3  ;;  %v1842_v3 = vadd.f32 %v1841_v28, %v5375_v12  ;;  %v4668_v12 = vld [vmem:[%s8214_s1 + $0x140] sm:$0xff] }
 0x29b   : > { %8576 = vst [vmem:[#allocation124_spill] sm:$0xff] %v6336_v52 }
 0x29c   : > { %8571 = vst [vmem:[#allocation119_spill] sm:$0xff] %v6320_v42  ;;  %3077 = vmatmul.bf16.gmra.mxu2 %v6317_v20  ;;  %v4745_v20 = vld [vmem:[%s8216_s3 + $0x1a4] sm:$0xf0]  ;;  %v6350_v42 = vpop.f32.mrf.mxu2 }
 0x29d   : > { %v6331_v6 = vpop.permute.xlu1 %1073  ;;  %v6355_v0 = vor.u32 %v4745_v20, %v4553_v4  ;;  %v1840_v4 = vadd.f32 %v1839_v19, %v5408_v62 }
 0x29e   : > { %8575 = vst [vmem:[#allocation123_spill] sm:$0xff] %v6331_v6 }
 0x29f   : > { %8580 = vst [vmem:[#allocation128_spill] sm:$0xff] %v6355_v0 }
 0x2a0   : > { %v1844_v56 = vpop.f32.mrf.mxu0  ;;  %v6344_v8 = vpop.f32.mrf.mxu3 }
 0x2a1   : > { %v2173_v37 = vpop.f32.mrf.mxu1  ;;  %v1845_v6 = vadd.f32 %v1844_v56, %v5347_v36  ;;  %v6377_v28 = vpop.permute.xlu2 %1108 }
 0x2a2   : > { %v6353_v52 = vadd.f32 %v2173_v37, %v5347_v36  ;;  %v6362_v55 = vpop.permute.xlu0 %1113 }
 0x2a3   : > { %1883 = vmatmul.bf16.gmra.mxu0 %v4667_v22 }
 0x2a4   : > { %2212 = vmatmul.bf16.gmra.mxu1 %v4667_v22  ;;  %8579 = vst [vmem:[#allocation127_spill] sm:$0xff] %v6353_v52  ;;  %v6381_v62 = vpop.f32.mrf.mxu2 }
 0x2a5   : > { %v6348_v15 = vpop.permute.xlu1 %1058  ;;  %8584 = vst [vmem:[#allocation132_spill] sm:$0xff] %v6381_v62 }
 0x2a6   : > { %8578 = vst [vmem:[#allocation126_spill] sm:$0xff] %v6348_v15 }
 0x2a8   : > { %v1846_v22 = vpop.f32.mrf.mxu0  ;;  %v6369_v36 = vpop.f32.mrf.mxu3 }
 0x2a9   : > { %v1847_v2 = vadd.f32 %v1846_v22, %v5395_v5  ;;  %v2175_v27 = vpop.f32.mrf.mxu1  ;;  %8582 = vst [vmem:[#allocation130_spill] sm:$0xff] %v6369_v36 }
 0x2aa   : > { %v6360_v40 = vadd.f32 %v2175_v27, %v5395_v5  ;;  %v1837_v5 = vadd.f32 %v1836_v58, %v5393_v46  ;;  %v2398_v27 = vpack.c.bf16 %v1842_v3, %v1840_v4  ;;  %v6385_v3 = vpop.permute.xlu0 %1098  ;;  %v1830_v58 = vadd.f32 %v6209_v35, %v5406_v39 }
 0x2ab   : > { %v2400_v15 = vpack.c.bf16 %v1847_v2, %v1845_v6  ;;  %v1835_v6 = vadd.f32 %v6257_v48, %v5388_v41  ;;  %8585 = vst [vmem:[#allocation133_spill] sm:$0xff] %v6385_v3  ;;  %v4585_v41 = vld [vmem:[%s8216_s3 + $0x1c8] sm:$0xf] }
 0x2ac   : > { %8581 = vst [vmem:[#allocation129_spill] sm:$0xff] %v6360_v40  ;;  %3082 = vmatmul.bf16.gmra.mxu2 %v6355_v0  ;;  %v4753_v48 = vld [vmem:[%s8216_s3 + $0x1e4] sm:$0xf0] }
 0x2ad   : > { %3093 = vmatpush.bf16.msrb.mxu3 %v2400_v15  ;;  %v6371_v20 = vpop.permute.xlu1 %1143  ;;  %v1832_v15 = vadd.f32 %v6231_v34, %v5471_v18  ;;  %v2396_v46 = vpack.c.bf16 %v1837_v5, %v1835_v6  ;;  %v6402_v5 = vor.u32 %v4753_v48, %v4585_v41  ;;  %v8603_v6 = vpack.c.bf16 %v5977_v11, %v5974_v38  ;;  %v4670_v38 = vld [vmem:[%s8214_s1 + $0x150] sm:$0xff] }
 0x2ae   : > { %8583 = vst [vmem:[#allocation131_spill] sm:$0xff] %v6371_v20 }
 0x2af   : > { %v2394_v34 = vpack.c.bf16 %v1832_v15, %v1830_v58  ;;  %8588 = vst [vmem:[#allocation136_spill] sm:$0xff] %v6402_v5  ;;  %v2990_v15 = vpop.f32.mrf.mxu2 }
 0x2b0   : > { %v1849_v2 = vpop.f32.mrf.mxu0 }
 0x2b1   : > { %v2178_v56 = vpop.f32.mrf.mxu1  ;;  %3094 = vmatpush.bf16.msrb.mxu3 %v2398_v27  ;;  %v6405_v39 = vadd.f32 %v1849_v2, %v6279_v59 }
 0x2b2   : > { %v6395_v19 = vpop.f32.mrf.mxu3  ;;  %v6400_v22 = vadd.f32 %v2178_v56, %v6279_v59  ;;  %v6415_v56 = vpop.permute.xlu2 %1193  ;;  %v8591_v59 = vpack.c.bf16 %v6186_v44, %v6183_v32  ;;  %v8596_v32 = vpack.c.bf16 %v6054_v23, %v6051_v45  ;;  %v4693_v44 = vld [vmem:[%s8216_s3 + $0xc] sm:$0xf] }
 0x2b3   : > { %1888 = vmatmul.bf16.gmra.mxu0 %v4668_v12  ;;  %8590 = vst [vmem:[#allocation138_spill] sm:$0xff] %v6415_v56  ;;  %v6423_v2 = vpop.permute.xlu0 %1183 }
 0x2b4   : > { %2217 = vmatmul.bf16.gmra.mxu1 %v4668_v12  ;;  %8587 = vst [vmem:[#allocation135_spill] sm:$0xff] %v6400_v22 }
 0x2b5   : > { %3095 = vmatpush.bf16.msrb.mxu3 %v2396_v46  ;;  %v6397_v18 = vpop.permute.xlu1 %2558  ;;  %8592 = vst [vmem:[#allocation139_spill] sm:$0xff] %v6423_v2 }
 0x2b6   : > { %8586 = vst [vmem:[#allocation134_spill] sm:$0xff] %v6397_v18 }
 0x2b8   : > { %v1851_v4 = vpop.f32.mrf.mxu0 }
 0x2b9   : > { %v6408_v35 = vadd.f32 %v1851_v4, %v6262_v13  ;;  %v2180_v27 = vpop.f32.mrf.mxu1  ;;  %3096 = vmatpush.bf16.msrb.mxu3 %v2394_v34  ;;  %v8595_v4 = vpack.c.bf16 %v6126_v16, %v6123_v25 }
 0x2ba   : > { %v6411_v12 = vadd.f32 %v2180_v27, %v6262_v13  ;;  %v4669_v13 = vld [vmem:[%s8214_s1 + $0x148] sm:$0xff]  ;;  %v6430_v41 = vpop.f32.mrf.mxu3  ;;  %v6446_v46 = vpop.permute.xlu2 %1178 }
 0x2bb   : > { %8594 = vst [vmem:[#allocation141_spill] sm:$0xff] %v6430_v41  ;;  %v4363_v27 = vld [vmem:[%s8216_s3 + $0x28] sm:$0xf0]  ;;  %v6455_v23 = vpop.permute.xlu0 %1168 }
 0x2bc   : > { %8589 = vst [vmem:[#allocation137_spill] sm:$0xff] %v6411_v12  ;;  %3087 = vmatmul.bf16.gmra.mxu2 %v6402_v5  ;;  %v6453_v45 = vor.u32 %v4693_v44, %v4363_v27  ;;  %v4395_v44 = vld [vmem:[%s8216_s3 + $0x68] sm:$0xf0] }
 0x2bd   : > { %3097 = vmatpush.bf16.msrb.mxu3 %v8591_v59  ;;  %v6425_v58 = vpop.permute.xlu1 %2573  ;;  %v6444_v59 = vpop.f32.mrf.mxu2  ;;  %8598 = vst [vmem:[#allocation143_spill] sm:$0xff] %v6446_v46  ;;  %v4491_v46 = vld [vmem:[%s8216_s3 + $0x128] sm:$0xf0] }
 0x2be   : > { %8593 = vst [vmem:[#allocation140_spill] sm:$0xff] %v6425_v58 }
 0x2bf   : > { %8597 = vst [vmem:[#allocation142_spill] sm:$0xff] %v6444_v59 }
 0x2c0   : > { %v1854_v48 = vpop.f32.mrf.mxu0  ;;  %8601 = vst [vmem:[#allocation146_spill] sm:$0xff] %v6453_v45 }
 0x2c1   : > { %v2183_v34 = vpop.f32.mrf.mxu1  ;;  %3098 = vmatpush.bf16.msrb.mxu3 %v8595_v4  ;;  %8602 = vst [vmem:[#allocation147_spill] sm:$0xff] %v6455_v23  ;;  %v6458_v4 = vadd.f32 %v1854_v48, %v6040_v21 }
 0x2c2   : > { %v6451_v25 = vadd.f32 %v2183_v34, %v6040_v21  ;;  %v6466_v5 = vpop.f32.mrf.mxu3  ;;  %v4701_v21 = vld [vmem:[%s8216_s3 + $0x4c] sm:$0xf] }
 0x2c3   : > { %1893 = vmatmul.bf16.gmra.mxu0 %v4669_v13  ;;  %v6485_v27 = vpop.permute.xlu0 %1083  ;;  %v6502_v41 = vor.u32 %v4701_v21, %v4395_v44  ;;  %v4709_v44 = vld [vmem:[%s8216_s3 + $0x8c] sm:$0xf] }
 0x2c4   : > { %2222 = vmatmul.bf16.gmra.mxu1 %v4669_v13  ;;  %8600 = vst [vmem:[#allocation145_spill] sm:$0xff] %v6451_v25 }
 0x2c5   : > { %3099 = vmatpush.bf16.msrb.mxu3 %v8596_v32  ;;  %v6448_v16 = vpop.permute.xlu1 %2588  ;;  %8610 = vst [vmem:[#allocation154_spill] sm:$0xff] %v6502_v41 }
 0x2c6   : > { %8599 = vst [vmem:[#allocation144_spill] sm:$0xff] %v6448_v16 }
 0x2c8   : > { %v1856_v13 = vpop.f32.mrf.mxu0 }
 0x2c9   : > { %v6461_v32 = vadd.f32 %v1856_v13, %v6248_v10  ;;  %v2185_v37 = vpop.f32.mrf.mxu1  ;;  %3100 = vmatpush.bf16.msrb.mxu3 %v8603_v6  ;;  %v6483_v6 = vpop.permute.xlu2 %1093 }
 0x2ca   : > { %v6469_v34 = vadd.f32 %v2185_v37, %v6248_v10  ;;  %v6487_v13 = vpop.f32.mrf.mxu3 }
 0x2cb   : > { %8606 = vst [vmem:[#allocation150_spill] sm:$0xff] %v6487_v13 }
 0x2cc   : > { %8604 = vst [vmem:[#allocation148_spill] sm:$0xff] %v6469_v34  ;;  %3101 = vmatmul.bf16.vlgmr.msrb.gmra.mxu3 %v6453_v45 }
 0x2cd   : > { %v6476_v48 = vpop.permute.xlu1 %2603 }
 0x2ce   : > { %8605 = vst [vmem:[#allocation149_spill] sm:$0xff] %v6476_v48 }
 0x2cf   : > { %v6481_v11 = vpop.f32.mrf.mxu2 }
 0x2d0   : > { %v1859_v10 = vpop.f32.mrf.mxu0 }
 0x2d1   : > { %v2188_v37 = vpop.f32.mrf.mxu1  ;;  %v6510_v36 = vpop.permute.xlu2 %1078 }
 0x2d2   : > { %v6500_v0 = vadd.f32 %v2188_v37, %v6162_v63 }
 0x2d3   : > { %1898 = vmatmul.bf16.gmra.mxu0 %v4670_v38 }
 0x2d4   : > { %2227 = vmatmul.bf16.gmra.mxu1 %v4670_v38  ;;  %8609 = vst [vmem:[#allocation153_spill] sm:$0xff] %v6500_v0  ;;  %v6505_v38 = vadd.f32 %v1859_v10, %v6162_v63  ;;  %v6521_v63 = vpop.permute.xlu0 %1068 }
 0x2d5   : > { %v6497_v59 = vpop.permute.xlu1 %2618 }
 0x2d6   : > { %8608 = vst [vmem:[#allocation152_spill] sm:$0xff] %v6497_v59 }
 0x2d7   : > { %v6495_v45 = vpop.f32.mrf.mxu2 }
 0x2d8   : > { %8607 = vst [vmem:[#allocation151_spill] sm:$0xff] %v6495_v45  ;;  %v1861_v62 = vpop.f32.mrf.mxu0  ;;  %v2991_v45 = vadd.f32 %v2990_v15, %v6497_v59 }
 0x2d9   : > { %v6508_v13 = vadd.f32 %v1861_v62, %v5999_v50  ;;  %v2190_v48 = vpop.f32.mrf.mxu1  ;;  %v3039_v62 = vpop.f32.mrf.mxu3 }
 0x2da   : > { %v6513_v58 = vadd.f32 %v2190_v48, %v5999_v50  ;;  %v6523_v21 = vadd.f32 %v3039_v62, %v2991_v45  ;;  %v4671_v50 = vld [vmem:[%s8214_s1 + $0x158] sm:$0xff]  ;;  %v6530_v37 = vpop.permute.xlu2 %1163  ;;  %v4427_v45 = vld [vmem:[%s8216_s3 + $0xa8] sm:$0xf0] }
 0x2db   : > { %8612 = vst [vmem:[#allocation156_spill] sm:$0xff] %v6530_v37  ;;  %v6545_v12 = vor.u32 %v4709_v44, %v4427_v45  ;;  %v4717_v45 = vld [vmem:[%s8216_s3 + $0xcc] sm:$0xf]  ;;  %v2976_v37 = vadd.f32 %v6255_v31, %v6448_v16 }
 0x2dc   : > { %8611 = vst [vmem:[#allocation155_spill] sm:$0xff] %v6513_v58  ;;  %3106 = vmatmul.bf16.gmra.mxu3 %v6502_v41  ;;  %v6540_v59 = vpop.permute.xlu0 %1153 }
 0x2dd   : > { %8614 = vst [vmem:[#allocation158_spill] sm:$0xff] %v6540_v59 }
 0x2de   : > { %8616 = vst [vmem:[#allocation160_spill] sm:$0xff] %v6545_v12 }
 0x2df   : > { %v6528_v48 = vpop.f32.mrf.mxu2 }
 0x2e0   : > { %v1864_v15 = vpop.f32.mrf.mxu0 }
 0x2e1   : > { %v2193_v10 = vpop.f32.mrf.mxu1 }
 0x2e2   : > { %v6543_v41 = vadd.f32 %v2193_v10, %v6149_v47  ;;  %v6561_v44 = vpop.permute.xlu2 %1148  ;;  %v4459_v10 = vld [vmem:[%s8216_s3 + $0xe8] sm:$0xf0] }
 0x2e3   : > { %1903 = vmatmul.bf16.gmra.mxu0 %v4671_v50  ;;  %8618 = vst [vmem:[#allocation162_spill] sm:$0xff] %v6561_v44  ;;  %v6584_v0 = vor.u32 %v4717_v45, %v4459_v10  ;;  %v4733_v44 = vld [vmem:[%s8216_s3 + $0x14c] sm:$0xf] }
 0x2e4   : > { %2232 = vmatmul.bf16.gmra.mxu1 %v4671_v50  ;;  %8615 = vst [vmem:[#allocation159_spill] sm:$0xff] %v6543_v41  ;;  %v6548_v50 = vadd.f32 %v1864_v15, %v6149_v47  ;;  %v4672_v47 = vld [vmem:[%s8214_s1 + $0x160] sm:$0xff] }
 0x2e5   : > { %8621 = vst [vmem:[#allocation165_spill] sm:$0xff] %v6584_v0 }
 0x2e7   : > { %v6538_v62 = vpop.f32.mrf.mxu2 }
 0x2e8   : > { %8613 = vst [vmem:[#allocation157_spill] sm:$0xff] %v6538_v62  ;;  %v1866_v22 = vpop.f32.mrf.mxu0 }
 0x2e9   : > { %v6551_v52 = vadd.f32 %v1866_v22, %v6131_v60  ;;  %v2195_v40 = vpop.f32.mrf.mxu1 }
 0x2ea   : > { %v6554_v25 = vadd.f32 %v2195_v40, %v6131_v60  ;;  %v6570_v60 = vpop.permute.xlu0 %1138 }
 0x2eb   : > { %8619 = vst [vmem:[#allocation163_spill] sm:$0xff] %v6570_v60 }
 0x2ec   : > { %8617 = vst [vmem:[#allocation161_spill] sm:$0xff] %v6554_v25  ;;  %3111 = vmatmul.bf16.gmra.mxu3 %v6545_v12  ;;  %v6580_v12 = vpop.permute.xlu2 %1063 }
 0x2ef   : > { %v6566_v22 = vpop.f32.mrf.mxu2 }
 0x2f0   : > { %v6568_v15 = vpop.f32.mrf.mxu0 }
 0x2f1   : > { %v2198_v40 = vpop.f32.mrf.mxu1 }
 0x2f2   : > { %v6587_v41 = vadd.f32 %v2198_v40, %v5902_v53  ;;  %v6592_v25 = vpop.permute.xlu0 %2553 }
 0x2f3   : > { %1908 = vmatmul.bf16.gmra.mxu0 %v4672_v47  ;;  %8624 = vst [vmem:[#allocation168_spill] sm:$0xff] %v6592_v25 }
 0x2f4   : > { %2237 = vmatmul.bf16.gmra.mxu1 %v4672_v47  ;;  %8622 = vst [vmem:[#allocation166_spill] sm:$0xff] %v6587_v41  ;;  %v6604_v2 = vpop.permute.xlu2 %2548 }
 0x2f5   : > { %8625 = vst [vmem:[#allocation169_spill] sm:$0xff] %v6604_v2 }
 0x2f7   : > { %v6578_v62 = vpop.f32.mrf.mxu2 }
 0x2f8   : > { %8620 = vst [vmem:[#allocation164_spill] sm:$0xff] %v6578_v62  ;;  %v6582_v34 = vpop.f32.mrf.mxu0  ;;  %v4673_v62 = vld [vmem:[%s8214_s1 + $0x168] sm:$0xff] }
 0x2f9   : > { %v2200_v58 = vpop.f32.mrf.mxu1 }
 0x2fa   : > { %v6590_v47 = vadd.f32 %v2200_v58, %v6108_v30  ;;  %v4725_v58 = vld [vmem:[%s8216_s3 + $0x10c] sm:$0xf] }
 0x2fc   : > { %8623 = vst [vmem:[#allocation167_spill] sm:$0xff] %v6590_v47  ;;  %3116 = vmatmul.bf16.gmra.mxu3 %v6584_v0  ;;  %v6612_v0 = vpop.permute.xlu0 %2568  ;;  %v6616_v47 = vor.u32 %v4725_v58, %v4491_v46  ;;  %v6626_v59 = vpop.permute.xlu2 %2563  ;;  %v3025_v46 = vadd.f32 %v6344_v8, %v2976_v37  ;;  %v4523_v8 = vld [vmem:[%s8216_s3 + $0x168] sm:$0xf0] }
 0x2fd   : > { %8626 = vst [vmem:[#allocation170_spill] sm:$0xff] %v6612_v0 }
 0x2fe   : > { %8628 = vst [vmem:[#allocation172_spill] sm:$0xff] %v6616_v47 }
 0x2ff   : > { %v6600_v10 = vpop.f32.mrf.mxu2  ;;  %8631 = vst [vmem:[#allocation175_spill] sm:$0xff] %v6626_v59 }
 0x300   : > { %v6602_v45 = vpop.f32.mrf.mxu0 }
 0x301   : > { %v2203_v40 = vpop.f32.mrf.mxu1 }
 0x302   : > { %v6619_v23 = vadd.f32 %v2203_v40, %v5994_v61  ;;  %v4674_v40 = vld [vmem:[%s8214_s1 + $0x170] sm:$0xff] }
 0x303   : > { %1913 = vmatmul.bf16.gmra.mxu0 %v4673_v62 }
 0x304   : > { %2242 = vmatmul.bf16.gmra.mxu1 %v4673_v62  ;;  %8629 = vst [vmem:[#allocation173_spill] sm:$0xff] %v6619_v23  ;;  %v6645_v37 = vpop.permute.xlu2 %2578 }
 0x305   : > { %8633 = vst [vmem:[#allocation177_spill] sm:$0xff] %v6645_v37 }
 0x307   : > { %v6614_v25 = vpop.f32.mrf.mxu2 }
 0x308   : > { %8627 = vst [vmem:[#allocation171_spill] sm:$0xff] %v6614_v25  ;;  %v1876_v41 = vpop.f32.mrf.mxu0  ;;  %v6635_v25 = vpop.permute.xlu0 %2583 }
 0x309   : > { %v2205_v56 = vpop.f32.mrf.mxu1  ;;  %8632 = vst [vmem:[#allocation176_spill] sm:$0xff] %v6635_v25  ;;  %v6649_v25 = vor.u32 %v4733_v44, %v4523_v8  ;;  %v4675_v8 = vld [vmem:[%s8214_s1 + $0x178] sm:$0xff] }
 0x30a   : > { %v6622_v62 = vadd.f32 %v2205_v56, %v5879_v33 }
 0x30b   : > { %8635 = vst [vmem:[#allocation179_spill] sm:$0xff] %v6649_v25 }
 0x30c   : > { %8630 = vst [vmem:[#allocation174_spill] sm:$0xff] %v6622_v62  ;;  %3121 = vmatmul.bf16.gmra.mxu3 %v6616_v47 }
 0x30f   : > { %v3073_v58 = vpop.f32.mrf.mxu2 }
 0x310   : > { %v1879_v56 = vpop.f32.mrf.mxu0  ;;  %v6637_v20 = vadd.f32 %v3073_v58, %v3025_v46  ;;  %v6651_v58 = vpop.permute.xlu0 %2598 }
 0x311   : > { %v2208_v31 = vpop.f32.mrf.mxu1  ;;  %8636 = vst [vmem:[#allocation180_spill] sm:$0xff] %v6651_v58  ;;  %v2981_v23 = vadd.f32 %v6300_v7, %v6651_v58  ;;  %v4741_v7 = vld [vmem:[%s8216_s3 + $0x18c] sm:$0xf] }
 0x313   : > { %1918 = vmatmul.bf16.gmra.mxu0 %v4674_v40  ;;  %v3030_v44 = vadd.f32 %v6395_v19, %v2981_v23  ;;  %v4555_v19 = vld [vmem:[%s8216_s3 + $0x1a8] sm:$0xf0] }
 0x314   : > { %2247 = vmatmul.bf16.gmra.mxu1 %v4674_v40  ;;  %v6654_v40 = vadd.f32 %v2208_v31, %v5969_v17  ;;  %v6668_v31 = vpop.permute.xlu2 %2593  ;;  %v6680_v58 = vor.u32 %v4741_v7, %v4555_v19 }
 0x315   : > { %8639 = vst [vmem:[#allocation183_spill] sm:$0xff] %v6668_v31 }
 0x316   : > { %8637 = vst [vmem:[#allocation181_spill] sm:$0xff] %v6654_v40 }
 0x317   : > { %v6647_v16 = vpop.f32.mrf.mxu2  ;;  %8641 = vst [vmem:[#allocation185_spill] sm:$0xff] %v6680_v58 }
 0x318   : > { %8634 = vst [vmem:[#allocation178_spill] sm:$0xff] %v6647_v16  ;;  %v1881_v47 = vpop.f32.mrf.mxu0 }
 0x319   : > { %v2210_v46 = vpop.f32.mrf.mxu1 }
 0x31a   : > { %v6657_v59 = vadd.f32 %v2210_v46, %v5954_v1 }
 0x31c   : > { %8638 = vst [vmem:[#allocation182_spill] sm:$0xff] %v6657_v59  ;;  %3126 = vmatmul.bf16.gmra.mxu3 %v6649_v25  ;;  %v6684_v31 = vpop.permute.xlu2 %2608 }
 0x31d   : > { %8642 = vst [vmem:[#allocation186_spill] sm:$0xff] %v6684_v31  ;;  %v2986_v59 = vadd.f32 %v6350_v42, %v6684_v31  ;;  %v4676_v42 = vld [vmem:[%s8214_s1 + $0x180] sm:$0xff] }
 0x31f   : > { %v3078_v16 = vpop.f32.mrf.mxu2 }
 0x320   : > { %v1884_v60 = vpop.f32.mrf.mxu0  ;;  %v6670_v46 = vadd.f32 %v3078_v16, %v3030_v44 }
 0x321   : > { %v2213_v3 = vpop.f32.mrf.mxu1  ;;  %v1885_v25 = vadd.f32 %v1884_v60, %v5792_v51  ;;  %v8672_v60 = vld [vmem:[#allocation80_spill] sm:$0xff] }
 0x323   : > { %1923 = vmatmul.bf16.gmra.mxu0 %v4675_v8 }
 0x324   : > { %2252 = vmatmul.bf16.gmra.mxu1 %v4675_v8  ;;  %v6687_v8 = vadd.f32 %v2213_v3, %v5792_v51  ;;  %v3035_v51 = vadd.f32 %v6466_v5, %v2986_v59  ;;  %v1877_v3 = vadd.f32 %v1876_v41, %v5879_v33  ;;  %v1870_v33 = vadd.f32 %v6568_v15, %v5902_v53  ;;  %v4749_v41 = vld [vmem:[%s8216_s3 + $0x1cc] sm:$0xf] }
 0x327   : > { %v6678_v23 = vpop.f32.mrf.mxu2 }
 0x328   : > { %8640 = vst [vmem:[#allocation184_spill] sm:$0xff] %v6678_v23  ;;  %v1886_v62 = vpop.f32.mrf.mxu0  ;;  %v1882_v23 = vadd.f32 %v1881_v47, %v5954_v1  ;;  %v1875_v47 = vadd.f32 %v6602_v45, %v5994_v61  ;;  %v4587_v61 = vld [vmem:[%s8216_s3 + $0x1e8] sm:$0xf0] }
 0x329   : > { %v1887_v16 = vadd.f32 %v1886_v62, %v5928_v54  ;;  %v2215_v44 = vpop.f32.mrf.mxu1  ;;  %v1880_v62 = vadd.f32 %v1879_v56, %v5969_v17  ;;  %v1872_v17 = vadd.f32 %v6582_v34, %v6108_v30  ;;  %v6720_v30 = vor.u32 %v4749_v41, %v4587_v61  ;;  %v8674_v41 = vld [vmem:[#allocation66_spill] sm:$0xff] }
 0x32a   : > { %v6690_v40 = vadd.f32 %v2215_v44, %v5928_v54  ;;  %v2412_v5 = vpack.c.bf16 %v1877_v3, %v1875_v47  ;;  %v6762_v47 = vpop.f32.mrf.mxu3 }
 0x32b   : > { %v2416_v7 = vpack.c.bf16 %v1887_v16, %v1885_v25  ;;  %v2414_v54 = vpack.c.bf16 %v1882_v23, %v1880_v62  ;;  %v2410_v59 = vpack.c.bf16 %v1872_v17, %v1870_v33  ;;  %8644 = vst [vmem:[#allocation188_spill] sm:$0xff] %v6720_v30  ;;  %v8652_v17 = vpack.c.bf16 %v6408_v35, %v6405_v39 }
 0x32c   : > { %3131 = vmatmul.bf16.gmra.mxu3 %v6680_v58  ;;  %8650 = vst [vmem:[#allocation191_spill] sm:$0xff] %v6762_v47  ;;  %v8680_v58 = vld [vmem:[#allocation74_spill] sm:$0xff] }
 0x32d   : > { %3142 = vmatpush.bf16.msra.mxu2 %v2416_v7 }
 0x32f   : > { %v3083_v19 = vpop.f32.mrf.mxu2 }
 0x330   : > { %v1889_v1 = vpop.f32.mrf.mxu0  ;;  %v6704_v25 = vadd.f32 %v3083_v19, %v3035_v51  ;;  %v8647_v51 = vpack.c.bf16 %v6551_v52, %v6548_v50  ;;  %v8648_v19 = vpack.c.bf16 %v6508_v13, %v6505_v38  ;;  %v8649_v52 = vpack.c.bf16 %v6461_v32, %v6458_v4  ;;  %v4369_v50 = vld [vmem:[%s8216_s3 + $0x10] sm:$0xf] }
 0x331   : > { %v2218_v16 = vpop.f32.mrf.mxu1  ;;  %3143 = vmatpush.bf16.msra.mxu2 %v2414_v54  ;;  %v6723_v34 = vadd.f32 %v1889_v1, %v6110_v43  ;;  %v2956_v1 = vadd.f32 %v5943_v49, %v6604_v2  ;;  %v8685_v2 = vld [vmem:[#allocation73_spill] sm:$0xff] }
 0x332   : > { %v6729_v23 = vadd.f32 %v2218_v16, %v6110_v43  ;;  %v4677_v43 = vld [vmem:[%s8214_s1 + $0x188] sm:$0xff] }
 0x333   : > { %1928 = vmatmul.bf16.gmra.mxu0 %v4676_v42 }
 0x334   : > { %2257 = vmatmul.bf16.gmra.mxu1 %v4676_v42  ;;  %8645 = vst [vmem:[#allocation189_spill] sm:$0xff] %v6729_v23 }
 0x335   : > { %3144 = vmatpush.bf16.msra.mxu2 %v2412_v5  ;;  %v3005_v5 = vadd.f32 %v6170_v14, %v2956_v1  ;;  %v4678_v14 = vld [vmem:[%s8214_s1 + $0x190] sm:$0xff] }
 0x337   : > { %v6718_v45 = vpop.f32.mrf.mxu2 }
 0x338   : > { %8643 = vst [vmem:[#allocation187_spill] sm:$0xff] %v6718_v45  ;;  %v1891_v56 = vpop.f32.mrf.mxu0  ;;  %v4683_v45 = vld [vmem:[%s8214_s1 + $0x1b8] sm:$0xff] }
 0x339   : > { %v6726_v53 = vadd.f32 %v1891_v56, %v6298_v57  ;;  %v2220_v15 = vpop.f32.mrf.mxu1  ;;  %3145 = vmatpush.bf16.msra.mxu2 %v2410_v59  ;;  %v3054_v59 = vadd.f32 %v6481_v11, %v3005_v5  ;;  %v4401_v56 = vld [vmem:[%s8216_s3 + $0x50] sm:$0xf]  ;;  %v2961_v11 = vadd.f32 %v6027_v26, %v6397_v18 }
 0x33a   : > { %v6732_v44 = vadd.f32 %v2220_v15, %v6298_v57  ;;  %v4706_v15 = vld [vmem:[%s8216_s3 + $0x6c] sm:$0xf0] }
 0x33c   : > { %8646 = vst [vmem:[#allocation190_spill] sm:$0xff] %v6732_v44  ;;  %3136 = vmatmul.bf16.gmra.mxu3 %v6720_v30 }
 0x33d   : > { %3146 = vmatpush.bf16.msra.mxu2 %v8647_v51 }
 0x33f   : > { %v3088_v3 = vpop.f32.mrf.mxu2 }
 0x340   : > { %v1894_v54 = vpop.f32.mrf.mxu0  ;;  %v6746_v57 = vadd.f32 %v3088_v3, %v6523_v21  ;;  %v4698_v21 = vld [vmem:[%s8216_s3 + $0x2c] sm:$0xf0]  ;;  %v6803_v3 = vor.u32 %v4706_v15, %v4401_v56 }
 0x341   : > { %v2223_v42 = vpop.f32.mrf.mxu1  ;;  %3147 = vmatpush.bf16.msra.mxu2 %v8648_v19  ;;  %v6764_v38 = vor.u32 %v4698_v21, %v4369_v50  ;;  %v6767_v16 = vadd.f32 %v1894_v54, %v6235_v29  ;;  %v8657_v50 = vld [vmem:[#allocation98_spill] sm:$0xff] }
 0x342   : > { %v6777_v49 = vadd.f32 %v2223_v42, %v6235_v29  ;;  %8655 = vst [vmem:[#allocation195_spill] sm:$0xff] %v6803_v3  ;;  %v8656_v42 = vld [vmem:[#allocation95_spill] sm:$0xff]  ;;  %v3010_v21 = vadd.f32 %v8657_v50, %v2961_v11  ;;  %v8664_v50 = vld [vmem:[#allocation92_spill] sm:$0xff] }
 0x343   : > { %1933 = vmatmul.bf16.gmra.mxu0 %v4677_v43  ;;  %8651 = vst [vmem:[#allocation192_spill] sm:$0xff] %v6764_v38 }
 0x344   : > { %2262 = vmatmul.bf16.gmra.mxu1 %v4677_v43  ;;  %8653 = vst [vmem:[#allocation193_spill] sm:$0xff] %v6777_v49 }
 0x345   : > { %3148 = vmatpush.bf16.msra.mxu2 %v8649_v52 }
 0x348   : > { %v1896_v13 = vpop.f32.mrf.mxu0 }
 0x349   : > { %v6770_v4 = vadd.f32 %v1896_v13, %v6077_v24  ;;  %v2225_v32 = vpop.f32.mrf.mxu1  ;;  %3149 = vmatpush.bf16.msra.mxu2 %v8652_v17  ;;  %v3059_v17 = vadd.f32 %v6528_v48, %v3010_v21  ;;  %v8660_v48 = vld [vmem:[#allocation82_spill] sm:$0xff] }
 0x34a   : > { %v6780_v33 = vadd.f32 %v2225_v32, %v6077_v24  ;;  %v2966_v56 = vadd.f32 %v8660_v48, %v6612_v0  ;;  %v4682_v0 = vld [vmem:[%s8214_s1 + $0x1b0] sm:$0xff] }
 0x34c   : > { %8654 = vst [vmem:[#allocation194_spill] sm:$0xff] %v6780_v33  ;;  %3150 = vmatmul.bf16.vlgmr.msra.gmra.mxu2 %v6764_v38 }
 0x34f   : > { %v3102_v39 = vpop.f32.mrf.mxu3 }
 0x350   : > { %v6791_v29 = vadd.f32 %v3102_v39, %v3054_v59  ;;  %v1899_v35 = vpop.f32.mrf.mxu0  ;;  %v4679_v59 = vld [vmem:[%s8214_s1 + $0x198] sm:$0xff] }
 0x351   : > { %v2228_v24 = vpop.f32.mrf.mxu1  ;;  %v6806_v54 = vadd.f32 %v1899_v35, %v6214_v9  ;;  %v4433_v35 = vld [vmem:[%s8216_s3 + $0x90] sm:$0xf] }
 0x352   : > { %v6813_v1 = vadd.f32 %v2228_v24, %v6214_v9  ;;  %v4714_v24 = vld [vmem:[%s8216_s3 + $0xac] sm:$0xf0] }
 0x353   : > { %1938 = vmatmul.bf16.gmra.mxu0 %v4678_v14 }
 0x354   : > { %2267 = vmatmul.bf16.gmra.mxu1 %v4678_v14  ;;  %8658 = vst [vmem:[#allocation95_spill] sm:$0xff] %v6813_v1 }
 0x357   : > { %v6801_v51 = vpop.f32.mrf.mxu3 }
 0x358   : > { %v1901_v43 = vpop.f32.mrf.mxu0 }
 0x359   : > { %v6809_v19 = vadd.f32 %v1901_v43, %v8656_v42  ;;  %v2230_v52 = vpop.f32.mrf.mxu1  ;;  %v6839_v43 = vor.u32 %v4714_v24, %v4433_v35  ;;  %v8671_v35 = vld [vmem:[#allocation114_spill] sm:$0xff] }
 0x35a   : > { %v6816_v13 = vadd.f32 %v2230_v52, %v8656_v42  ;;  %v8663_v42 = vld [vmem:[#allocation69_spill] sm:$0xff] }
 0x35b   : > { %8662 = vst [vmem:[#allocation196_spill] sm:$0xff] %v6839_v43 }
 0x35c   : > { %8659 = vst [vmem:[#allocation98_spill] sm:$0xff] %v6816_v13  ;;  %3155 = vmatmul.bf16.gmra.mxu2 %v6803_v3 }
 0x35f   : > { %v3107_v5 = vpop.f32.mrf.mxu3 }
 0x360   : > { %v6827_v9 = vadd.f32 %v3107_v5, %v3059_v17  ;;  %v1904_v39 = vpop.f32.mrf.mxu0  ;;  %v8665_v5 = vld [vmem:[#allocation105_spill] sm:$0xff] }
 0x361   : > { %v2233_v14 = vpop.f32.mrf.mxu1  ;;  %v6842_v52 = vadd.f32 %v1904_v39, %v8663_v42 }
 0x362   : > { %v6849_v62 = vadd.f32 %v2233_v14, %v8663_v42 }
 0x363   : > { %1943 = vmatmul.bf16.gmra.mxu0 %v4679_v59 }
 0x364   : > { %2272 = vmatmul.bf16.gmra.mxu1 %v4679_v59  ;;  %v3015_v59 = vadd.f32 %v8665_v5, %v2966_v56  ;;  %8666 = vst [vmem:[#allocation69_spill] sm:$0xff] %v6849_v62  ;;  %v4680_v56 = vld [vmem:[%s8214_s1 + $0x1a0] sm:$0xff] }
 0x366   : > { %v3064_v39 = vadd.f32 %v6566_v22, %v3015_v59  ;;  %v4722_v22 = vld [vmem:[%s8216_s3 + $0xec] sm:$0xf0] }
 0x367   : > { %v6837_v15 = vpop.f32.mrf.mxu3 }
 0x368   : > { %8661 = vst [vmem:[#allocation82_spill] sm:$0xff] %v6837_v15  ;;  %v1906_v11 = vpop.f32.mrf.mxu0 }
 0x369   : > { %v6845_v21 = vadd.f32 %v1906_v11, %v8664_v50  ;;  %v2235_v17 = vpop.f32.mrf.mxu1 }
 0x36a   : > { %v6852_v61 = vadd.f32 %v2235_v17, %v8664_v50  ;;  %v4465_v50 = vld [vmem:[%s8216_s3 + $0xd0] sm:$0xf]  ;;  %v8668_v17 = vld [vmem:[#allocation93_spill] sm:$0xff] }
 0x36b   : > { %v2971_v5 = vadd.f32 %v8668_v17, %v6645_v37 }
 0x36c   : > { %8667 = vst [vmem:[#allocation92_spill] sm:$0xff] %v6852_v61  ;;  %3160 = vmatmul.bf16.gmra.mxu2 %v6839_v43 }
 0x36f   : > { %v3112_v24 = vpop.f32.mrf.mxu3 }
 0x370   : > { %v6863_v14 = vadd.f32 %v3112_v24, %v3064_v39  ;;  %v6865_v11 = vpop.f32.mrf.mxu0  ;;  %v6879_v24 = vor.u32 %v4722_v22, %v4465_v50  ;;  %v4681_v50 = vld [vmem:[%s8214_s1 + $0x1a8] sm:$0xff] }
 0x371   : > { %v2238_v42 = vpop.f32.mrf.mxu1 }
 0x372   : > { %8670 = vst [vmem:[#allocation93_spill] sm:$0xff] %v6879_v24  ;;  %v6883_v7 = vadd.f32 %v2238_v42, %v8672_v60 }
 0x373   : > { %1948 = vmatmul.bf16.gmra.mxu0 %v4680_v56 }
 0x374   : > { %2277 = vmatmul.bf16.gmra.mxu1 %v4680_v56  ;;  %v3020_v56 = vadd.f32 %v8671_v35, %v2971_v5  ;;  %8673 = vst [vmem:[#allocation114_spill] sm:$0xff] %v6883_v7  ;;  %v4730_v5 = vld [vmem:[%s8216_s3 + $0x12c] sm:$0xf0] }
 0x375   : > { %v8812_v7 = vld [vmem:[#allocation124_spill] sm:$0xff] }
 0x376   : > { %v3069_v17 = vadd.f32 %v6600_v10, %v3020_v56 }
 0x377   : > { %v6875_v59 = vpop.f32.mrf.mxu3 }
 0x378   : > { %8669 = vst [vmem:[#allocation105_spill] sm:$0xff] %v6875_v59  ;;  %v6877_v39 = vpop.f32.mrf.mxu0  ;;  %v8688_v59 = vld [vmem:[#allocation64_spill] sm:$0xff] }
 0x379   : > { %v2240_v32 = vpop.f32.mrf.mxu1 }
 0x37a   : > { %v6886_v26 = vadd.f32 %v2240_v32, %v8674_v41  ;;  %v4497_v32 = vld [vmem:[%s8216_s3 + $0x110] sm:$0xf] }
 0x37b   : > { %v6905_v48 = vor.u32 %v4730_v5, %v4497_v32 }
 0x37c   : > { %8675 = vst [vmem:[#allocation80_spill] sm:$0xff] %v6886_v26  ;;  %3165 = vmatmul.bf16.gmra.mxu2 %v6879_v24 }
 0x37d   : > { %8677 = vst [vmem:[#allocation197_spill] sm:$0xff] %v6905_v48 }
 0x37f   : > { %v3117_v30 = vpop.f32.mrf.mxu3 }
 0x380   : > { %v6895_v22 = vadd.f32 %v3117_v30, %v3069_v17  ;;  %v1914_v35 = vpop.f32.mrf.mxu0  ;;  %v8678_v30 = vld [vmem:[#allocation78_spill] sm:$0xff] }
 0x381   : > { %v2243_v42 = vpop.f32.mrf.mxu1 }
 0x382   : > { %v6908_v17 = vadd.f32 %v2243_v42, %v8678_v30  ;;  %v4738_v42 = vld [vmem:[%s8216_s3 + $0x16c] sm:$0xf0] }
 0x383   : > { %1953 = vmatmul.bf16.gmra.mxu0 %v4681_v50 }
 0x384   : > { %2282 = vmatmul.bf16.gmra.mxu1 %v4681_v50  ;;  %8679 = vst [vmem:[#allocation78_spill] sm:$0xff] %v6908_v17  ;;  %v8813_v17 = vld [vmem:[#allocation138_spill] sm:$0xff] }
 0x387   : > { %v6903_v10 = vpop.f32.mrf.mxu3 }
 0x388   : > { %8676 = vst [vmem:[#allocation66_spill] sm:$0xff] %v6903_v10  ;;  %v1916_v56 = vpop.f32.mrf.mxu0 }
 0x389   : > { %v2245_v31 = vpop.f32.mrf.mxu1 }
 0x38a   : > { %v6911_v37 = vadd.f32 %v2245_v31, %v8680_v58  ;;  %v4529_v31 = vld [vmem:[%s8216_s3 + $0x150] sm:$0xf] }
 0x38b   : > { %v6930_v18 = vor.u32 %v4738_v42, %v4529_v31 }
 0x38c   : > { %8681 = vst [vmem:[#allocation74_spill] sm:$0xff] %v6911_v37  ;;  %3170 = vmatmul.bf16.gmra.mxu2 %v6905_v48 }
 0x38d   : > { %8683 = vst [vmem:[#allocation199_spill] sm:$0xff] %v6930_v18 }
 0x38f   : > { %v3122_v24 = vpop.f32.mrf.mxu3 }
 0x390   : > { %v6920_v32 = vadd.f32 %v3122_v24, %v6637_v20  ;;  %v1919_v5 = vpop.f32.mrf.mxu0  ;;  %v8684_v20 = vld [vmem:[#allocation58_spill] sm:$0xff] }
 0x391   : > { %v2248_v43 = vpop.f32.mrf.mxu1 }
 0x392   : > { %v6933_v24 = vadd.f32 %v2248_v43, %v8684_v20  ;;  %v4746_v43 = vld [vmem:[%s8216_s3 + $0x1ac] sm:$0xf0] }
 0x393   : > { %1958 = vmatmul.bf16.gmra.mxu0 %v4682_v0 }
 0x394   : > { %2287 = vmatmul.bf16.gmra.mxu1 %v4682_v0 }
 0x397   : > { %v6928_v50 = vpop.f32.mrf.mxu3 }
 0x398   : > { %8682 = vst [vmem:[#allocation198_spill] sm:$0xff] %v6928_v50  ;;  %v1921_v48 = vpop.f32.mrf.mxu0 }
 0x399   : > { %v2250_v3 = vpop.f32.mrf.mxu1  ;;  %v1922_v33 = vadd.f32 %v1921_v48, %v8685_v2 }
 0x39a   : > { %v6936_v38 = vadd.f32 %v2250_v3, %v8685_v2  ;;  %v4561_v3 = vld [vmem:[%s8216_s3 + $0x190] sm:$0xf] }
 0x39b   : > { %v6955_v10 = vor.u32 %v4746_v43, %v4561_v3  ;;  %v1920_v3 = vadd.f32 %v1919_v5, %v8684_v20 }
 0x39c   : > { %3175 = vmatmul.bf16.gmra.mxu2 %v6930_v18 }
 0x39d   : > { %8687 = vst [vmem:[#allocation73_spill] sm:$0xff] %v6955_v10 }
 0x39f   : > { %v3127_v47 = vpop.f32.mrf.mxu3 }
 0x3a0   : > { %v6945_v31 = vadd.f32 %v3127_v47, %v6670_v46  ;;  %v1924_v42 = vpop.f32.mrf.mxu0  ;;  %v8689_v47 = vld [vmem:[#allocation56_spill] sm:$0xff] }
 0x3a1   : > { %v2253_v50 = vpop.f32.mrf.mxu1  ;;  %v1925_v46 = vadd.f32 %v1924_v42, %v8688_v59  ;;  %v2430_v42 = vpack.c.bf16 %v1922_v33, %v1920_v3  ;;  %v4754_v33 = vld [vmem:[%s8216_s3 + $0x1ec] sm:$0xf0] }
 0x3a3   : > { %1963 = vmatmul.bf16.gmra.mxu0 %v4683_v45 }
 0x3a4   : > { %2292 = vmatmul.bf16.gmra.mxu1 %v4683_v45  ;;  %v6960_v45 = vadd.f32 %v2253_v50, %v8688_v59  ;;  %v1912_v50 = vadd.f32 %v6877_v39, %v8674_v41  ;;  %v8692_v39 = vld [vmem:[#allocation126_spill] sm:$0xff] }
 0x3a7   : > { %v6953_v0 = vpop.f32.mrf.mxu3 }
 0x3a8   : > { %8686 = vst [vmem:[#allocation58_spill] sm:$0xff] %v6953_v0  ;;  %v1926_v18 = vpop.f32.mrf.mxu0 }
 0x3a9   : > { %v1927_v23 = vadd.f32 %v1926_v18, %v8689_v47  ;;  %v2255_v44 = vpop.f32.mrf.mxu1  ;;  %v1917_v18 = vadd.f32 %v1916_v56, %v8680_v58  ;;  %v1910_v58 = vadd.f32 %v6865_v11, %v8672_v60 }
 0x3aa   : > { %v6963_v49 = vadd.f32 %v2255_v44, %v8689_v47  ;;  %v4684_v44 = vld [vmem:[%s8214_s1 + $0x1c0] sm:$0xff] }
 0x3ab   : > { %v2432_v1 = vpack.c.bf16 %v1927_v23, %v1925_v46  ;;  %v1915_v23 = vadd.f32 %v1914_v35, %v8678_v30  ;;  %v2426_v35 = vpack.c.bf16 %v1912_v50, %v1910_v58 }
 0x3ac   : > { %3180 = vmatmul.bf16.gmra.mxu2 %v6955_v10 }
 0x3ad   : > { %3191 = vmatpush.bf16.msra.mxu3 %v2432_v1  ;;  %v2428_v1 = vpack.c.bf16 %v1917_v18, %v1915_v23  ;;  %v8695_v18 = vpack.c.bf16 %v6845_v21, %v6842_v52  ;;  %v8696_v23 = vpack.c.bf16 %v6809_v19, %v6806_v54  ;;  %v8697_v52 = vpack.c.bf16 %v6770_v4, %v6767_v16  ;;  %v4694_v21 = vld [vmem:[%s8216_s3 + $0x14] sm:$0xf]  ;;  %v8700_v19 = vld [vmem:[#allocation123_spill] sm:$0xff] }
 0x3ae   : > { %v8701_v4 = vpack.c.bf16 %v6726_v53, %v6723_v34  ;;  %v4686_v34 = vld [vmem:[%s8214_s1 + $0x1d0] sm:$0xff] }
 0x3af   : > { %v3132_v43 = vpop.f32.mrf.mxu3 }
 0x3b0   : > { %v6975_v59 = vadd.f32 %v3132_v43, %v6704_v25  ;;  %v1929_v2 = vpop.f32.mrf.mxu0  ;;  %v4593_v25 = vld [vmem:[%s8216_s3 + $0x1d0] sm:$0xf]  ;;  %v4685_v43 = vld [vmem:[%s8214_s1 + $0x1c8] sm:$0xff] }
 0x3b1   : > { %v2258_v48 = vpop.f32.mrf.mxu1  ;;  %3192 = vmatpush.bf16.msra.mxu3 %v2430_v42  ;;  %v6990_v41 = vor.u32 %v4754_v33, %v4593_v25  ;;  %v6993_v5 = vadd.f32 %v1929_v2, %v8692_v39 }
 0x3b2   : > { %v6999_v20 = vadd.f32 %v2258_v48, %v8692_v39  ;;  %v7030_v48 = vpop.f32.mrf.mxu2 }
 0x3b3   : > { %1968 = vmatmul.bf16.gmra.mxu0 %v4684_v44  ;;  %8691 = vst [vmem:[#allocation56_spill] sm:$0xff] %v6990_v41 }
 0x3b4   : > { %2297 = vmatmul.bf16.gmra.mxu1 %v4684_v44  ;;  %8693 = vst [vmem:[#allocation126_spill] sm:$0xff] %v6999_v20 }
 0x3b5   : > { %3193 = vmatpush.bf16.msra.mxu3 %v2428_v1  ;;  %8698 = vst [vmem:[#allocation201_spill] sm:$0xff] %v7030_v48 }
 0x3b7   : > { %v6988_v56 = vpop.f32.mrf.mxu3 }
 0x3b8   : > { %8690 = vst [vmem:[#allocation64_spill] sm:$0xff] %v6988_v56  ;;  %v1931_v30 = vpop.f32.mrf.mxu0 }
 0x3b9   : > { %v6996_v60 = vadd.f32 %v1931_v30, %v6580_v12  ;;  %v2260_v11 = vpop.f32.mrf.mxu1  ;;  %3194 = vmatpush.bf16.msra.mxu3 %v2426_v35 }
 0x3ba   : > { %v7002_v46 = vadd.f32 %v2260_v11, %v6580_v12 }
 0x3bc   : > { %8694 = vst [vmem:[#allocation200_spill] sm:$0xff] %v7002_v46  ;;  %3185 = vmatmul.bf16.gmra.mxu2 %v6990_v41  ;;  %v8722_v46 = vld [vmem:[#allocation86_spill] sm:$0xff] }
 0x3bd   : > { %3195 = vmatpush.bf16.msra.mxu3 %v8695_v18  ;;  %v4702_v18 = vld [vmem:[%s8216_s3 + $0x54] sm:$0xf] }
 0x3bf   : > { %v3137_v42 = vpop.f32.mrf.mxu3 }
 0x3c0   : > { %v7016_v12 = vadd.f32 %v3137_v42, %v6746_v57  ;;  %v1934_v44 = vpop.f32.mrf.mxu0  ;;  %v4371_v57 = vld [vmem:[%s8216_s3 + $0x30] sm:$0xf0] }
 0x3c1   : > { %v2263_v2 = vpop.f32.mrf.mxu1  ;;  %3196 = vmatpush.bf16.msra.mxu3 %v8696_v23  ;;  %v7032_v1 = vor.u32 %v4694_v21, %v4371_v57  ;;  %v7035_v54 = vadd.f32 %v1934_v44, %v6521_v63  ;;  %v4403_v42 = vld [vmem:[%s8216_s3 + $0x70] sm:$0xf0] }
 0x3c2   : > { %v7044_v25 = vadd.f32 %v2263_v2, %v6521_v63  ;;  %v7068_v2 = vor.u32 %v4702_v18, %v4403_v42 }
 0x3c3   : > { %1973 = vmatmul.bf16.gmra.mxu0 %v4685_v43  ;;  %8699 = vst [vmem:[#allocation202_spill] sm:$0xff] %v7032_v1 }
 0x3c4   : > { %2302 = vmatmul.bf16.gmra.mxu1 %v4685_v43  ;;  %8702 = vst [vmem:[#allocation123_spill] sm:$0xff] %v7044_v25 }
 0x3c5   : > { %3197 = vmatpush.bf16.msra.mxu3 %v8697_v52  ;;  %8704 = vst [vmem:[#allocation204_spill] sm:$0xff] %v7068_v2 }
 0x3c8   : > { %v1936_v50 = vpop.f32.mrf.mxu0 }
 0x3c9   : > { %v7038_v58 = vadd.f32 %v1936_v50, %v8700_v19  ;;  %v2265_v16 = vpop.f32.mrf.mxu1  ;;  %3198 = vmatpush.bf16.msra.mxu3 %v8701_v4  ;;  %v4687_v4 = vld [vmem:[%s8214_s1 + $0x1d8] sm:$0xff] }
 0x3ca   : > { %v7047_v33 = vadd.f32 %v2265_v16, %v8700_v19 }
 0x3cc   : > { %8703 = vst [vmem:[#allocation203_spill] sm:$0xff] %v7047_v33  ;;  %3199 = vmatmul.bf16.vlgmr.msra.gmra.mxu3 %v7032_v1 }
 0x3cf   : > { %v3151_v39 = vpop.f32.mrf.mxu2 }
 0x3d0   : > { %v7058_v53 = vadd.f32 %v3151_v39, %v6791_v29  ;;  %v1939_v63 = vpop.f32.mrf.mxu0 }
 0x3d1   : > { %v2268_v11 = vpop.f32.mrf.mxu1  ;;  %v7071_v29 = vadd.f32 %v1939_v63, %v6510_v36  ;;  %v4435_v63 = vld [vmem:[%s8216_s3 + $0xb0] sm:$0xf0] }
 0x3d2   : > { %v7077_v21 = vadd.f32 %v2268_v11, %v6510_v36 }
 0x3d3   : > { %1978 = vmatmul.bf16.gmra.mxu0 %v4686_v34 }
 0x3d4   : > { %2307 = vmatmul.bf16.gmra.mxu1 %v4686_v34  ;;  %8705 = vst [vmem:[#allocation205_spill] sm:$0xff] %v7077_v21 }
 0x3d7   : > { %v7066_v43 = vpop.f32.mrf.mxu2 }
 0x3d8   : > { %v1941_v44 = vpop.f32.mrf.mxu0 }
 0x3d9   : > { %v7074_v23 = vadd.f32 %v1941_v44, %v6485_v27  ;;  %v2270_v52 = vpop.f32.mrf.mxu1  ;;  %v8709_v44 = vld [vmem:[#allocation106_spill] sm:$0xff] }
 0x3da   : > { %v7080_v57 = vadd.f32 %v2270_v52, %v6485_v27  ;;  %v4710_v27 = vld [vmem:[%s8216_s3 + $0x94] sm:$0xf] }
 0x3db   : > { %v7101_v42 = vor.u32 %v4710_v27, %v4435_v63  ;;  %v4688_v63 = vld [vmem:[%s8214_s1 + $0x1e0] sm:$0xff] }
 0x3dc   : > { %8706 = vst [vmem:[#allocation206_spill] sm:$0xff] %v7080_v57  ;;  %3204 = vmatmul.bf16.gmra.mxu3 %v7068_v2  ;;  %v8724_v57 = vld [vmem:[#allocation88_spill] sm:$0xff] }
 0x3dd   : > { %8708 = vst [vmem:[#allocation208_spill] sm:$0xff] %v7101_v42 }
 0x3df   : > { %v3156_v16 = vpop.f32.mrf.mxu2 }
 0x3e0   : > { %v7091_v39 = vadd.f32 %v3156_v16, %v6827_v9  ;;  %v1944_v36 = vpop.f32.mrf.mxu0 }
 0x3e1   : > { %v2273_v34 = vpop.f32.mrf.mxu1  ;;  %v7104_v9 = vadd.f32 %v1944_v36, %v8709_v44 }
 0x3e3   : > { %1983 = vmatmul.bf16.gmra.mxu0 %v4687_v4 }
 0x3e4   : > { %2312 = vmatmul.bf16.gmra.mxu1 %v4687_v4  ;;  %v7110_v4 = vadd.f32 %v2273_v34, %v8709_v44  ;;  %v4718_v44 = vld [vmem:[%s8216_s3 + $0xd4] sm:$0xf] }
 0x3e6   : > { %8710 = vst [vmem:[#allocation106_spill] sm:$0xff] %v7110_v4 }
 0x3e7   : > { %v7099_v11 = vpop.f32.mrf.mxu2 }
 0x3e8   : > { %8707 = vst [vmem:[#allocation207_spill] sm:$0xff] %v7099_v11  ;;  %v1946_v18 = vpop.f32.mrf.mxu0 }
 0x3e9   : > { %v7107_v52 = vadd.f32 %v1946_v18, %v6483_v6  ;;  %v2275_v16 = vpop.f32.mrf.mxu1 }
 0x3ea   : > { %v7113_v3 = vadd.f32 %v2275_v16, %v6483_v6  ;;  %v4467_v16 = vld [vmem:[%s8216_s3 + $0xf0] sm:$0xf0] }
 0x3eb   : > { %v7138_v0 = vor.u32 %v4718_v44, %v4467_v16  ;;  %v4726_v44 = vld [vmem:[%s8216_s3 + $0x114] sm:$0xf] }
 0x3ec   : > { %8711 = vst [vmem:[#allocation209_spill] sm:$0xff] %v7113_v3  ;;  %3209 = vmatmul.bf16.gmra.mxu3 %v7101_v42  ;;  %v4499_v16 = vld [vmem:[%s8216_s3 + $0x130] sm:$0xf0] }
 0x3ed   : > { %8714 = vst [vmem:[#allocation212_spill] sm:$0xff] %v7138_v0  ;;  %v7159_v42 = vor.u32 %v4726_v44, %v4499_v16  ;;  %v4734_v44 = vld [vmem:[%s8216_s3 + $0x154] sm:$0xf] }
 0x3ee   : > { %v4531_v16 = vld [vmem:[%s8216_s3 + $0x170] sm:$0xf0] }
 0x3ef   : > { %v3161_v36 = vpop.f32.mrf.mxu2  ;;  %8716 = vst [vmem:[#allocation214_spill] sm:$0xff] %v7159_v42  ;;  %v7180_v48 = vor.u32 %v4734_v44, %v4531_v16  ;;  %v4742_v44 = vld [vmem:[%s8216_s3 + $0x194] sm:$0xf] }
 0x3f0   : > { %v7124_v18 = vadd.f32 %v3161_v36, %v6863_v14  ;;  %v7126_v34 = vpop.f32.mrf.mxu0  ;;  %v4563_v16 = vld [vmem:[%s8216_s3 + $0x1b0] sm:$0xf0] }
 0x3f1   : > { %v7128_v6 = vpop.f32.mrf.mxu1  ;;  %8718 = vst [vmem:[#allocation216_spill] sm:$0xff] %v7180_v48  ;;  %v7201_v20 = vor.u32 %v4742_v44, %v4563_v16  ;;  %v8725_v3 = vld [vmem:[#allocation104_spill] sm:$0xff] }
 0x3f2   : > { %8712 = vst [vmem:[#allocation210_spill] sm:$0xff] %v7128_v6 }
 0x3f3   : > { %1988 = vmatmul.bf16.gmra.mxu0 %v4688_v63  ;;  %8720 = vst [vmem:[#allocation218_spill] sm:$0xff] %v7201_v20 }
 0x3f4   : > { %2317 = vmatmul.bf16.gmra.mxu1 %v4688_v63  ;;  %v4689_v63 = vld [vmem:[%s8214_s1 + $0x1e8] sm:$0xff] }
 0x3f7   : > { %v7136_v19 = vpop.f32.mrf.mxu2 }
 0x3f8   : > { %8713 = vst [vmem:[#allocation211_spill] sm:$0xff] %v7136_v19  ;;  %v1951_v27 = vpop.f32.mrf.mxu0 }
 0x3f9   : > { %v7140_v14 = vpop.f32.mrf.mxu1 }
 0x3fc   : > { %3214 = vmatmul.bf16.gmra.mxu3 %v7138_v0 }
 0x3ff   : > { %v3166_v36 = vpop.f32.mrf.mxu2 }
 0x400   : > { %v7147_v47 = vadd.f32 %v3166_v36, %v6895_v22  ;;  %v1954_v35 = vpop.f32.mrf.mxu0 }
 0x401   : > { %v7149_v50 = vpop.f32.mrf.mxu1 }
 0x403   : > { %1993 = vmatmul.bf16.gmra.mxu0 %v4689_v63 }
 0x404   : > { %2322 = vmatmul.bf16.gmra.mxu1 %v4689_v63  ;;  %v4690_v63 = vld [vmem:[%s8214_s1 + $0x1f0] sm:$0xff] }
 0x407   : > { %v7157_v30 = vpop.f32.mrf.mxu2 }
 0x408   : > { %8715 = vst [vmem:[#allocation213_spill] sm:$0xff] %v7157_v30  ;;  %v1956_v0 = vpop.f32.mrf.mxu0 }
 0x409   : > { %v7161_v22 = vpop.f32.mrf.mxu1  ;;  %v1957_v15 = vadd.f32 %v1956_v0, %v6362_v55  ;;  %v4595_v0 = vld [vmem:[%s8216_s3 + $0x1f0] sm:$0xf0] }
 0x40c   : > { %3219 = vmatmul.bf16.gmra.mxu3 %v7159_v42 }
 0x40f   : > { %v3171_v36 = vpop.f32.mrf.mxu2 }
 0x410   : > { %v7168_v2 = vadd.f32 %v3171_v36, %v6920_v32  ;;  %v1959_v1 = vpop.f32.mrf.mxu0 }
 0x411   : > { %v7170_v41 = vpop.f32.mrf.mxu1  ;;  %v1960_v13 = vadd.f32 %v1959_v1, %v8724_v57 }
 0x413   : > { %1998 = vmatmul.bf16.gmra.mxu0 %v4690_v63 }
 0x414   : > { %2327 = vmatmul.bf16.gmra.mxu1 %v4690_v63  ;;  %v4691_v63 = vld [vmem:[%s8214_s1 + $0x1f8] sm:$0xff] }
 0x417   : > { %v7178_v42 = vpop.f32.mrf.mxu2 }
 0x418   : > { %8717 = vst [vmem:[#allocation215_spill] sm:$0xff] %v7178_v42  ;;  %v1961_v10 = vpop.f32.mrf.mxu0 }
 0x419   : > { %v7182_v32 = vpop.f32.mrf.mxu1 }
 0x41c   : > { %3224 = vmatmul.bf16.gmra.mxu3 %v7180_v48 }
 0x41f   : > { %v3176_v36 = vpop.f32.mrf.mxu2 }
 0x420   : > { %v7189_v56 = vadd.f32 %v3176_v36, %v6945_v31  ;;  %v1964_v30 = vpop.f32.mrf.mxu0  ;;  %v8721_v31 = vld [vmem:[#allocation111_spill] sm:$0xff] }
 0x421   : > { %v7191_v19 = vpop.f32.mrf.mxu1  ;;  %v1965_v36 = vadd.f32 %v1964_v30, %v8721_v31 }
 0x423   : > { %2003 = vmatmul.bf16.gmra.mxu0 %v4691_v63 }
 0x424   : > { %2332 = vmatmul.bf16.gmra.mxu1 %v4691_v63  ;;  %v8723_v63 = vld [vmem:[#allocation125_spill] sm:$0xff] }
 0x425   : > { %v1962_v11 = vadd.f32 %v1961_v10, %v8723_v63  ;;  %v1952_v10 = vadd.f32 %v1951_v27, %v8725_v3 }
 0x427   : > { %v7199_v48 = vpop.f32.mrf.mxu2 }
 0x428   : > { %8719 = vst [vmem:[#allocation217_spill] sm:$0xff] %v7199_v48  ;;  %v1966_v42 = vpop.f32.mrf.mxu0  ;;  %v2446_v48 = vpack.c.bf16 %v1962_v11, %v1960_v13  ;;  %v4750_v13 = vld [vmem:[%s8216_s3 + $0x1d4] sm:$0xf]  ;;  %v8730_v11 = vld [vmem:[#allocation131_spill] sm:$0xff] }
 0x429   : > { %v1967_v25 = vadd.f32 %v1966_v42, %v8722_v46  ;;  %v7205_v33 = vpop.f32.mrf.mxu1  ;;  %v1955_v42 = vadd.f32 %v1954_v35, %v6377_v28 }
 0x42b   : > { %v2448_v21 = vpack.c.bf16 %v1967_v25, %v1965_v36  ;;  %v2444_v25 = vpack.c.bf16 %v1957_v15, %v1955_v42  ;;  %v8726_v36 = vld [vmem:[#allocation133_spill] sm:$0xff] }
 0x42c   : > { %3229 = vmatmul.bf16.gmra.mxu3 %v7201_v20  ;;  %v1950_v20 = vadd.f32 %v7126_v34, %v8726_v36 }
 0x42d   : > { %3240 = vmatpush.bf16.msrb.mxu2 %v2448_v21  ;;  %v8729_v21 = vld [vmem:[#allocation163_spill] sm:$0xff] }
 0x42f   : > { %v3181_v4 = vpop.f32.mrf.mxu2 }
 0x430   : > { %v7212_v44 = vadd.f32 %v3181_v4, %v6975_v59  ;;  %v1969_v30 = vpop.f32.mrf.mxu0  ;;  %v2442_v59 = vpack.c.bf16 %v1952_v10, %v1950_v20  ;;  %v4409_v10 = vld [vmem:[%s8216_s3 + $0x58] sm:$0xf] }
 0x431   : > { %v2298_v16 = vpop.f32.mrf.mxu1  ;;  %3241 = vmatpush.bf16.msrb.mxu2 %v2446_v48  ;;  %v7226_v48 = vor.u32 %v4750_v13, %v4595_v0  ;;  %v7229_v15 = vadd.f32 %v1969_v30, %v8729_v21  ;;  %v8733_v30 = vpack.c.bf16 %v7107_v52, %v7104_v9  ;;  %v4699_v9 = vld [vmem:[%s8216_s3 + $0x34] sm:$0xf0] }
 0x432   : > { %v7235_v34 = vadd.f32 %v2298_v16, %v8729_v21  ;;  %v4377_v21 = vld [vmem:[%s8216_s3 + $0x18] sm:$0xf] }
 0x433   : > { %8728 = vst [vmem:[#allocation86_spill] sm:$0xff] %v7226_v48 }
 0x434   : > { %8731 = vst [vmem:[#allocation125_spill] sm:$0xff] %v7235_v34 }
 0x435   : > { %3242 = vmatpush.bf16.msrb.mxu2 %v2444_v25 }
 0x437   : > { %v7224_v1 = vpop.f32.mrf.mxu2 }
 0x438   : > { %8727 = vst [vmem:[#allocation111_spill] sm:$0xff] %v7224_v1  ;;  %v1971_v35 = vpop.f32.mrf.mxu0 }
 0x439   : > { %v7232_v4 = vadd.f32 %v1971_v35, %v8730_v11  ;;  %v2300_v27 = vpop.f32.mrf.mxu1  ;;  %3243 = vmatpush.bf16.msrb.mxu2 %v2442_v59  ;;  %v8734_v59 = vpack.c.bf16 %v7074_v23, %v7071_v29  ;;  %v8735_v35 = vpack.c.bf16 %v7038_v58, %v7035_v54  ;;  %v8739_v23 = vld [vmem:[#allocation158_spill] sm:$0xff]  ;;  %v8740_v58 = vpack.c.bf16 %v6996_v60, %v6993_v5  ;;  %v8746_v5 = vld [vmem:[#allocation15_spill] sm:$0xff] }
 0x43a   : > { %v7238_v42 = vadd.f32 %v2300_v27, %v8730_v11  ;;  %v7265_v11 = vor.u32 %v4699_v9, %v4377_v21  ;;  %v8738_v27 = vld [vmem:[#allocation162_spill] sm:$0xff]  ;;  %v8744_v21 = vld [vmem:[#allocation16_spill] sm:$0xff] }
 0x43b   : > { %v8747_v60 = vld [vmem:[#allocation14_spill] sm:$0xff] }
 0x43c   : > { %8732 = vst [vmem:[#allocation88_spill] sm:$0xff] %v7238_v42  ;;  %3234 = vmatmul.bf16.gmra.mxu3 %v7226_v48 }
 0x43d   : > { %3244 = vmatpush.bf16.msrb.mxu2 %v8733_v30  ;;  %8737 = vst [vmem:[#allocation163_spill] sm:$0xff] %v7265_v11 }
 0x43f   : > { %v3186_v25 = vpop.f32.mrf.mxu2 }
 0x440   : > { %v7249_v13 = vadd.f32 %v3186_v25, %v7016_v12  ;;  %v1974_v16 = vpop.f32.mrf.mxu0  ;;  %v7263_v12 = vpop.f32.mrf.mxu3 }
 0x441   : > { %v2303_v0 = vpop.f32.mrf.mxu1  ;;  %3245 = vmatpush.bf16.msrb.mxu2 %v8734_v59  ;;  %8736 = vst [vmem:[#allocation104_spill] sm:$0xff] %v7263_v12  ;;  %v7268_v29 = vadd.f32 %v1974_v16, %v8738_v27  ;;  %v8756_v16 = vld [vmem:[#allocation116_spill] sm:$0xff] }
 0x442   : > { %v7277_v25 = vadd.f32 %v2303_v0, %v8738_v27 }
 0x444   : > { %8741 = vst [vmem:[#allocation131_spill] sm:$0xff] %v7277_v25 }
 0x445   : > { %3246 = vmatpush.bf16.msrb.mxu2 %v8735_v35  ;;  %v8743_v35 = vld [vmem:[#allocation17_spill] sm:$0xff] }
 0x446   : > { %v8745_v9 = vpack.c.bf16 %v8743_v35, %v8744_v21  ;;  %v8749_v35 = vld [vmem:[#allocation13_spill] sm:$0xff]  ;;  %v8750_v21 = vld [vmem:[#allocation12_spill] sm:$0xff] }
 0x448   : > { %v1976_v52 = vpop.f32.mrf.mxu0 }
 0x449   : > { %v7271_v30 = vadd.f32 %v1976_v52, %v8739_v23  ;;  %v2305_v54 = vpop.f32.mrf.mxu1  ;;  %3247 = vmatpush.bf16.msrb.mxu2 %v8740_v58  ;;  %v8748_v58 = vpack.c.bf16 %v8746_v5, %v8747_v60  ;;  %v4707_v52 = vld [vmem:[%s8216_s3 + $0x74] sm:$0xf0]  ;;  %v8752_v5 = vld [vmem:[#allocation11_spill] sm:$0xff]  ;;  %v8753_v60 = vld [vmem:[#allocation10_spill] sm:$0xff] }
 0x44a   : > { %v7280_v59 = vadd.f32 %v2305_v54, %v8739_v23  ;;  %v7310_v20 = vor.u32 %v4707_v52, %v4409_v10  ;;  %v4441_v52 = vld [vmem:[%s8216_s3 + $0x98] sm:$0xf] }
 0x44b   : > { %v4715_v10 = vld [vmem:[%s8216_s3 + $0xb4] sm:$0xf0] }
 0x44c   : > { %8742 = vst [vmem:[#allocation162_spill] sm:$0xff] %v7280_v59  ;;  %3248 = vmatmul.bf16.vlgmr.msrb.gmra.mxu2 %v7265_v11 }
 0x44d   : > { %3338 = vmatpush.bf16.msra.mxu2 %v8745_v9  ;;  %v8751_v9 = vpack.c.bf16 %v8749_v35, %v8750_v21  ;;  %8755 = vst [vmem:[#allocation158_spill] sm:$0xff] %v7310_v20  ;;  %v8757_v21 = vld [vmem:[#allocation156_spill] sm:$0xff] }
 0x44f   : > { %v3200_v0 = vpop.f32.mrf.mxu3 }
 0x450   : > { %v7294_v27 = vadd.f32 %v3200_v0, %v7058_v53  ;;  %v1979_v23 = vpop.f32.mrf.mxu0 }
 0x451   : > { %3339 = vmatpush.bf16.msra.mxu2 %v8748_v58  ;;  %v2308_v54 = vpop.f32.mrf.mxu1  ;;  %v8754_v58 = vpack.c.bf16 %v8752_v5, %v8753_v60  ;;  %v7313_v35 = vadd.f32 %v1979_v23, %v8756_v16  ;;  %v8760_v5 = vld [vmem:[#allocation9_spill] sm:$0xff]  ;;  %v8761_v60 = vld [vmem:[#allocation8_spill] sm:$0xff]  ;;  %v8763_v23 = vld [vmem:[#allocation7_spill] sm:$0xff] }
 0x452   : > { %v7319_v11 = vadd.f32 %v2308_v54, %v8756_v16 }
 0x454   : > { %8758 = vst [vmem:[#allocation17_spill] sm:$0xff] %v7319_v11  ;;  %v8778_v11 = vld [vmem:[#allocation113_spill] sm:$0xff] }
 0x455   : > { %3340 = vmatpush.bf16.msra.mxu2 %v8751_v9 }
 0x457   : > { %v7308_v53 = vpop.f32.mrf.mxu3 }
 0x458   : > { %v1981_v0 = vpop.f32.mrf.mxu0 }
 0x459   : > { %3341 = vmatpush.bf16.msra.mxu2 %v8754_v58  ;;  %v7316_v9 = vadd.f32 %v1981_v0, %v8757_v21  ;;  %v2310_v48 = vpop.f32.mrf.mxu1  ;;  %v8762_v58 = vpack.c.bf16 %v8760_v5, %v8761_v60  ;;  %v8764_v0 = vld [vmem:[#allocation6_spill] sm:$0xff]  ;;  %v8766_v5 = vld [vmem:[#allocation5_spill] sm:$0xff]  ;;  %v8767_v60 = vld [vmem:[#allocation3_spill] sm:$0xff] }
 0x45a   : > { %v7322_v34 = vadd.f32 %v2310_v48, %v8757_v21  ;;  %v8765_v42 = vpack.c.bf16 %v8763_v23, %v8764_v0  ;;  %v8769_v23 = vld [vmem:[#allocation2_spill] sm:$0xff] }
 0x45c   : > { %8759 = vst [vmem:[#allocation16_spill] sm:$0xff] %v7322_v34  ;;  %3253 = vmatmul.bf16.gmra.mxu2 %v7310_v20  ;;  %v8774_v20 = vld [vmem:[#allocation63_spill] sm:$0xff] }
 0x45d   : > { %3342 = vmatpush.bf16.msra.mxu2 %v8762_v58  ;;  %v8768_v58 = vpack.c.bf16 %v8766_v5, %v8767_v60  ;;  %v7355_v60 = vor.u32 %v4715_v10, %v4441_v52  ;;  %v8795_v52 = vld [vmem:[#allocation42_spill] sm:$0xff] }
 0x45f   : > { %v3205_v16 = vpop.f32.mrf.mxu3  ;;  %8776 = vst [vmem:[#allocation14_spill] sm:$0xff] %v7355_v60 }
 0x460   : > { %v7336_v48 = vadd.f32 %v3205_v16, %v7091_v39  ;;  %v1984_v54 = vpop.f32.mrf.mxu0  ;;  %v8773_v16 = vld [vmem:[#allocation65_spill] sm:$0xff] }
 0x461   : > { %3343 = vmatpush.bf16.msra.mxu2 %v8765_v42  ;;  %v2313_v21 = vpop.f32.mrf.mxu1  ;;  %v8770_v42 = vld [vmem:[#allocation4_spill] sm:$0xff]  ;;  %v8775_v25 = vpack.c.bf16 %v8773_v16, %v8774_v20  ;;  %v8785_v16 = vld [vmem:[#allocation53_spill] sm:$0xff] }
 0x462   : > { %v8771_v0 = vpack.c.bf16 %v8769_v23, %v8770_v42  ;;  %v8782_v42 = vld [vmem:[#allocation59_spill] sm:$0xff] }
 0x465   : > { %3344 = vmatpush.bf16.msra.mxu2 %v8768_v58  ;;  %v8777_v58 = vld [vmem:[#allocation147_spill] sm:$0xff] }
 0x466   : > { %v7358_v59 = vadd.f32 %v1984_v54, %v8777_v58  ;;  %v7364_v1 = vadd.f32 %v2313_v21, %v8777_v58  ;;  %v8788_v58 = vld [vmem:[#allocation49_spill] sm:$0xff] }
 0x467   : > { %v7350_v39 = vpop.f32.mrf.mxu3 }
 0x468   : > { %8772 = vst [vmem:[#allocation15_spill] sm:$0xff] %v7350_v39  ;;  %v1986_v5 = vpop.f32.mrf.mxu0 }
 0x469   : > { %3345 = vmatpush.bf16.msra.mxu2 %v8771_v0  ;;  %v7361_v34 = vadd.f32 %v1986_v5, %v8778_v11  ;;  %v2315_v12 = vpop.f32.mrf.mxu1  ;;  %8779 = vst [vmem:[#allocation13_spill] sm:$0xff] %v7364_v1  ;;  %v8784_v0 = vld [vmem:[#allocation54_spill] sm:$0xff] }
 0x46a   : > { %v7367_v23 = vadd.f32 %v2315_v12, %v8778_v11  ;;  %v8786_v21 = vpack.c.bf16 %v8784_v0, %v8785_v16  ;;  %v8787_v5 = vld [vmem:[#allocation50_spill] sm:$0xff]  ;;  %v8792_v16 = vld [vmem:[#allocation45_spill] sm:$0xff] }
 0x46b   : > { %v8789_v20 = vpack.c.bf16 %v8787_v5, %v8788_v58  ;;  %v8791_v0 = vld [vmem:[#allocation46_spill] sm:$0xff]  ;;  %v8796_v5 = vld [vmem:[#allocation41_spill] sm:$0xff] }
 0x46c   : > { %8780 = vst [vmem:[#allocation12_spill] sm:$0xff] %v7367_v23  ;;  %3258 = vmatmul.bf16.gmra.mxu2 %v7355_v60  ;;  %v8798_v60 = vld [vmem:[#allocation39_spill] sm:$0xff]  ;;  %v8799_v1 = vld [vmem:[#allocation38_spill] sm:$0xff] }
 0x46d   : > { %3436 = vmatpush.bf16.msrb.mxu2 %v8775_v25  ;;  %v8781_v25 = vld [vmem:[#allocation60_spill] sm:$0xff]  ;;  %v8800_v23 = vpack.c.bf16 %v8798_v60, %v8799_v1 }
 0x46e   : > { %v8783_v10 = vpack.c.bf16 %v8781_v25, %v8782_v42  ;;  %v4473_v25 = vld [vmem:[%s8216_s3 + $0xd8] sm:$0xf] }
 0x46f   : > { %v3210_v54 = vpop.f32.mrf.mxu3  ;;  %v4723_v42 = vld [vmem:[%s8216_s3 + $0xf4] sm:$0xf0] }
 0x470   : > { %v7381_v12 = vadd.f32 %v3210_v54, %v7124_v18  ;;  %v1989_v11 = vpop.f32.mrf.mxu0  ;;  %v7397_v54 = vor.u32 %v4723_v42, %v4473_v25  ;;  %v4731_v25 = vld [vmem:[%s8216_s3 + $0x134] sm:$0xf0] }
 0x471   : > { %3437 = vmatpush.bf16.msrb.mxu2 %v8783_v10 }
 0x472   : > { %8794 = vst [vmem:[#allocation10_spill] sm:$0xff] %v7397_v54 }
 0x475   : > { %3438 = vmatpush.bf16.msrb.mxu2 %v8786_v21  ;;  %v8793_v21 = vpack.c.bf16 %v8791_v0, %v8792_v16  ;;  %v8801_v0 = vld [vmem:[#allocation36_spill] sm:$0xff]  ;;  %v8802_v16 = vld [vmem:[#allocation35_spill] sm:$0xff] }
 0x477   : > { %v7392_v10 = vpop.f32.mrf.mxu3 }
 0x478   : > { %8790 = vst [vmem:[#allocation11_spill] sm:$0xff] %v7392_v10  ;;  %v1991_v18 = vpop.f32.mrf.mxu0 }
 0x479   : > { %3439 = vmatpush.bf16.msrb.mxu2 %v8789_v20  ;;  %v8797_v20 = vpack.c.bf16 %v8795_v52, %v8796_v5  ;;  %v4505_v52 = vld [vmem:[%s8216_s3 + $0x118] sm:$0xf] }
 0x47a   : > { %v7420_v60 = vor.u32 %v4731_v25, %v4505_v52 }
 0x47c   : > { %3263 = vmatmul.bf16.gmra.mxu2 %v7397_v54  ;;  %8805 = vst [vmem:[#allocation156_spill] sm:$0xff] %v7420_v60 }
 0x47d   : > { %3440 = vmatpush.bf16.msrb.mxu2 %v8793_v21  ;;  %v8803_v21 = vpack.c.bf16 %v8801_v0, %v8802_v16 }
 0x47f   : > { %v3215_v58 = vpop.f32.mrf.mxu3 }
 0x480   : > { %v7407_v10 = vadd.f32 %v3215_v58, %v7147_v47  ;;  %v1994_v39 = vpop.f32.mrf.mxu0  ;;  %v4739_v58 = vld [vmem:[%s8216_s3 + $0x174] sm:$0xf0] }
 0x481   : > { %3441 = vmatpush.bf16.msrb.mxu2 %v8797_v20  ;;  %v4537_v20 = vld [vmem:[%s8216_s3 + $0x158] sm:$0xf] }
 0x485   : > { %3442 = vmatpush.bf16.msrb.mxu2 %v8800_v23 }
 0x487   : > { %v7418_v42 = vpop.f32.mrf.mxu3 }
 0x488   : > { %8804 = vst [vmem:[#allocation116_spill] sm:$0xff] %v7418_v42  ;;  %v1996_v1 = vpop.f32.mrf.mxu0  ;;  %v8810_v42 = vld [vmem:[#allocation115_spill] sm:$0xff] }
 0x489   : > { %3443 = vmatpush.bf16.msrb.mxu2 %v8803_v21  ;;  %v7434_v21 = vor.u32 %v4739_v58, %v4537_v20  ;;  %v8809_v58 = vld [vmem:[#allocation120_spill] sm:$0xff]  ;;  %v1997_v37 = vadd.f32 %v1996_v1, %v8813_v17 }
 0x48b   : > { %8807 = vst [vmem:[#allocation8_spill] sm:$0xff] %v7434_v21 }
 0x48c   : > { %3268 = vmatmul.bf16.gmra.mxu2 %v7420_v60  ;;  %v4747_v60 = vld [vmem:[%s8216_s3 + $0x1b4] sm:$0xf0] }
 0x48f   : > { %v3220_v47 = vpop.f32.mrf.mxu3 }
 0x490   : > { %v7424_v23 = vadd.f32 %v3220_v47, %v7168_v2  ;;  %v1999_v5 = vpop.f32.mrf.mxu0  ;;  %v4569_v47 = vld [vmem:[%s8216_s3 + $0x198] sm:$0xf] }
 0x491   : > { %v7448_v20 = vor.u32 %v4747_v60, %v4569_v47  ;;  %v2000_v26 = vadd.f32 %v1999_v5, %v8812_v7  ;;  %v8814_v60 = vld [vmem:[#allocation99_spill] sm:$0xff]  ;;  %v4695_v5 = vld [vmem:[%s8216_s3 + $0x1c] sm:$0xf] }
 0x492   : > { %v1995_v47 = vadd.f32 %v1994_v39, %v8814_v60 }
 0x497   : > { %v7432_v0 = vpop.f32.mrf.mxu3 }
 0x498   : > { %8806 = vst [vmem:[#allocation9_spill] sm:$0xff] %v7432_v0  ;;  %v2001_v16 = vpop.f32.mrf.mxu0 }
 0x49c   : > { %3273 = vmatmul.bf16.gmra.mxu2 %v7434_v21 }
 0x49f   : > { %v3225_v52 = vpop.f32.mrf.mxu3 }
 0x4a0   : > { %v7438_v2 = vadd.f32 %v3225_v52, %v7189_v56  ;;  %v2004_v25 = vpop.f32.mrf.mxu0  ;;  %v8811_v56 = vld [vmem:[#allocation96_spill] sm:$0xff] }
 0x4a1   : > { %v2005_v21 = vadd.f32 %v2004_v25, %v8809_v58  ;;  %v2002_v52 = vadd.f32 %v2001_v16, %v8811_v56  ;;  %v8815_v25 = vld [vmem:[#allocation139_spill] sm:$0xff]  ;;  %v2460_v58 = vpack.c.bf16 %v1997_v37, %v1995_v47  ;;  %v8817_v37 = vpack.c.bf16 %v7361_v34, %v7358_v59  ;;  %v4379_v34 = vld [vmem:[%s8216_s3 + $0x38] sm:$0xf0]  ;;  %v7491_v59 = vpop.f32.mrf.mxu2  ;;  %v8827_v47 = vld [vmem:[#allocation30_spill] sm:$0xff] }
 0x4a2   : > { %v8816_v16 = vld [vmem:[#allocation143_spill] sm:$0xff] }
 0x4a3   : > { %v2462_v6 = vpack.c.bf16 %v2002_v52, %v2000_v26  ;;  %v4755_v26 = vld [vmem:[%s8216_s3 + $0x1f4] sm:$0xf0]  ;;  %v8826_v52 = vld [vmem:[#allocation31_spill] sm:$0xff] }
 0x4a7   : > { %v7446_v54 = vpop.f32.mrf.mxu3 }
 0x4a8   : > { %8808 = vst [vmem:[#allocation7_spill] sm:$0xff] %v7446_v54  ;;  %v2006_v0 = vpop.f32.mrf.mxu0 }
 0x4a9   : > { %v2007_v62 = vadd.f32 %v2006_v0, %v8810_v42  ;;  %v1992_v0 = vadd.f32 %v1991_v18, %v8815_v25  ;;  %v8819_v18 = vpack.c.bf16 %v7271_v30, %v7268_v29  ;;  %v8824_v30 = vld [vmem:[#allocation34_spill] sm:$0xff] }
 0x4ab   : > { %v2464_v61 = vpack.c.bf16 %v2007_v62, %v2005_v21  ;;  %v1990_v62 = vadd.f32 %v1989_v11, %v8816_v16  ;;  %v8818_v11 = vpack.c.bf16 %v7316_v9, %v7313_v35  ;;  %v8820_v35 = vpack.c.bf16 %v7232_v4, %v7229_v15  ;;  %v8821_v9 = vld [vmem:[#allocation33_spill] sm:$0xff]  ;;  %v8822_v21 = vld [vmem:[#allocation32_spill] sm:$0xff]  ;;  %v8829_v4 = vld [vmem:[#allocation182_spill] sm:$0xff] }
 0x4ac   : > { %3278 = vmatmul.bf16.gmra.mxu2 %v7448_v20  ;;  %v8823_v29 = vpack.c.bf16 %v8821_v9, %v8822_v21 }
 0x4ad   : > { %3289 = vmatpush.bf16.msrb.mxu3 %v2464_v61  ;;  %v4601_v61 = vld [vmem:[%s8216_s3 + $0x1d8] sm:$0xf]  ;;  %v2458_v1 = vpack.c.bf16 %v1992_v0, %v1990_v62  ;;  %v8828_v0 = vpack.c.bf16 %v8826_v52, %v8827_v47  ;;  %v8845_v47 = vld [vmem:[#allocation24_spill] sm:$0xff] }
 0x4ae   : > { %v8844_v52 = vld [vmem:[#allocation25_spill] sm:$0xff] }
 0x4af   : > { %v3230_v36 = vpop.f32.mrf.mxu3 }
 0x4b0   : > { %v7457_v54 = vadd.f32 %v3230_v36, %v7212_v44  ;;  %v7470_v36 = vor.u32 %v4755_v26, %v4601_v61  ;;  %v8830_v61 = vld [vmem:[#allocation181_spill] sm:$0xff] }
 0x4b1   : > { %3290 = vmatpush.bf16.msrb.mxu3 %v2462_v6  ;;  %v8831_v26 = vpack.c.bf16 %v8829_v4, %v8830_v61  ;;  %v8848_v4 = vld [vmem:[#allocation161_spill] sm:$0xff]  ;;  %v8849_v61 = vld [vmem:[#allocation159_spill] sm:$0xff] }
 0x4b5   : > { %3291 = vmatpush.bf16.msrb.mxu3 %v2460_v58  ;;  %v8825_v58 = vpack.c.bf16 %v6690_v40, %v6687_v8  ;;  %v4703_v8 = vld [vmem:[%s8216_s3 + $0x5c] sm:$0xf] }
 0x4b7   : > { %v7468_v44 = vpop.f32.mrf.mxu3 }
 0x4b9   : > { %3292 = vmatpush.bf16.msrb.mxu3 %v2458_v1  ;;  %v8832_v1 = vld [vmem:[#allocation29_spill] sm:$0xff] }
 0x4bc   : > { %3283 = vmatmul.bf16.gmra.mxu2 %v7470_v36 }
 0x4bd   : > { %3293 = vmatpush.bf16.msrb.mxu3 %v8817_v37  ;;  %v8833_v37 = vld [vmem:[#allocation28_spill] sm:$0xff] }
 0x4bf   : > { %v3235_v6 = vpop.f32.mrf.mxu3 }
 0x4c0   : > { %v7477_v39 = vadd.f32 %v3235_v6, %v7249_v13  ;;  %v7493_v13 = vor.u32 %v4695_v5, %v4379_v34  ;;  %v8834_v6 = vpack.c.bf16 %v8832_v1, %v8833_v37  ;;  %v8838_v5 = vld [vmem:[#allocation27_spill] sm:$0xff]  ;;  %v8839_v34 = vld [vmem:[#allocation26_spill] sm:$0xff] }
 0x4c1   : > { %3294 = vmatpush.bf16.msrb.mxu3 %v8818_v11  ;;  %v8835_v11 = vld [vmem:[#allocation174_spill] sm:$0xff]  ;;  %v8851_v1 = vld [vmem:[#allocation23_spill] sm:$0xff] }
 0x4c2   : > { %v8852_v37 = vld [vmem:[#allocation22_spill] sm:$0xff] }
 0x4c5   : > { %3295 = vmatpush.bf16.msrb.mxu3 %v8819_v18  ;;  %v8836_v18 = vld [vmem:[#allocation173_spill] sm:$0xff] }
 0x4c6   : > { %v8837_v40 = vpack.c.bf16 %v8835_v11, %v8836_v18 }
 0x4c9   : > { %3296 = vmatpush.bf16.msrb.mxu3 %v8820_v35  ;;  %v8840_v35 = vpack.c.bf16 %v8838_v5, %v8839_v34  ;;  %v8857_v5 = vld [vmem:[#allocation21_spill] sm:$0xff]  ;;  %v8858_v34 = vld [vmem:[#allocation20_spill] sm:$0xff] }
 0x4cc   : > { %3297 = vmatmul.bf16.vlgmr.msrb.gmra.mxu3 %v7493_v13  ;;  %3346 = vmatmul.bf16.vlgmr.msra.gmra.mxu2 %v8824_v30  ;;  %v8842_v30 = vld [vmem:[#allocation166_spill] sm:$0xff] }
 0x4cd   : > { %3387 = vmatpush.bf16.msra.mxu3 %v8823_v29  ;;  %3534 = vmatpush.bf16.msra.mxu2 %v8825_v58  ;;  %v8841_v29 = vld [vmem:[#allocation167_spill] sm:$0xff] }
 0x4ce   : > { %v8843_v58 = vpack.c.bf16 %v8841_v29, %v8842_v30  ;;  %v8860_v29 = vld [vmem:[#allocation148_spill] sm:$0xff]  ;;  %v8861_v30 = vld [vmem:[#allocation145_spill] sm:$0xff] }
 0x4cf   : > { %v3249_v62 = vpop.f32.mrf.mxu2 }
 0x4d0   : > { %v7510_v15 = vadd.f32 %v3249_v62, %v7294_v27  ;;  %v4411_v27 = vld [vmem:[%s8216_s3 + $0x78] sm:$0xf0] }
 0x4d1   : > { %3388 = vmatpush.bf16.msra.mxu3 %v8828_v0  ;;  %3535 = vmatpush.bf16.msra.mxu2 %v8831_v26  ;;  %v7532_v21 = vor.u32 %v4703_v8, %v4411_v27  ;;  %v8846_v0 = vpack.c.bf16 %v8844_v52, %v8845_v47  ;;  %v8847_v62 = vld [vmem:[#allocation37_spill] sm:$0xff]  ;;  %v8850_v26 = vpack.c.bf16 %v8848_v4, %v8849_v61  ;;  %v8863_v47 = vld [vmem:[#allocation19_spill] sm:$0xff] }
 0x4d2   : > { %v8855_v8 = vld [vmem:[#allocation153_spill] sm:$0xff] }
 0x4d3   : > { %v4711_v52 = vld [vmem:[%s8216_s3 + $0x9c] sm:$0xf] }
 0x4d4   : > { %v8866_v61 = vld [vmem:[#allocation129_spill] sm:$0xff] }
 0x4d5   : > { %3389 = vmatpush.bf16.msra.mxu3 %v8834_v6  ;;  %3536 = vmatpush.bf16.msra.mxu2 %v8837_v40  ;;  %v8853_v6 = vpack.c.bf16 %v8851_v1, %v8852_v37  ;;  %v8854_v40 = vld [vmem:[#allocation155_spill] sm:$0xff] }
 0x4d6   : > { %v8856_v27 = vpack.c.bf16 %v8854_v40, %v8855_v8  ;;  %v8872_v8 = vld [vmem:[#allocation119_spill] sm:$0xff] }
 0x4d7   : > { %v7530_v9 = vpop.f32.mrf.mxu2 }
 0x4d9   : > { %3390 = vmatpush.bf16.msra.mxu3 %v8840_v35  ;;  %3537 = vmatpush.bf16.msra.mxu2 %v8843_v58  ;;  %v8859_v35 = vpack.c.bf16 %v8857_v5, %v8858_v34  ;;  %v8862_v58 = vpack.c.bf16 %v8860_v29, %v8861_v30  ;;  %v8875_v34 = vld [vmem:[#allocation40_spill] sm:$0xff]  ;;  %v8876_v29 = vld [vmem:[#allocation110_spill] sm:$0xff]  ;;  %v8877_v30 = vld [vmem:[#allocation107_spill] sm:$0xff] }
 0x4dc   : > { %3302 = vmatmul.bf16.gmra.mxu3 %v7532_v21  ;;  %3351 = vmatmul.bf16.gmra.mxu2 %v8847_v62 }
 0x4dd   : > { %3391 = vmatpush.bf16.msra.mxu3 %v8846_v0  ;;  %3538 = vmatpush.bf16.msra.mxu2 %v8850_v26  ;;  %v8864_v0 = vld [vmem:[#allocation18_spill] sm:$0xff]  ;;  %v8867_v26 = vld [vmem:[#allocation127_spill] sm:$0xff] }
 0x4de   : > { %v8865_v62 = vpack.c.bf16 %v8863_v47, %v8864_v0  ;;  %v8868_v1 = vpack.c.bf16 %v8866_v61, %v8867_v26  ;;  %v8880_v47 = vld [vmem:[#allocation100_spill] sm:$0xff]  ;;  %v4475_v61 = vld [vmem:[%s8216_s3 + $0xf8] sm:$0xf0] }
 0x4df   : > { %v3254_v11 = vpop.f32.mrf.mxu2 }
 0x4e0   : > { %v7549_v18 = vadd.f32 %v3254_v11, %v7336_v48  ;;  %v4443_v48 = vld [vmem:[%s8216_s3 + $0xb8] sm:$0xf0]  ;;  %v8870_v11 = vld [vmem:[#allocation135_spill] sm:$0xff] }
 0x4e1   : > { %3392 = vmatpush.bf16.msra.mxu3 %v8853_v6  ;;  %3539 = vmatpush.bf16.msra.mxu2 %v8856_v27  ;;  %v7574_v37 = vor.u32 %v4711_v52, %v4443_v48  ;;  %v8869_v6 = vld [vmem:[#allocation137_spill] sm:$0xff]  ;;  %v8879_v48 = vld [vmem:[#allocation102_spill] sm:$0xff] }
 0x4e2   : > { %v8871_v40 = vpack.c.bf16 %v8869_v6, %v8870_v11  ;;  %v8873_v27 = vld [vmem:[#allocation117_spill] sm:$0xff]  ;;  %v8881_v0 = vpack.c.bf16 %v8879_v48, %v8880_v47  ;;  %v8892_v48 = vld [vmem:[#allocation71_spill] sm:$0xff]  ;;  %v8893_v47 = vld [vmem:[#allocation68_spill] sm:$0xff] }
 0x4e3   : > { %v8874_v5 = vpack.c.bf16 %v8872_v8, %v8873_v27  ;;  %v8883_v6 = vld [vmem:[#allocation89_spill] sm:$0xff]  ;;  %v8886_v8 = vld [vmem:[#allocation83_spill] sm:$0xff] }
 0x4e5   : > { %3393 = vmatpush.bf16.msra.mxu3 %v8859_v35  ;;  %3540 = vmatpush.bf16.msra.mxu2 %v8862_v58  ;;  %v8878_v58 = vpack.c.bf16 %v8876_v29, %v8877_v30  ;;  %v8890_v29 = vld [vmem:[#allocation75_spill] sm:$0xff] }
 0x4e7   : > { %v7569_v4 = vpop.f32.mrf.mxu2 }
 0x4e9   : > { %3394 = vmatpush.bf16.msra.mxu3 %v8865_v62  ;;  %3541 = vmatpush.bf16.msra.mxu2 %v8871_v40  ;;  %v4719_v62 = vld [vmem:[%s8216_s3 + $0xdc] sm:$0xf] }
 0x4ea   : > { %v8885_v40 = vld [vmem:[#allocation85_spill] sm:$0xff] }
 0x4eb   : > { %v8887_v27 = vpack.c.bf16 %v8885_v40, %v8886_v8  ;;  %v4735_v8 = vld [vmem:[%s8216_s3 + $0x15c] sm:$0xf] }
 0x4ec   : > { %3307 = vmatmul.bf16.gmra.mxu3 %v7574_v37  ;;  %3356 = vmatmul.bf16.gmra.mxu2 %v8875_v34 }
 0x4ed   : > { %3485 = vmatpush.bf16.msrb.mxu3 %v8868_v1  ;;  %v8882_v1 = vld [vmem:[#allocation91_spill] sm:$0xff] }
 0x4ee   : > { %v8884_v11 = vpack.c.bf16 %v8882_v1, %v8883_v6 }
 0x4ef   : > { %v3259_v35 = vpop.f32.mrf.mxu2 }
 0x4f0   : > { %v7588_v52 = vadd.f32 %v3259_v35, %v7381_v12  ;;  %v7604_v12 = vor.u32 %v4719_v62, %v4475_v61  ;;  %v8889_v35 = vld [vmem:[#allocation77_spill] sm:$0xff] }
 0x4f1   : > { %3486 = vmatpush.bf16.msrb.mxu3 %v8874_v5  ;;  %v8888_v5 = vld [vmem:[#allocation43_spill] sm:$0xff]  ;;  %v8891_v30 = vpack.c.bf16 %v8889_v35, %v8890_v29  ;;  %v4727_v62 = vld [vmem:[%s8216_s3 + $0x11c] sm:$0xf] }
 0x4f2   : > { %v4507_v61 = vld [vmem:[%s8216_s3 + $0x138] sm:$0xf0]  ;;  %v8898_v35 = vld [vmem:[#allocation51_spill] sm:$0xff] }
 0x4f3   : > { %v7628_v6 = vor.u32 %v4727_v62, %v4507_v61  ;;  %v8900_v62 = vld [vmem:[#allocation55_spill] sm:$0xff] }
 0x4f5   : > { %3487 = vmatpush.bf16.msrb.mxu3 %v8878_v58  ;;  %8895 = vst [vmem:[#allocation6_spill] sm:$0xff] %v7628_v6 }
 0x4f7   : > { %v7599_v26 = vpop.f32.mrf.mxu2 }
 0x4f9   : > { %3488 = vmatpush.bf16.msrb.mxu3 %v8881_v0  ;;  %v8894_v0 = vpack.c.bf16 %v8892_v48, %v8893_v47  ;;  %v4571_v48 = vld [vmem:[%s8216_s3 + $0x1b8] sm:$0xf0] }
 0x4fc   : > { %3312 = vmatmul.bf16.gmra.mxu3 %v7604_v12  ;;  %3361 = vmatmul.bf16.gmra.mxu2 %v8888_v5 }
 0x4fd   : > { %3489 = vmatpush.bf16.msrb.mxu3 %v8884_v11 }
 0x4ff   : > { %v3264_v34 = vpop.f32.mrf.mxu2 }
 0x500   : > { %v7615_v58 = vadd.f32 %v3264_v34, %v7407_v10  ;;  %v8896_v10 = vld [vmem:[#allocation47_spill] sm:$0xff] }
 0x501   : > { %3490 = vmatpush.bf16.msrb.mxu3 %v8887_v27  ;;  %v4539_v27 = vld [vmem:[%s8216_s3 + $0x178] sm:$0xf0] }
 0x502   : > { %v7643_v34 = vor.u32 %v4735_v8, %v4539_v27 }
 0x504   : > { %8897 = vst [vmem:[#allocation5_spill] sm:$0xff] %v7643_v34 }
 0x505   : > { %3491 = vmatpush.bf16.msrb.mxu3 %v8891_v30  ;;  %v4743_v30 = vld [vmem:[%s8216_s3 + $0x19c] sm:$0xf] }
 0x507   : > { %v7626_v1 = vpop.f32.mrf.mxu2 }
 0x509   : > { %3492 = vmatpush.bf16.msrb.mxu3 %v8894_v0  ;;  %v7658_v0 = vor.u32 %v4743_v30, %v4571_v48  ;;  %v8903_v30 = vld [vmem:[#allocation168_spill] sm:$0xff]  ;;  %v8904_v48 = vld [vmem:[#allocation70_spill] sm:$0xff] }
 0x50b   : > { %8899 = vst [vmem:[#allocation3_spill] sm:$0xff] %v7658_v0 }
 0x50c   : > { %3317 = vmatmul.bf16.gmra.mxu3 %v7628_v6  ;;  %3366 = vmatmul.bf16.gmra.mxu2 %v8896_v10  ;;  %v4751_v10 = vld [vmem:[%s8216_s3 + $0x1dc] sm:$0xf]  ;;  %v8907_v6 = vld [vmem:[#allocation76_spill] sm:$0xff] }
 0x50f   : > { %v3269_v11 = vpop.f32.mrf.mxu2 }
 0x510   : > { %v7633_v40 = vadd.f32 %v3269_v11, %v7424_v23  ;;  %v4603_v11 = vld [vmem:[%s8216_s3 + $0x1f8] sm:$0xf0] }
 0x511   : > { %v7673_v27 = vor.u32 %v4751_v10, %v4603_v11  ;;  %v2294_v10 = vadd.f32 %v7191_v19, %v8721_v31  ;;  %v8905_v11 = vld [vmem:[#allocation94_spill] sm:$0xff]  ;;  %v8909_v19 = vld [vmem:[#allocation151_spill] sm:$0xff] }
 0x513   : > { %8901 = vst [vmem:[#allocation2_spill] sm:$0xff] %v7673_v27 }
 0x517   : > { %v7641_v5 = vpop.f32.mrf.mxu2 }
 0x51c   : > { %3322 = vmatmul.bf16.gmra.mxu3 %v7643_v34  ;;  %3371 = vmatmul.bf16.gmra.mxu2 %v8898_v35  ;;  %v8902_v35 = vld [vmem:[#allocation61_spill] sm:$0xff] }
 0x51f   : > { %v3274_v29 = vpop.f32.mrf.mxu2 }
 0x520   : > { %v7648_v23 = vadd.f32 %v3274_v29, %v7438_v2 }
 0x527   : > { %v7656_v47 = vpop.f32.mrf.mxu2 }
 0x52c   : > { %3327 = vmatmul.bf16.gmra.mxu3 %v7658_v0  ;;  %3376 = vmatmul.bf16.gmra.mxu2 %v8900_v62  ;;  %v2958_v62 = vadd.f32 %v8904_v48, %v8903_v30  ;;  %v7684_v0 = vpop.f32.mrf.mxu3  ;;  %v2286_v48 = vadd.f32 %v7161_v22, %v6362_v55  ;;  %v8910_v55 = vpack.c.bf16 %v6936_v38, %v6933_v24  ;;  %v8916_v38 = vld [vmem:[#allocation175_spill] sm:$0xff] }
 0x52d   : > { %v2281_v22 = vadd.f32 %v7140_v14, %v8725_v3  ;;  %v8917_v24 = vld [vmem:[#allocation79_spill] sm:$0xff]  ;;  %v8918_v14 = vld [vmem:[#allocation80_spill] sm:$0xff] }
 0x52f   : > { %v3279_v61 = vpop.f32.mrf.mxu2 }
 0x530   : > { %v7663_v2 = vadd.f32 %v3279_v61, %v7457_v54  ;;  %v2296_v61 = vadd.f32 %v7205_v33, %v8722_v46  ;;  %v2289_v46 = vadd.f32 %v7170_v41, %v8724_v57  ;;  %v8908_v33 = vpack.c.bf16 %v6963_v49, %v6960_v45 }
 0x531   : > { %v2284_v45 = vadd.f32 %v7149_v50, %v6377_v28  ;;  %v8913_v28 = vld [vmem:[#allocation74_spill] sm:$0xff] }
 0x532   : > { %v8914_v50 = vld [vmem:[#allocation78_spill] sm:$0xff] }
 0x537   : > { %v7671_v8 = vpop.f32.mrf.mxu2 }
 0x53c   : > { %3332 = vmatmul.bf16.gmra.mxu3 %v7673_v27  ;;  %3381 = vmatmul.bf16.gmra.mxu2 %v8902_v35  ;;  %v3007_v27 = vadd.f32 %v8905_v11, %v2958_v62  ;;  %v2291_v35 = vadd.f32 %v7182_v32, %v8723_v63  ;;  %v8912_v62 = vld [vmem:[#allocation210_spill] sm:$0xff] }
 0x53e   : > { %v3056_v31 = vadd.f32 %v8909_v19, %v3007_v27  ;;  %v2447_v32 = vpack.c.bf16 %v2291_v35, %v2289_v46  ;;  %v8911_v27 = vld [vmem:[#allocation133_spill] sm:$0xff] }
 0x53f   : > { %v3284_v29 = vpop.f32.mrf.mxu2 }
 0x540   : > { %v7678_v54 = vadd.f32 %v3284_v29, %v7477_v39  ;;  %v2449_v39 = vpack.c.bf16 %v2296_v61, %v2294_v10  ;;  %v8906_v29 = vld [vmem:[#allocation44_spill] sm:$0xff]  ;;  %v3105_v41 = vadd.f32 %v6801_v51, %v3056_v31  ;;  %v2445_v51 = vpack.c.bf16 %v2286_v48, %v2284_v45  ;;  %v8928_v45 = vld [vmem:[#allocation106_spill] sm:$0xff] }
 0x541   : > { %v2279_v61 = vadd.f32 %v8912_v62, %v8911_v27  ;;  %v8915_v10 = vpack.c.bf16 %v8913_v28, %v8914_v50  ;;  %v8922_v31 = vld [vmem:[#allocation48_spill] sm:$0xff]  ;;  %v8931_v27 = vld [vmem:[#allocation82_spill] sm:$0xff]  ;;  %v8933_v50 = vld [vmem:[#allocation95_spill] sm:$0xff] }
 0x542   : > { %v3154_v57 = vadd.f32 %v7066_v43, %v3105_v41  ;;  %v2963_v43 = vadd.f32 %v8917_v24, %v8916_v38  ;;  %v8923_v48 = vld [vmem:[#allocation84_spill] sm:$0xff]  ;;  %v8927_v41 = vld [vmem:[#allocation209_spill] sm:$0xff]  ;;  %v8932_v28 = vld [vmem:[#allocation98_spill] sm:$0xff] }
 0x543   : > { %v2443_v35 = vpack.c.bf16 %v2281_v22, %v2279_v61  ;;  %v8935_v24 = vld [vmem:[#allocation206_spill] sm:$0xff] }
 0x547   : > { %v7686_v34 = vpop.f32.mrf.mxu2 }
 0x54c   : > { %3395 = vmatmul.bf16.vlgmr.msra.gmra.mxu3 %v8906_v29  ;;  %3444 = vmatmul.bf16.vlgmr.msrb.gmra.mxu2 %v8907_v6 }
 0x54d   : > { %3583 = vmatpush.bf16.msra.mxu3 %v8908_v33  ;;  %3632 = vmatpush.bf16.msrb.mxu2 %v2449_v39  ;;  %v8921_v33 = vld [vmem:[#allocation103_spill] sm:$0xff] }
 0x54e   : > { %v3012_v19 = vadd.f32 %v8921_v33, %v2963_v43  ;;  %v8936_v43 = vld [vmem:[#allocation205_spill] sm:$0xff] }
 0x54f   : > { %v3298_v63 = vpop.f32.mrf.mxu3  ;;  %v7709_v6 = vpop.f32.mrf.mxu2  ;;  %v8941_v33 = vld [vmem:[#allocation193_spill] sm:$0xff] }
 0x550   : > { %v7713_v49 = vadd.f32 %v3298_v63, %v7510_v15  ;;  %v3203_v15 = vadd.f32 %v7308_v53, %v3154_v57  ;;  %v8919_v53 = vld [vmem:[#allocation114_spill] sm:$0xff]  ;;  %v8930_v57 = vld [vmem:[#allocation157_spill] sm:$0xff] }
 0x551   : > { %3584 = vmatpush.bf16.msra.mxu3 %v8910_v55  ;;  %3633 = vmatpush.bf16.msrb.mxu2 %v2447_v32  ;;  %v8920_v46 = vpack.c.bf16 %v8918_v14, %v8919_v53  ;;  %v8925_v32 = vld [vmem:[#allocation69_spill] sm:$0xff]  ;;  %v8929_v55 = vpack.c.bf16 %v8927_v41, %v8928_v45  ;;  %v3061_v22 = vadd.f32 %v8930_v57, %v3012_v19  ;;  %v8939_v14 = vld [vmem:[#allocation15_spill] sm:$0xff] }
 0x552   : > { %3730 = vst [vmem:[%s7707_s16] sm:$0xff] %v7713_v49  ;;  %v3252_v11 = vadd.f32 %v7530_v9, %v3203_v15  ;;  %v8924_v9 = vld [vmem:[#allocation92_spill] sm:$0xff] }
 0x553   : > { %v8926_v63 = vpack.c.bf16 %v8924_v9, %v8925_v32  ;;  %v3110_v62 = vadd.f32 %v8931_v27, %v3061_v22  ;;  %v8946_v9 = vld [vmem:[#allocation140_spill] sm:$0xff]  ;;  %v8947_v32 = vld [vmem:[#allocation87_spill] sm:$0xff]  ;;  %v8949_v22 = vld [vmem:[#allocation190_spill] sm:$0xff] }
 0x555   : > { %3585 = vmatpush.bf16.msra.mxu3 %v8915_v10  ;;  %3634 = vmatpush.bf16.msrb.mxu2 %v2445_v51  ;;  %v8934_v10 = vpack.c.bf16 %v8932_v28, %v8933_v50  ;;  %v8953_v28 = vld [vmem:[#allocation126_spill] sm:$0xff] }
 0x557   : > { %v3300_v39 = vpop.f32.mrf.mxu3  ;;  %v7734_v29 = vpop.f32.mrf.mxu2 }
 0x558   : > { %v7736_v3 = vadd.f32 %v3300_v39, %v3252_v11  ;;  %v8937_v11 = vpack.c.bf16 %v8935_v24, %v8936_v43  ;;  %v8956_v43 = vld [vmem:[#allocation52_spill] sm:$0xff] }
 0x559   : > { %3586 = vmatpush.bf16.msra.mxu3 %v8920_v46  ;;  %3635 = vmatpush.bf16.msrb.mxu2 %v2443_v35  ;;  %v8938_v35 = vld [vmem:[#allocation207_spill] sm:$0xff]  ;;  %v8940_v46 = vld [vmem:[#allocation194_spill] sm:$0xff] }
 0x55a   : > { %3732 = vst [vmem:[%s7707_s16 + $0x10] sm:$0xff] %v7736_v3  ;;  %v3159_v39 = vadd.f32 %v8938_v35, %v3110_v62  ;;  %v8942_v19 = vpack.c.bf16 %v8940_v46, %v8941_v33  ;;  %v8952_v62 = vld [vmem:[#allocation200_spill] sm:$0xff] }
 0x55b   : > { %v8954_v50 = vpack.c.bf16 %v8952_v62, %v8953_v28  ;;  %v8967_v28 = vld [vmem:[#allocation57_spill] sm:$0xff] }
 0x55c   : > { %3400 = vmatmul.bf16.gmra.mxu3 %v8922_v31  ;;  %3449 = vmatmul.bf16.gmra.mxu2 %v8923_v48  ;;  %v3208_v53 = vadd.f32 %v8939_v14, %v3159_v39  ;;  %v8944_v31 = vld [vmem:[#allocation123_spill] sm:$0xff] }
 0x55d   : > { %3587 = vmatpush.bf16.msra.mxu3 %v8926_v63  ;;  %3636 = vmatpush.bf16.msrb.mxu2 %v8929_v55  ;;  %v2968_v63 = vadd.f32 %v8947_v32, %v8946_v9 }
 0x55e   : > { %v3257_v41 = vadd.f32 %v7569_v4, %v3208_v53  ;;  %v8957_v4 = vld [vmem:[#allocation90_spill] sm:$0xff]  ;;  %v8959_v53 = vld [vmem:[#allocation105_spill] sm:$0xff] }
 0x55f   : > { %v3303_v51 = vpop.f32.mrf.mxu3  ;;  %v7753_v15 = vpop.f32.mrf.mxu2 }
 0x560   : > { %v7757_v61 = vadd.f32 %v3303_v51, %v7549_v18  ;;  %v8943_v18 = vld [vmem:[#allocation203_spill] sm:$0xff]  ;;  %v8950_v51 = vld [vmem:[#allocation189_spill] sm:$0xff] }
 0x561   : > { %3588 = vmatpush.bf16.msra.mxu3 %v8934_v10  ;;  %3637 = vmatpush.bf16.msrb.mxu2 %v8937_v11  ;;  %v8945_v48 = vpack.c.bf16 %v8943_v18, %v8944_v31  ;;  %v8951_v27 = vpack.c.bf16 %v8949_v22, %v8950_v51  ;;  %v8955_v10 = vld [vmem:[#allocation112_spill] sm:$0xff]  ;;  %v8962_v31 = vld [vmem:[#allocation11_spill] sm:$0xff]  ;;  %v8964_v22 = vld [vmem:[#allocation97_spill] sm:$0xff] }
 0x562   : > { %3734 = vst [vmem:[%s7707_s16 + $0x20] sm:$0xff] %v7757_v61  ;;  %v3017_v24 = vadd.f32 %v8955_v10, %v2968_v63  ;;  %v8958_v11 = vld [vmem:[#allocation164_spill] sm:$0xff]  ;;  %v8969_v10 = vld [vmem:[#allocation171_spill] sm:$0xff] }
 0x564   : > { %v3066_v35 = vadd.f32 %v8958_v11, %v3017_v24  ;;  %v7817_v24 = vpop.f32.mrf.mxu1  ;;  %v8970_v11 = vld [vmem:[#allocation66_spill] sm:$0xff] }
 0x565   : > { %3589 = vmatpush.bf16.msra.mxu3 %v8942_v19  ;;  %3638 = vmatpush.bf16.msrb.mxu2 %v8945_v48  ;;  %v8961_v19 = vld [vmem:[#allocation211_spill] sm:$0xff] }
 0x566   : > { %v3115_v46 = vadd.f32 %v8959_v53, %v3066_v35  ;;  %v8972_v53 = vld [vmem:[#allocation213_spill] sm:$0xff] }
 0x567   : > { %v3305_v45 = vpop.f32.mrf.mxu3  ;;  %v7778_v55 = vpop.f32.mrf.mxu2 }
 0x568   : > { %v7780_v57 = vadd.f32 %v3305_v45, %v3257_v41  ;;  %v3164_v18 = vadd.f32 %v8961_v19, %v3115_v46  ;;  %v8963_v45 = vld [vmem:[#allocation176_spill] sm:$0xff] }
 0x569   : > { %3590 = vmatpush.bf16.msra.mxu3 %v8951_v27  ;;  %3639 = vmatpush.bf16.msrb.mxu2 %v8954_v50  ;;  %v2973_v51 = vadd.f32 %v8964_v22, %v8963_v45  ;;  %v8968_v50 = vld [vmem:[#allocation101_spill] sm:$0xff]  ;;  %v8973_v19 = vld [vmem:[#allocation116_spill] sm:$0xff] }
 0x56a   : > { %8948 = vst [vmem:[#allocation4_spill] sm:$0xff] %v7780_v57  ;;  %v3213_v48 = vadd.f32 %v8962_v31, %v3164_v18  ;;  %v8975_v22 = vld [vmem:[#allocation109_spill] sm:$0xff] }
 0x56b   : > { %3736 = vst [vmem:[%s7707_s16 + $0x30] sm:$0xff] %v7780_v57 }
 0x56c   : > { %3405 = vmatmul.bf16.gmra.mxu3 %v8956_v43  ;;  %3454 = vmatmul.bf16.gmra.mxu2 %v8957_v4  ;;  %v3262_v32 = vadd.f32 %v7599_v26, %v3213_v48 }
 0x56f   : > { %v3308_v39 = vpop.f32.mrf.mxu3  ;;  %v7794_v14 = vpop.f32.mrf.mxu2 }
 0x570   : > { %v7798_v33 = vadd.f32 %v3308_v39, %v7588_v52  ;;  %v8966_v52 = vld [vmem:[#allocation122_spill] sm:$0xff] }
 0x571   : > { %v3022_v62 = vadd.f32 %v8966_v52, %v2973_v51  ;;  %v7834_v52 = vpop.f32.mrf.mxu1 }
 0x572   : > { %8960 = vst [vmem:[#allocation65_spill] sm:$0xff] %v7798_v33 }
 0x573   : > { %3738 = vst [vmem:[%s7707_s16 + $0x40] sm:$0xff] %v7798_v33  ;;  %v3071_v26 = vadd.f32 %v8969_v10, %v3022_v62  ;;  %v8979_v10 = vld [vmem:[#allocation108_spill] sm:$0xff] }
 0x575   : > { %v3120_v35 = vadd.f32 %v8970_v11, %v3071_v26 }
 0x577   : > { %v3310_v63 = vpop.f32.mrf.mxu3  ;;  %v7805_v41 = vpop.f32.mrf.mxu2  ;;  %v3169_v46 = vadd.f32 %v8972_v53, %v3120_v35  ;;  %v8981_v35 = vld [vmem:[#allocation198_spill] sm:$0xff] }
 0x578   : > { %v7809_v27 = vadd.f32 %v3310_v63, %v3262_v32  ;;  %v8974_v63 = vld [vmem:[#allocation183_spill] sm:$0xff] }
 0x579   : > { %v3218_v18 = vadd.f32 %v8973_v19, %v3169_v46  ;;  %v2978_v51 = vadd.f32 %v8975_v22, %v8974_v63  ;;  %v8983_v19 = vld [vmem:[#allocation215_spill] sm:$0xff] }
 0x57a   : > { %8965 = vst [vmem:[#allocation63_spill] sm:$0xff] %v7809_v27 }
 0x57b   : > { %3740 = vst [vmem:[%s7707_s16 + $0x50] sm:$0xff] %v7809_v27  ;;  %v3267_v31 = vadd.f32 %v7626_v1, %v3218_v18  ;;  %v8980_v1 = vld [vmem:[#allocation178_spill] sm:$0xff] }
 0x57c   : > { %3410 = vmatmul.bf16.gmra.mxu3 %v8967_v28  ;;  %3459 = vmatmul.bf16.gmra.mxu2 %v8968_v50  ;;  %v8978_v50 = vld [vmem:[#allocation62_spill] sm:$0xff] }
 0x57f   : > { %v3313_v43 = vpop.f32.mrf.mxu3  ;;  %v7819_v4 = vpop.f32.mrf.mxu2 }
 0x580   : > { %v7823_v39 = vadd.f32 %v3313_v43, %v7615_v58  ;;  %v8977_v58 = vld [vmem:[#allocation130_spill] sm:$0xff] }
 0x581   : > { %v3027_v28 = vadd.f32 %v8977_v58, %v2978_v51 }
 0x582   : > { %8971 = vst [vmem:[#allocation147_spill] sm:$0xff] %v7823_v39 }
 0x583   : > { %3742 = vst [vmem:[%s7707_s16 + $0x60] sm:$0xff] %v7823_v39  ;;  %v3076_v26 = vadd.f32 %v8980_v1, %v3027_v28  ;;  %v9002_v39 = vld [vmem:[#allocation64_spill] sm:$0xff] }
 0x585   : > { %v3125_v53 = vadd.f32 %v8981_v35, %v3076_v26 }
 0x587   : > { %v3315_v48 = vpop.f32.mrf.mxu3  ;;  %v7830_v32 = vpop.f32.mrf.mxu2  ;;  %v3174_v18 = vadd.f32 %v8983_v19, %v3125_v53  ;;  %v8989_v53 = vld [vmem:[#allocation67_spill] sm:$0xff]  ;;  %v8990_v19 = vld [vmem:[#allocation118_spill] sm:$0xff] }
 0x588   : > { %v7836_v62 = vadd.f32 %v3315_v48, %v3267_v31  ;;  %v7851_v31 = vpop.f32.mrf.mxu1  ;;  %v8984_v48 = vld [vmem:[#allocation9_spill] sm:$0xff] }
 0x589   : > { %v3223_v22 = vadd.f32 %v8984_v48, %v3174_v18 }
 0x58a   : > { %8976 = vst [vmem:[#allocation113_spill] sm:$0xff] %v7836_v62 }
 0x58b   : > { %3744 = vst [vmem:[%s7707_s16 + $0x70] sm:$0xff] %v7836_v62  ;;  %v3272_v51 = vadd.f32 %v7641_v5, %v3223_v22  ;;  %v8991_v5 = vld [vmem:[#allocation184_spill] sm:$0xff] }
 0x58c   : > { %3415 = vmatmul.bf16.gmra.mxu3 %v8978_v50  ;;  %3464 = vmatmul.bf16.gmra.mxu2 %v8979_v10  ;;  %v8985_v50 = vld [vmem:[#allocation149_spill] sm:$0xff] }
 0x58d   : > { %v8986_v10 = vld [vmem:[#allocation121_spill] sm:$0xff] }
 0x58e   : > { %v2983_v1 = vadd.f32 %v8986_v10, %v8985_v50 }
 0x58f   : > { %v3318_v43 = vpop.f32.mrf.mxu3  ;;  %v7844_v11 = vpop.f32.mrf.mxu2 }
 0x590   : > { %v7848_v46 = vadd.f32 %v3318_v43, %v7633_v40  ;;  %v8988_v40 = vld [vmem:[#allocation141_spill] sm:$0xff]  ;;  %v7866_v35 = vpop.f32.mrf.mxu1 }
 0x591   : > { %v3032_v43 = vadd.f32 %v8988_v40, %v2983_v1  ;;  %v8995_v1 = vld [vmem:[#allocation7_spill] sm:$0xff] }
 0x592   : > { %8982 = vst [vmem:[#allocation60_spill] sm:$0xff] %v7848_v46 }
 0x593   : > { %3746 = vst [vmem:[%s7707_s16 + $0x80] sm:$0xff] %v7848_v46  ;;  %v3081_v18 = vadd.f32 %v8991_v5, %v3032_v43  ;;  %v8992_v46 = vld [vmem:[#allocation58_spill] sm:$0xff] }
 0x595   : > { %v3130_v10 = vadd.f32 %v8992_v46, %v3081_v18  ;;  %v8996_v46 = vld [vmem:[#allocation132_spill] sm:$0xff] }
 0x597   : > { %v3320_v58 = vpop.f32.mrf.mxu3  ;;  %v7857_v28 = vpop.f32.mrf.mxu2 }
 0x598   : > { %v7861_v26 = vadd.f32 %v3320_v58, %v3272_v51  ;;  %v8994_v58 = vld [vmem:[#allocation217_spill] sm:$0xff] }
 0x59a   : > { %8987 = vst [vmem:[#allocation59_spill] sm:$0xff] %v7861_v26 }
 0x59b   : > { %3748 = vst [vmem:[%s7707_s16 + $0x90] sm:$0xff] %v7861_v26  ;;  %v3179_v26 = vadd.f32 %v8994_v58, %v3130_v10  ;;  %v8999_v58 = vld [vmem:[#allocation72_spill] sm:$0xff] }
 0x59c   : > { %3420 = vmatmul.bf16.gmra.mxu3 %v8989_v53  ;;  %3469 = vmatmul.bf16.gmra.mxu2 %v8990_v19  ;;  %v7881_v53 = vpop.permute.xlu0 %2613  ;;  %v2328_v19 = vpop.f32.mrf.mxu1 }
 0x59d   : > { %v3228_v40 = vadd.f32 %v8995_v1, %v3179_v26  ;;  %v2988_v18 = vadd.f32 %v8996_v46, %v7881_v53  ;;  %v9000_v26 = vld [vmem:[#allocation128_spill] sm:$0xff]  ;;  %v9001_v1 = vld [vmem:[#allocation187_spill] sm:$0xff] }
 0x59f   : > { %v3323_v48 = vpop.f32.mrf.mxu3  ;;  %v7871_v22 = vpop.f32.mrf.mxu2  ;;  %v3277_v62 = vadd.f32 %v7656_v47, %v3228_v40 }
 0x5a0   : > { %v7875_v51 = vadd.f32 %v3323_v48, %v7648_v23  ;;  %v8998_v48 = vld [vmem:[#allocation150_spill] sm:$0xff] }
 0x5a1   : > { %v3037_v10 = vadd.f32 %v8998_v48, %v2988_v18  ;;  %v7906_v48 = vpop.permute.xlu2 %2623 }
 0x5a2   : > { %8993 = vst [vmem:[#allocation54_spill] sm:$0xff] %v7875_v51 }
 0x5a3   : > { %3750 = vst [vmem:[%s7707_s16 + $0xa0] sm:$0xff] %v7875_v51  ;;  %v3086_v51 = vadd.f32 %v9001_v1, %v3037_v10 }
 0x5a4   : > { %v2330_v33 = vpop.f32.mrf.mxu1 }
 0x5a5   : > { %v3135_v27 = vadd.f32 %v9002_v39, %v3086_v51  ;;  %v9005_v39 = vld [vmem:[#allocation142_spill] sm:$0xff] }
 0x5a6   : > { %v2993_v51 = vadd.f32 %v9005_v39, %v7906_v48 }
 0x5a7   : > { %v3325_v43 = vpop.f32.mrf.mxu3  ;;  %v7884_v5 = vpop.f32.mrf.mxu2 }
 0x5a8   : > { %v7888_v23 = vadd.f32 %v3325_v43, %v3277_v62  ;;  %v9004_v43 = vld [vmem:[#allocation111_spill] sm:$0xff] }
 0x5a9   : > { %v3184_v46 = vadd.f32 %v9004_v43, %v3135_v27  ;;  %v9006_v27 = vld [vmem:[#allocation191_spill] sm:$0xff]  ;;  %v9007_v43 = vld [vmem:[#allocation81_spill] sm:$0xff] }
 0x5aa   : > { %8997 = vst [vmem:[#allocation53_spill] sm:$0xff] %v7888_v23 }
 0x5ab   : > { %3752 = vst [vmem:[%s7707_s16 + $0xb0] sm:$0xff] %v7888_v23  ;;  %v3233_v18 = vadd.f32 %v7468_v44, %v3184_v46  ;;  %v9008_v44 = vld [vmem:[#allocation136_spill] sm:$0xff]  ;;  %v9009_v46 = vld [vmem:[#allocation201_spill] sm:$0xff] }
 0x5ac   : > { %3425 = vmatmul.bf16.gmra.mxu3 %v8999_v58  ;;  %3474 = vmatmul.bf16.gmra.mxu2 %v9000_v26  ;;  %v9010_v23 = vld [vmem:[#allocation104_spill] sm:$0xff] }
 0x5ad   : > { %v3282_v10 = vadd.f32 %v7671_v8, %v3233_v18 }
 0x5af   : > { %v3328_v47 = vpop.f32.mrf.mxu3  ;;  %v7896_v40 = vpop.f32.mrf.mxu2 }
 0x5b0   : > { %v7900_v62 = vadd.f32 %v3328_v47, %v7663_v2  ;;  %v2333_v2 = vpop.f32.mrf.mxu1  ;;  %v3042_v47 = vadd.f32 %v9006_v27, %v2993_v51 }
 0x5b2   : > { %9003 = vst [vmem:[#allocation50_spill] sm:$0xff] %v7900_v62  ;;  %v3091_v8 = vadd.f32 %v9009_v46, %v3042_v47 }
 0x5b3   : > { %3754 = vst [vmem:[%s7707_s16 + $0xc0] sm:$0xff] %v7900_v62 }
 0x5b4   : > { %v3140_v57 = vadd.f32 %v9010_v23, %v3091_v8  ;;  %v9011_v23 = vld [vmem:[#allocation120_spill] sm:$0xff] }
 0x5b5   : > { %v2334_v8 = vadd.f32 %v2333_v2, %v9011_v23 }
 0x5b7   : > { %v3330_v58 = vpop.f32.mrf.mxu3  ;;  %v7909_v26 = vpop.f32.mrf.mxu2 }
 0x5b8   : > { %v7913_v1 = vadd.f32 %v3330_v58, %v3282_v10  ;;  %v3189_v58 = vadd.f32 %v7491_v59, %v3140_v57  ;;  %v2335_v39 = vpop.f32.mrf.mxu1  ;;  %v2331_v59 = vadd.f32 %v2330_v33, %v8811_v56  ;;  %v9012_v57 = vld [vmem:[#allocation146_spill] sm:$0xff]  ;;  %v2324_v56 = vadd.f32 %v7851_v31, %v8814_v60 }
 0x5b9   : > { %v9015_v31 = vld [vmem:[#allocation154_spill] sm:$0xff] }
 0x5ba   : > { %3756 = vst [vmem:[%s7707_s16 + $0xd0] sm:$0xff] %v7913_v1  ;;  %v3238_v51 = vadd.f32 %v7684_v0, %v3189_v58  ;;  %v2326_v58 = vadd.f32 %v7866_v35, %v8813_v17  ;;  %v3350_v17 = vadd.f32 %v7734_v29, %v8903_v30 }
 0x5bc   : > { %3430 = vmatmul.bf16.gmra.mxu3 %v9007_v43  ;;  %3479 = vmatmul.bf16.gmra.mxu2 %v9008_v44  ;;  %v3287_v27 = vadd.f32 %v7686_v34, %v3238_v51  ;;  %v2336_v43 = vadd.f32 %v2335_v39, %v8810_v42  ;;  %v2329_v34 = vadd.f32 %v2328_v19, %v8812_v7  ;;  %v9014_v42 = vld [vmem:[#allocation169_spill] sm:$0xff] }
 0x5bd   : > { %v3348_v0 = vadd.f32 %v7709_v6, %v9014_v42  ;;  %v2321_v7 = vadd.f32 %v7834_v52, %v8815_v25  ;;  %v2461_v19 = vpack.c.bf16 %v2326_v58, %v2324_v56  ;;  %v2319_v6 = vadd.f32 %v7817_v24, %v8816_v16  ;;  %v9017_v25 = vld [vmem:[#allocation12_spill] sm:$0xff]  ;;  %v9018_v52 = vld [vmem:[#allocation13_spill] sm:$0xff]  ;;  %v9020_v16 = vld [vmem:[#allocation134_spill] sm:$0xff] }
 0x5be   : > { %v2463_v39 = vpack.c.bf16 %v2331_v59, %v2329_v34  ;;  %v9019_v59 = vpack.c.bf16 %v9017_v25, %v9018_v52  ;;  %v3353_v24 = vadd.f32 %v7753_v15, %v9020_v16  ;;  %v9025_v58 = vld [vmem:[#allocation131_spill] sm:$0xff]  ;;  %v9027_v15 = vld [vmem:[#allocation88_spill] sm:$0xff] }
 0x5bf   : > { %v3333_v18 = vpop.f32.mrf.mxu3  ;;  %v7921_v62 = vpop.f32.mrf.mxu2  ;;  %v2459_v35 = vpack.c.bf16 %v2321_v7, %v2319_v6  ;;  %v9028_v7 = vld [vmem:[#allocation125_spill] sm:$0xff] }
 0x5c0   : > { %v7925_v10 = vadd.f32 %v3333_v18, %v7678_v54  ;;  %v2465_v54 = vpack.c.bf16 %v2336_v43, %v2334_v8  ;;  %v9013_v18 = vld [vmem:[#allocation192_spill] sm:$0xff]  ;;  %v9016_v8 = vld [vmem:[#allocation195_spill] sm:$0xff] }
 0x5c2   : > { %3758 = vst [vmem:[%s7707_s16 + $0xe0] sm:$0xff] %v7925_v10 }
 0x5c7   : > { %v3335_v47 = vpop.f32.mrf.mxu3  ;;  %v7933_v44 = vpop.f32.mrf.mxu2 }
 0x5c8   : > { %v7935_v46 = vadd.f32 %v3335_v47, %v3287_v27 }
 0x5ca   : > { %3760 = vst [vmem:[%s7707_s16 + $0xf0] sm:$0xff] %v7935_v46 }
 0x5cc   : > { %3493 = vmatmul.bf16.vlgmr.msrb.gmra.mxu3 %v9012_v57  ;;  %3542 = vmatmul.bf16.vlgmr.msra.gmra.mxu2 %v9013_v18  ;;  %v9021_v57 = vld [vmem:[#allocation16_spill] sm:$0xff]  ;;  %v9022_v18 = vld [vmem:[#allocation17_spill] sm:$0xff] }
 0x5cd   : > { %3681 = vmatpush.bf16.msrb.mxu3 %v2465_v54  ;;  %v9023_v34 = vpack.c.bf16 %v9021_v57, %v9022_v18 }
 0x5cf   : > { %v3396_v2 = vpop.f32.mrf.mxu3  ;;  %v3445_v51 = vpop.f32.mrf.mxu2 }
 0x5d0   : > { %v3397_v27 = vadd.f32 %v3396_v2, %v3348_v0  ;;  %v9024_v0 = vld [vmem:[#allocation162_spill] sm:$0xff]  ;;  %v3355_v2 = vadd.f32 %v7778_v55, %v8916_v38  ;;  %v3360_v55 = vadd.f32 %v7805_v41, %v8946_v9  ;;  %v3365_v9 = vadd.f32 %v7830_v32, %v8963_v45 }
 0x5d1   : > { %3682 = vmatpush.bf16.msrb.mxu3 %v2463_v39  ;;  %v9026_v39 = vpack.c.bf16 %v9024_v0, %v9025_v58  ;;  %v3370_v45 = vadd.f32 %v7857_v28, %v8974_v63  ;;  %v3375_v63 = vadd.f32 %v7884_v5, %v8985_v50  ;;  %v3380_v50 = vadd.f32 %v7909_v26, %v7881_v53 }
 0x5d2   : > { %v7950_v33 = vadd.f32 %v3445_v51, %v3397_v27  ;;  %v3385_v53 = vadd.f32 %v7933_v44, %v7906_v48  ;;  %v9050_v44 = vld [vmem:[#allocation204_spill] sm:$0xff] }
 0x5d5   : > { %3683 = vmatpush.bf16.msrb.mxu3 %v2461_v19  ;;  %v9029_v19 = vpack.c.bf16 %v9027_v15, %v9028_v7 }
 0x5d7   : > { %v3398_v43 = vpop.f32.mrf.mxu3  ;;  %v3447_v47 = vpop.f32.mrf.mxu2 }
 0x5d8   : > { %v3399_v23 = vadd.f32 %v3398_v43, %v3350_v17  ;;  %v9030_v17 = vld [vmem:[#allocation160_spill] sm:$0xff]  ;;  %v9032_v43 = vld [vmem:[#allocation170_spill] sm:$0xff] }
 0x5d9   : > { %3684 = vmatpush.bf16.msrb.mxu3 %v2459_v35  ;;  %v9031_v35 = vld [vmem:[#allocation196_spill] sm:$0xff] }
 0x5da   : > { %v7958_v60 = vadd.f32 %v3447_v47, %v3399_v23  ;;  %v3358_v47 = vadd.f32 %v7794_v14, %v9032_v43 }
 0x5dc   : > { %3498 = vmatmul.bf16.gmra.mxu3 %v9015_v31  ;;  %3547 = vmatmul.bf16.gmra.mxu2 %v9016_v8 }
 0x5dd   : > { %3685 = vmatpush.bf16.msrb.mxu3 %v9019_v59 }
 0x5df   : > { %v3401_v54 = vpop.f32.mrf.mxu3  ;;  %v3450_v30 = vpop.f32.mrf.mxu2 }
 0x5e0   : > { %v3402_v29 = vadd.f32 %v3401_v54, %v3353_v24  ;;  %v9033_v24 = vld [vmem:[#allocation165_spill] sm:$0xff] }
 0x5e1   : > { %3686 = vmatpush.bf16.msrb.mxu3 %v9023_v34  ;;  %v9034_v54 = vld [vmem:[#allocation93_spill] sm:$0xff] }
 0x5e2   : > { %v7970_v42 = vadd.f32 %v3450_v30, %v3402_v29  ;;  %v9035_v30 = vld [vmem:[#allocation177_spill] sm:$0xff] }
 0x5e3   : > { %v3363_v14 = vadd.f32 %v7819_v4, %v9035_v30  ;;  %v9042_v30 = vld [vmem:[#allocation185_spill] sm:$0xff] }
 0x5e5   : > { %3687 = vmatpush.bf16.msrb.mxu3 %v9026_v39 }
 0x5e7   : > { %v3403_v51 = vpop.f32.mrf.mxu3  ;;  %v3452_v27 = vpop.f32.mrf.mxu2 }
 0x5e8   : > { %v3404_v56 = vadd.f32 %v3403_v51, %v3355_v2  ;;  %v9036_v2 = vld [vmem:[#allocation172_spill] sm:$0xff]  ;;  %v9037_v51 = vld [vmem:[#allocation197_spill] sm:$0xff] }
 0x5e9   : > { %3688 = vmatpush.bf16.msrb.mxu3 %v9029_v19 }
 0x5ea   : > { %v7980_v6 = vadd.f32 %v3452_v27, %v3404_v56  ;;  %v9038_v27 = vld [vmem:[#allocation144_spill] sm:$0xff] }
 0x5eb   : > { %v3368_v4 = vadd.f32 %v7844_v11, %v9038_v27  ;;  %v9046_v27 = vld [vmem:[#allocation56_spill] sm:$0xff] }
 0x5ec   : > { %3503 = vmatmul.bf16.gmra.mxu3 %v9030_v17  ;;  %3552 = vmatmul.bf16.gmra.mxu2 %v9031_v35 }
 0x5ef   : > { %v3406_v23 = vpop.f32.mrf.mxu3  ;;  %v3455_v31 = vpop.f32.mrf.mxu2 }
 0x5f0   : > { %v3407_v8 = vadd.f32 %v3406_v23, %v3358_v47  ;;  %v9039_v47 = vld [vmem:[#allocation179_spill] sm:$0xff] }
 0x5f1   : > { %v9040_v23 = vld [vmem:[#allocation199_spill] sm:$0xff] }
 0x5f2   : > { %v7986_v38 = vadd.f32 %v3455_v31, %v3407_v8  ;;  %v9041_v31 = vld [vmem:[#allocation180_spill] sm:$0xff] }
 0x5f3   : > { %v3373_v11 = vadd.f32 %v7871_v22, %v9041_v31 }
 0x5f7   : > { %v3408_v25 = vpop.f32.mrf.mxu3  ;;  %v3457_v52 = vpop.f32.mrf.mxu2 }
 0x5f8   : > { %v3409_v59 = vadd.f32 %v3408_v25, %v3360_v55 }
 0x5fa   : > { %v7990_v16 = vadd.f32 %v3457_v52, %v3409_v59 }
 0x5fc   : > { %3508 = vmatmul.bf16.gmra.mxu3 %v9033_v24  ;;  %3557 = vmatmul.bf16.gmra.mxu2 %v9034_v54 }
 0x5ff   : > { %v3411_v29 = vpop.f32.mrf.mxu3  ;;  %v3460_v57 = vpop.f32.mrf.mxu2 }
 0x600   : > { %v3412_v18 = vadd.f32 %v3411_v29, %v3363_v14  ;;  %v9043_v14 = vld [vmem:[#allocation73_spill] sm:$0xff]  ;;  %v9044_v29 = vld [vmem:[#allocation186_spill] sm:$0xff] }
 0x601   : > { %v3378_v22 = vadd.f32 %v7896_v40, %v9044_v29 }
 0x602   : > { %v7996_v34 = vadd.f32 %v3460_v57, %v3412_v18 }
 0x607   : > { %v3413_v41 = vpop.f32.mrf.mxu3  ;;  %v3462_v0 = vpop.f32.mrf.mxu2 }
 0x608   : > { %v3414_v58 = vadd.f32 %v3413_v41, %v3365_v9 }
 0x60a   : > { %v8000_v39 = vadd.f32 %v3462_v0, %v3414_v58 }
 0x60c   : > { %3513 = vmatmul.bf16.gmra.mxu3 %v9036_v2  ;;  %3562 = vmatmul.bf16.gmra.mxu2 %v9037_v51  ;;  %v9045_v51 = vld [vmem:[#allocation188_spill] sm:$0xff] }
 0x60f   : > { %v3416_v56 = vpop.f32.mrf.mxu3  ;;  %v3465_v15 = vpop.f32.mrf.mxu2 }
 0x610   : > { %v3417_v7 = vadd.f32 %v3416_v56, %v3368_v4  ;;  %v9047_v4 = vld [vmem:[#allocation152_spill] sm:$0xff] }
 0x611   : > { %v3383_v40 = vadd.f32 %v7921_v62, %v9047_v4  ;;  %v9054_v4 = vld [vmem:[#allocation212_spill] sm:$0xff] }
 0x612   : > { %v8006_v19 = vadd.f32 %v3465_v15, %v3417_v7 }
 0x617   : > { %v3418_v32 = vpop.f32.mrf.mxu3  ;;  %v3467_v17 = vpop.f32.mrf.mxu2 }
 0x618   : > { %v3419_v35 = vadd.f32 %v3418_v32, %v3370_v45 }
 0x61a   : > { %v8010_v43 = vadd.f32 %v3467_v17, %v3419_v35 }
 0x61c   : > { %3518 = vmatmul.bf16.gmra.mxu3 %v9039_v47  ;;  %3567 = vmatmul.bf16.gmra.mxu2 %v9040_v23  ;;  %v9048_v47 = vld [vmem:[#allocation202_spill] sm:$0xff]  ;;  %v9049_v23 = vld [vmem:[#allocation163_spill] sm:$0xff] }
 0x61f   : > { %v3421_v8 = vpop.f32.mrf.mxu3  ;;  %v3470_v55 = vpop.f32.mrf.mxu2 }
 0x620   : > { %v3422_v25 = vadd.f32 %v3421_v8, %v3373_v11 }
 0x622   : > { %v8016_v52 = vadd.f32 %v3470_v55, %v3422_v25 }
 0x627   : > { %v3423_v28 = vpop.f32.mrf.mxu3  ;;  %v3472_v59 = vpop.f32.mrf.mxu2 }
 0x628   : > { %v3424_v24 = vadd.f32 %v3423_v28, %v3375_v63  ;;  %v9051_v28 = vld [vmem:[#allocation158_spill] sm:$0xff] }
 0x62a   : > { %v8020_v54 = vadd.f32 %v3472_v59, %v3424_v24 }
 0x62c   : > { %3523 = vmatmul.bf16.gmra.mxu3 %v9042_v30  ;;  %3572 = vmatmul.bf16.gmra.mxu2 %v9043_v14 }
 0x62f   : > { %v3426_v57 = vpop.f32.mrf.mxu3  ;;  %v3475_v18 = vpop.f32.mrf.mxu2 }
 0x630   : > { %v3427_v9 = vadd.f32 %v3426_v57, %v3378_v22 }
 0x632   : > { %v8026_v41 = vadd.f32 %v3475_v18, %v3427_v9  ;;  %v9052_v18 = vld [vmem:[#allocation208_spill] sm:$0xff] }
 0x637   : > { %v3428_v5 = vpop.f32.mrf.mxu3  ;;  %v3477_v0 = vpop.f32.mrf.mxu2 }
 0x638   : > { %v3429_v58 = vadd.f32 %v3428_v5, %v3380_v50 }
 0x63a   : > { %v8030_v2 = vadd.f32 %v3477_v0, %v3429_v58 }
 0x63c   : > { %3528 = vmatmul.bf16.gmra.mxu3 %v9045_v51  ;;  %3577 = vmatmul.bf16.gmra.mxu2 %v9046_v27 }
 0x63f   : > { %v3431_v56 = vpop.f32.mrf.mxu3  ;;  %v3480_v15 = vpop.f32.mrf.mxu2 }
 0x640   : > { %v3432_v7 = vadd.f32 %v3431_v56, %v3383_v40 }
 0x642   : > { %v8036_v45 = vadd.f32 %v3480_v15, %v3432_v7 }
 0x647   : > { %v3433_v26 = vpop.f32.mrf.mxu3  ;;  %v3482_v32 = vpop.f32.mrf.mxu2 }
 0x648   : > { %v3434_v17 = vadd.f32 %v3433_v26, %v3385_v53 }
 0x64a   : > { %v8040_v35 = vadd.f32 %v3482_v32, %v3434_v17  ;;  %v9056_v17 = vld [vmem:[#allocation214_spill] sm:$0xff] }
 0x64c   : > { %3591 = vmatmul.bf16.vlgmr.msra.gmra.mxu3 %v9048_v47  ;;  %3640 = vmatmul.bf16.vlgmr.msrb.gmra.mxu2 %v9049_v23  ;;  %v9057_v47 = vld [vmem:[#allocation156_spill] sm:$0xff] }
 0x64f   : > { %v3494_v31 = vpop.f32.mrf.mxu3  ;;  %v3543_v11 = vpop.f32.mrf.mxu2 }
 0x650   : > { %v3495_v62 = vadd.f32 %v3494_v31, %v7950_v33 }
 0x652   : > { %v8045_v8 = vadd.f32 %v3543_v11, %v3495_v62 }
 0x657   : > { %v3496_v55 = vpop.f32.mrf.mxu3  ;;  %v3545_v25 = vpop.f32.mrf.mxu2 }
 0x658   : > { %v3497_v63 = vadd.f32 %v3496_v55, %v7958_v60  ;;  %v9053_v60 = vld [vmem:[#allocation14_spill] sm:$0xff] }
 0x65a   : > { %v8048_v48 = vadd.f32 %v3545_v25, %v3497_v63  ;;  %v9058_v63 = vld [vmem:[#allocation216_spill] sm:$0xff] }
 0x65c   : > { %3596 = vmatmul.bf16.gmra.mxu3 %v9050_v44  ;;  %3645 = vmatmul.bf16.gmra.mxu2 %v9051_v28  ;;  %v9059_v44 = vld [vmem:[#allocation8_spill] sm:$0xff] }
 0x65f   : > { %v3499_v59 = vpop.f32.mrf.mxu3  ;;  %v3548_v24 = vpop.f32.mrf.mxu2 }
 0x660   : > { %v3500_v30 = vadd.f32 %v3499_v59, %v7970_v42 }
 0x662   : > { %v8053_v14 = vadd.f32 %v3548_v24, %v3500_v30 }
 0x667   : > { %v3501_v29 = vpop.f32.mrf.mxu3  ;;  %v3550_v33 = vpop.f32.mrf.mxu2 }
 0x668   : > { %v3502_v22 = vadd.f32 %v3501_v29, %v7980_v6  ;;  %v9055_v6 = vld [vmem:[#allocation10_spill] sm:$0xff] }
 0x66a   : > { %v8056_v57 = vadd.f32 %v3550_v33, %v3502_v22  ;;  %v9060_v22 = vld [vmem:[#allocation218_spill] sm:$0xff] }
 0x66c   : > { %3601 = vmatmul.bf16.gmra.mxu3 %v9052_v18  ;;  %3650 = vmatmul.bf16.gmra.mxu2 %v9053_v60 }
 0x66f   : > { %v3504_v9 = vpop.f32.mrf.mxu3  ;;  %v3553_v50 = vpop.f32.mrf.mxu2 }
 0x670   : > { %v3505_v5 = vadd.f32 %v3504_v9, %v7986_v38 }
 0x672   : > { %v8061_v0 = vadd.f32 %v3553_v50, %v3505_v5 }
 0x677   : > { %v3506_v58 = vpop.f32.mrf.mxu3  ;;  %v3555_v42 = vpop.f32.mrf.mxu2 }
 0x678   : > { %v3507_v51 = vadd.f32 %v3506_v58, %v7990_v16 }
 0x67a   : > { %v8064_v27 = vadd.f32 %v3555_v42, %v3507_v51  ;;  %v9061_v42 = vld [vmem:[#allocation86_spill] sm:$0xff] }
 0x67c   : > { %3606 = vmatmul.bf16.gmra.mxu3 %v9054_v4  ;;  %3655 = vmatmul.bf16.gmra.mxu2 %v9055_v6 }
 0x67f   : > { %v3509_v40 = vpop.f32.mrf.mxu3  ;;  %v3558_v56 = vpop.f32.mrf.mxu2 }
 0x680   : > { %v3510_v15 = vadd.f32 %v3509_v40, %v7996_v34 }
 0x682   : > { %v3559_v7 = vadd.f32 %v3558_v56, %v3510_v15 }
 0x687   : > { %v3511_v53 = vpop.f32.mrf.mxu3  ;;  %v3560_v26 = vpop.f32.mrf.mxu2 }
 0x688   : > { %v3512_v38 = vadd.f32 %v3511_v53, %v8000_v39 }
 0x68a   : > { %v3561_v32 = vadd.f32 %v3560_v26, %v3512_v38 }
 0x68c   : > { %3611 = vmatmul.bf16.gmra.mxu3 %v9056_v17  ;;  %3660 = vmatmul.bf16.gmra.mxu2 %v9057_v47 }
 0x68f   : > { %v3514_v16 = vpop.f32.mrf.mxu3  ;;  %v3563_v23 = vpop.f32.mrf.mxu2 }
 0x690   : > { %v3515_v31 = vadd.f32 %v3514_v16, %v8006_v19 }
 0x692   : > { %v3564_v11 = vadd.f32 %v3563_v23, %v3515_v31 }
 0x697   : > { %v3516_v62 = vpop.f32.mrf.mxu3  ;;  %v3565_v55 = vpop.f32.mrf.mxu2 }
 0x698   : > { %v3517_v25 = vadd.f32 %v3516_v62, %v8010_v43 }
 0x69a   : > { %v3566_v34 = vadd.f32 %v3565_v55, %v3517_v25 }
 0x69c   : > { %3616 = vmatmul.bf16.gmra.mxu3 %v9058_v63  ;;  %3665 = vmatmul.bf16.gmra.mxu2 %v9059_v44 }
 0x69f   : > { %v3519_v39 = vpop.f32.mrf.mxu3  ;;  %v3568_v28 = vpop.f32.mrf.mxu2 }
 0x6a0   : > { %v3520_v59 = vadd.f32 %v3519_v39, %v8016_v52 }
 0x6a2   : > { %v3569_v24 = vadd.f32 %v3568_v28, %v3520_v59 }
 0x6a7   : > { %v3521_v30 = vpop.f32.mrf.mxu3  ;;  %v3570_v29 = vpop.f32.mrf.mxu2 }
 0x6a8   : > { %v3522_v33 = vadd.f32 %v3521_v30, %v8020_v54 }
 0x6aa   : > { %v3571_v19 = vadd.f32 %v3570_v29, %v3522_v33 }
 0x6ac   : > { %3621 = vmatmul.bf16.gmra.mxu3 %v9060_v22  ;;  %3670 = vmatmul.bf16.gmra.mxu2 %v7448_v20 }
 0x6af   : > { %v3524_v43 = vpop.f32.mrf.mxu3  ;;  %v3573_v18 = vpop.f32.mrf.mxu2 }
 0x6b0   : > { %v3525_v60 = vadd.f32 %v3524_v43, %v8026_v41 }
 0x6b2   : > { %v3574_v9 = vadd.f32 %v3573_v18, %v3525_v60 }
 0x6b7   : > { %v3526_v50 = vpop.f32.mrf.mxu3  ;;  %v3575_v5 = vpop.f32.mrf.mxu2 }
 0x6b8   : > { %v3527_v58 = vadd.f32 %v3526_v50, %v8030_v2 }
 0x6ba   : > { %v3576_v52 = vadd.f32 %v3575_v5, %v3527_v58 }
 0x6bc   : > { %3626 = vmatmul.bf16.gmra.mxu3 %v9061_v42  ;;  %3675 = vmatmul.bf16.gmra.mxu2 %v7470_v36 }
 0x6bf   : > { %v3529_v54 = vpop.f32.mrf.mxu3  ;;  %v3578_v51 = vpop.f32.mrf.mxu2 }
 0x6c0   : > { %v3530_v4 = vadd.f32 %v3529_v54, %v8036_v45 }
 0x6c2   : > { %v3579_v6 = vadd.f32 %v3578_v51, %v3530_v4 }
 0x6c7   : > { %v3531_v20 = vpop.f32.mrf.mxu3  ;;  %v3580_v40 = vpop.f32.mrf.mxu2 }
 0x6c8   : > { %v3532_v56 = vadd.f32 %v3531_v20, %v8040_v35 }
 0x6ca   : > { %v3581_v41 = vadd.f32 %v3580_v40, %v3532_v56 }
 0x6cc   : > { %3689 = vmatmul.bf16.vlgmr.msrb.gmra.mxu3 %v7493_v13 }
 0x6cf   : > { %v3592_v15 = vpop.f32.mrf.mxu3 }
 0x6d0   : > { %v3593_v2 = vadd.f32 %v3592_v15, %v8045_v8 }
 0x6d7   : > { %v3594_v53 = vpop.f32.mrf.mxu3 }
 0x6d8   : > { %v3595_v26 = vadd.f32 %v3594_v53, %v8048_v48 }
 0x6dc   : > { %3694 = vmatmul.bf16.gmra.mxu3 %v7532_v21 }
 0x6df   : > { %v3597_v36 = vpop.f32.mrf.mxu3 }
 0x6e0   : > { %v3598_v38 = vadd.f32 %v3597_v36, %v8053_v14  ;;  %v9062_v14 = vld [vmem:[#allocation6_spill] sm:$0xff] }
 0x6e7   : > { %v3599_v45 = vpop.f32.mrf.mxu3 }
 0x6e8   : > { %v3600_v17 = vadd.f32 %v3599_v45, %v8056_v57 }
 0x6ec   : > { %3699 = vmatmul.bf16.gmra.mxu3 %v7574_v37 }
 0x6ef   : > { %v3602_v35 = vpop.f32.mrf.mxu3 }
 0x6f0   : > { %v3603_v47 = vadd.f32 %v3602_v35, %v8061_v0  ;;  %v9063_v0 = vld [vmem:[#allocation5_spill] sm:$0xff]  ;;  %v9068_v35 = vld [vmem:[#allocation63_spill] sm:$0xff] }
 0x6f7   : > { %v3604_v13 = vpop.f32.mrf.mxu3 }
 0x6f8   : > { %v8095_v16 = vadd.f32 %v3604_v13, %v8064_v27 }
 0x6fc   : > { %3704 = vmatmul.bf16.gmra.mxu3 %v7604_v12 }
 0x6ff   : > { %v3607_v8 = vpop.f32.mrf.mxu3 }
 0x700   : > { %v8098_v48 = vadd.f32 %v3607_v8, %v3559_v7  ;;  %v9064_v7 = vld [vmem:[#allocation3_spill] sm:$0xff] }
 0x707   : > { %v3609_v21 = vpop.f32.mrf.mxu3 }
 0x708   : > { %v8100_v23 = vadd.f32 %v3609_v21, %v3561_v32  ;;  %v3641_v32 = vpop.f32.mrf.mxu2 }
 0x709   : > { %v3642_v22 = vadd.f32 %v3641_v32, %v3593_v2 }
 0x70c   : > { %3709 = vmatmul.bf16.gmra.mxu3 %v9062_v14 }
 0x70f   : > { %v3612_v57 = vpop.f32.mrf.mxu3 }
 0x710   : > { %v8103_v31 = vadd.f32 %v3612_v57, %v3564_v11  ;;  %v3643_v11 = vpop.f32.mrf.mxu2  ;;  %v9069_v57 = vld [vmem:[#allocation147_spill] sm:$0xff] }
 0x711   : > { %v3644_v50 = vadd.f32 %v3643_v11, %v3595_v26  ;;  %v9067_v26 = vld [vmem:[#allocation65_spill] sm:$0xff] }
 0x717   : > { %v3614_v37 = vpop.f32.mrf.mxu3 }
 0x718   : > { %v8105_v62 = vadd.f32 %v3614_v37, %v3566_v34  ;;  %v9065_v34 = vld [vmem:[#allocation2_spill] sm:$0xff]  ;;  %v3646_v30 = vpop.f32.mrf.mxu2 }
 0x719   : > { %v3647_v42 = vadd.f32 %v3646_v30, %v3598_v38 }
 0x71c   : > { %3714 = vmatmul.bf16.gmra.mxu3 %v9063_v0 }
 0x71f   : > { %v3617_v27 = vpop.f32.mrf.mxu3 }
 0x720   : > { %v8108_v55 = vadd.f32 %v3617_v27, %v3569_v24 }
 0x727   : > { %v3619_v12 = vpop.f32.mrf.mxu3 }
 0x728   : > { %v8110_v25 = vadd.f32 %v3619_v12, %v3571_v19  ;;  %v3648_v19 = vpop.f32.mrf.mxu2 }
 0x72c   : > { %3719 = vmatmul.bf16.gmra.mxu3 %v9064_v7  ;;  %v9070_v7 = vld [vmem:[#allocation113_spill] sm:$0xff] }
 0x72f   : > { %v3622_v63 = vpop.f32.mrf.mxu3 }
 0x730   : > { %v8113_v44 = vadd.f32 %v3622_v63, %v3574_v9  ;;  %v3651_v9 = vpop.f32.mrf.mxu2 }
 0x737   : > { %v3624_v39 = vpop.f32.mrf.mxu3 }
 0x738   : > { %v8115_v28 = vadd.f32 %v3624_v39, %v3576_v52  ;;  %v3653_v54 = vpop.f32.mrf.mxu2 }
 0x73c   : > { %3724 = vmatmul.bf16.gmra.mxu3 %v9065_v34  ;;  %v9071_v34 = vld [vmem:[#allocation60_spill] sm:$0xff] }
 0x73f   : > { %v3627_v59 = vpop.f32.mrf.mxu3 }
 0x740   : > { %v8118_v24 = vadd.f32 %v3627_v59, %v3579_v6  ;;  %v3656_v56 = vpop.f32.mrf.mxu2 }
 0x747   : > { %v3629_v29 = vpop.f32.mrf.mxu3 }
 0x748   : > { %v8120_v33 = vadd.f32 %v3629_v29, %v3581_v41  ;;  %v9066_v41 = vld [vmem:[#allocation4_spill] sm:$0xff]  ;;  %v3658_v38 = vpop.f32.mrf.mxu2 }
 0x749   : > { %v3659_v0 = vadd.f32 %v3658_v38, %v8100_v23 }
 0x74f   : > { %v3690_v43 = vpop.f32.mrf.mxu3 }
 0x750   : > { %v3691_v18 = vadd.f32 %v3690_v43, %v3642_v22  ;;  %v3661_v8 = vpop.f32.mrf.mxu2 }
 0x751   : > { %v3662_v63 = vadd.f32 %v3661_v8, %v8103_v31 }
 0x752   : > { %3731 = vst [vmem:[%s7707_s16 + $0x8] sm:$0xff] %v3691_v18  ;;  %v3762_v60 = vadd.f32 %v3691_v18, %v7713_v49  ;;  %v3649_v49 = vadd.f32 %v3648_v19, %v3600_v17  ;;  %v9072_v19 = vld [vmem:[#allocation59_spill] sm:$0xff] }
 0x754   : > { %3763 = vadd.xlane.f32.xlu0 %v3762_v60 }
 0x757   : > { %v3692_v5 = vpop.f32.mrf.mxu3 }
 0x758   : > { %v3693_v58 = vadd.f32 %v3692_v5, %v3644_v50 }
 0x75a   : > { %3733 = vst [vmem:[%s7707_s16 + $0x18] sm:$0xff] %v3693_v58  ;;  %v3765_v52 = vadd.f32 %v3693_v58, %v7736_v3  ;;  %v3652_v3 = vadd.f32 %v3651_v9, %v3603_v47  ;;  %v3657_v47 = vadd.f32 %v3656_v56, %v8098_v48  ;;  %v9073_v9 = vld [vmem:[#allocation54_spill] sm:$0xff] }
 0x75c   : > { %3766 = vadd.xlane.f32.xlu1 %v3765_v52 }
 0x75f   : > { %v3695_v51 = vpop.f32.mrf.mxu3 }
 0x760   : > { %v3696_v4 = vadd.f32 %v3695_v51, %v3647_v42  ;;  %v9074_v42 = vld [vmem:[#allocation53_spill] sm:$0xff] }
 0x762   : > { %3735 = vst [vmem:[%s7707_s16 + $0x28] sm:$0xff] %v3696_v4  ;;  %v3768_v6 = vadd.f32 %v3696_v4, %v7757_v61  ;;  %v3654_v61 = vadd.f32 %v3653_v54, %v8095_v16  ;;  %v3663_v16 = vpop.f32.mrf.mxu2 }
 0x763   : > { %v3664_v23 = vadd.f32 %v3663_v16, %v8105_v62 }
 0x764   : > { %3769 = vadd.xlane.f32.xlu2 %v3768_v6 }
 0x767   : > { %v3697_v20 = vpop.f32.mrf.mxu3 }
 0x768   : > { %v3698_v40 = vadd.f32 %v3697_v20, %v3649_v49  ;;  %v9075_v49 = vld [vmem:[#allocation50_spill] sm:$0xff] }
 0x76a   : > { %3737 = vst [vmem:[%s7707_s16 + $0x38] sm:$0xff] %v3698_v40  ;;  %v3771_v15 = vadd.f32 %v3698_v40, %v9066_v41  ;;  %v3666_v39 = vpop.f32.mrf.mxu2 }
 0x76b   : > { %v3667_v31 = vadd.f32 %v3666_v39, %v8108_v55 }
 0x76c   : > { %3772 = vadd.xlane.f32.xlu2 %v3771_v15 }
 0x76f   : > { %v3700_v2 = vpop.f32.mrf.mxu3 }
 0x770   : > { %v3701_v53 = vadd.f32 %v3700_v2, %v3652_v3 }
 0x772   : > { %3739 = vst [vmem:[%s7707_s16 + $0x48] sm:$0xff] %v3701_v53  ;;  %v3774_v36 = vadd.f32 %v3701_v53, %v9067_v26  ;;  %v3668_v43 = vpop.f32.mrf.mxu2 }
 0x773   : > { %v3669_v62 = vadd.f32 %v3668_v43, %v8110_v25 }
 0x774   : > { %3775 = vadd.xlane.f32.xlu0 %v3774_v36 }
 0x777   : > { %v3702_v45 = vpop.f32.mrf.mxu3 }
 0x778   : > { %v3703_v17 = vadd.f32 %v3702_v45, %v3654_v61 }
 0x77a   : > { %3741 = vst [vmem:[%s7707_s16 + $0x58] sm:$0xff] %v3703_v17  ;;  %v3777_v13 = vadd.f32 %v3703_v17, %v9068_v35  ;;  %v3671_v5 = vpop.f32.mrf.mxu2 }
 0x77b   : > { %v3672_v51 = vadd.f32 %v3671_v5, %v8113_v44 }
 0x77c   : > { %3778 = vadd.xlane.f32.xlu1 %v3777_v13 }
 0x77f   : > { %v3705_v21 = vpop.f32.mrf.mxu3 }
 0x780   : > { %v3706_v14 = vadd.f32 %v3705_v21, %v3657_v47 }
 0x782   : > { %3743 = vst [vmem:[%s7707_s16 + $0x68] sm:$0xff] %v3706_v14  ;;  %v3780_v37 = vadd.f32 %v3706_v14, %v9069_v57  ;;  %v3673_v55 = vpop.f32.mrf.mxu2 }
 0x783   : > { %v3674_v40 = vadd.f32 %v3673_v55, %v8115_v28 }
 0x784   : > { %3781 = vadd.xlane.f32.xlu2 %v3780_v37 }
 0x787   : > { %v3707_v27 = vpop.f32.mrf.mxu3 }
 0x788   : > { %v3708_v12 = vadd.f32 %v3707_v27, %v3659_v0 }
 0x78a   : > { %3745 = vst [vmem:[%s7707_s16 + $0x78] sm:$0xff] %v3708_v12  ;;  %v3783_v32 = vadd.f32 %v3708_v12, %v9070_v7  ;;  %v3676_v41 = vpop.f32.mrf.mxu2 }
 0x78b   : > { %v3677_v44 = vadd.f32 %v3676_v41, %v8118_v24 }
 0x78c   : > { %3784 = vadd.xlane.f32.xlu0 %v3783_v32 }
 0x78f   : > { %v3710_v48 = vpop.f32.mrf.mxu3 }
 0x790   : > { %v3711_v11 = vadd.f32 %v3710_v48, %v3662_v63 }
 0x792   : > { %3747 = vst [vmem:[%s7707_s16 + $0x88] sm:$0xff] %v3711_v11  ;;  %v3786_v59 = vadd.f32 %v3711_v11, %v9071_v34  ;;  %v3678_v26 = vpop.f32.mrf.mxu2 }
 0x793   : > { %v3679_v28 = vadd.f32 %v3678_v26, %v8120_v33 }
 0x794   : > { %3787 = vadd.xlane.f32.xlu1 %v3786_v59 }
 0x797   : > { %v3712_v30 = vpop.f32.mrf.mxu3 }
 0x798   : > { %v3713_v29 = vadd.f32 %v3712_v30, %v3664_v23 }
 0x79a   : > { %3749 = vst [vmem:[%s7707_s16 + $0x98] sm:$0xff] %v3713_v29  ;;  %v3789_v22 = vadd.f32 %v3713_v29, %v9072_v19 }
 0x79c   : > { %3790 = vadd.xlane.f32.xlu2 %v3789_v22 }
 0x79f   : > { %v3715_v18 = vpop.f32.mrf.mxu3 }
 0x7a0   : > { %v3716_v60 = vadd.f32 %v3715_v18, %v3667_v31 }
 0x7a2   : > { %3751 = vst [vmem:[%s7707_s16 + $0xa8] sm:$0xff] %v3716_v60  ;;  %v3792_v50 = vadd.f32 %v3716_v60, %v9073_v9 }
 0x7a4   : > { %3793 = vadd.xlane.f32.xlu0 %v3792_v50 }
 0x7a7   : > { %v3717_v58 = vpop.f32.mrf.mxu3 }
 0x7a8   : > { %v3718_v52 = vadd.f32 %v3717_v58, %v3669_v62 }
 0x7aa   : > { %3753 = vst [vmem:[%s7707_s16 + $0xb8] sm:$0xff] %v3718_v52  ;;  %v3795_v54 = vadd.f32 %v3718_v52, %v9074_v42 }
 0x7ac   : > { %3796 = vadd.xlane.f32.xlu1 %v3795_v54 }
 0x7af   : > { %v3720_v4 = vpop.f32.mrf.mxu3 }
 0x7b0   : > { %v3721_v6 = vadd.f32 %v3720_v4, %v3672_v51 }
 0x7b2   : > { %3755 = vst [vmem:[%s7707_s16 + $0xc8] sm:$0xff] %v3721_v6  ;;  %v3798_v20 = vadd.f32 %v3721_v6, %v9075_v49 }
 0x7b4   : > { %3799 = vadd.xlane.f32.xlu2 %v3798_v20 }
 0x7b7   : > { %v3722_v25 = vpop.f32.mrf.mxu3 }
 0x7b8   : > { %v3723_v56 = vadd.f32 %v3722_v25, %v3674_v40 }
 0x7ba   : > { %3757 = vst [vmem:[%s7707_s16 + $0xd8] sm:$0xff] %v3723_v56  ;;  %v3801_v15 = vadd.f32 %v3723_v56, %v7913_v1 }
 0x7bc   : > { %3802 = vadd.xlane.f32.xlu0 %v3801_v15 }
 0x7bf   : > { %v3725_v3 = vpop.f32.mrf.mxu3 }
 0x7c0   : > { %v3726_v2 = vadd.f32 %v3725_v3, %v3677_v44 }
 0x7c2   : > { %3759 = vst [vmem:[%s7707_s16 + $0xe8] sm:$0xff] %v3726_v2  ;;  %v3804_v53 = vadd.f32 %v3726_v2, %v7925_v10 }
 0x7c4   : > { %3805 = vadd.xlane.f32.xlu1 %v3804_v53 }
 0x7c7   : > { %v3727_v36 = vpop.f32.mrf.mxu3  ;;  %v3764_v38 = vpop.xlane.xlu0 %3763 }
 0x7c8   : > { %v3728_v61 = vadd.f32 %v3727_v36, %v3679_v28  ;;  %v3810_v1 = vmul.f32 0.00390625, %v3764_v38 }
 0x7ca   : > { %3761 = vst [vmem:[%s7707_s16 + $0xf8] sm:$0xff] %v3728_v61  ;;  %v3807_v10 = vadd.f32 %v3728_v61, %v7935_v46 }
 0x7cb   : > { %3831 = vst.msk [vmem:[%s8168_s10] sm:$0xff] %vm3830_vm0, %v3810_v1 }
 0x7cc   : > { %3808 = vadd.xlane.f32.xlu2 %v3807_v10 }
 0x7cf   : > { %v3767_v24 = vpop.xlane.xlu1 %3766 }
 0x7d0   : > { %v3811_v33 = vmul.f32 0.00390625, %v3767_v24 }
 0x7d2   : > { %3832 = vst.msk [vmem:[%s8168_s10 + $0x8] sm:$0xff] %vm3830_vm0, %v3811_v33 }
 0x7d7   : > { %v3770_v45 = vpop.xlane.xlu2 %3769 }
 0x7d8   : > { %v3812_v17 = vmul.f32 0.00390625, %v3770_v45 }
 0x7da   : > { %3833 = vst.msk [vmem:[%s8168_s10 + $0x10] sm:$0xff] %vm3830_vm0, %v3812_v17 }
 0x7df   : > { %v3773_v35 = vpop.xlane.xlu2 %3772 }
 0x7e0   : > { %v3813_v13 = vmul.f32 0.00390625, %v3773_v35 }
 0x7e2   : > { %3834 = vst.msk [vmem:[%s8168_s10 + $0x18] sm:$0xff] %vm3830_vm0, %v3813_v13 }
 0x7e7   : > { %v3776_v46 = vpop.xlane.xlu0 %3775 }
 0x7e8   : > { %v3814_v8 = vmul.f32 0.00390625, %v3776_v46 }
 0x7ea   : > { %3835 = vst.msk [vmem:[%s8168_s10 + $0x20] sm:$0xff] %vm3830_vm0, %v3814_v8 }
 0x7ef   : > { %v3779_v47 = vpop.xlane.xlu1 %3778 }
 0x7f0   : > { %v3815_v21 = vmul.f32 0.00390625, %v3779_v47 }
 0x7f2   : > { %3836 = vst.msk [vmem:[%s8168_s10 + $0x28] sm:$0xff] %vm3830_vm0, %v3815_v21 }
 0x7f7   : > { %v3782_v14 = vpop.xlane.xlu2 %3781 }
 0x7f8   : > { %v3816_v57 = vmul.f32 0.00390625, %v3782_v14 }
 0x7fa   : > { %3837 = vst.msk [vmem:[%s8168_s10 + $0x30] sm:$0xff] %vm3830_vm0, %v3816_v57 }
 0x7ff   : > { %v3785_v37 = vpop.xlane.xlu0 %3784 }
 0x800   : > { %v3817_v0 = vmul.f32 0.00390625, %v3785_v37 }
 0x802   : > { %3838 = vst.msk [vmem:[%s8168_s10 + $0x38] sm:$0xff] %vm3830_vm0, %v3817_v0 }
 0x807   : > { %v3788_v16 = vpop.xlane.xlu1 %3787 }
 0x808   : > { %v3818_v27 = vmul.f32 0.00390625, %v3788_v16 }
 0x80a   : > { %3839 = vst.msk [vmem:[%s8168_s10 + $0x40] sm:$0xff] %vm3830_vm0, %v3818_v27 }
 0x80f   : > { %v3791_v12 = vpop.xlane.xlu2 %3790 }
 0x810   : > { %v3819_v7 = vmul.f32 0.00390625, %v3791_v12 }
 0x812   : > { %3840 = vst.msk [vmem:[%s8168_s10 + $0x48] sm:$0xff] %vm3830_vm0, %v3819_v7 }
 0x817   : > { %v3794_v32 = vpop.xlane.xlu0 %3793 }
 0x818   : > { %v3820_v63 = vmul.f32 0.00390625, %v3794_v32 }
 0x81a   : > { %3841 = vst.msk [vmem:[%s8168_s10 + $0x50] sm:$0xff] %vm3830_vm0, %v3820_v63 }
 0x81f   : > { %v3797_v48 = vpop.xlane.xlu1 %3796 }
 0x820   : > { %v3821_v11 = vmul.f32 0.00390625, %v3797_v48 }
 0x822   : > { %3842 = vst.msk [vmem:[%s8168_s10 + $0x58] sm:$0xff] %vm3830_vm0, %v3821_v11 }
 0x827   : > { %v3800_v39 = vpop.xlane.xlu2 %3799 }
 0x828   : > { %v3822_v34 = vmul.f32 0.00390625, %v3800_v39 }
 0x82a   : > { %3843 = vst.msk [vmem:[%s8168_s10 + $0x60] sm:$0xff] %vm3830_vm0, %v3822_v34 }
 0x82f   : > { %v3803_v59 = vpop.xlane.xlu0 %3802 }
 0x830   : > { %v3823_v23 = vmul.f32 0.00390625, %v3803_v59 }
 0x832   : > { %3844 = vst.msk [vmem:[%s8168_s10 + $0x68] sm:$0xff] %vm3830_vm0, %v3823_v23 }
 0x837   : > { %v3806_v30 = vpop.xlane.xlu1 %3805 }
 0x838   : > { %v3824_v29 = vmul.f32 0.00390625, %v3806_v30 }
 0x83a   : > { %3845 = vst.msk [vmem:[%s8168_s10 + $0x70] sm:$0xff] %vm3830_vm0, %v3824_v29 }
 0x83f   : > { %v3809_v19 = vpop.xlane.xlu2 %3808 }
 0x840   : > { %v3825_v22 = vmul.f32 0.00390625, %v3809_v19 }
 0x842   : > { %3846 = vst.msk [vmem:[%s8168_s10 + $0x78] sm:$0xff] %vm3830_vm0, %v3825_v22 }
 0x843 PF: > { %s17_s23 = sadd.s32 1, %s4806_s23   ;;  %s9076_s21 = smov %s4802_s22 }
 0x844   : > { %p14_p5 = scmp.ge.s32.totalorder %s17_s23, 4   ;;  %s9077_s22 = smov %s9079_s24 }
 0x846   :  { %16 = sbr.rel (!%p14_p5) target bundleno = 2 (0x2), region = 90 }

// kernel: tse_forward.9
= control target key start
LH: loop header
LB: loop body
LE: loop exit
PB: predicated region body
PF: predicated region fallthrough
CT: control target
= control target key end

     0   :  { %s4778_s21 = smov 0   ;;  %s4780_s22 = smov 0   ;;  %s8079_s0 = inlined_call_operand.vmem [shape: bf16[2,128,256], index: 0, kind: input, shape index: {}]   ;;  %s8080_s1 = inlined_call_operand.vmem [shape: bf16[1024,128], index: 1, kind: input, shape index: {}]   ;;  %s8081_s2 = inlined_call_operand.vmem [shape: f32[1024,1], index: 2, kind: input, shape index: {}]   ;;  %s8082_s3 = inlined_call_operand.vmem [shape: bf16[128,1024], index: 3, kind: input, shape index: {}]   ;;  %s8083_s4 = inlined_call_operand.vmem [shape: f32[128,1], index: 4, kind: input, shape index: {}]   ;;  %s8084_s5 = inlined_call_operand.vmem [shape: f32[2,128,256], index: 5, kind: input, shape index: {}]   ;;  %s8085_s6 = inlined_call_operand.vmem [shape: f32[2,128,256], index: 6, kind: output, shape index: {}]  }
   0x1   :  { %s4782_s23 = smov 0  }
   0x2 LB: > { %s28_s24 = sadd.s32 1, %s4736_s22  ;;  %p3958_p0 = scmp.ge.s32.totalorder %s4740_s23, 1  ;;  %s4740_s23 = sphi %s4782_s23, %s16_s23   ;;  %s4736_s22 = sphi %s4780_s22, %s8910_s22   ;;  %s4732_s21 = sphi %s4778_s21, %s8909_s21  }
   0x3   : > { %p30_p1 = scmp.ge.s32.totalorder %s28_s24, 2  ;;  %p250_p2 = scmp.lt.s32.totalorder %s4740_s23, 3 }
   0x5   : > { %s8912_s24 = smov (%p30_p1, %s28_s24), 0  ;;  %p251_p3 = pnand %p3958_p0, %p250_p2 }
   0x7   : > { %254 = sbr.rel (%p251_p3) target bundleno = 1997 (0x7cd), region = 44 }
   0xc   : > { %v501_v0 = vld [vmem:[%s8081_s2 + $0xf0] sm:$0xff]  ;;  %p298_p4 = scmp.lt.s32.totalorder %s4732_s21, 1  ;;  %v4742_v2 = vmov 0   ;;  %v483_v3 = vld [vmem:[%s8081_s2 + $0x60] sm:$0xff]  ;;  %v502_v4 = vld [vmem:[%s8081_s2 + $0xf8] sm:$0xff] }
   0xd   : > { %v485_v1 = vld [vmem:[%s8081_s2 + $0x70] sm:$0xff]  ;;  %4716 = vset.pattern.permute.xlu1 %v4742_v2  ;;  %4715 = vset.pattern.permute.xlu0 %v4742_v2  ;;  %v486_v13 = vld [vmem:[%s8081_s2 + $0x78] sm:$0xff]  ;;  %v484_v17 = vld [vmem:[%s8081_s2 + $0x68] sm:$0xff] }
   0xe   : > { %751 = vperm.xlu1 %4716, %v501_v0   ;;  %671 = vperm.xlu0 %4715, %v485_v1   ;;  %s8914_s21 = smov (!%p298_p4, %s4732_s21), 1  ;;  %v500_v27 = vld [vmem:[%s8081_s2 + $0xe8] sm:$0xff]  ;;  %v499_v30 = vld [vmem:[%s8081_s2 + $0xe0] sm:$0xff]  ;;  %v481_v32 = vld [vmem:[%s8081_s2 + $0x50] sm:$0xff] }
   0xf   : > { %4717 = vset.pattern.permute.xlu2 %v4742_v2  ;;  %s4543_s7 = sshll.u32 %s8914_s21, 7  ;;  %v497_v42 = vld [vmem:[%s8081_s2 + $0xd0] sm:$0xff]  ;;  %v482_v45 = vld [vmem:[%s8081_s2 + $0x58] sm:$0xff]  ;;  %v480_v57 = vld [vmem:[%s8081_s2 + $0x48] sm:$0xff] }
  0x10   : > { %661 = vperm.xlu2 %4717, %v483_v3   ;;  %s4811_s10 = scalar_lea.vmem %s8079_s0, %s4543_s7  ;;  %v498_v47 = vld [vmem:[%s8081_s2 + $0xd8] sm:$0xff]  ;;  %v479_v60 = vld [vmem:[%s8081_s2 + $0x40] sm:$0xff]  ;;  %v477_v1 = vld [vmem:[%s8081_s2 + $0x30] sm:$0xff] }
  0x11   : > { %v4279_v5 = vld [vmem:[%s4811_s10 + $0x70] sm:$0xf]  ;;  %v4561_v6 = vld [vmem:[%s4811_s10 + $0x74] sm:$0xf0]  ;;  %v4560_v7 = vld [vmem:[%s4811_s10 + $0x74] sm:$0xf] }
  0x12   : > { %v4280_v8 = vor.u32 %v4561_v6, %v4279_v5  ;;  %v4281_v9 = vld [vmem:[%s4811_s10 + $0x78] sm:$0xf0]  ;;  %v4271_v10 = vld [vmem:[%s4811_s10 + $0x60] sm:$0xf]  ;;  %v4559_v11 = vld [vmem:[%s4811_s10 + $0x64] sm:$0xf0] }
  0x13   : > { %v4284_v12 = vor.u32 %v4560_v7, %v4281_v9  ;;  %v4558_v14 = vld [vmem:[%s4811_s10 + $0x64] sm:$0xf]  ;;  %v4273_v15 = vld [vmem:[%s4811_s10 + $0x68] sm:$0xf0]  ;;  %v4272_v16 = vor.u32 %v4559_v11, %v4271_v10  ;;  %v4263_v19 = vld [vmem:[%s4811_s10 + $0x50] sm:$0xf] }
  0x14   : > { %1703 = vmatpush.bf16.msra.mxu0 %v4280_v8  ;;  %v4276_v18 = vor.u32 %v4558_v14, %v4273_v15  ;;  %v4557_v20 = vld [vmem:[%s4811_s10 + $0x54] sm:$0xf0]  ;;  %v4556_v21 = vld [vmem:[%s4811_s10 + $0x54] sm:$0xf]  ;;  %v4265_v22 = vld [vmem:[%s4811_s10 + $0x58] sm:$0xf0] }
  0x15   : > { %2032 = vmatpush.bf16.msra.mxu1 %v4284_v12  ;;  %v4264_v23 = vor.u32 %v4557_v20, %v4263_v19  ;;  %v4268_v24 = vor.u32 %v4556_v21, %v4265_v22  ;;  %v4255_v25 = vld [vmem:[%s4811_s10 + $0x40] sm:$0xf]  ;;  %v4555_v26 = vld [vmem:[%s4811_s10 + $0x44] sm:$0xf0]  ;;  %v4554_v28 = vld [vmem:[%s4811_s10 + $0x44] sm:$0xf] }
  0x16   : > { %756 = vperm.xlu1 %4716, %v502_v4   ;;  %676 = vperm.xlu0 %4715, %v486_v13   ;;  %v4257_v29 = vld [vmem:[%s4811_s10 + $0x48] sm:$0xf0]  ;;  %v4256_v31 = vor.u32 %v4555_v26, %v4255_v25  ;;  %v4247_v34 = vld [vmem:[%s4811_s10 + $0x30] sm:$0xf]  ;;  %v4553_v35 = vld [vmem:[%s4811_s10 + $0x34] sm:$0xf0] }
  0x17   : > { %v4260_v33 = vor.u32 %v4554_v28, %v4257_v29  ;;  %v4552_v36 = vld [vmem:[%s4811_s10 + $0x34] sm:$0xf]  ;;  %v4249_v37 = vld [vmem:[%s4811_s10 + $0x38] sm:$0xf0]  ;;  %v4248_v38 = vor.u32 %v4553_v35, %v4247_v34  ;;  %v4239_v40 = vld [vmem:[%s4811_s10 + $0x20] sm:$0xf] }
  0x18   : > { %666 = vperm.xlu2 %4717, %v484_v17   ;;  %1704 = vmatpush.bf16.msra.mxu0 %v4272_v16  ;;  %v4252_v39 = vor.u32 %v4552_v36, %v4249_v37  ;;  %v4551_v41 = vld [vmem:[%s4811_s10 + $0x24] sm:$0xf0]  ;;  %v4550_v43 = vld [vmem:[%s4811_s10 + $0x24] sm:$0xf]  ;;  %v4241_v44 = vld [vmem:[%s4811_s10 + $0x28] sm:$0xf0] }
  0x19   : > { %2033 = vmatpush.bf16.msra.mxu1 %v4276_v18  ;;  %v4240_v46 = vor.u32 %v4551_v41, %v4239_v40  ;;  %v4244_v48 = vor.u32 %v4550_v43, %v4241_v44  ;;  %v4231_v49 = vld [vmem:[%s4811_s10 + $0x10] sm:$0xf]  ;;  %v4549_v50 = vld [vmem:[%s4811_s10 + $0x14] sm:$0xf0]  ;;  %v4548_v51 = vld [vmem:[%s4811_s10 + $0x14] sm:$0xf] }
  0x1a   : > { %v4233_v52 = vld [vmem:[%s4811_s10 + $0x18] sm:$0xf0]  ;;  %v4232_v53 = vor.u32 %v4549_v50, %v4231_v49  ;;  %v4223_v55 = vld [vmem:[%s4811_s10] sm:$0xf]  ;;  %v4547_v56 = vld [vmem:[%s4811_s10 + $0x4] sm:$0xf0] }
  0x1b   : > { %v4236_v54 = vor.u32 %v4548_v51, %v4233_v52  ;;  %v4546_v58 = vld [vmem:[%s4811_s10 + $0x4] sm:$0xf]  ;;  %v4225_v59 = vld [vmem:[%s4811_s10 + $0x8] sm:$0xf0]  ;;  %v4224_v61 = vor.u32 %v4547_v56, %v4223_v55  ;;  %v478_v3 = vld [vmem:[%s8081_s2 + $0x38] sm:$0xff]  ;;  %s4544_s10 = sshll.u32 %s8914_s21, 8 }
  0x1c   : > { %1705 = vmatpush.bf16.msra.mxu0 %v4264_v23  ;;  %v495_v62 = vld [vmem:[%s8081_s2 + $0xc0] sm:$0xff]  ;;  %v4228_v63 = vor.u32 %v4546_v58, %v4225_v59  ;;  %v496_v2 = vld [vmem:[%s8081_s2 + $0xc8] sm:$0xff]  ;;  %v494_v4 = vld [vmem:[%s8081_s2 + $0xb8] sm:$0xff]  ;;  %s7631_s20 = scalar_lea.vmem %s8084_s5, %s4544_s10  ;;  %s7651_s26 = scalar_lea.vmem %s8085_s6, %s4544_s10 }
  0x1d   : > { %2034 = vmatpush.bf16.msra.mxu1 %v4268_v24  ;;  %v4562_v0 = vld [vmem:[%s8080_s1] sm:$0xff]  ;;  %v493_v5 = vld [vmem:[%s8081_s2 + $0xb0] sm:$0xff]  ;;  %v4563_v7 = vld [vmem:[%s8080_s1 + $0x8] sm:$0xff] }
  0x1e   : > { %746 = vperm.xlu1 %4716, %v500_v27   ;;  %741 = vperm.xlu0 %4715, %v499_v30   ;;  %v475_v6 = vld [vmem:[%s8081_s2 + $0x20] sm:$0xff]  ;;  %v476_v9 = vld [vmem:[%s8081_s2 + $0x28] sm:$0xff]  ;;  %v474_v11 = vld [vmem:[%s8081_s2 + $0x18] sm:$0xff] }
  0x1f   : > { %v491_v8 = vld [vmem:[%s8081_s2 + $0xa0] sm:$0xff]  ;;  %v492_v10 = vld [vmem:[%s8081_s2 + $0xa8] sm:$0xff]  ;;  %v473_v12 = vld [vmem:[%s8081_s2 + $0x10] sm:$0xff] }
  0x20   : > { %651 = vperm.xlu2 %4717, %v481_v32   ;;  %1706 = vmatpush.bf16.msra.mxu0 %v4256_v31  ;;  %v489_v13 = vld [vmem:[%s8081_s2 + $0x90] sm:$0xff]  ;;  %v471_v15 = vld [vmem:[%s8081_s2] sm:$0xff]  ;;  %v472_v16 = vld [vmem:[%s8081_s2 + $0x8] sm:$0xff] }
  0x21   : > { %2035 = vmatpush.bf16.msra.mxu1 %v4260_v33  ;;  %v4564_v14 = vld [vmem:[%s8080_s1 + $0x10] sm:$0xff]  ;;  %v4565_v17 = vld [vmem:[%s8080_s1 + $0x18] sm:$0xff]  ;;  %v4566_v19 = vld [vmem:[%s8080_s1 + $0x20] sm:$0xff] }
  0x22   : > { %v4567_v24 = vld [vmem:[%s8080_s1 + $0x28] sm:$0xff]  ;;  %v4568_v29 = vld [vmem:[%s8080_s1 + $0x30] sm:$0xff]  ;;  %v490_v32 = vld [vmem:[%s8081_s2 + $0x98] sm:$0xff] }
  0x23   : > { %v487_v35 = vld [vmem:[%s8081_s2 + $0x80] sm:$0xff]  ;;  %v488_v40 = vld [vmem:[%s8081_s2 + $0x88] sm:$0xff] }
  0x24   : > { %1707 = vmatpush.bf16.msra.mxu0 %v4248_v38  ;;  %v4569_v38 = vld [vmem:[%s8080_s1 + $0x38] sm:$0xff]  ;;  %v4571_v56 = vld [vmem:[%s8080_s1 + $0x48] sm:$0xff] }
  0x25   : > { %2036 = vmatpush.bf16.msra.mxu1 %v4252_v39 }
  0x26   : > { %731 = vperm.xlu1 %4716, %v497_v42   ;;  %656 = vperm.xlu0 %4715, %v482_v45   ;;  %v4570_v45 = vld [vmem:[%s8080_s1 + $0x40] sm:$0xff] }
  0x28   : > { %736 = vperm.xlu2 %4717, %v498_v47   ;;  %1708 = vmatpush.bf16.msra.mxu0 %v4240_v46 }
  0x29   : > { %2037 = vmatpush.bf16.msra.mxu1 %v4244_v48 }
  0x2c   : > { %1709 = vmatpush.bf16.msra.mxu0 %v4232_v53 }
  0x2d   : > { %2038 = vmatpush.bf16.msra.mxu1 %v4236_v54 }
  0x2e   : > { %646 = vperm.xlu1 %4716, %v480_v57   ;;  %641 = vperm.xlu0 %4715, %v479_v60  }
  0x30   : > { %721 = vperm.xlu2 %4717, %v495_v62   ;;  %1710 = vmatpush.bf16.msra.mxu0 %v4224_v61 }
  0x31   : > { %2039 = vmatpush.bf16.msra.mxu1 %v4228_v63 }
  0x33   : > { %1711 = vmatmul.bf16.vlgmr.msra.gmra.mxu0 %v4562_v0 }
  0x34   : > { %2040 = vmatmul.bf16.vlgmr.msra.gmra.mxu1 %v4562_v0 }
  0x36   : > { %631 = vperm.xlu1 %4716, %v477_v1   ;;  %726 = vperm.xlu0 %4715, %v496_v2  }
  0x38   : > { %636 = vperm.xlu2 %4717, %v478_v3  }
  0x3e   : > { %716 = vperm.xlu1 %4716, %v494_v4   ;;  %711 = vperm.xlu0 %4715, %v493_v5  }
  0x40   : > { %621 = vperm.xlu2 %4717, %v475_v6  }
  0x43   : > { %1716 = vmatmul.bf16.gmra.mxu0 %v4563_v7 }
  0x44   : > { %2045 = vmatmul.bf16.gmra.mxu1 %v4563_v7 }
  0x46   : > { %701 = vperm.xlu1 %4716, %v491_v8   ;;  %626 = vperm.xlu0 %4715, %v476_v9  }
  0x48   : > { %706 = vperm.xlu2 %4717, %v492_v10  }
  0x4e   : > { %616 = vperm.xlu1 %4716, %v474_v11   ;;  %611 = vperm.xlu0 %4715, %v473_v12   ;;  %v4572_v12 = vld [vmem:[%s8080_s1 + $0x50] sm:$0xff]  ;;  %v503_v11 = vld [vmem:[%s8081_s2 + $0x100] sm:$0xff] }
  0x50   : > { %691 = vperm.xlu2 %4717, %v489_v13  }
  0x53   : > { %1721 = vmatmul.bf16.gmra.mxu0 %v4564_v14 }
  0x54   : > { %2050 = vmatmul.bf16.gmra.mxu1 %v4564_v14 }
  0x56   : > { %601 = vperm.xlu1 %4716, %v471_v15   ;;  %696 = vperm.xlu0 %4715, %v490_v32  }
  0x58   : > { %606 = vperm.xlu2 %4717, %v472_v16   ;;  %v518_v16 = vld [vmem:[%s8081_s2 + $0x178] sm:$0xff] }
  0x5e   : > { %681 = vperm.xlu0 %4715, %v487_v35   ;;  %686 = vperm.xlu1 %4716, %v488_v40   ;;  %v515_v40 = vld [vmem:[%s8081_s2 + $0x160] sm:$0xff] }
  0x63   : > { %1726 = vmatmul.bf16.gmra.mxu0 %v4565_v17 }
  0x64   : > { %2055 = vmatmul.bf16.gmra.mxu1 %v4565_v17 }
  0x66   : > { %836 = vperm.xlu0 %4715, %v518_v16  }
  0x6a   : > { %v4935_v18 = vpop.permute.xlu2 %661 }
  0x6e   : > { %821 = vperm.xlu0 %4715, %v515_v40  }
  0x72   : > { %v4940_v20 = vpop.permute.xlu2 %666 }
  0x73   : > { %1731 = vmatmul.bf16.gmra.mxu0 %v4566_v19 }
  0x74   : > { %2060 = vmatmul.bf16.gmra.mxu1 %v4566_v19 }
  0x7a   : > { %v4942_v21 = vpop.permute.xlu2 %651 }
  0x80   : > { %v4944_v22 = vpop.permute.xlu1 %751  ;;  %v4946_v23 = vpop.permute.xlu0 %671 }
  0x82   : > { %v4955_v27 = vpop.permute.xlu2 %736 }
  0x83   : > { %1736 = vmatmul.bf16.gmra.mxu0 %v4567_v24 }
  0x84   : > { %2065 = vmatmul.bf16.gmra.mxu1 %v4567_v24 }
  0x88   : > { %v4951_v25 = vpop.permute.xlu1 %756  ;;  %v4953_v26 = vpop.permute.xlu0 %676 }
  0x8a   : > { %v4964_v31 = vpop.permute.xlu2 %721 }
  0x90   : > { %v4957_v28 = vpop.permute.xlu1 %746  ;;  %v4962_v30 = vpop.permute.xlu0 %741 }
  0x92   : > { %v4976_v36 = vpop.permute.xlu2 %636 }
  0x93   : > { %1741 = vmatmul.bf16.gmra.mxu0 %v4568_v29 }
  0x94   : > { %2070 = vmatmul.bf16.gmra.mxu1 %v4568_v29 }
  0x98   : > { %v4969_v33 = vpop.permute.xlu1 %731  ;;  %v4971_v34 = vpop.permute.xlu0 %656 }
  0x9a   : > { %v622_v41 = vpop.permute.xlu2 %621 }
  0xa0   : > { %v4978_v37 = vpop.permute.xlu1 %646  ;;  %v4983_v39 = vpop.permute.xlu0 %641 }
  0xa2   : > { %v4997_v47 = vpop.permute.xlu2 %706 }
  0xa3   : > { %1746 = vmatmul.bf16.gmra.mxu0 %v4569_v38 }
  0xa4   : > { %2075 = vmatmul.bf16.gmra.mxu1 %v4569_v38  ;;  %v511_v38 = vld [vmem:[%s8081_s2 + $0x140] sm:$0xff] }
  0xa8   : > { %v4988_v42 = vpop.permute.xlu1 %631  ;;  %v4990_v43 = vpop.permute.xlu0 %726 }
  0xaa   : > { %v5003_v53 = vpop.permute.xlu2 %691 }
  0xb0   : > { %v4992_v44 = vpop.permute.xlu1 %716  ;;  %v1712_v46 = vpop.f32.mrf.mxu0 }
  0xb1   : > { %v2041_v48 = vpop.f32.mrf.mxu1  ;;  %v4999_v49 = vpop.permute.xlu0 %711 }
  0xb2   : > { %v607_v59 = vpop.permute.xlu2 %606 }
  0xb3   : > { %1751 = vmatmul.bf16.gmra.mxu0 %v4570_v45 }
  0xb4   : > { %2080 = vmatmul.bf16.gmra.mxu1 %v4570_v45  ;;  %v4573_v45 = vld [vmem:[%s8080_s1 + $0x58] sm:$0xff] }
  0xb8   : > { %v5001_v50 = vpop.permute.xlu1 %701  ;;  %v1714_v51 = vpop.f32.mrf.mxu0 }
  0xb9   : > { %v2043_v52 = vpop.f32.mrf.mxu1  ;;  %v627_v54 = vpop.permute.xlu0 %626  ;;  %v5010_v63 = vadd.f32 %v1714_v51, %v607_v59 }
  0xba   : > { %v5008_v60 = vadd.f32 %v2043_v52, %v607_v59  ;;  %v532_v52 = vld [vmem:[%s8081_s2 + $0x1e8] sm:$0xff] }
  0xbb   : > { %906 = vperm.xlu0 %4715, %v532_v52  }
  0xbc   : > { %8299 = vst [vmem:[#allocation2_spill] sm:$0xff] %v5008_v60 }
  0xc0   : > { %v617_v55 = vpop.permute.xlu1 %616  ;;  %v1717_v57 = vpop.f32.mrf.mxu0 }
  0xc1   : > { %v2046_v58 = vpop.f32.mrf.mxu1  ;;  %v612_v61 = vpop.permute.xlu0 %611 }
  0xc2   : > { %v5012_v0 = vadd.f32 %v2046_v58, %v612_v61  ;;  %v5018_v4 = vadd.f32 %v1717_v57, %v612_v61 }
  0xc3   : > { %1756 = vmatmul.bf16.gmra.mxu0 %v4571_v56 }
  0xc4   : > { %2085 = vmatmul.bf16.gmra.mxu1 %v4571_v56  ;;  %8300 = vst [vmem:[#allocation3_spill] sm:$0xff] %v5012_v0 }
  0xc8   : > { %v602_v62 = vpop.permute.xlu1 %601  ;;  %v1719_v3 = vpop.f32.mrf.mxu0 }
  0xc9   : > { %v5014_v1 = vadd.f32 %v1712_v46, %v602_v62  ;;  %v5016_v2 = vadd.f32 %v2041_v48, %v602_v62  ;;  %v5020_v5 = vadd.f32 %v1719_v3, %v617_v55  ;;  %v2048_v6 = vpop.f32.mrf.mxu1  ;;  %v529_v3 = vld [vmem:[%s8081_s2 + $0x1d0] sm:$0xff]  ;;  %v504_v62 = vld [vmem:[%s8081_s2 + $0x108] sm:$0xff] }
  0xca   : > { %v5024_v8 = vadd.f32 %v2048_v6, %v617_v55  ;;  %891 = vperm.xlu0 %4715, %v529_v3   ;;  %v510_v3 = vld [vmem:[%s8081_s2 + $0x138] sm:$0xff] }
  0xcb   : > { %8301 = vst [vmem:[#allocation4_spill] sm:$0xff] %v5016_v2 }
  0xcc   : > { %8302 = vst [vmem:[#allocation5_spill] sm:$0xff] %v5024_v8 }
  0xd0   : > { %v1722_v13 = vpop.f32.mrf.mxu0 }
  0xd1   : > { %v2051_v14 = vpop.f32.mrf.mxu1  ;;  %v5040_v19 = vadd.f32 %v1722_v13, %v622_v41  ;;  %v512_v13 = vld [vmem:[%s8081_s2 + $0x148] sm:$0xff] }
  0xd2   : > { %v5035_v15 = vadd.f32 %v2051_v14, %v622_v41  ;;  %v533_v41 = vld [vmem:[%s8081_s2 + $0x1f0] sm:$0xff]  ;;  %v530_v14 = vld [vmem:[%s8081_s2 + $0x1d8] sm:$0xff]  ;;  %806 = vperm.xlu0 %4715, %v512_v13  }
  0xd3   : > { %1761 = vmatmul.bf16.gmra.mxu0 %v4572_v12  ;;  %911 = vperm.xlu1 %4716, %v533_v41  }
  0xd4   : > { %8303 = vst [vmem:[#allocation6_spill] sm:$0xff] %v5035_v15  ;;  %2090 = vmatmul.bf16.gmra.mxu1 %v4572_v12 }
  0xd8   : > { %v1724_v17 = vpop.f32.mrf.mxu0 }
  0xd9   : > { %v5042_v24 = vadd.f32 %v1724_v17, %v627_v54  ;;  %v2053_v29 = vpop.f32.mrf.mxu1 }
  0xda   : > { %v5044_v32 = vadd.f32 %v2053_v29, %v627_v54  ;;  %v516_v54 = vld [vmem:[%s8081_s2 + $0x168] sm:$0xff] }
  0xdb   : > { %v2365_v35 = vpack.c.bf16 %v5042_v24, %v5040_v19  ;;  %826 = vperm.xlu1 %4716, %v516_v54  }
  0xdc   : > { %8304 = vst [vmem:[#allocation7_spill] sm:$0xff] %v5044_v32 }
  0xe0   : > { %v1727_v46 = vpop.f32.mrf.mxu0 }
  0xe1   : > { %v2056_v48 = vpop.f32.mrf.mxu1  ;;  %v5069_v56 = vadd.f32 %v1727_v46, %v4988_v42  ;;  %v527_v46 = vld [vmem:[%s8081_s2 + $0x1c0] sm:$0xff] }
  0xe2   : > { %v5060_v51 = vadd.f32 %v2056_v48, %v4988_v42  ;;  %v513_v42 = vld [vmem:[%s8081_s2 + $0x150] sm:$0xff]  ;;  %v4575_v48 = vld [vmem:[%s8080_s1 + $0x68] sm:$0xff] }
  0xe3   : > { %1766 = vmatmul.bf16.gmra.mxu0 %v4573_v45  ;;  %811 = vperm.xlu1 %4716, %v513_v42  }
  0xe4   : > { %8305 = vst [vmem:[#allocation8_spill] sm:$0xff] %v5060_v51  ;;  %2095 = vmatmul.bf16.gmra.mxu1 %v4573_v45  ;;  %v509_v45 = vld [vmem:[%s8081_s2 + $0x130] sm:$0xff] }
  0xe5   : > { %791 = vperm.xlu0 %4715, %v509_v45   ;;  %v534_v45 = vld [vmem:[%s8081_s2 + $0x1f8] sm:$0xff] }
  0xe8   : > { %v1729_v55 = vpop.f32.mrf.mxu0 }
  0xe9   : > { %v5072_v57 = vadd.f32 %v1729_v55, %v4976_v36  ;;  %v2058_v58 = vpop.f32.mrf.mxu1  ;;  %v526_v55 = vld [vmem:[%s8081_s2 + $0x1b8] sm:$0xff] }
  0xea   : > { %v5075_v59 = vadd.f32 %v2058_v58, %v4976_v36  ;;  %v4574_v36 = vld [vmem:[%s8080_s1 + $0x60] sm:$0xff]  ;;  %v517_v58 = vld [vmem:[%s8081_s2 + $0x170] sm:$0xff] }
  0xeb   : > { %v2367_v61 = vpack.c.bf16 %v5072_v57, %v5069_v56  ;;  %896 = vperm.xlu1 %4716, %v530_v14   ;;  %831 = vperm.xlu2 %4717, %v517_v58   ;;  %v506_v58 = vld [vmem:[%s8081_s2 + $0x118] sm:$0xff]  ;;  %v8317_v56 = vpack.c.bf16 %v5020_v5, %v5018_v4 }
  0xec   : > { %8306 = vst [vmem:[#allocation9_spill] sm:$0xff] %v5075_v59 }
  0xed   : > { %876 = vperm.xlu0 %4715, %v526_v55  }
  0xf0   : > { %v5090_v6 = vpop.f32.mrf.mxu0 }
  0xf1   : > { %v2061_v12 = vpop.f32.mrf.mxu1 }
  0xf2   : > { %v5099_v16 = vadd.f32 %v2061_v12, %v4983_v39 }
  0xf3   : > { %1771 = vmatmul.bf16.gmra.mxu0 %v4574_v36  ;;  %881 = vperm.xlu1 %4716, %v527_v46   ;;  %v507_v46 = vld [vmem:[%s8081_s2 + $0x120] sm:$0xff] }
  0xf4   : > { %2100 = vmatmul.bf16.gmra.mxu1 %v4574_v36  ;;  %8307 = vst [vmem:[#allocation10_spill] sm:$0xff] %v5099_v16  ;;  %916 = vperm.xlu2 %4717, %v534_v45  }
  0xf8   : > { %v5101_v17 = vpop.f32.mrf.mxu0 }
  0xf9   : > { %v2063_v29 = vpop.f32.mrf.mxu1 }
  0xfa   : > { %v5104_v40 = vadd.f32 %v2063_v29, %v4978_v37  ;;  %v523_v29 = vld [vmem:[%s8081_s2 + $0x1a0] sm:$0xff] }
  0xfb   : > { %796 = vperm.xlu1 %4716, %v510_v3   ;;  %861 = vperm.xlu0 %4715, %v523_v29   ;;  %v531_v3 = vld [vmem:[%s8081_s2 + $0x1e0] sm:$0xff] }
  0xfc   : > { %8308 = vst [vmem:[#allocation11_spill] sm:$0xff] %v5104_v40  ;;  %901 = vperm.xlu2 %4717, %v531_v3   ;;  %v4577_v3 = vld [vmem:[%s8080_s1 + $0x78] sm:$0xff] }
 0x100   : > { %v5117_v52 = vpop.f32.mrf.mxu0 }
 0x101   : > { %v2066_v54 = vpop.f32.mrf.mxu1 }
 0x102   : > { %v5129_v42 = vadd.f32 %v2066_v54, %v4942_v21 }
 0x103   : > { %1776 = vmatmul.bf16.gmra.mxu0 %v4575_v48  ;;  %781 = vperm.xlu1 %4716, %v507_v46  }
 0x104   : > { %2105 = vmatmul.bf16.gmra.mxu1 %v4575_v48  ;;  %8309 = vst [vmem:[#allocation12_spill] sm:$0xff] %v5129_v42  ;;  %v4576_v48 = vld [vmem:[%s8080_s1 + $0x70] sm:$0xff]  ;;  %776 = vperm.xlu0 %4715, %v506_v58   ;;  %v514_v58 = vld [vmem:[%s8081_s2 + $0x158] sm:$0xff] }
 0x105   : > { %816 = vperm.xlu2 %4717, %v514_v58  }
 0x108   : > { %v1739_v36 = vpop.f32.mrf.mxu0 }
 0x109   : > { %v2068_v12 = vpop.f32.mrf.mxu1 }
 0x10a   : > { %v5132_v13 = vadd.f32 %v2068_v12, %v4971_v34  ;;  %v524_v12 = vld [vmem:[%s8081_s2 + $0x1a8] sm:$0xff] }
 0x10b   : > { %866 = vperm.xlu1 %4716, %v524_v12  }
 0x10c   : > { %8310 = vst [vmem:[#allocation13_spill] sm:$0xff] %v5132_v13  ;;  %761 = vperm.xlu0 %4715, %v503_v11   ;;  %v697_v11 = vpop.permute.xlu0 %696 }
 0x10d   : > { %801 = vperm.xlu2 %4717, %v511_v38  }
 0x110   : > { %v1742_v54 = vpop.f32.mrf.mxu0 }
 0x111   : > { %v2071_v55 = vpop.f32.mrf.mxu1 }
 0x112   : > { %v5158_v29 = vadd.f32 %v2071_v55, %v4935_v18  ;;  %v521_v55 = vld [vmem:[%s8081_s2 + $0x190] sm:$0xff] }
 0x113   : > { %1781 = vmatmul.bf16.gmra.mxu0 %v4576_v48  ;;  %851 = vperm.xlu1 %4716, %v521_v55  }
 0x114   : > { %2110 = vmatmul.bf16.gmra.mxu1 %v4576_v48  ;;  %8311 = vst [vmem:[#allocation14_spill] sm:$0xff] %v5158_v29 }
 0x118   : > { %v1744_v45 = vpop.f32.mrf.mxu0 }
 0x119   : > { %v2073_v46 = vpop.f32.mrf.mxu1  ;;  %v1745_v9 = vadd.f32 %v1744_v45, %v4940_v20  ;;  %v682_v45 = vpop.permute.xlu0 %681 }
 0x11a   : > { %v5161_v48 = vadd.f32 %v2073_v46, %v4940_v20 }
 0x11b   : > { %766 = vperm.xlu1 %4716, %v504_v62   ;;  %v528_v62 = vld [vmem:[%s8081_s2 + $0x1c8] sm:$0xff] }
 0x11c   : > { %8312 = vst [vmem:[#allocation15_spill] sm:$0xff] %v5161_v48  ;;  %886 = vperm.xlu2 %4717, %v528_v62   ;;  %v2565_v48 = vld [vmem:[%s8083_s4 + $0x60] sm:$0xff] }
 0x120   : > { %v1747_v12 = vpop.f32.mrf.mxu0 }
 0x121   : > { %v2076_v46 = vpop.f32.mrf.mxu1  ;;  %v1748_v55 = vadd.f32 %v1747_v12, %v4946_v23 }
 0x122   : > { %v5184_v58 = vadd.f32 %v2076_v46, %v4946_v23  ;;  %v1743_v46 = vadd.f32 %v1742_v54, %v4935_v18  ;;  %v1740_v23 = vadd.f32 %v1739_v36, %v4971_v34  ;;  %v1735_v18 = vadd.f32 %v5101_v17, %v4978_v37  ;;  %v525_v34 = vld [vmem:[%s8081_s2 + $0x1b0] sm:$0xff] }
 0x123   : > { %1786 = vmatmul.bf16.gmra.mxu0 %v4577_v3 }
 0x124   : > { %2115 = vmatmul.bf16.gmra.mxu1 %v4577_v3  ;;  %8313 = vst [vmem:[#allocation16_spill] sm:$0xff] %v5184_v58  ;;  %871 = vperm.xlu2 %4717, %v525_v34  }
 0x128   : > { %v1749_v41 = vpop.f32.mrf.mxu0 }
 0x129   : > { %v1750_v14 = vadd.f32 %v1749_v41, %v4953_v26  ;;  %v2078_v3 = vpop.f32.mrf.mxu1  ;;  %v2373_v41 = vpack.c.bf16 %v1745_v9, %v1743_v46  ;;  %v1733_v9 = vadd.f32 %v5090_v6, %v4983_v39  ;;  %v508_v39 = vld [vmem:[%s8081_s2 + $0x128] sm:$0xff] }
 0x12a   : > { %v5189_v7 = vadd.f32 %v2078_v3, %v4953_v26  ;;  %v4578_v26 = vld [vmem:[%s8080_s1 + $0x80] sm:$0xff]  ;;  %v4579_v6 = vld [vmem:[%s8080_s1 + $0x88] sm:$0xff] }
 0x12b   : > { %v2375_v10 = vpack.c.bf16 %v1750_v14, %v1748_v55  ;;  %v1738_v14 = vadd.f32 %v5117_v52, %v4942_v21  ;;  %v687_v21 = vpop.permute.xlu1 %686  ;;  %v2369_v52 = vpack.c.bf16 %v1735_v18, %v1733_v9  ;;  %v5273_v9 = vpop.permute.xlu0 %836 }
 0x12c   : > { %8314 = vst [vmem:[#allocation17_spill] sm:$0xff] %v5189_v7  ;;  %786 = vperm.xlu2 %4717, %v508_v39   ;;  %v4599_v7 = vld [vmem:[%s8080_s1 + $0x128] sm:$0xff] }
 0x12d   : > { %2969 = vmatpush.bf16.msra.mxu2 %v2375_v10  ;;  %v2371_v10 = vpack.c.bf16 %v1740_v23, %v1738_v14 }
 0x130   : > { %v1752_v20 = vpop.f32.mrf.mxu0 }
 0x131   : > { %v2081_v12 = vpop.f32.mrf.mxu1  ;;  %2970 = vmatpush.bf16.msra.mxu2 %v2373_v41  ;;  %v5213_v54 = vadd.f32 %v1752_v20, %v682_v45 }
 0x132   : > { %v5204_v55 = vadd.f32 %v2081_v12, %v682_v45 }
 0x133   : > { %1791 = vmatmul.bf16.gmra.mxu0 %v4578_v26 }
 0x134   : > { %8315 = vst [vmem:[#allocation18_spill] sm:$0xff] %v5204_v55  ;;  %2120 = vmatmul.bf16.gmra.mxu1 %v4578_v26  ;;  %v505_v26 = vld [vmem:[%s8081_s2 + $0x110] sm:$0xff] }
 0x135   : > { %2971 = vmatpush.bf16.msra.mxu2 %v2371_v10  ;;  %771 = vperm.xlu2 %4717, %v505_v26   ;;  %v549_v55 = vld [vmem:[%s8081_s2 + $0x270] sm:$0xff] }
 0x136   : > { %991 = vperm.xlu1 %4716, %v549_v55   ;;  %v566_v55 = vld [vmem:[%s8081_s2 + $0x2f8] sm:$0xff] }
 0x138   : > { %v1754_v36 = vpop.f32.mrf.mxu0 }
 0x139   : > { %v5215_v3 = vadd.f32 %v1754_v36, %v687_v21  ;;  %v2083_v37 = vpop.f32.mrf.mxu1  ;;  %2972 = vmatpush.bf16.msra.mxu2 %v2369_v52 }
 0x13a   : > { %v5217_v17 = vadd.f32 %v2083_v37, %v687_v21 }
 0x13c   : > { %8316 = vst [vmem:[#allocation19_spill] sm:$0xff] %v5217_v17 }
 0x13d   : > { %2973 = vmatpush.bf16.msra.mxu2 %v2367_v61 }
 0x13e   : > { %1076 = vperm.xlu1 %4716, %v566_v55   ;;  %v563_v55 = vld [vmem:[%s8081_s2 + $0x2e0] sm:$0xff] }
 0x140   : > { %v1757_v23 = vpop.f32.mrf.mxu0 }
 0x141   : > { %v2086_v41 = vpop.f32.mrf.mxu1  ;;  %2974 = vmatpush.bf16.msra.mxu2 %v2365_v35  ;;  %v5245_v20 = vadd.f32 %v1757_v23, %v5003_v53  ;;  %v8319_v35 = vpack.c.bf16 %v5010_v63, %v5014_v1 }
 0x142   : > { %v5242_v57 = vadd.f32 %v2086_v41, %v5003_v53  ;;  %v4580_v53 = vld [vmem:[%s8080_s1 + $0x90] sm:$0xff] }
 0x143   : > { %1796 = vmatmul.bf16.gmra.mxu0 %v4579_v6 }
 0x144   : > { %2125 = vmatmul.bf16.gmra.mxu1 %v4579_v6  ;;  %8318 = vst [vmem:[#allocation20_spill] sm:$0xff] %v5242_v57 }
 0x145   : > { %2975 = vmatpush.bf16.msra.mxu2 %v8317_v56  ;;  %v5279_v36 = vpop.permute.xlu1 %911 }
 0x146   : > { %1061 = vperm.xlu1 %4716, %v563_v55  }
 0x148   : > { %v1759_v61 = vpop.f32.mrf.mxu0 }
 0x149   : > { %v5247_v19 = vadd.f32 %v1759_v61, %v697_v11  ;;  %v2088_v24 = vpop.f32.mrf.mxu1  ;;  %2976 = vmatpush.bf16.msra.mxu2 %v8319_v35 }
 0x14a   : > { %v5252_v14 = vadd.f32 %v2088_v24, %v697_v11 }
 0x14c   : > { %8320 = vst [vmem:[#allocation21_spill] sm:$0xff] %v5252_v14 }
 0x14d   : > { %v5286_v6 = vpop.permute.xlu1 %826 }
 0x150   : > { %v1762_v45 = vpop.f32.mrf.mxu0 }
 0x151   : > { %v2091_v12 = vpop.f32.mrf.mxu1  ;;  %v5265_v1 = vadd.f32 %v1762_v45, %v5001_v50  ;;  %v4582_v45 = vld [vmem:[%s8080_s1 + $0xa0] sm:$0xff] }
 0x152   : > { %v5262_v18 = vadd.f32 %v2091_v12, %v5001_v50  ;;  %v4581_v50 = vld [vmem:[%s8080_s1 + $0x98] sm:$0xff] }
 0x153   : > { %1801 = vmatmul.bf16.gmra.mxu0 %v4580_v53 }
 0x154   : > { %2130 = vmatmul.bf16.gmra.mxu1 %v4580_v53  ;;  %8321 = vst [vmem:[#allocation22_spill] sm:$0xff] %v5262_v18 }
 0x158   : > { %v1764_v63 = vpop.f32.mrf.mxu0 }
 0x159   : > { %v5268_v11 = vadd.f32 %v1764_v63, %v4997_v47  ;;  %v2093_v10 = vpop.f32.mrf.mxu1  ;;  %v5311_v63 = vpop.permute.xlu1 %811 }
 0x15a   : > { %v5271_v34 = vadd.f32 %v2093_v10, %v4997_v47  ;;  %v5284_v47 = vpop.permute.xlu0 %821 }
 0x15c   : > { %8322 = vst [vmem:[#allocation23_spill] sm:$0xff] %v5271_v34 }
 0x160   : > { %v1767_v37 = vpop.f32.mrf.mxu0 }
 0x161   : > { %v2096_v39 = vpop.f32.mrf.mxu1  ;;  %v5292_v26 = vadd.f32 %v1767_v37, %v4999_v49  ;;  %v5325_v46 = vpop.permute.xlu1 %896 }
 0x162   : > { %v5289_v23 = vadd.f32 %v2096_v39, %v4999_v49  ;;  %v5307_v12 = vpop.permute.xlu0 %906 }
 0x163   : > { %1806 = vmatmul.bf16.gmra.mxu0 %v4581_v50 }
 0x164   : > { %2135 = vmatmul.bf16.gmra.mxu1 %v4581_v50  ;;  %8323 = vst [vmem:[#allocation24_spill] sm:$0xff] %v5289_v23  ;;  %v5313_v50 = vpop.permute.xlu2 %831 }
 0x168   : > { %v1769_v41 = vpop.f32.mrf.mxu0 }
 0x169   : > { %v5295_v56 = vadd.f32 %v1769_v41, %v4992_v44  ;;  %v2098_v61 = vpop.f32.mrf.mxu1 }
 0x16a   : > { %v5298_v24 = vadd.f32 %v2098_v61, %v4992_v44  ;;  %v5320_v41 = vpop.permute.xlu0 %891 }
 0x16c   : > { %8324 = vst [vmem:[#allocation25_spill] sm:$0xff] %v5298_v24  ;;  %v5327_v5 = vpop.permute.xlu2 %916 }
 0x170   : > { %v5309_v49 = vpop.f32.mrf.mxu0 }
 0x171   : > { %v2101_v10 = vpop.f32.mrf.mxu1 }
 0x172   : > { %v5316_v44 = vadd.f32 %v2101_v10, %v4964_v31  ;;  %v5336_v38 = vpop.permute.xlu0 %806 }
 0x173   : > { %1811 = vmatmul.bf16.gmra.mxu0 %v4582_v45 }
 0x174   : > { %2140 = vmatmul.bf16.gmra.mxu1 %v4582_v45  ;;  %8325 = vst [vmem:[#allocation26_spill] sm:$0xff] %v5316_v44  ;;  %v4583_v45 = vld [vmem:[%s8080_s1 + $0xa8] sm:$0xff]  ;;  %v5340_v62 = vpop.permute.xlu2 %901 }
 0x178   : > { %v5318_v37 = vpop.f32.mrf.mxu0 }
 0x179   : > { %v2103_v39 = vpop.f32.mrf.mxu1 }
 0x17a   : > { %v5323_v61 = vadd.f32 %v2103_v39, %v4990_v43  ;;  %v5338_v39 = vpop.permute.xlu1 %881  ;;  %v5352_v17 = vpop.permute.xlu0 %791 }
 0x17c   : > { %8326 = vst [vmem:[#allocation27_spill] sm:$0xff] %v5323_v61  ;;  %v5359_v14 = vpop.permute.xlu2 %816 }
 0x180   : > { %v5334_v10 = vpop.f32.mrf.mxu0 }
 0x181   : > { %v2106_v53 = vpop.f32.mrf.mxu1 }
 0x182   : > { %v5343_v4 = vadd.f32 %v2106_v53, %v4969_v33  ;;  %v5354_v57 = vpop.permute.xlu1 %796  ;;  %v5367_v34 = vpop.permute.xlu0 %876 }
 0x183   : > { %1816 = vmatmul.bf16.gmra.mxu0 %v4583_v45 }
 0x184   : > { %2145 = vmatmul.bf16.gmra.mxu1 %v4583_v45  ;;  %8327 = vst [vmem:[#allocation28_spill] sm:$0xff] %v5343_v4  ;;  %v4584_v45 = vld [vmem:[%s8080_s1 + $0xb0] sm:$0xff]  ;;  %v5374_v4 = vpop.permute.xlu2 %801 }
 0x188   : > { %v5345_v21 = vpop.f32.mrf.mxu0 }
 0x189   : > { %v2108_v52 = vpop.f32.mrf.mxu1 }
 0x18a   : > { %v5348_v35 = vadd.f32 %v2108_v52, %v4955_v27  ;;  %v520_v52 = vld [vmem:[%s8081_s2 + $0x188] sm:$0xff]  ;;  %v5372_v44 = vpop.permute.xlu1 %781  ;;  %v5393_v0 = vpop.permute.xlu0 %861 }
 0x18b   : > { %846 = vperm.xlu0 %4715, %v520_v52   ;;  %v565_v52 = vld [vmem:[%s8081_s2 + $0x2f0] sm:$0xff] }
 0x18c   : > { %8328 = vst [vmem:[#allocation29_spill] sm:$0xff] %v5348_v35 }
 0x190   : > { %v1782_v53 = vpop.f32.mrf.mxu0 }
 0x191   : > { %v2111_v18 = vpop.f32.mrf.mxu1  ;;  %v1783_v16 = vadd.f32 %v1782_v53, %v4962_v30 }
 0x192   : > { %v5370_v23 = vadd.f32 %v2111_v18, %v4962_v30  ;;  %v5395_v8 = vpop.permute.xlu1 %866  ;;  %v5403_v18 = vpop.permute.xlu2 %886  ;;  %v1778_v30 = vadd.f32 %v5334_v10, %v4969_v33  ;;  %v1773_v33 = vadd.f32 %v5309_v49, %v4964_v31  ;;  %v4319_v49 = vld [vmem:[%s8082_s3 + $0x40] sm:$0xf] }
 0x193   : > { %1821 = vmatmul.bf16.gmra.mxu0 %v4584_v45  ;;  %1071 = vperm.xlu0 %4715, %v565_v52   ;;  %v548_v52 = vld [vmem:[%s8081_s2 + $0x268] sm:$0xff] }
 0x194   : > { %2150 = vmatmul.bf16.gmra.mxu1 %v4584_v45  ;;  %8329 = vst [vmem:[#allocation30_spill] sm:$0xff] %v5370_v23  ;;  %v4585_v45 = vld [vmem:[%s8080_s1 + $0xb8] sm:$0xff] }
 0x198   : > { %v1784_v24 = vpop.f32.mrf.mxu0 }
 0x199   : > { %v2113_v61 = vpop.f32.mrf.mxu1 }
 0x19a   : > { %v5377_v35 = vadd.f32 %v2113_v61, %v4957_v28  ;;  %v522_v61 = vld [vmem:[%s8081_s2 + $0x198] sm:$0xff]  ;;  %v5435_v55 = vpop.permute.xlu1 %851 }
 0x19b   : > { %856 = vperm.xlu2 %4717, %v522_v61   ;;  %986 = vperm.xlu0 %4715, %v548_v52   ;;  %v545_v52 = vld [vmem:[%s8081_s2 + $0x250] sm:$0xff] }
 0x19c   : > { %8330 = vst [vmem:[#allocation31_spill] sm:$0xff] %v5377_v35  ;;  %v519_v35 = vld [vmem:[%s8081_s2 + $0x180] sm:$0xff] }
 0x1a0   : > { %v1787_v2 = vpop.f32.mrf.mxu0 }
 0x1a1   : > { %v2116_v60 = vpop.f32.mrf.mxu1  ;;  %v1788_v15 = vadd.f32 %v1787_v2, %v4944_v22 }
 0x1a2   : > { %v5406_v61 = vadd.f32 %v2116_v60, %v4944_v22  ;;  %v4630_v60 = vld [vmem:[%s8082_s3 + $0x1c] sm:$0xf0]  ;;  %v1785_v22 = vadd.f32 %v1784_v24, %v4957_v28  ;;  %v5438_v28 = vpop.permute.xlu2 %871 }
 0x1a3   : > { %1826 = vmatmul.bf16.gmra.mxu0 %v4585_v45  ;;  %841 = vperm.xlu2 %4717, %v519_v35   ;;  %v4586_v24 = vld [vmem:[%s8080_s1 + $0xc0] sm:$0xff] }
 0x1a4   : > { %2155 = vmatmul.bf16.gmra.mxu1 %v4585_v45  ;;  %8331 = vst [vmem:[#allocation32_spill] sm:$0xff] %v5406_v61  ;;  %v4287_v45 = vld [vmem:[%s8082_s3] sm:$0xf]  ;;  %971 = vperm.xlu0 %4715, %v545_v52   ;;  %v573_v61 = vld [vmem:[%s8081_s2 + $0x330] sm:$0xff] }
 0x1a8   : > { %v1789_v23 = vpop.f32.mrf.mxu0 }
 0x1a9   : > { %v1790_v32 = vadd.f32 %v1789_v23, %v4951_v25  ;;  %v2118_v51 = vpop.f32.mrf.mxu1  ;;  %v5426_v23 = vor.u32 %v4630_v60, %v4287_v45  ;;  %v550_v60 = vld [vmem:[%s8081_s2 + $0x278] sm:$0xff] }
 0x1aa   : > { %v5414_v59 = vadd.f32 %v2118_v51, %v4951_v25  ;;  %v546_v25 = vld [vmem:[%s8081_s2 + $0x258] sm:$0xff]  ;;  %v5431_v51 = vpop.permute.xlu0 %776 }
 0x1ab   : > { %v2391_v2 = vpack.c.bf16 %v1790_v32, %v1788_v15  ;;  %8333 = vst [vmem:[#allocation34_spill] sm:$0xff] %v5426_v23  ;;  %976 = vperm.xlu1 %4716, %v546_v25   ;;  %2977 = vmatmul.bf16.vlgmr.msra.gmra.mxu2 %v5426_v23  ;;  %v1780_v15 = vadd.f32 %v5345_v21, %v4955_v27  ;;  %v562_v27 = vld [vmem:[%s8081_s2 + $0x2d8] sm:$0xff]  ;;  %v592_v23 = vld [vmem:[%s8081_s2 + $0x3c8] sm:$0xff] }
 0x1ac   : > { %8332 = vst [vmem:[#allocation33_spill] sm:$0xff] %v5414_v59  ;;  %v2389_v32 = vpack.c.bf16 %v1785_v22, %v1783_v16  ;;  %996 = vperm.xlu2 %4717, %v550_v60   ;;  %v543_v16 = vld [vmem:[%s8081_s2 + $0x240] sm:$0xff]  ;;  %v1775_v21 = vadd.f32 %v5318_v37, %v4990_v43  ;;  %1056 = vperm.xlu0 %4715, %v562_v27   ;;  %v767_v22 = vpop.permute.xlu1 %766  ;;  %v560_v27 = vld [vmem:[%s8081_s2 + $0x2c8] sm:$0xff] }
 0x1ad   : > { %3018 = vmatpush.bf16.msra.mxu3 %v2391_v2  ;;  %v2387_v52 = vpack.c.bf16 %v1780_v15, %v1778_v30  ;;  %v5461_v2 = vpop.permute.xlu2 %786  ;;  %v547_v43 = vld [vmem:[%s8081_s2 + $0x260] sm:$0xff] }
 0x1ae   : > { %v2385_v25 = vpack.c.bf16 %v1775_v21, %v1773_v33  ;;  %v4638_v30 = vld [vmem:[%s8082_s3 + $0x5c] sm:$0xf0]  ;;  %v4587_v33 = vld [vmem:[%s8080_s1 + $0xc8] sm:$0xff] }
 0x1b0   : > { %v1792_v45 = vpop.f32.mrf.mxu0 }
 0x1b1   : > { %v2121_v53 = vpop.f32.mrf.mxu1  ;;  %3019 = vmatpush.bf16.msra.mxu3 %v2389_v32 }
 0x1b2   : > { %v762_v10 = vpop.permute.xlu0 %761 }
 0x1b3   : > { %1831 = vmatmul.bf16.gmra.mxu0 %v4586_v24  ;;  %961 = vperm.xlu1 %4716, %v543_v16   ;;  %v5463_v32 = vadd.f32 %v2121_v53, %v762_v10  ;;  %v5468_v37 = vadd.f32 %v1792_v45, %v762_v10  ;;  %v559_v45 = vld [vmem:[%s8081_s2 + $0x2c0] sm:$0xff]  ;;  %v5483_v53 = vor.u32 %v4638_v30, %v4319_v49 }
 0x1b4   : > { %2160 = vmatmul.bf16.gmra.mxu1 %v4586_v24  ;;  %981 = vperm.xlu2 %4717, %v547_v43   ;;  %v8338_v43 = vpack.c.bf16 %v5268_v11, %v5265_v1  ;;  %v8340_v49 = vpack.c.bf16 %v5247_v19, %v5245_v20  ;;  %v561_v11 = vld [vmem:[%s8081_s2 + $0x2d0] sm:$0xff]  ;;  %v4351_v20 = vld [vmem:[%s8082_s3 + $0x80] sm:$0xf] }
 0x1b5   : > { %3020 = vmatpush.bf16.msra.mxu3 %v2387_v52  ;;  %8334 = vst [vmem:[#allocation35_spill] sm:$0xff] %v5463_v32  ;;  %1041 = vperm.xlu0 %4715, %v559_v45   ;;  %v8337_v52 = vpack.c.bf16 %v5295_v56, %v5292_v26  ;;  %v542_v56 = vld [vmem:[%s8081_s2 + $0x238] sm:$0xff]  ;;  %v4646_v19 = vld [vmem:[%s8082_s3 + $0x9c] sm:$0xf0] }
 0x1b6   : > { %8336 = vst [vmem:[#allocation37_spill] sm:$0xff] %v5483_v53  ;;  %v579_v16 = vld [vmem:[%s8081_s2 + $0x360] sm:$0xff] }
 0x1b8   : > { %v1794_v60 = vpop.f32.mrf.mxu0 }
 0x1b9   : > { %v5470_v15 = vadd.f32 %v1794_v60, %v767_v22  ;;  %v2123_v24 = vpop.f32.mrf.mxu1  ;;  %3021 = vmatpush.bf16.msra.mxu3 %v2385_v25  ;;  %v772_v25 = vpop.permute.xlu2 %771 }
 0x1ba   : > { %v5472_v31 = vadd.f32 %v2123_v24, %v767_v22  ;;  %v564_v22 = vld [vmem:[%s8081_s2 + $0x2e8] sm:$0xff]  ;;  %v557_v24 = vld [vmem:[%s8081_s2 + $0x2b0] sm:$0xff] }
 0x1bb   : > { %1046 = vperm.xlu1 %4716, %v560_v27   ;;  %2982 = vmatmul.bf16.gmra.mxu2 %v5483_v53  ;;  %v4592_v53 = vld [vmem:[%s8080_s1 + $0xf0] sm:$0xff] }
 0x1bc   : > { %8335 = vst [vmem:[#allocation36_spill] sm:$0xff] %v5472_v31  ;;  %1066 = vperm.xlu2 %4717, %v564_v22   ;;  %v5539_v22 = vor.u32 %v4646_v19, %v4351_v20 }
 0x1bd   : > { %3022 = vmatpush.bf16.msra.mxu3 %v8337_v52  ;;  %956 = vperm.xlu0 %4715, %v542_v56   ;;  %v8341_v52 = vpack.c.bf16 %v5215_v3, %v5213_v54  ;;  %v540_v3 = vld [vmem:[%s8081_s2 + $0x228] sm:$0xff] }
 0x1be   : > { %8343 = vst [vmem:[#allocation40_spill] sm:$0xff] %v5539_v22 }
 0x1c0   : > { %v1797_v10 = vpop.f32.mrf.mxu0 }
 0x1c1   : > { %v2126_v60 = vpop.f32.mrf.mxu1  ;;  %3023 = vmatpush.bf16.msra.mxu3 %v8338_v43  ;;  %v5519_v30 = vadd.f32 %v1797_v10, %v772_v25  ;;  %v539_v10 = vld [vmem:[%s8081_s2 + $0x220] sm:$0xff]  ;;  %v544_v43 = vld [vmem:[%s8081_s2 + $0x248] sm:$0xff] }
 0x1c2   : > { %v5505_v26 = vadd.f32 %v2126_v60, %v772_v25  ;;  %v4588_v25 = vld [vmem:[%s8080_s1 + $0xd0] sm:$0xff] }
 0x1c3   : > { %1836 = vmatmul.bf16.gmra.mxu0 %v4587_v33  ;;  %1031 = vperm.xlu1 %4716, %v557_v24   ;;  %v556_v24 = vld [vmem:[%s8081_s2 + $0x2a8] sm:$0xff] }
 0x1c4   : > { %8339 = vst [vmem:[#allocation38_spill] sm:$0xff] %v5505_v26  ;;  %2165 = vmatmul.bf16.gmra.mxu1 %v4587_v33  ;;  %1051 = vperm.xlu2 %4717, %v561_v11  }
 0x1c5   : > { %3024 = vmatpush.bf16.msra.mxu3 %v8340_v49  ;;  %941 = vperm.xlu0 %4715, %v539_v10   ;;  %v537_v49 = vld [vmem:[%s8081_s2 + $0x210] sm:$0xff] }
 0x1c8   : > { %v1799_v1 = vpop.f32.mrf.mxu0 }
 0x1c9   : > { %v5522_v45 = vadd.f32 %v1799_v1, %v5431_v51  ;;  %v2128_v27 = vpop.f32.mrf.mxu1  ;;  %3025 = vmatpush.bf16.msra.mxu3 %v8341_v52 }
 0x1ca   : > { %v5528_v33 = vadd.f32 %v2128_v27, %v5431_v51  ;;  %v541_v27 = vld [vmem:[%s8081_s2 + $0x230] sm:$0xff] }
 0x1cb   : > { %946 = vperm.xlu1 %4716, %v540_v3   ;;  %2987 = vmatmul.bf16.gmra.mxu2 %v5539_v22  ;;  %v4383_v3 = vld [vmem:[%s8082_s3 + $0xc0] sm:$0xf] }
 0x1cc   : > { %8342 = vst [vmem:[#allocation39_spill] sm:$0xff] %v5528_v33  ;;  %966 = vperm.xlu2 %4717, %v544_v43  }
 0x1cd   : > { %1026 = vperm.xlu0 %4715, %v556_v24   ;;  %v4589_v24 = vld [vmem:[%s8080_s1 + $0xd8] sm:$0xff] }
 0x1d0   : > { %v1802_v60 = vpop.f32.mrf.mxu0 }
 0x1d1   : > { %v2131_v56 = vpop.f32.mrf.mxu1  ;;  %v5568_v52 = vadd.f32 %v1802_v60, %v5372_v44 }
 0x1d2   : > { %v5562_v1 = vadd.f32 %v2131_v56, %v5372_v44  ;;  %v553_v44 = vld [vmem:[%s8081_s2 + $0x290] sm:$0xff] }
 0x1d3   : > { %1841 = vmatmul.bf16.gmra.mxu0 %v4588_v25  ;;  %931 = vperm.xlu1 %4716, %v537_v49   ;;  %v4626_v49 = vld [vmem:[%s8082_s3 + $0x4] sm:$0xf] }
 0x1d4   : > { %2170 = vmatmul.bf16.gmra.mxu1 %v4588_v25  ;;  %8344 = vst [vmem:[#allocation41_spill] sm:$0xff] %v5562_v1  ;;  %951 = vperm.xlu2 %4717, %v541_v27   ;;  %v4654_v25 = vld [vmem:[%s8082_s3 + $0xdc] sm:$0xf0] }
 0x1d5   : > { %v5585_v60 = vor.u32 %v4654_v25, %v4383_v3  ;;  %1011 = vperm.xlu0 %4715, %v553_v44   ;;  %v536_v44 = vld [vmem:[%s8081_s2 + $0x208] sm:$0xff] }
 0x1d7   : > { %8346 = vst [vmem:[#allocation43_spill] sm:$0xff] %v5585_v60 }
 0x1d8   : > { %v1804_v11 = vpop.f32.mrf.mxu0 }
 0x1d9   : > { %v5571_v20 = vadd.f32 %v1804_v11, %v5461_v2  ;;  %v2133_v19 = vpop.f32.mrf.mxu1  ;;  %v4289_v11 = vld [vmem:[%s8082_s3 + $0x20] sm:$0xf0] }
 0x1da   : > { %v5574_v10 = vadd.f32 %v2133_v19, %v5461_v2  ;;  %v554_v2 = vld [vmem:[%s8081_s2 + $0x298] sm:$0xff]  ;;  %v5607_v3 = vor.u32 %v4626_v49, %v4289_v11  ;;  %v555_v11 = vld [vmem:[%s8081_s2 + $0x2a0] sm:$0xff] }
 0x1db   : > { %1016 = vperm.xlu1 %4716, %v554_v2   ;;  %2992 = vmatmul.bf16.gmra.mxu2 %v5585_v60  ;;  %v558_v19 = vld [vmem:[%s8081_s2 + $0x2b8] sm:$0xff]  ;;  %v551_v2 = vld [vmem:[%s8081_s2 + $0x280] sm:$0xff] }
 0x1dc   : > { %8345 = vst [vmem:[#allocation42_spill] sm:$0xff] %v5574_v10  ;;  %1036 = vperm.xlu2 %4717, %v558_v19   ;;  %3026 = vmatmul.bf16.vlgmr.msra.gmra.mxu3 %v5607_v3  ;;  %v572_v10 = vld [vmem:[%s8081_s2 + $0x328] sm:$0xff] }
 0x1dd   : > { %8347 = vst [vmem:[#allocation44_spill] sm:$0xff] %v5607_v3  ;;  %926 = vperm.xlu0 %4715, %v536_v44   ;;  %v578_v3 = vld [vmem:[%s8081_s2 + $0x358] sm:$0xff] }
 0x1e0   : > { %v1807_v27 = vpop.f32.mrf.mxu0 }
 0x1e1   : > { %v2136_v25 = vpop.f32.mrf.mxu1  ;;  %v5623_v19 = vadd.f32 %v1807_v27, %v5352_v17 }
 0x1e2   : > { %v5617_v35 = vadd.f32 %v2136_v25, %v5352_v17  ;;  %v4662_v25 = vld [vmem:[%s8082_s3 + $0x11c] sm:$0xf0]  ;;  %v581_v17 = vld [vmem:[%s8081_s2 + $0x370] sm:$0xff] }
 0x1e3   : > { %1846 = vmatmul.bf16.gmra.mxu0 %v4589_v24  ;;  %1001 = vperm.xlu1 %4716, %v551_v2   ;;  %v4591_v2 = vld [vmem:[%s8080_s1 + $0xe8] sm:$0xff] }
 0x1e4   : > { %2175 = vmatmul.bf16.gmra.mxu1 %v4589_v24  ;;  %8348 = vst [vmem:[#allocation45_spill] sm:$0xff] %v5617_v35  ;;  %1021 = vperm.xlu2 %4717, %v555_v11   ;;  %v4415_v24 = vld [vmem:[%s8082_s3 + $0x100] sm:$0xf]  ;;  %v4634_v11 = vld [vmem:[%s8082_s3 + $0x44] sm:$0xf] }
 0x1e5   : > { %v5640_v27 = vor.u32 %v4662_v25, %v4415_v24  ;;  %1151 = vperm.xlu0 %4715, %v581_v17   ;;  %v4321_v24 = vld [vmem:[%s8082_s3 + $0x60] sm:$0xf0]  ;;  %v538_v17 = vld [vmem:[%s8081_s2 + $0x218] sm:$0xff] }
 0x1e6   : > { %v587_v35 = vld [vmem:[%s8081_s2 + $0x3a0] sm:$0xff] }
 0x1e7   : > { %8350 = vst [vmem:[#allocation47_spill] sm:$0xff] %v5640_v27 }
 0x1e8   : > { %v1809_v49 = vpop.f32.mrf.mxu0 }
 0x1e9   : > { %v5626_v21 = vadd.f32 %v1809_v49, %v5354_v57  ;;  %v2138_v51 = vpop.f32.mrf.mxu1  ;;  %v4590_v49 = vld [vmem:[%s8080_s1 + $0xe0] sm:$0xff] }
 0x1ea   : > { %v5629_v44 = vadd.f32 %v2138_v51, %v5354_v57  ;;  %v582_v57 = vld [vmem:[%s8081_s2 + $0x378] sm:$0xff] }
 0x1eb   : > { %1156 = vperm.xlu1 %4716, %v582_v57   ;;  %2997 = vmatmul.bf16.gmra.mxu2 %v5640_v27  ;;  %v5664_v57 = vor.u32 %v4634_v11, %v4321_v24  ;;  %v598_v51 = vld [vmem:[%s8081_s2 + $0x3f8] sm:$0xff]  ;;  %v535_v24 = vld [vmem:[%s8081_s2 + $0x200] sm:$0xff] }
 0x1ec   : > { %8349 = vst [vmem:[#allocation46_spill] sm:$0xff] %v5629_v44  ;;  %936 = vperm.xlu2 %4717, %v538_v17  }
 0x1ed   : > { %8351 = vst [vmem:[#allocation48_spill] sm:$0xff] %v5664_v57  ;;  %3031 = vmatmul.bf16.gmra.mxu3 %v5664_v57  ;;  %1236 = vperm.xlu0 %4715, %v598_v51   ;;  %v4447_v51 = vld [vmem:[%s8082_s3 + $0x140] sm:$0xf] }
 0x1f0   : > { %v5659_v25 = vpop.f32.mrf.mxu0 }
 0x1f1   : > { %v2141_v56 = vpop.f32.mrf.mxu1 }
 0x1f2   : > { %v5674_v54 = vadd.f32 %v2141_v56, %v5374_v4  ;;  %v595_v56 = vld [vmem:[%s8081_s2 + $0x3e0] sm:$0xff] }
 0x1f3   : > { %1851 = vmatmul.bf16.gmra.mxu0 %v4590_v49  ;;  %1141 = vperm.xlu1 %4716, %v579_v16   ;;  %v4670_v16 = vld [vmem:[%s8082_s3 + $0x15c] sm:$0xf0] }
 0x1f4   : > { %2180 = vmatmul.bf16.gmra.mxu1 %v4590_v49  ;;  %8352 = vst [vmem:[#allocation49_spill] sm:$0xff] %v5674_v54  ;;  %921 = vperm.xlu2 %4717, %v535_v24   ;;  %v5693_v49 = vor.u32 %v4670_v16, %v4447_v51  ;;  %v596_v24 = vld [vmem:[%s8081_s2 + $0x3e8] sm:$0xff]  ;;  %v4642_v51 = vld [vmem:[%s8082_s3 + $0x84] sm:$0xf] }
 0x1f5   : > { %1221 = vperm.xlu0 %4715, %v595_v56   ;;  %v4353_v16 = vld [vmem:[%s8082_s3 + $0xa0] sm:$0xf0]  ;;  %v5790_v31 = vpop.permute.xlu2 %856 }
 0x1f6   : > { %8354 = vst [vmem:[#allocation51_spill] sm:$0xff] %v5693_v49  ;;  %v5712_v57 = vor.u32 %v4642_v51, %v4353_v16  ;;  %v5724_v51 = vpop.permute.xlu1 %991  ;;  %v591_v54 = vld [vmem:[%s8081_s2 + $0x3c0] sm:$0xff] }
 0x1f8   : > { %v5676_v11 = vpop.f32.mrf.mxu0  ;;  %8355 = vst [vmem:[#allocation52_spill] sm:$0xff] %v5712_v57 }
 0x1f9   : > { %v2143_v17 = vpop.f32.mrf.mxu1 }
 0x1fa   : > { %v5682_v43 = vadd.f32 %v2143_v17, %v5336_v38 }
 0x1fb   : > { %1226 = vperm.xlu1 %4716, %v596_v24   ;;  %3002 = vmatmul.bf16.gmra.mxu2 %v5693_v49  ;;  %v552_v24 = vld [vmem:[%s8081_s2 + $0x288] sm:$0xff]  ;;  %v593_v49 = vld [vmem:[%s8081_s2 + $0x3d0] sm:$0xff] }
 0x1fc   : > { %8353 = vst [vmem:[#allocation50_spill] sm:$0xff] %v5682_v43  ;;  %1006 = vperm.xlu2 %4717, %v552_v24  }
 0x1fd   : > { %3036 = vmatmul.bf16.gmra.mxu3 %v5712_v57  ;;  %1136 = vperm.xlu0 %4715, %v578_v3   ;;  %v597_v57 = vld [vmem:[%s8081_s2 + $0x3f0] sm:$0xff]  ;;  %v4479_v3 = vld [vmem:[%s8082_s3 + $0x180] sm:$0xf]  ;;  %v5809_v26 = vpop.permute.xlu0 %846 }
 0x1fe   : > { %v5754_v22 = vpop.permute.xlu1 %1076 }
 0x1ff   : > { %8359 = vst [vmem:[#allocation56_spill] sm:$0xff] %v5754_v22 }
 0x200   : > { %v5710_v56 = vpop.f32.mrf.mxu0 }
 0x201   : > { %v2146_v17 = vpop.f32.mrf.mxu1 }
 0x202   : > { %v5727_v16 = vadd.f32 %v2146_v17, %v5311_v63 }
 0x203   : > { %1856 = vmatmul.bf16.gmra.mxu0 %v4591_v2  ;;  %1211 = vperm.xlu1 %4716, %v593_v49   ;;  %v575_v49 = vld [vmem:[%s8081_s2 + $0x340] sm:$0xff] }
 0x204   : > { %2185 = vmatmul.bf16.gmra.mxu1 %v4591_v2  ;;  %8356 = vst [vmem:[#allocation53_spill] sm:$0xff] %v5727_v16  ;;  %1231 = vperm.xlu2 %4717, %v597_v57   ;;  %v4678_v2 = vld [vmem:[%s8082_s3 + $0x19c] sm:$0xf0] }
 0x205   : > { %v5746_v17 = vor.u32 %v4678_v2, %v4479_v3  ;;  %1121 = vperm.xlu0 %4715, %v575_v49   ;;  %v4650_v3 = vld [vmem:[%s8082_s3 + $0xc4] sm:$0xf] }
 0x206   : > { %v4385_v2 = vld [vmem:[%s8082_s3 + $0xe0] sm:$0xf0] }
 0x207   : > { %8358 = vst [vmem:[#allocation55_spill] sm:$0xff] %v5746_v17  ;;  %v5767_v57 = vor.u32 %v4650_v3, %v4385_v2  ;;  %v5779_v3 = vpop.permute.xlu1 %1061 }
 0x208   : > { %v5729_v24 = vpop.f32.mrf.mxu0  ;;  %8361 = vst [vmem:[#allocation58_spill] sm:$0xff] %v5779_v3 }
 0x209   : > { %v2148_v27 = vpop.f32.mrf.mxu1  ;;  %8360 = vst [vmem:[#allocation57_spill] sm:$0xff] %v5767_v57 }
 0x20a   : > { %v5735_v60 = vadd.f32 %v2148_v27, %v5359_v14  ;;  %v576_v27 = vld [vmem:[%s8081_s2 + $0x348] sm:$0xff] }
 0x20b   : > { %1126 = vperm.xlu1 %4716, %v576_v27   ;;  %3007 = vmatmul.bf16.gmra.mxu2 %v5746_v17  ;;  %v580_v27 = vld [vmem:[%s8081_s2 + $0x368] sm:$0xff] }
 0x20c   : > { %8357 = vst [vmem:[#allocation54_spill] sm:$0xff] %v5735_v60  ;;  %1146 = vperm.xlu2 %4717, %v580_v27  }
 0x20d   : > { %3041 = vmatmul.bf16.gmra.mxu3 %v5767_v57  ;;  %1206 = vperm.xlu0 %4715, %v592_v23   ;;  %v577_v57 = vld [vmem:[%s8081_s2 + $0x350] sm:$0xff]  ;;  %v4686_v23 = vld [vmem:[%s8082_s3 + $0x1dc] sm:$0xf0] }
 0x210   : > { %v5765_v49 = vpop.f32.mrf.mxu0 }
 0x211   : > { %v2151_v17 = vpop.f32.mrf.mxu1 }
 0x212   : > { %v5782_v2 = vadd.f32 %v2151_v17, %v5284_v47 }
 0x213   : > { %1861 = vmatmul.bf16.gmra.mxu0 %v4592_v53  ;;  %1111 = vperm.xlu1 %4716, %v573_v61   ;;  %v4511_v61 = vld [vmem:[%s8082_s3 + $0x1c0] sm:$0xf] }
 0x214   : > { %2190 = vmatmul.bf16.gmra.mxu1 %v4592_v53  ;;  %8362 = vst [vmem:[#allocation59_spill] sm:$0xff] %v5782_v2  ;;  %1131 = vperm.xlu2 %4717, %v577_v57   ;;  %v589_v53 = vld [vmem:[%s8081_s2 + $0x3b0] sm:$0xff]  ;;  %v5801_v17 = vor.u32 %v4686_v23, %v4511_v61  ;;  %v4593_v61 = vld [vmem:[%s8080_s1 + $0xf8] sm:$0xff]  ;;  %v4658_v23 = vld [vmem:[%s8082_s3 + $0x104] sm:$0xf] }
 0x215   : > { %1191 = vperm.xlu0 %4715, %v589_v53   ;;  %v4417_v53 = vld [vmem:[%s8082_s3 + $0x120] sm:$0xf0]  ;;  %v570_v2 = vld [vmem:[%s8081_s2 + $0x318] sm:$0xff] }
 0x216   : > { %8364 = vst [vmem:[#allocation61_spill] sm:$0xff] %v5801_v17 }
 0x218   : > { %v1824_v27 = vpop.f32.mrf.mxu0 }
 0x219   : > { %v2153_v59 = vpop.f32.mrf.mxu1 }
 0x21a   : > { %v5788_v32 = vadd.f32 %v2153_v59, %v5286_v6  ;;  %v590_v59 = vld [vmem:[%s8081_s2 + $0x3b8] sm:$0xff] }
 0x21b   : > { %1196 = vperm.xlu1 %4716, %v590_v59   ;;  %3012 = vmatmul.bf16.gmra.mxu2 %v5801_v17  ;;  %v5822_v59 = vor.u32 %v4658_v23, %v4417_v53  ;;  %v594_v17 = vld [vmem:[%s8081_s2 + $0x3d8] sm:$0xff]  ;;  %v842_v23 = vpop.permute.xlu2 %841 }
 0x21c   : > { %8363 = vst [vmem:[#allocation60_spill] sm:$0xff] %v5788_v32  ;;  %1216 = vperm.xlu2 %4717, %v594_v17  }
 0x21d   : > { %v5811_v33 = vpop.permute.xlu1 %976  ;;  %8365 = vst [vmem:[#allocation62_spill] sm:$0xff] %v5822_v59  ;;  %3046 = vmatmul.bf16.gmra.mxu3 %v5822_v59  ;;  %1106 = vperm.xlu0 %4715, %v572_v10   ;;  %v5839_v59 = vpop.permute.xlu0 %1071 }
 0x21e   : > { %8367 = vst [vmem:[#allocation64_spill] sm:$0xff] %v5839_v59 }
 0x220   : > { %v1827_v57 = vpop.f32.mrf.mxu0 }
 0x221   : > { %v2156_v1 = vpop.f32.mrf.mxu1  ;;  %v1828_v43 = vadd.f32 %v1827_v57, %v5313_v50 }
 0x222   : > { %v5837_v44 = vadd.f32 %v2156_v1, %v5313_v50  ;;  %v569_v1 = vld [vmem:[%s8081_s2 + $0x310] sm:$0xff]  ;;  %v571_v50 = vld [vmem:[%s8081_s2 + $0x320] sm:$0xff] }
 0x223   : > { %1866 = vmatmul.bf16.gmra.mxu0 %v4593_v61  ;;  %1181 = vperm.xlu1 %4716, %v587_v35  }
 0x224   : > { %2195 = vmatmul.bf16.gmra.mxu1 %v4593_v61  ;;  %8366 = vst [vmem:[#allocation63_spill] sm:$0xff] %v5837_v44  ;;  %1201 = vperm.xlu2 %4717, %v591_v54   ;;  %v1825_v61 = vadd.f32 %v1824_v27, %v5286_v6  ;;  %v5860_v54 = vpop.permute.xlu2 %996  ;;  %v1820_v6 = vadd.f32 %v5729_v24, %v5359_v14  ;;  %v574_v14 = vld [vmem:[%s8081_s2 + $0x338] sm:$0xff] }
 0x225   : > { %v5834_v53 = vpop.permute.xlu1 %961  ;;  %1091 = vperm.xlu0 %4715, %v569_v1   ;;  %v1818_v24 = vadd.f32 %v5710_v56, %v5311_v63  ;;  %v5886_v1 = vpop.permute.xlu0 %986  ;;  %v1815_v63 = vadd.f32 %v5676_v11, %v5336_v38 }
 0x227   : > { %v2403_v56 = vpack.c.bf16 %v1820_v6, %v1818_v24  ;;  %v8383_v24 = vpack.c.bf16 %v5470_v15, %v5468_v37  ;;  %v568_v37 = vld [vmem:[%s8081_s2 + $0x308] sm:$0xff] }
 0x228   : > { %v1829_v17 = vpop.f32.mrf.mxu0 }
 0x229   : > { %v1830_v16 = vadd.f32 %v1829_v17, %v5273_v9  ;;  %v2158_v10 = vpop.f32.mrf.mxu1 }
 0x22a   : > { %v5847_v35 = vadd.f32 %v2158_v10, %v5273_v9  ;;  %v1823_v9 = vadd.f32 %v5765_v49, %v5284_v47  ;;  %v4449_v47 = vld [vmem:[%s8082_s3 + $0x160] sm:$0xf0] }
 0x22b   : > { %v2407_v60 = vpack.c.bf16 %v1830_v16, %v1828_v43  ;;  %1096 = vperm.xlu1 %4716, %v570_v2   ;;  %v4594_v16 = vld [vmem:[%s8080_s1 + $0x100] sm:$0xff] }
 0x22c   : > { %8368 = vst [vmem:[#allocation65_spill] sm:$0xff] %v5847_v35  ;;  %v2405_v43 = vpack.c.bf16 %v1825_v61, %v1823_v9  ;;  %v4666_v2 = vld [vmem:[%s8082_s3 + $0x144] sm:$0xf]  ;;  %1116 = vperm.xlu2 %4717, %v574_v14   ;;  %v586_v61 = vld [vmem:[%s8081_s2 + $0x398] sm:$0xff] }
 0x22d   : > { %3067 = vmatpush.bf16.msrb.mxu2 %v2407_v60  ;;  %v5862_v57 = vpop.permute.xlu1 %1046  ;;  %v5877_v27 = vor.u32 %v4666_v2, %v4449_v47  ;;  %v567_v9 = vld [vmem:[%s8081_s2 + $0x300] sm:$0xff]  ;;  %1176 = vperm.xlu0 %4715, %v586_v61   ;;  %v5926_v61 = vpop.permute.xlu0 %971 }
 0x22e   : > { %8369 = vst [vmem:[#allocation66_spill] sm:$0xff] %v5862_v57  ;;  %v5875_v49 = vpop.f32.mrf.mxu2 }
 0x22f   : > { %8370 = vst [vmem:[#allocation67_spill] sm:$0xff] %v5877_v27  ;;  %3051 = vmatmul.bf16.gmra.mxu3 %v5877_v27 }
 0x230   : > { %v1832_v60 = vpop.f32.mrf.mxu0 }
 0x231   : > { %v2161_v17 = vpop.f32.mrf.mxu1  ;;  %3068 = vmatpush.bf16.msrb.mxu2 %v2405_v43  ;;  %v1813_v43 = vadd.f32 %v5659_v25, %v5374_v4  ;;  %v5906_v38 = vadd.f32 %v1832_v60, %v842_v23  ;;  %v583_v25 = vld [vmem:[%s8081_s2 + $0x380] sm:$0xff] }
 0x232   : > { %v5884_v10 = vadd.f32 %v2161_v17, %v842_v23  ;;  %v5901_v17 = vpop.permute.xlu2 %981  ;;  %v584_v23 = vld [vmem:[%s8081_s2 + $0x388] sm:$0xff] }
 0x233   : > { %1871 = vmatmul.bf16.gmra.mxu0 %v4594_v16  ;;  %1081 = vperm.xlu1 %4716, %v567_v9   ;;  %v2401_v47 = vpack.c.bf16 %v1815_v63, %v1813_v43  ;;  %v4595_v9 = vld [vmem:[%s8080_s1 + $0x108] sm:$0xff]  ;;  %v4674_v63 = vld [vmem:[%s8082_s3 + $0x184] sm:$0xf] }
 0x234   : > { %8371 = vst [vmem:[#allocation68_spill] sm:$0xff] %v5884_v10  ;;  %2200 = vmatmul.bf16.gmra.mxu1 %v4594_v16  ;;  %1101 = vperm.xlu2 %4717, %v571_v50  }
 0x235   : > { %3069 = vmatpush.bf16.msrb.mxu2 %v2403_v56  ;;  %v5899_v2 = vpop.permute.xlu1 %1031  ;;  %1161 = vperm.xlu0 %4715, %v583_v25   ;;  %v4481_v56 = vld [vmem:[%s8082_s3 + $0x1a0] sm:$0xf0]  ;;  %v2554_v25 = vld [vmem:[%s8083_s4 + $0x8] sm:$0xff] }
 0x236   : > { %8372 = vst [vmem:[#allocation69_spill] sm:$0xff] %v5899_v2  ;;  %v5911_v16 = vpop.f32.mrf.mxu2 }
 0x237   : > { %8373 = vst [vmem:[#allocation70_spill] sm:$0xff] %v5911_v16 }
 0x238   : > { %v1834_v14 = vpop.f32.mrf.mxu0 }
 0x239   : > { %v5909_v11 = vadd.f32 %v1834_v14, %v5809_v26  ;;  %v2163_v6 = vpop.f32.mrf.mxu1  ;;  %3070 = vmatpush.bf16.msrb.mxu2 %v2401_v47  ;;  %v5942_v47 = vor.u32 %v4674_v63, %v4481_v56  ;;  %v8377_v14 = vpack.c.bf16 %v5571_v20, %v5568_v52  ;;  %v8379_v52 = vpack.c.bf16 %v5522_v45, %v5519_v30  ;;  %v4295_v20 = vld [vmem:[%s8082_s3 + $0x8] sm:$0xf]  ;;  %v5970_v56 = vpop.permute.xlu0 %1056  ;;  %v585_v30 = vld [vmem:[%s8081_s2 + $0x390] sm:$0xff] }
 0x23a   : > { %v5914_v4 = vadd.f32 %v2163_v6, %v5809_v26  ;;  %v8375_v26 = vpack.c.bf16 %v5626_v21, %v5623_v19  ;;  %v588_v21 = vld [vmem:[%s8081_s2 + $0x3a8] sm:$0xff]  ;;  %v5950_v6 = vpop.permute.xlu2 %1066  ;;  %8380 = vst [vmem:[#allocation74_spill] sm:$0xff] %v5970_v56 }
 0x23b   : > { %1166 = vperm.xlu1 %4716, %v584_v23   ;;  %8376 = vst [vmem:[#allocation72_spill] sm:$0xff] %v5942_v47  ;;  %v2555_v23 = vld [vmem:[%s8083_s4 + $0x10] sm:$0xff]  ;;  %v4631_v63 = vld [vmem:[%s8082_s3 + $0x24] sm:$0xf0] }
 0x23c   : > { %8374 = vst [vmem:[#allocation71_spill] sm:$0xff] %v5914_v4  ;;  %1186 = vperm.xlu2 %4717, %v588_v21   ;;  %v4455_v56 = vld [vmem:[%s8082_s3 + $0x148] sm:$0xf] }
 0x23d   : > { %3071 = vmatpush.bf16.msrb.mxu2 %v8375_v26  ;;  %v5931_v50 = vpop.permute.xlu1 %946  ;;  %8378 = vst [vmem:[#allocation73_spill] sm:$0xff] %v5950_v6  ;;  %2576 = vperm.xlu0 %4715, %v2554_v25   ;;  %v5977_v25 = vor.u32 %v4631_v63, %v4295_v20  ;;  %v2557_v20 = vld [vmem:[%s8083_s4 + $0x20] sm:$0xff]  ;;  %v4596_v63 = vld [vmem:[%s8080_s1 + $0x110] sm:$0xff] }
 0x23e   : > { %v5959_v26 = vpop.f32.mrf.mxu2 }
 0x23f   : > { %3056 = vmatmul.bf16.gmra.mxu3 %v5942_v47  ;;  %8382 = vst [vmem:[#allocation76_spill] sm:$0xff] %v5977_v25  ;;  %v2561_v47 = vld [vmem:[%s8083_s4 + $0x40] sm:$0xff] }
 0x240   : > { %v1837_v43 = vpop.f32.mrf.mxu0 }
 0x241   : > { %v2166_v19 = vpop.f32.mrf.mxu1  ;;  %3072 = vmatpush.bf16.msrb.mxu2 %v8377_v14  ;;  %v5983_v45 = vadd.f32 %v1837_v43, %v5435_v55  ;;  %v2558_v43 = vld [vmem:[%s8083_s4 + $0x28] sm:$0xff] }
 0x242   : > { %v5975_v14 = vadd.f32 %v2166_v19, %v5435_v55  ;;  %v6005_v15 = vpop.permute.xlu2 %1051  ;;  %v2560_v55 = vld [vmem:[%s8083_s4 + $0x38] sm:$0xff] }
 0x243   : > { %1876 = vmatmul.bf16.gmra.mxu0 %v4595_v9  ;;  %2581 = vperm.xlu1 %4716, %v2555_v23   ;;  %8385 = vst [vmem:[#allocation78_spill] sm:$0xff] %v6005_v15 }
 0x244   : > { %2205 = vmatmul.bf16.gmra.mxu1 %v4595_v9  ;;  %8381 = vst [vmem:[#allocation75_spill] sm:$0xff] %v5975_v14  ;;  %1171 = vperm.xlu2 %4717, %v585_v30   ;;  %v4513_v30 = vld [vmem:[%s8082_s3 + $0x1e0] sm:$0xf0] }
 0x245   : > { %3073 = vmatpush.bf16.msrb.mxu2 %v8379_v52  ;;  %v5972_v21 = vpop.permute.xlu1 %931  ;;  %2591 = vperm.xlu0 %4715, %v2557_v20   ;;  %v6020_v20 = vpop.permute.xlu0 %1041 }
 0x246   : > { %8387 = vst [vmem:[#allocation80_spill] sm:$0xff] %v6020_v20 }
 0x248   : > { %v1839_v9 = vpop.f32.mrf.mxu0 }
 0x249   : > { %v5986_v23 = vadd.f32 %v1839_v9, %v5790_v31  ;;  %v2168_v52 = vpop.f32.mrf.mxu1  ;;  %3074 = vmatpush.bf16.msrb.mxu2 %v8383_v24  ;;  %v4682_v9 = vld [vmem:[%s8082_s3 + $0x1c4] sm:$0xf] }
 0x24a   : > { %v5992_v19 = vadd.f32 %v2168_v52, %v5790_v31  ;;  %v6007_v31 = vpop.f32.mrf.mxu2 }
 0x24b   : > { %2596 = vperm.xlu1 %4716, %v2558_v43   ;;  %8386 = vst [vmem:[#allocation79_spill] sm:$0xff] %v6007_v31  ;;  %v6022_v43 = vor.u32 %v4682_v9, %v4513_v30  ;;  %v4327_v9 = vld [vmem:[%s8082_s3 + $0x48] sm:$0xf]  ;;  %v6040_v30 = vpop.permute.xlu2 %966 }
 0x24c   : > { %8384 = vst [vmem:[#allocation77_spill] sm:$0xff] %v5992_v19  ;;  %3075 = vmatmul.bf16.vlgmr.msrb.gmra.mxu2 %v5977_v25  ;;  %1086 = vperm.xlu2 %4717, %v568_v37   ;;  %v4639_v37 = vld [vmem:[%s8082_s3 + $0x64] sm:$0xf0] }
 0x24d   : > { %v6009_v24 = vpop.permute.xlu1 %1016  ;;  %8388 = vst [vmem:[#allocation81_spill] sm:$0xff] %v6022_v43  ;;  %2606 = vperm.xlu0 %4715, %v2560_v55   ;;  %v4359_v19 = vld [vmem:[%s8082_s3 + $0x88] sm:$0xf] }
 0x24f   : > { %3061 = vmatmul.bf16.gmra.mxu3 %v6022_v43 }
 0x250   : > { %v1842_v52 = vpop.f32.mrf.mxu0 }
 0x251   : > { %v2171_v60 = vpop.f32.mrf.mxu1  ;;  %v6055_v25 = vadd.f32 %v1842_v52, %v5393_v0  ;;  %v2567_v52 = vld [vmem:[%s8083_s4 + $0x70] sm:$0xff] }
 0x252   : > { %v6044_v27 = vpop.f32.mrf.mxu2  ;;  %v6047_v31 = vadd.f32 %v2171_v60, %v5393_v0  ;;  %v6063_v60 = vpop.permute.xlu0 %956  ;;  %v2564_v0 = vld [vmem:[%s8083_s4 + $0x58] sm:$0xff] }
 0x253   : > { %1881 = vmatmul.bf16.gmra.mxu0 %v4596_v63  ;;  %2611 = vperm.xlu1 %4716, %v2561_v47   ;;  %8389 = vst [vmem:[#allocation82_spill] sm:$0xff] %v6044_v27  ;;  %v2553_v47 = vld [vmem:[%s8083_s4] sm:$0xff] }
 0x254   : > { %2210 = vmatmul.bf16.gmra.mxu1 %v4596_v63  ;;  %8390 = vst [vmem:[#allocation83_spill] sm:$0xff] %v6047_v31  ;;  %v6049_v63 = vor.u32 %v4639_v37, %v4327_v9  ;;  %2571 = vperm.xlu2 %4717, %v2553_v47   ;;  %v2563_v9 = vld [vmem:[%s8083_s4 + $0x50] sm:$0xff]  ;;  %v6081_v47 = vpop.permute.xlu2 %951 }
 0x255   : > { %v6042_v43 = vpop.permute.xlu1 %1001  ;;  %2621 = vperm.xlu0 %4715, %v2563_v9   ;;  %v2556_v9 = vld [vmem:[%s8083_s4 + $0x18] sm:$0xff] }
 0x256   : > { %8391 = vst [vmem:[#allocation84_spill] sm:$0xff] %v6049_v63 }
 0x258   : > { %v1844_v55 = vpop.f32.mrf.mxu0 }
 0x259   : > { %v6058_v16 = vadd.f32 %v1844_v55, %v5395_v8  ;;  %v2173_v10 = vpop.f32.mrf.mxu1 }
 0x25a   : > { %v6061_v4 = vadd.f32 %v2173_v10, %v5395_v8  ;;  %v4597_v10 = vld [vmem:[%s8080_s1 + $0x118] sm:$0xff]  ;;  %v6086_v14 = vpop.f32.mrf.mxu2 }
 0x25b   : > { %2626 = vperm.xlu1 %4716, %v2564_v0   ;;  %8394 = vst [vmem:[#allocation87_spill] sm:$0xff] %v6086_v14  ;;  %v2566_v0 = vld [vmem:[%s8083_s4 + $0x68] sm:$0xff] }
 0x25c   : > { %8392 = vst [vmem:[#allocation85_spill] sm:$0xff] %v6061_v4  ;;  %3080 = vmatmul.bf16.gmra.mxu2 %v6049_v63  ;;  %2586 = vperm.xlu2 %4717, %v2556_v9   ;;  %v6094_v63 = vpop.permute.xlu0 %941  ;;  %v4647_v9 = vld [vmem:[%s8082_s3 + $0xa4] sm:$0xf0] }
 0x25d   : > { %v6076_v8 = vpop.permute.xlu1 %1156  ;;  %2636 = vperm.xlu0 %4715, %v2566_v0  }
 0x25e   : > { %8393 = vst [vmem:[#allocation86_spill] sm:$0xff] %v6076_v8 }
 0x25f   : > { %v6102_v14 = vpop.f32.mrf.mxu3 }
 0x260   : > { %v1847_v55 = vpop.f32.mrf.mxu0 }
 0x261   : > { %v2176_v37 = vpop.f32.mrf.mxu1  ;;  %v6115_v32 = vadd.f32 %v1847_v55, %v5438_v28 }
 0x262   : > { %v6107_v4 = vadd.f32 %v2176_v37, %v5438_v28  ;;  %v6123_v37 = vpop.permute.xlu2 %1036  ;;  %v6125_v42 = vpop.f32.mrf.mxu2 }
 0x263   : > { %1886 = vmatmul.bf16.gmra.mxu0 %v4597_v10  ;;  %2641 = vperm.xlu1 %4716, %v2567_v52   ;;  %v2559_v52 = vld [vmem:[%s8083_s4 + $0x30] sm:$0xff]  ;;  %8399 = vst [vmem:[#allocation92_spill] sm:$0xff] %v6123_v37 }
 0x264   : > { %2215 = vmatmul.bf16.gmra.mxu1 %v4597_v10  ;;  %8396 = vst [vmem:[#allocation89_spill] sm:$0xff] %v6107_v4  ;;  %v6109_v10 = vor.u32 %v4647_v9, %v4359_v19  ;;  %2601 = vperm.xlu2 %4717, %v2559_v52   ;;  %v6134_v55 = vpop.permute.xlu0 %1026  ;;  %v2562_v52 = vld [vmem:[%s8083_s4 + $0x48] sm:$0xff] }
 0x265   : > { %v6104_v31 = vpop.permute.xlu1 %1141  ;;  %8400 = vst [vmem:[#allocation93_spill] sm:$0xff] %v6125_v42 }
 0x266   : > { %8395 = vst [vmem:[#allocation88_spill] sm:$0xff] %v6104_v31 }
 0x267   : > { %8397 = vst [vmem:[#allocation90_spill] sm:$0xff] %v6109_v10  ;;  %v6132_v28 = vpop.f32.mrf.mxu3 }
 0x268   : > { %v1849_v0 = vpop.f32.mrf.mxu0  ;;  %8401 = vst [vmem:[#allocation94_spill] sm:$0xff] %v6132_v28  ;;  %v4655_v28 = vld [vmem:[%s8082_s3 + $0xe4] sm:$0xf0] }
 0x269   : > { %v6118_v44 = vadd.f32 %v1849_v0, %v5367_v34  ;;  %v2178_v35 = vpop.f32.mrf.mxu1  ;;  %8402 = vst [vmem:[#allocation95_spill] sm:$0xff] %v6134_v55 }
 0x26a   : > { %v6121_v40 = vadd.f32 %v2178_v35, %v5367_v34  ;;  %v4598_v34 = vld [vmem:[%s8080_s1 + $0x120] sm:$0xff]  ;;  %v6146_v9 = vpop.permute.xlu2 %1021  ;;  %v6154_v4 = vpop.f32.mrf.mxu2 }
 0x26b   : > { %8404 = vst [vmem:[#allocation97_spill] sm:$0xff] %v6154_v4 }
 0x26c   : > { %8398 = vst [vmem:[#allocation91_spill] sm:$0xff] %v6121_v40  ;;  %3085 = vmatmul.bf16.gmra.mxu2 %v6109_v10  ;;  %2616 = vperm.xlu2 %4717, %v2562_v52   ;;  %v4391_v10 = vld [vmem:[%s8082_s3 + $0xc8] sm:$0xf]  ;;  %v6167_v29 = vpop.permute.xlu0 %1011 }
 0x26d   : > { %v6136_v0 = vpop.permute.xlu1 %1226  ;;  %v6165_v13 = vor.u32 %v4655_v28, %v4391_v10 }
 0x26e   : > { %8403 = vst [vmem:[#allocation96_spill] sm:$0xff] %v6136_v0 }
 0x26f   : > { %8408 = vst [vmem:[#allocation101_spill] sm:$0xff] %v6165_v13 }
 0x270   : > { %v6141_v35 = vpop.f32.mrf.mxu0  ;;  %v6156_v40 = vpop.f32.mrf.mxu3 }
 0x271   : > { %v2181_v19 = vpop.f32.mrf.mxu1  ;;  %8405 = vst [vmem:[#allocation98_spill] sm:$0xff] %v6156_v40 }
 0x272   : > { %v6161_v52 = vadd.f32 %v2181_v19, %v5338_v39  ;;  %v6180_v10 = vpop.permute.xlu2 %936  ;;  %v6187_v31 = vpop.f32.mrf.mxu2 }
 0x273   : > { %1891 = vmatmul.bf16.gmra.mxu0 %v4598_v34 }
 0x274   : > { %2220 = vmatmul.bf16.gmra.mxu1 %v4598_v34  ;;  %8407 = vst [vmem:[#allocation100_spill] sm:$0xff] %v6161_v52  ;;  %2631 = vperm.xlu2 %4717, %v2565_v48   ;;  %v4663_v52 = vld [vmem:[%s8082_s3 + $0x124] sm:$0xf0] }
 0x275   : > { %v6158_v0 = vpop.permute.xlu1 %1211 }
 0x276   : > { %8406 = vst [vmem:[#allocation99_spill] sm:$0xff] %v6158_v0 }
 0x278   : > { %v6163_v34 = vpop.f32.mrf.mxu0  ;;  %v6178_v19 = vpop.f32.mrf.mxu3 }
 0x279   : > { %v2183_v58 = vpop.f32.mrf.mxu1  ;;  %8410 = vst [vmem:[#allocation103_spill] sm:$0xff] %v6178_v19  ;;  %v4423_v19 = vld [vmem:[%s8082_s3 + $0x108] sm:$0xf] }
 0x27a   : > { %v6173_v4 = vadd.f32 %v2183_v58, %v5403_v18  ;;  %v2568_v58 = vld [vmem:[%s8083_s4 + $0x78] sm:$0xff]  ;;  %v6209_v22 = vor.u32 %v4663_v52, %v4423_v19  ;;  %v6211_v59 = vpop.permute.xlu2 %921  ;;  %v6213_v6 = vpop.f32.mrf.mxu2  ;;  %v4600_v52 = vld [vmem:[%s8080_s1 + $0x130] sm:$0xff] }
 0x27b   : > { %8416 = vst [vmem:[#allocation109_spill] sm:$0xff] %v6213_v6 }
 0x27c   : > { %8409 = vst [vmem:[#allocation102_spill] sm:$0xff] %v6173_v4  ;;  %3090 = vmatmul.bf16.gmra.mxu2 %v6165_v13  ;;  %2646 = vperm.xlu2 %4717, %v2568_v58   ;;  %v6194_v13 = vpop.permute.xlu0 %926 }
 0x27d   : > { %v6182_v28 = vpop.permute.xlu1 %1126  ;;  %8415 = vst [vmem:[#allocation108_spill] sm:$0xff] %v6209_v22 }
 0x27e   : > { %8411 = vst [vmem:[#allocation104_spill] sm:$0xff] %v6182_v28 }
 0x280   : > { %v6189_v48 = vpop.f32.mrf.mxu0  ;;  %v6202_v4 = vpop.f32.mrf.mxu3 }
 0x281   : > { %v2186_v0 = vpop.f32.mrf.mxu1  ;;  %8412 = vst [vmem:[#allocation105_spill] sm:$0xff] %v6202_v4  ;;  %v4487_v4 = vld [vmem:[%s8082_s3 + $0x188] sm:$0xf] }
 0x282   : > { %v6207_v8 = vadd.f32 %v2186_v0, %v5320_v41  ;;  %v6230_v57 = vpop.permute.xlu2 %1006 }
 0x283   : > { %1896 = vmatmul.bf16.gmra.mxu0 %v4599_v7 }
 0x284   : > { %2225 = vmatmul.bf16.gmra.mxu1 %v4599_v7  ;;  %8414 = vst [vmem:[#allocation107_spill] sm:$0xff] %v6207_v8 }
 0x285   : > { %v6204_v28 = vpop.permute.xlu1 %1111 }
 0x286   : > { %8413 = vst [vmem:[#allocation106_spill] sm:$0xff] %v6204_v28  ;;  %v6221_v28 = vpop.permute.xlu0 %1151 }
 0x287   : > { %8418 = vst [vmem:[#allocation111_spill] sm:$0xff] %v6221_v28 }
 0x288   : > { %v1859_v58 = vpop.f32.mrf.mxu0  ;;  %v6223_v0 = vpop.f32.mrf.mxu3 }
 0x289   : > { %v2188_v7 = vpop.f32.mrf.mxu1  ;;  %8419 = vst [vmem:[#allocation112_spill] sm:$0xff] %v6223_v0 }
 0x28a   : > { %v6216_v3 = vadd.f32 %v2188_v7, %v5325_v46  ;;  %v6232_v7 = vpop.f32.mrf.mxu2 }
 0x28c   : > { %8417 = vst [vmem:[#allocation110_spill] sm:$0xff] %v6216_v3  ;;  %3095 = vmatmul.bf16.gmra.mxu2 %v6209_v22  ;;  %v4671_v22 = vld [vmem:[%s8082_s3 + $0x164] sm:$0xf0] }
 0x28d   : > { %v6225_v15 = vpop.permute.xlu1 %1196  ;;  %v6249_v20 = vor.u32 %v4671_v22, %v4455_v56  ;;  %v4601_v22 = vld [vmem:[%s8080_s1 + $0x138] sm:$0xff] }
 0x28e   : > { %8420 = vst [vmem:[#allocation113_spill] sm:$0xff] %v6225_v15  ;;  %v6242_v8 = vpop.permute.xlu0 %1236 }
 0x28f   : > { %8422 = vst [vmem:[#allocation115_spill] sm:$0xff] %v6242_v8 }
 0x290   : > { %v1862_v19 = vpop.f32.mrf.mxu0  ;;  %v6240_v0 = vpop.f32.mrf.mxu3  ;;  %8425 = vst [vmem:[#allocation118_spill] sm:$0xff] %v6249_v20 }
 0x291   : > { %v2191_v6 = vpop.f32.mrf.mxu1  ;;  %8421 = vst [vmem:[#allocation114_spill] sm:$0xff] %v6240_v0  ;;  %v6257_v0 = vpop.permute.xlu2 %1231 }
 0x292   : > { %v6247_v15 = vadd.f32 %v2191_v6, %v5340_v62  ;;  %8427 = vst [vmem:[#allocation120_spill] sm:$0xff] %v6257_v0  ;;  %v6259_v8 = vpop.f32.mrf.mxu2 }
 0x293   : > { %1901 = vmatmul.bf16.gmra.mxu0 %v4600_v52  ;;  %8428 = vst [vmem:[#allocation121_spill] sm:$0xff] %v6259_v8 }
 0x294   : > { %2230 = vmatmul.bf16.gmra.mxu1 %v4600_v52  ;;  %8424 = vst [vmem:[#allocation117_spill] sm:$0xff] %v6247_v15 }
 0x295   : > { %v6244_v3 = vpop.permute.xlu1 %1181 }
 0x296   : > { %8423 = vst [vmem:[#allocation116_spill] sm:$0xff] %v6244_v3 }
 0x298   : > { %v1864_v28 = vpop.f32.mrf.mxu0  ;;  %v6261_v3 = vpop.f32.mrf.mxu3 }
 0x299   : > { %v2193_v52 = vpop.f32.mrf.mxu1  ;;  %8429 = vst [vmem:[#allocation122_spill] sm:$0xff] %v6261_v3  ;;  %v6278_v3 = vpop.permute.xlu2 %1146 }
 0x29a   : > { %v6252_v42 = vadd.f32 %v2193_v52, %v5307_v12  ;;  %v6268_v52 = vpop.permute.xlu0 %1221  ;;  %8432 = vst [vmem:[#allocation125_spill] sm:$0xff] %v6278_v3  ;;  %v1865_v3 = vadd.f32 %v1864_v28, %v5307_v12  ;;  %v4602_v12 = vld [vmem:[%s8080_s1 + $0x140] sm:$0xff] }
 0x29b   : > { %8431 = vst [vmem:[#allocation124_spill] sm:$0xff] %v6268_v52 }
 0x29c   : > { %8426 = vst [vmem:[#allocation119_spill] sm:$0xff] %v6252_v42  ;;  %3100 = vmatmul.bf16.gmra.mxu2 %v6249_v20  ;;  %v4679_v20 = vld [vmem:[%s8082_s3 + $0x1a4] sm:$0xf0]  ;;  %v6282_v42 = vpop.f32.mrf.mxu2 }
 0x29d   : > { %v6263_v6 = vpop.permute.xlu1 %1096  ;;  %v6287_v0 = vor.u32 %v4679_v20, %v4487_v4  ;;  %v1863_v4 = vadd.f32 %v1862_v19, %v5340_v62 }
 0x29e   : > { %8430 = vst [vmem:[#allocation123_spill] sm:$0xff] %v6263_v6 }
 0x29f   : > { %8435 = vst [vmem:[#allocation128_spill] sm:$0xff] %v6287_v0 }
 0x2a0   : > { %v1867_v56 = vpop.f32.mrf.mxu0  ;;  %v6276_v8 = vpop.f32.mrf.mxu3 }
 0x2a1   : > { %v2196_v37 = vpop.f32.mrf.mxu1  ;;  %v1868_v6 = vadd.f32 %v1867_v56, %v5279_v36  ;;  %v6309_v28 = vpop.permute.xlu2 %1131 }
 0x2a2   : > { %v6285_v52 = vadd.f32 %v2196_v37, %v5279_v36  ;;  %v6294_v55 = vpop.permute.xlu0 %1136 }
 0x2a3   : > { %1906 = vmatmul.bf16.gmra.mxu0 %v4601_v22 }
 0x2a4   : > { %2235 = vmatmul.bf16.gmra.mxu1 %v4601_v22  ;;  %8434 = vst [vmem:[#allocation127_spill] sm:$0xff] %v6285_v52  ;;  %v6313_v62 = vpop.f32.mrf.mxu2 }
 0x2a5   : > { %v6280_v15 = vpop.permute.xlu1 %1081  ;;  %8439 = vst [vmem:[#allocation132_spill] sm:$0xff] %v6313_v62 }
 0x2a6   : > { %8433 = vst [vmem:[#allocation126_spill] sm:$0xff] %v6280_v15 }
 0x2a8   : > { %v1869_v22 = vpop.f32.mrf.mxu0  ;;  %v6301_v36 = vpop.f32.mrf.mxu3 }
 0x2a9   : > { %v1870_v2 = vadd.f32 %v1869_v22, %v5327_v5  ;;  %v2198_v27 = vpop.f32.mrf.mxu1  ;;  %8437 = vst [vmem:[#allocation130_spill] sm:$0xff] %v6301_v36 }
 0x2aa   : > { %v6292_v40 = vadd.f32 %v2198_v27, %v5327_v5  ;;  %v1860_v5 = vadd.f32 %v1859_v58, %v5325_v46  ;;  %v2421_v27 = vpack.c.bf16 %v1865_v3, %v1863_v4  ;;  %v6317_v3 = vpop.permute.xlu0 %1121  ;;  %v1853_v58 = vadd.f32 %v6141_v35, %v5338_v39 }
 0x2ab   : > { %v2423_v15 = vpack.c.bf16 %v1870_v2, %v1868_v6  ;;  %v1858_v6 = vadd.f32 %v6189_v48, %v5320_v41  ;;  %8440 = vst [vmem:[#allocation133_spill] sm:$0xff] %v6317_v3  ;;  %v4519_v41 = vld [vmem:[%s8082_s3 + $0x1c8] sm:$0xf] }
 0x2ac   : > { %8436 = vst [vmem:[#allocation129_spill] sm:$0xff] %v6292_v40  ;;  %3105 = vmatmul.bf16.gmra.mxu2 %v6287_v0  ;;  %v4687_v48 = vld [vmem:[%s8082_s3 + $0x1e4] sm:$0xf0] }
 0x2ad   : > { %3116 = vmatpush.bf16.msrb.mxu3 %v2423_v15  ;;  %v6303_v20 = vpop.permute.xlu1 %1166  ;;  %v1855_v15 = vadd.f32 %v6163_v34, %v5403_v18  ;;  %v2419_v46 = vpack.c.bf16 %v1860_v5, %v1858_v6  ;;  %v6334_v5 = vor.u32 %v4687_v48, %v4519_v41  ;;  %v8458_v6 = vpack.c.bf16 %v5909_v11, %v5906_v38  ;;  %v4604_v38 = vld [vmem:[%s8080_s1 + $0x150] sm:$0xff] }
 0x2ae   : > { %8438 = vst [vmem:[#allocation131_spill] sm:$0xff] %v6303_v20 }
 0x2af   : > { %v2417_v34 = vpack.c.bf16 %v1855_v15, %v1853_v58  ;;  %8443 = vst [vmem:[#allocation136_spill] sm:$0xff] %v6334_v5  ;;  %v3013_v15 = vpop.f32.mrf.mxu2 }
 0x2b0   : > { %v1872_v2 = vpop.f32.mrf.mxu0 }
 0x2b1   : > { %v2201_v56 = vpop.f32.mrf.mxu1  ;;  %3117 = vmatpush.bf16.msrb.mxu3 %v2421_v27  ;;  %v6337_v39 = vadd.f32 %v1872_v2, %v6211_v59 }
 0x2b2   : > { %v6327_v19 = vpop.f32.mrf.mxu3  ;;  %v6332_v22 = vadd.f32 %v2201_v56, %v6211_v59  ;;  %v6347_v56 = vpop.permute.xlu2 %1216  ;;  %v8446_v59 = vpack.c.bf16 %v6118_v44, %v6115_v32  ;;  %v8451_v32 = vpack.c.bf16 %v5986_v23, %v5983_v45  ;;  %v4627_v44 = vld [vmem:[%s8082_s3 + $0xc] sm:$0xf] }
 0x2b3   : > { %1911 = vmatmul.bf16.gmra.mxu0 %v4602_v12  ;;  %8445 = vst [vmem:[#allocation138_spill] sm:$0xff] %v6347_v56  ;;  %v6355_v2 = vpop.permute.xlu0 %1206 }
 0x2b4   : > { %2240 = vmatmul.bf16.gmra.mxu1 %v4602_v12  ;;  %8442 = vst [vmem:[#allocation135_spill] sm:$0xff] %v6332_v22 }
 0x2b5   : > { %3118 = vmatpush.bf16.msrb.mxu3 %v2419_v46  ;;  %v6329_v18 = vpop.permute.xlu1 %2581  ;;  %8447 = vst [vmem:[#allocation139_spill] sm:$0xff] %v6355_v2 }
 0x2b6   : > { %8441 = vst [vmem:[#allocation134_spill] sm:$0xff] %v6329_v18 }
 0x2b8   : > { %v1874_v4 = vpop.f32.mrf.mxu0 }
 0x2b9   : > { %v6340_v35 = vadd.f32 %v1874_v4, %v6194_v13  ;;  %v2203_v27 = vpop.f32.mrf.mxu1  ;;  %3119 = vmatpush.bf16.msrb.mxu3 %v2417_v34  ;;  %v8450_v4 = vpack.c.bf16 %v6058_v16, %v6055_v25 }
 0x2ba   : > { %v6343_v12 = vadd.f32 %v2203_v27, %v6194_v13  ;;  %v4603_v13 = vld [vmem:[%s8080_s1 + $0x148] sm:$0xff]  ;;  %v6362_v41 = vpop.f32.mrf.mxu3  ;;  %v6378_v46 = vpop.permute.xlu2 %1201 }
 0x2bb   : > { %8449 = vst [vmem:[#allocation141_spill] sm:$0xff] %v6362_v41  ;;  %v4297_v27 = vld [vmem:[%s8082_s3 + $0x28] sm:$0xf0]  ;;  %v6387_v23 = vpop.permute.xlu0 %1191 }
 0x2bc   : > { %8444 = vst [vmem:[#allocation137_spill] sm:$0xff] %v6343_v12  ;;  %3110 = vmatmul.bf16.gmra.mxu2 %v6334_v5  ;;  %v6385_v45 = vor.u32 %v4627_v44, %v4297_v27  ;;  %v4329_v44 = vld [vmem:[%s8082_s3 + $0x68] sm:$0xf0] }
 0x2bd   : > { %3120 = vmatpush.bf16.msrb.mxu3 %v8446_v59  ;;  %v6357_v58 = vpop.permute.xlu1 %2596  ;;  %v6376_v59 = vpop.f32.mrf.mxu2  ;;  %8453 = vst [vmem:[#allocation143_spill] sm:$0xff] %v6378_v46  ;;  %v4425_v46 = vld [vmem:[%s8082_s3 + $0x128] sm:$0xf0] }
 0x2be   : > { %8448 = vst [vmem:[#allocation140_spill] sm:$0xff] %v6357_v58 }
 0x2bf   : > { %8452 = vst [vmem:[#allocation142_spill] sm:$0xff] %v6376_v59 }
 0x2c0   : > { %v1877_v48 = vpop.f32.mrf.mxu0  ;;  %8456 = vst [vmem:[#allocation146_spill] sm:$0xff] %v6385_v45 }
 0x2c1   : > { %v2206_v34 = vpop.f32.mrf.mxu1  ;;  %3121 = vmatpush.bf16.msrb.mxu3 %v8450_v4  ;;  %8457 = vst [vmem:[#allocation147_spill] sm:$0xff] %v6387_v23  ;;  %v6390_v4 = vadd.f32 %v1877_v48, %v5972_v21 }
 0x2c2   : > { %v6383_v25 = vadd.f32 %v2206_v34, %v5972_v21  ;;  %v6398_v5 = vpop.f32.mrf.mxu3  ;;  %v4635_v21 = vld [vmem:[%s8082_s3 + $0x4c] sm:$0xf] }
 0x2c3   : > { %1916 = vmatmul.bf16.gmra.mxu0 %v4603_v13  ;;  %v6417_v27 = vpop.permute.xlu0 %1106  ;;  %v6434_v41 = vor.u32 %v4635_v21, %v4329_v44  ;;  %v4643_v44 = vld [vmem:[%s8082_s3 + $0x8c] sm:$0xf] }
 0x2c4   : > { %2245 = vmatmul.bf16.gmra.mxu1 %v4603_v13  ;;  %8455 = vst [vmem:[#allocation145_spill] sm:$0xff] %v6383_v25 }
 0x2c5   : > { %3122 = vmatpush.bf16.msrb.mxu3 %v8451_v32  ;;  %v6380_v16 = vpop.permute.xlu1 %2611  ;;  %8465 = vst [vmem:[#allocation154_spill] sm:$0xff] %v6434_v41 }
 0x2c6   : > { %8454 = vst [vmem:[#allocation144_spill] sm:$0xff] %v6380_v16 }
 0x2c8   : > { %v1879_v13 = vpop.f32.mrf.mxu0 }
 0x2c9   : > { %v6393_v32 = vadd.f32 %v1879_v13, %v6180_v10  ;;  %v2208_v37 = vpop.f32.mrf.mxu1  ;;  %3123 = vmatpush.bf16.msrb.mxu3 %v8458_v6  ;;  %v6415_v6 = vpop.permute.xlu2 %1116 }
 0x2ca   : > { %v6401_v34 = vadd.f32 %v2208_v37, %v6180_v10  ;;  %v6419_v13 = vpop.f32.mrf.mxu3 }
 0x2cb   : > { %8461 = vst [vmem:[#allocation150_spill] sm:$0xff] %v6419_v13 }
 0x2cc   : > { %8459 = vst [vmem:[#allocation148_spill] sm:$0xff] %v6401_v34  ;;  %3124 = vmatmul.bf16.vlgmr.msrb.gmra.mxu3 %v6385_v45 }
 0x2cd   : > { %v6408_v48 = vpop.permute.xlu1 %2626 }
 0x2ce   : > { %8460 = vst [vmem:[#allocation149_spill] sm:$0xff] %v6408_v48 }
 0x2cf   : > { %v6413_v11 = vpop.f32.mrf.mxu2 }
 0x2d0   : > { %v1882_v10 = vpop.f32.mrf.mxu0 }
 0x2d1   : > { %v2211_v37 = vpop.f32.mrf.mxu1  ;;  %v6442_v36 = vpop.permute.xlu2 %1101 }
 0x2d2   : > { %v6432_v0 = vadd.f32 %v2211_v37, %v6094_v63 }
 0x2d3   : > { %1921 = vmatmul.bf16.gmra.mxu0 %v4604_v38 }
 0x2d4   : > { %2250 = vmatmul.bf16.gmra.mxu1 %v4604_v38  ;;  %8464 = vst [vmem:[#allocation153_spill] sm:$0xff] %v6432_v0  ;;  %v6437_v38 = vadd.f32 %v1882_v10, %v6094_v63  ;;  %v6453_v63 = vpop.permute.xlu0 %1091 }
 0x2d5   : > { %v6429_v59 = vpop.permute.xlu1 %2641 }
 0x2d6   : > { %8463 = vst [vmem:[#allocation152_spill] sm:$0xff] %v6429_v59 }
 0x2d7   : > { %v6427_v45 = vpop.f32.mrf.mxu2 }
 0x2d8   : > { %8462 = vst [vmem:[#allocation151_spill] sm:$0xff] %v6427_v45  ;;  %v1884_v62 = vpop.f32.mrf.mxu0  ;;  %v3014_v45 = vadd.f32 %v3013_v15, %v6429_v59 }
 0x2d9   : > { %v6440_v13 = vadd.f32 %v1884_v62, %v5931_v50  ;;  %v2213_v48 = vpop.f32.mrf.mxu1  ;;  %v3062_v62 = vpop.f32.mrf.mxu3 }
 0x2da   : > { %v6445_v58 = vadd.f32 %v2213_v48, %v5931_v50  ;;  %v6455_v21 = vadd.f32 %v3062_v62, %v3014_v45  ;;  %v4605_v50 = vld [vmem:[%s8080_s1 + $0x158] sm:$0xff]  ;;  %v6462_v37 = vpop.permute.xlu2 %1186  ;;  %v4361_v45 = vld [vmem:[%s8082_s3 + $0xa8] sm:$0xf0] }
 0x2db   : > { %8467 = vst [vmem:[#allocation156_spill] sm:$0xff] %v6462_v37  ;;  %v6477_v12 = vor.u32 %v4643_v44, %v4361_v45  ;;  %v4651_v45 = vld [vmem:[%s8082_s3 + $0xcc] sm:$0xf]  ;;  %v2999_v37 = vadd.f32 %v6187_v31, %v6380_v16 }
 0x2dc   : > { %8466 = vst [vmem:[#allocation155_spill] sm:$0xff] %v6445_v58  ;;  %3129 = vmatmul.bf16.gmra.mxu3 %v6434_v41  ;;  %v6472_v59 = vpop.permute.xlu0 %1176 }
 0x2dd   : > { %8469 = vst [vmem:[#allocation158_spill] sm:$0xff] %v6472_v59 }
 0x2de   : > { %8471 = vst [vmem:[#allocation160_spill] sm:$0xff] %v6477_v12 }
 0x2df   : > { %v6460_v48 = vpop.f32.mrf.mxu2 }
 0x2e0   : > { %v1887_v15 = vpop.f32.mrf.mxu0 }
 0x2e1   : > { %v2216_v10 = vpop.f32.mrf.mxu1 }
 0x2e2   : > { %v6475_v41 = vadd.f32 %v2216_v10, %v6081_v47  ;;  %v6493_v44 = vpop.permute.xlu2 %1171  ;;  %v4393_v10 = vld [vmem:[%s8082_s3 + $0xe8] sm:$0xf0] }
 0x2e3   : > { %1926 = vmatmul.bf16.gmra.mxu0 %v4605_v50  ;;  %8473 = vst [vmem:[#allocation162_spill] sm:$0xff] %v6493_v44  ;;  %v6516_v0 = vor.u32 %v4651_v45, %v4393_v10  ;;  %v4667_v44 = vld [vmem:[%s8082_s3 + $0x14c] sm:$0xf] }
 0x2e4   : > { %2255 = vmatmul.bf16.gmra.mxu1 %v4605_v50  ;;  %8470 = vst [vmem:[#allocation159_spill] sm:$0xff] %v6475_v41  ;;  %v6480_v50 = vadd.f32 %v1887_v15, %v6081_v47  ;;  %v4606_v47 = vld [vmem:[%s8080_s1 + $0x160] sm:$0xff] }
 0x2e5   : > { %8476 = vst [vmem:[#allocation165_spill] sm:$0xff] %v6516_v0 }
 0x2e7   : > { %v6470_v62 = vpop.f32.mrf.mxu2 }
 0x2e8   : > { %8468 = vst [vmem:[#allocation157_spill] sm:$0xff] %v6470_v62  ;;  %v1889_v22 = vpop.f32.mrf.mxu0 }
 0x2e9   : > { %v6483_v52 = vadd.f32 %v1889_v22, %v6063_v60  ;;  %v2218_v40 = vpop.f32.mrf.mxu1 }
 0x2ea   : > { %v6486_v25 = vadd.f32 %v2218_v40, %v6063_v60  ;;  %v6502_v60 = vpop.permute.xlu0 %1161 }
 0x2eb   : > { %8474 = vst [vmem:[#allocation163_spill] sm:$0xff] %v6502_v60 }
 0x2ec   : > { %8472 = vst [vmem:[#allocation161_spill] sm:$0xff] %v6486_v25  ;;  %3134 = vmatmul.bf16.gmra.mxu3 %v6477_v12  ;;  %v6512_v12 = vpop.permute.xlu2 %1086 }
 0x2ef   : > { %v6498_v22 = vpop.f32.mrf.mxu2 }
 0x2f0   : > { %v6500_v15 = vpop.f32.mrf.mxu0 }
 0x2f1   : > { %v2221_v40 = vpop.f32.mrf.mxu1 }
 0x2f2   : > { %v6519_v41 = vadd.f32 %v2221_v40, %v5834_v53  ;;  %v6524_v25 = vpop.permute.xlu0 %2576 }
 0x2f3   : > { %1931 = vmatmul.bf16.gmra.mxu0 %v4606_v47  ;;  %8479 = vst [vmem:[#allocation168_spill] sm:$0xff] %v6524_v25 }
 0x2f4   : > { %2260 = vmatmul.bf16.gmra.mxu1 %v4606_v47  ;;  %8477 = vst [vmem:[#allocation166_spill] sm:$0xff] %v6519_v41  ;;  %v6536_v2 = vpop.permute.xlu2 %2571 }
 0x2f5   : > { %8480 = vst [vmem:[#allocation169_spill] sm:$0xff] %v6536_v2 }
 0x2f7   : > { %v6510_v62 = vpop.f32.mrf.mxu2 }
 0x2f8   : > { %8475 = vst [vmem:[#allocation164_spill] sm:$0xff] %v6510_v62  ;;  %v6514_v34 = vpop.f32.mrf.mxu0  ;;  %v4607_v62 = vld [vmem:[%s8080_s1 + $0x168] sm:$0xff] }
 0x2f9   : > { %v2223_v58 = vpop.f32.mrf.mxu1 }
 0x2fa   : > { %v6522_v47 = vadd.f32 %v2223_v58, %v6040_v30  ;;  %v4659_v58 = vld [vmem:[%s8082_s3 + $0x10c] sm:$0xf] }
 0x2fc   : > { %8478 = vst [vmem:[#allocation167_spill] sm:$0xff] %v6522_v47  ;;  %3139 = vmatmul.bf16.gmra.mxu3 %v6516_v0  ;;  %v6544_v0 = vpop.permute.xlu0 %2591  ;;  %v6548_v47 = vor.u32 %v4659_v58, %v4425_v46  ;;  %v6558_v59 = vpop.permute.xlu2 %2586  ;;  %v3048_v46 = vadd.f32 %v6276_v8, %v2999_v37  ;;  %v4457_v8 = vld [vmem:[%s8082_s3 + $0x168] sm:$0xf0] }
 0x2fd   : > { %8481 = vst [vmem:[#allocation170_spill] sm:$0xff] %v6544_v0 }
 0x2fe   : > { %8483 = vst [vmem:[#allocation172_spill] sm:$0xff] %v6548_v47 }
 0x2ff   : > { %v6532_v10 = vpop.f32.mrf.mxu2  ;;  %8486 = vst [vmem:[#allocation175_spill] sm:$0xff] %v6558_v59 }
 0x300   : > { %v6534_v45 = vpop.f32.mrf.mxu0 }
 0x301   : > { %v2226_v40 = vpop.f32.mrf.mxu1 }
 0x302   : > { %v6551_v23 = vadd.f32 %v2226_v40, %v5926_v61  ;;  %v4608_v40 = vld [vmem:[%s8080_s1 + $0x170] sm:$0xff] }
 0x303   : > { %1936 = vmatmul.bf16.gmra.mxu0 %v4607_v62 }
 0x304   : > { %2265 = vmatmul.bf16.gmra.mxu1 %v4607_v62  ;;  %8484 = vst [vmem:[#allocation173_spill] sm:$0xff] %v6551_v23  ;;  %v6577_v37 = vpop.permute.xlu2 %2601 }
 0x305   : > { %8488 = vst [vmem:[#allocation177_spill] sm:$0xff] %v6577_v37 }
 0x307   : > { %v6546_v25 = vpop.f32.mrf.mxu2 }
 0x308   : > { %8482 = vst [vmem:[#allocation171_spill] sm:$0xff] %v6546_v25  ;;  %v1899_v41 = vpop.f32.mrf.mxu0  ;;  %v6567_v25 = vpop.permute.xlu0 %2606 }
 0x309   : > { %v2228_v56 = vpop.f32.mrf.mxu1  ;;  %8487 = vst [vmem:[#allocation176_spill] sm:$0xff] %v6567_v25  ;;  %v6581_v25 = vor.u32 %v4667_v44, %v4457_v8  ;;  %v4609_v8 = vld [vmem:[%s8080_s1 + $0x178] sm:$0xff] }
 0x30a   : > { %v6554_v62 = vadd.f32 %v2228_v56, %v5811_v33 }
 0x30b   : > { %8490 = vst [vmem:[#allocation179_spill] sm:$0xff] %v6581_v25 }
 0x30c   : > { %8485 = vst [vmem:[#allocation174_spill] sm:$0xff] %v6554_v62  ;;  %3144 = vmatmul.bf16.gmra.mxu3 %v6548_v47 }
 0x30f   : > { %v3096_v58 = vpop.f32.mrf.mxu2 }
 0x310   : > { %v1902_v56 = vpop.f32.mrf.mxu0  ;;  %v6569_v20 = vadd.f32 %v3096_v58, %v3048_v46  ;;  %v6583_v58 = vpop.permute.xlu0 %2621 }
 0x311   : > { %v2231_v31 = vpop.f32.mrf.mxu1  ;;  %8491 = vst [vmem:[#allocation180_spill] sm:$0xff] %v6583_v58  ;;  %v3004_v23 = vadd.f32 %v6232_v7, %v6583_v58  ;;  %v4675_v7 = vld [vmem:[%s8082_s3 + $0x18c] sm:$0xf] }
 0x313   : > { %1941 = vmatmul.bf16.gmra.mxu0 %v4608_v40  ;;  %v3053_v44 = vadd.f32 %v6327_v19, %v3004_v23  ;;  %v4489_v19 = vld [vmem:[%s8082_s3 + $0x1a8] sm:$0xf0] }
 0x314   : > { %2270 = vmatmul.bf16.gmra.mxu1 %v4608_v40  ;;  %v6586_v40 = vadd.f32 %v2231_v31, %v5901_v17  ;;  %v6600_v31 = vpop.permute.xlu2 %2616  ;;  %v6612_v58 = vor.u32 %v4675_v7, %v4489_v19 }
 0x315   : > { %8494 = vst [vmem:[#allocation183_spill] sm:$0xff] %v6600_v31 }
 0x316   : > { %8492 = vst [vmem:[#allocation181_spill] sm:$0xff] %v6586_v40 }
 0x317   : > { %v6579_v16 = vpop.f32.mrf.mxu2  ;;  %8496 = vst [vmem:[#allocation185_spill] sm:$0xff] %v6612_v58 }
 0x318   : > { %8489 = vst [vmem:[#allocation178_spill] sm:$0xff] %v6579_v16  ;;  %v1904_v47 = vpop.f32.mrf.mxu0 }
 0x319   : > { %v2233_v46 = vpop.f32.mrf.mxu1 }
 0x31a   : > { %v6589_v59 = vadd.f32 %v2233_v46, %v5886_v1 }
 0x31c   : > { %8493 = vst [vmem:[#allocation182_spill] sm:$0xff] %v6589_v59  ;;  %3149 = vmatmul.bf16.gmra.mxu3 %v6581_v25  ;;  %v6616_v31 = vpop.permute.xlu2 %2631 }
 0x31d   : > { %8497 = vst [vmem:[#allocation186_spill] sm:$0xff] %v6616_v31  ;;  %v3009_v59 = vadd.f32 %v6282_v42, %v6616_v31  ;;  %v4610_v42 = vld [vmem:[%s8080_s1 + $0x180] sm:$0xff] }
 0x31f   : > { %v3101_v16 = vpop.f32.mrf.mxu2 }
 0x320   : > { %v1907_v60 = vpop.f32.mrf.mxu0  ;;  %v6602_v46 = vadd.f32 %v3101_v16, %v3053_v44 }
 0x321   : > { %v2236_v3 = vpop.f32.mrf.mxu1  ;;  %v1908_v25 = vadd.f32 %v1907_v60, %v5724_v51  ;;  %v8527_v60 = vld [vmem:[#allocation80_spill] sm:$0xff] }
 0x323   : > { %1946 = vmatmul.bf16.gmra.mxu0 %v4609_v8 }
 0x324   : > { %2275 = vmatmul.bf16.gmra.mxu1 %v4609_v8  ;;  %v6619_v8 = vadd.f32 %v2236_v3, %v5724_v51  ;;  %v3058_v51 = vadd.f32 %v6398_v5, %v3009_v59  ;;  %v1900_v3 = vadd.f32 %v1899_v41, %v5811_v33  ;;  %v1893_v33 = vadd.f32 %v6500_v15, %v5834_v53  ;;  %v4683_v41 = vld [vmem:[%s8082_s3 + $0x1cc] sm:$0xf] }
 0x327   : > { %v6610_v23 = vpop.f32.mrf.mxu2 }
 0x328   : > { %8495 = vst [vmem:[#allocation184_spill] sm:$0xff] %v6610_v23  ;;  %v1909_v62 = vpop.f32.mrf.mxu0  ;;  %v1905_v23 = vadd.f32 %v1904_v47, %v5886_v1  ;;  %v1898_v47 = vadd.f32 %v6534_v45, %v5926_v61  ;;  %v4521_v61 = vld [vmem:[%s8082_s3 + $0x1e8] sm:$0xf0] }
 0x329   : > { %v1910_v16 = vadd.f32 %v1909_v62, %v5860_v54  ;;  %v2238_v44 = vpop.f32.mrf.mxu1  ;;  %v1903_v62 = vadd.f32 %v1902_v56, %v5901_v17  ;;  %v1895_v17 = vadd.f32 %v6514_v34, %v6040_v30  ;;  %v6652_v30 = vor.u32 %v4683_v41, %v4521_v61  ;;  %v8529_v41 = vld [vmem:[#allocation66_spill] sm:$0xff] }
 0x32a   : > { %v6622_v40 = vadd.f32 %v2238_v44, %v5860_v54  ;;  %v2435_v5 = vpack.c.bf16 %v1900_v3, %v1898_v47  ;;  %v6694_v47 = vpop.f32.mrf.mxu3 }
 0x32b   : > { %v2439_v7 = vpack.c.bf16 %v1910_v16, %v1908_v25  ;;  %v2437_v54 = vpack.c.bf16 %v1905_v23, %v1903_v62  ;;  %v2433_v59 = vpack.c.bf16 %v1895_v17, %v1893_v33  ;;  %8499 = vst [vmem:[#allocation188_spill] sm:$0xff] %v6652_v30  ;;  %v8507_v17 = vpack.c.bf16 %v6340_v35, %v6337_v39 }
 0x32c   : > { %3154 = vmatmul.bf16.gmra.mxu3 %v6612_v58  ;;  %8505 = vst [vmem:[#allocation191_spill] sm:$0xff] %v6694_v47  ;;  %v8535_v58 = vld [vmem:[#allocation74_spill] sm:$0xff] }
 0x32d   : > { %3165 = vmatpush.bf16.msra.mxu2 %v2439_v7 }
 0x32f   : > { %v3106_v19 = vpop.f32.mrf.mxu2 }
 0x330   : > { %v1912_v1 = vpop.f32.mrf.mxu0  ;;  %v6636_v25 = vadd.f32 %v3106_v19, %v3058_v51  ;;  %v8502_v51 = vpack.c.bf16 %v6483_v52, %v6480_v50  ;;  %v8503_v19 = vpack.c.bf16 %v6440_v13, %v6437_v38  ;;  %v8504_v52 = vpack.c.bf16 %v6393_v32, %v6390_v4  ;;  %v4303_v50 = vld [vmem:[%s8082_s3 + $0x10] sm:$0xf] }
 0x331   : > { %v2241_v16 = vpop.f32.mrf.mxu1  ;;  %3166 = vmatpush.bf16.msra.mxu2 %v2437_v54  ;;  %v6655_v34 = vadd.f32 %v1912_v1, %v6042_v43  ;;  %v2979_v1 = vadd.f32 %v5875_v49, %v6536_v2  ;;  %v8540_v2 = vld [vmem:[#allocation73_spill] sm:$0xff] }
 0x332   : > { %v6661_v23 = vadd.f32 %v2241_v16, %v6042_v43  ;;  %v4611_v43 = vld [vmem:[%s8080_s1 + $0x188] sm:$0xff] }
 0x333   : > { %1951 = vmatmul.bf16.gmra.mxu0 %v4610_v42 }
 0x334   : > { %2280 = vmatmul.bf16.gmra.mxu1 %v4610_v42  ;;  %8500 = vst [vmem:[#allocation189_spill] sm:$0xff] %v6661_v23 }
 0x335   : > { %3167 = vmatpush.bf16.msra.mxu2 %v2435_v5  ;;  %v3028_v5 = vadd.f32 %v6102_v14, %v2979_v1  ;;  %v4612_v14 = vld [vmem:[%s8080_s1 + $0x190] sm:$0xff] }
 0x337   : > { %v6650_v45 = vpop.f32.mrf.mxu2 }
 0x338   : > { %8498 = vst [vmem:[#allocation187_spill] sm:$0xff] %v6650_v45  ;;  %v1914_v56 = vpop.f32.mrf.mxu0  ;;  %v4617_v45 = vld [vmem:[%s8080_s1 + $0x1b8] sm:$0xff] }
 0x339   : > { %v6658_v53 = vadd.f32 %v1914_v56, %v6230_v57  ;;  %v2243_v15 = vpop.f32.mrf.mxu1  ;;  %3168 = vmatpush.bf16.msra.mxu2 %v2433_v59  ;;  %v3077_v59 = vadd.f32 %v6413_v11, %v3028_v5  ;;  %v4335_v56 = vld [vmem:[%s8082_s3 + $0x50] sm:$0xf]  ;;  %v2984_v11 = vadd.f32 %v5959_v26, %v6329_v18 }
 0x33a   : > { %v6664_v44 = vadd.f32 %v2243_v15, %v6230_v57  ;;  %v4640_v15 = vld [vmem:[%s8082_s3 + $0x6c] sm:$0xf0] }
 0x33c   : > { %8501 = vst [vmem:[#allocation190_spill] sm:$0xff] %v6664_v44  ;;  %3159 = vmatmul.bf16.gmra.mxu3 %v6652_v30 }
 0x33d   : > { %3169 = vmatpush.bf16.msra.mxu2 %v8502_v51 }
 0x33f   : > { %v3111_v3 = vpop.f32.mrf.mxu2 }
 0x340   : > { %v1917_v54 = vpop.f32.mrf.mxu0  ;;  %v6678_v57 = vadd.f32 %v3111_v3, %v6455_v21  ;;  %v4632_v21 = vld [vmem:[%s8082_s3 + $0x2c] sm:$0xf0]  ;;  %v6735_v3 = vor.u32 %v4640_v15, %v4335_v56 }
 0x341   : > { %v2246_v42 = vpop.f32.mrf.mxu1  ;;  %3170 = vmatpush.bf16.msra.mxu2 %v8503_v19  ;;  %v6696_v38 = vor.u32 %v4632_v21, %v4303_v50  ;;  %v6699_v16 = vadd.f32 %v1917_v54, %v6167_v29  ;;  %v8512_v50 = vld [vmem:[#allocation98_spill] sm:$0xff] }
 0x342   : > { %v6709_v49 = vadd.f32 %v2246_v42, %v6167_v29  ;;  %8510 = vst [vmem:[#allocation195_spill] sm:$0xff] %v6735_v3  ;;  %v8511_v42 = vld [vmem:[#allocation95_spill] sm:$0xff]  ;;  %v3033_v21 = vadd.f32 %v8512_v50, %v2984_v11  ;;  %v8519_v50 = vld [vmem:[#allocation92_spill] sm:$0xff] }
 0x343   : > { %1956 = vmatmul.bf16.gmra.mxu0 %v4611_v43  ;;  %8506 = vst [vmem:[#allocation192_spill] sm:$0xff] %v6696_v38 }
 0x344   : > { %2285 = vmatmul.bf16.gmra.mxu1 %v4611_v43  ;;  %8508 = vst [vmem:[#allocation193_spill] sm:$0xff] %v6709_v49 }
 0x345   : > { %3171 = vmatpush.bf16.msra.mxu2 %v8504_v52 }
 0x348   : > { %v1919_v13 = vpop.f32.mrf.mxu0 }
 0x349   : > { %v6702_v4 = vadd.f32 %v1919_v13, %v6009_v24  ;;  %v2248_v32 = vpop.f32.mrf.mxu1  ;;  %3172 = vmatpush.bf16.msra.mxu2 %v8507_v17  ;;  %v3082_v17 = vadd.f32 %v6460_v48, %v3033_v21  ;;  %v8515_v48 = vld [vmem:[#allocation82_spill] sm:$0xff] }
 0x34a   : > { %v6712_v33 = vadd.f32 %v2248_v32, %v6009_v24  ;;  %v2989_v56 = vadd.f32 %v8515_v48, %v6544_v0  ;;  %v4616_v0 = vld [vmem:[%s8080_s1 + $0x1b0] sm:$0xff] }
 0x34c   : > { %8509 = vst [vmem:[#allocation194_spill] sm:$0xff] %v6712_v33  ;;  %3173 = vmatmul.bf16.vlgmr.msra.gmra.mxu2 %v6696_v38 }
 0x34f   : > { %v3125_v39 = vpop.f32.mrf.mxu3 }
 0x350   : > { %v6723_v29 = vadd.f32 %v3125_v39, %v3077_v59  ;;  %v1922_v35 = vpop.f32.mrf.mxu0  ;;  %v4613_v59 = vld [vmem:[%s8080_s1 + $0x198] sm:$0xff] }
 0x351   : > { %v2251_v24 = vpop.f32.mrf.mxu1  ;;  %v6738_v54 = vadd.f32 %v1922_v35, %v6146_v9  ;;  %v4367_v35 = vld [vmem:[%s8082_s3 + $0x90] sm:$0xf] }
 0x352   : > { %v6745_v1 = vadd.f32 %v2251_v24, %v6146_v9  ;;  %v4648_v24 = vld [vmem:[%s8082_s3 + $0xac] sm:$0xf0] }
 0x353   : > { %1961 = vmatmul.bf16.gmra.mxu0 %v4612_v14 }
 0x354   : > { %2290 = vmatmul.bf16.gmra.mxu1 %v4612_v14  ;;  %8513 = vst [vmem:[#allocation95_spill] sm:$0xff] %v6745_v1 }
 0x357   : > { %v6733_v51 = vpop.f32.mrf.mxu3 }
 0x358   : > { %v1924_v43 = vpop.f32.mrf.mxu0 }
 0x359   : > { %v6741_v19 = vadd.f32 %v1924_v43, %v8511_v42  ;;  %v2253_v52 = vpop.f32.mrf.mxu1  ;;  %v6771_v43 = vor.u32 %v4648_v24, %v4367_v35  ;;  %v8526_v35 = vld [vmem:[#allocation114_spill] sm:$0xff] }
 0x35a   : > { %v6748_v13 = vadd.f32 %v2253_v52, %v8511_v42  ;;  %v8518_v42 = vld [vmem:[#allocation69_spill] sm:$0xff] }
 0x35b   : > { %8517 = vst [vmem:[#allocation196_spill] sm:$0xff] %v6771_v43 }
 0x35c   : > { %8514 = vst [vmem:[#allocation98_spill] sm:$0xff] %v6748_v13  ;;  %3178 = vmatmul.bf16.gmra.mxu2 %v6735_v3 }
 0x35f   : > { %v3130_v5 = vpop.f32.mrf.mxu3 }
 0x360   : > { %v6759_v9 = vadd.f32 %v3130_v5, %v3082_v17  ;;  %v1927_v39 = vpop.f32.mrf.mxu0  ;;  %v8520_v5 = vld [vmem:[#allocation105_spill] sm:$0xff] }
 0x361   : > { %v2256_v14 = vpop.f32.mrf.mxu1  ;;  %v6774_v52 = vadd.f32 %v1927_v39, %v8518_v42 }
 0x362   : > { %v6781_v62 = vadd.f32 %v2256_v14, %v8518_v42 }
 0x363   : > { %1966 = vmatmul.bf16.gmra.mxu0 %v4613_v59 }
 0x364   : > { %2295 = vmatmul.bf16.gmra.mxu1 %v4613_v59  ;;  %v3038_v59 = vadd.f32 %v8520_v5, %v2989_v56  ;;  %8521 = vst [vmem:[#allocation69_spill] sm:$0xff] %v6781_v62  ;;  %v4614_v56 = vld [vmem:[%s8080_s1 + $0x1a0] sm:$0xff] }
 0x366   : > { %v3087_v39 = vadd.f32 %v6498_v22, %v3038_v59  ;;  %v4656_v22 = vld [vmem:[%s8082_s3 + $0xec] sm:$0xf0] }
 0x367   : > { %v6769_v15 = vpop.f32.mrf.mxu3 }
 0x368   : > { %8516 = vst [vmem:[#allocation82_spill] sm:$0xff] %v6769_v15  ;;  %v1929_v11 = vpop.f32.mrf.mxu0 }
 0x369   : > { %v6777_v21 = vadd.f32 %v1929_v11, %v8519_v50  ;;  %v2258_v17 = vpop.f32.mrf.mxu1 }
 0x36a   : > { %v6784_v61 = vadd.f32 %v2258_v17, %v8519_v50  ;;  %v4399_v50 = vld [vmem:[%s8082_s3 + $0xd0] sm:$0xf]  ;;  %v8523_v17 = vld [vmem:[#allocation93_spill] sm:$0xff] }
 0x36b   : > { %v2994_v5 = vadd.f32 %v8523_v17, %v6577_v37 }
 0x36c   : > { %8522 = vst [vmem:[#allocation92_spill] sm:$0xff] %v6784_v61  ;;  %3183 = vmatmul.bf16.gmra.mxu2 %v6771_v43 }
 0x36f   : > { %v3135_v24 = vpop.f32.mrf.mxu3 }
 0x370   : > { %v6795_v14 = vadd.f32 %v3135_v24, %v3087_v39  ;;  %v6797_v11 = vpop.f32.mrf.mxu0  ;;  %v6811_v24 = vor.u32 %v4656_v22, %v4399_v50  ;;  %v4615_v50 = vld [vmem:[%s8080_s1 + $0x1a8] sm:$0xff] }
 0x371   : > { %v2261_v42 = vpop.f32.mrf.mxu1 }
 0x372   : > { %8525 = vst [vmem:[#allocation93_spill] sm:$0xff] %v6811_v24  ;;  %v6815_v7 = vadd.f32 %v2261_v42, %v8527_v60 }
 0x373   : > { %1971 = vmatmul.bf16.gmra.mxu0 %v4614_v56 }
 0x374   : > { %2300 = vmatmul.bf16.gmra.mxu1 %v4614_v56  ;;  %v3043_v56 = vadd.f32 %v8526_v35, %v2994_v5  ;;  %8528 = vst [vmem:[#allocation114_spill] sm:$0xff] %v6815_v7  ;;  %v4664_v5 = vld [vmem:[%s8082_s3 + $0x12c] sm:$0xf0] }
 0x375   : > { %v8667_v7 = vld [vmem:[#allocation124_spill] sm:$0xff] }
 0x376   : > { %v3092_v17 = vadd.f32 %v6532_v10, %v3043_v56 }
 0x377   : > { %v6807_v59 = vpop.f32.mrf.mxu3 }
 0x378   : > { %8524 = vst [vmem:[#allocation105_spill] sm:$0xff] %v6807_v59  ;;  %v6809_v39 = vpop.f32.mrf.mxu0  ;;  %v8543_v59 = vld [vmem:[#allocation64_spill] sm:$0xff] }
 0x379   : > { %v2263_v32 = vpop.f32.mrf.mxu1 }
 0x37a   : > { %v6818_v26 = vadd.f32 %v2263_v32, %v8529_v41  ;;  %v4431_v32 = vld [vmem:[%s8082_s3 + $0x110] sm:$0xf] }
 0x37b   : > { %v6837_v48 = vor.u32 %v4664_v5, %v4431_v32 }
 0x37c   : > { %8530 = vst [vmem:[#allocation80_spill] sm:$0xff] %v6818_v26  ;;  %3188 = vmatmul.bf16.gmra.mxu2 %v6811_v24 }
 0x37d   : > { %8532 = vst [vmem:[#allocation197_spill] sm:$0xff] %v6837_v48 }
 0x37f   : > { %v3140_v30 = vpop.f32.mrf.mxu3 }
 0x380   : > { %v6827_v22 = vadd.f32 %v3140_v30, %v3092_v17  ;;  %v1937_v35 = vpop.f32.mrf.mxu0  ;;  %v8533_v30 = vld [vmem:[#allocation78_spill] sm:$0xff] }
 0x381   : > { %v2266_v42 = vpop.f32.mrf.mxu1 }
 0x382   : > { %v6840_v17 = vadd.f32 %v2266_v42, %v8533_v30  ;;  %v4672_v42 = vld [vmem:[%s8082_s3 + $0x16c] sm:$0xf0] }
 0x383   : > { %1976 = vmatmul.bf16.gmra.mxu0 %v4615_v50 }
 0x384   : > { %2305 = vmatmul.bf16.gmra.mxu1 %v4615_v50  ;;  %8534 = vst [vmem:[#allocation78_spill] sm:$0xff] %v6840_v17  ;;  %v8668_v17 = vld [vmem:[#allocation138_spill] sm:$0xff] }
 0x387   : > { %v6835_v10 = vpop.f32.mrf.mxu3 }
 0x388   : > { %8531 = vst [vmem:[#allocation66_spill] sm:$0xff] %v6835_v10  ;;  %v1939_v56 = vpop.f32.mrf.mxu0 }
 0x389   : > { %v2268_v31 = vpop.f32.mrf.mxu1 }
 0x38a   : > { %v6843_v37 = vadd.f32 %v2268_v31, %v8535_v58  ;;  %v4463_v31 = vld [vmem:[%s8082_s3 + $0x150] sm:$0xf] }
 0x38b   : > { %v6862_v18 = vor.u32 %v4672_v42, %v4463_v31 }
 0x38c   : > { %8536 = vst [vmem:[#allocation74_spill] sm:$0xff] %v6843_v37  ;;  %3193 = vmatmul.bf16.gmra.mxu2 %v6837_v48 }
 0x38d   : > { %8538 = vst [vmem:[#allocation199_spill] sm:$0xff] %v6862_v18 }
 0x38f   : > { %v3145_v24 = vpop.f32.mrf.mxu3 }
 0x390   : > { %v6852_v32 = vadd.f32 %v3145_v24, %v6569_v20  ;;  %v1942_v5 = vpop.f32.mrf.mxu0  ;;  %v8539_v20 = vld [vmem:[#allocation58_spill] sm:$0xff] }
 0x391   : > { %v2271_v43 = vpop.f32.mrf.mxu1 }
 0x392   : > { %v6865_v24 = vadd.f32 %v2271_v43, %v8539_v20  ;;  %v4680_v43 = vld [vmem:[%s8082_s3 + $0x1ac] sm:$0xf0] }
 0x393   : > { %1981 = vmatmul.bf16.gmra.mxu0 %v4616_v0 }
 0x394   : > { %2310 = vmatmul.bf16.gmra.mxu1 %v4616_v0 }
 0x397   : > { %v6860_v50 = vpop.f32.mrf.mxu3 }
 0x398   : > { %8537 = vst [vmem:[#allocation198_spill] sm:$0xff] %v6860_v50  ;;  %v1944_v48 = vpop.f32.mrf.mxu0 }
 0x399   : > { %v2273_v3 = vpop.f32.mrf.mxu1  ;;  %v1945_v33 = vadd.f32 %v1944_v48, %v8540_v2 }
 0x39a   : > { %v6868_v38 = vadd.f32 %v2273_v3, %v8540_v2  ;;  %v4495_v3 = vld [vmem:[%s8082_s3 + $0x190] sm:$0xf] }
 0x39b   : > { %v6887_v10 = vor.u32 %v4680_v43, %v4495_v3  ;;  %v1943_v3 = vadd.f32 %v1942_v5, %v8539_v20 }
 0x39c   : > { %3198 = vmatmul.bf16.gmra.mxu2 %v6862_v18 }
 0x39d   : > { %8542 = vst [vmem:[#allocation73_spill] sm:$0xff] %v6887_v10 }
 0x39f   : > { %v3150_v47 = vpop.f32.mrf.mxu3 }
 0x3a0   : > { %v6877_v31 = vadd.f32 %v3150_v47, %v6602_v46  ;;  %v1947_v42 = vpop.f32.mrf.mxu0  ;;  %v8544_v47 = vld [vmem:[#allocation56_spill] sm:$0xff] }
 0x3a1   : > { %v2276_v50 = vpop.f32.mrf.mxu1  ;;  %v1948_v46 = vadd.f32 %v1947_v42, %v8543_v59  ;;  %v2453_v42 = vpack.c.bf16 %v1945_v33, %v1943_v3  ;;  %v4688_v33 = vld [vmem:[%s8082_s3 + $0x1ec] sm:$0xf0] }
 0x3a3   : > { %1986 = vmatmul.bf16.gmra.mxu0 %v4617_v45 }
 0x3a4   : > { %2315 = vmatmul.bf16.gmra.mxu1 %v4617_v45  ;;  %v6892_v45 = vadd.f32 %v2276_v50, %v8543_v59  ;;  %v1935_v50 = vadd.f32 %v6809_v39, %v8529_v41  ;;  %v8547_v39 = vld [vmem:[#allocation126_spill] sm:$0xff] }
 0x3a7   : > { %v6885_v0 = vpop.f32.mrf.mxu3 }
 0x3a8   : > { %8541 = vst [vmem:[#allocation58_spill] sm:$0xff] %v6885_v0  ;;  %v1949_v18 = vpop.f32.mrf.mxu0 }
 0x3a9   : > { %v1950_v23 = vadd.f32 %v1949_v18, %v8544_v47  ;;  %v2278_v44 = vpop.f32.mrf.mxu1  ;;  %v1940_v18 = vadd.f32 %v1939_v56, %v8535_v58  ;;  %v1933_v58 = vadd.f32 %v6797_v11, %v8527_v60 }
 0x3aa   : > { %v6895_v49 = vadd.f32 %v2278_v44, %v8544_v47  ;;  %v4618_v44 = vld [vmem:[%s8080_s1 + $0x1c0] sm:$0xff] }
 0x3ab   : > { %v2455_v1 = vpack.c.bf16 %v1950_v23, %v1948_v46  ;;  %v1938_v23 = vadd.f32 %v1937_v35, %v8533_v30  ;;  %v2449_v35 = vpack.c.bf16 %v1935_v50, %v1933_v58 }
 0x3ac   : > { %3203 = vmatmul.bf16.gmra.mxu2 %v6887_v10 }
 0x3ad   : > { %3214 = vmatpush.bf16.msra.mxu3 %v2455_v1  ;;  %v2451_v1 = vpack.c.bf16 %v1940_v18, %v1938_v23  ;;  %v8550_v18 = vpack.c.bf16 %v6777_v21, %v6774_v52  ;;  %v8551_v23 = vpack.c.bf16 %v6741_v19, %v6738_v54  ;;  %v8552_v52 = vpack.c.bf16 %v6702_v4, %v6699_v16  ;;  %v4628_v21 = vld [vmem:[%s8082_s3 + $0x14] sm:$0xf]  ;;  %v8555_v19 = vld [vmem:[#allocation123_spill] sm:$0xff] }
 0x3ae   : > { %v8556_v4 = vpack.c.bf16 %v6658_v53, %v6655_v34  ;;  %v4620_v34 = vld [vmem:[%s8080_s1 + $0x1d0] sm:$0xff] }
 0x3af   : > { %v3155_v43 = vpop.f32.mrf.mxu3 }
 0x3b0   : > { %v6907_v59 = vadd.f32 %v3155_v43, %v6636_v25  ;;  %v1952_v2 = vpop.f32.mrf.mxu0  ;;  %v4527_v25 = vld [vmem:[%s8082_s3 + $0x1d0] sm:$0xf]  ;;  %v4619_v43 = vld [vmem:[%s8080_s1 + $0x1c8] sm:$0xff] }
 0x3b1   : > { %v2281_v48 = vpop.f32.mrf.mxu1  ;;  %3215 = vmatpush.bf16.msra.mxu3 %v2453_v42  ;;  %v6922_v41 = vor.u32 %v4688_v33, %v4527_v25  ;;  %v6925_v5 = vadd.f32 %v1952_v2, %v8547_v39 }
 0x3b2   : > { %v6931_v20 = vadd.f32 %v2281_v48, %v8547_v39  ;;  %v6962_v48 = vpop.f32.mrf.mxu2 }
 0x3b3   : > { %1991 = vmatmul.bf16.gmra.mxu0 %v4618_v44  ;;  %8546 = vst [vmem:[#allocation56_spill] sm:$0xff] %v6922_v41 }
 0x3b4   : > { %2320 = vmatmul.bf16.gmra.mxu1 %v4618_v44  ;;  %8548 = vst [vmem:[#allocation126_spill] sm:$0xff] %v6931_v20 }
 0x3b5   : > { %3216 = vmatpush.bf16.msra.mxu3 %v2451_v1  ;;  %8553 = vst [vmem:[#allocation201_spill] sm:$0xff] %v6962_v48 }
 0x3b7   : > { %v6920_v56 = vpop.f32.mrf.mxu3 }
 0x3b8   : > { %8545 = vst [vmem:[#allocation64_spill] sm:$0xff] %v6920_v56  ;;  %v1954_v30 = vpop.f32.mrf.mxu0 }
 0x3b9   : > { %v6928_v60 = vadd.f32 %v1954_v30, %v6512_v12  ;;  %v2283_v11 = vpop.f32.mrf.mxu1  ;;  %3217 = vmatpush.bf16.msra.mxu3 %v2449_v35 }
 0x3ba   : > { %v6934_v46 = vadd.f32 %v2283_v11, %v6512_v12 }
 0x3bc   : > { %8549 = vst [vmem:[#allocation200_spill] sm:$0xff] %v6934_v46  ;;  %3208 = vmatmul.bf16.gmra.mxu2 %v6922_v41  ;;  %v8577_v46 = vld [vmem:[#allocation86_spill] sm:$0xff] }
 0x3bd   : > { %3218 = vmatpush.bf16.msra.mxu3 %v8550_v18  ;;  %v4636_v18 = vld [vmem:[%s8082_s3 + $0x54] sm:$0xf] }
 0x3bf   : > { %v3160_v42 = vpop.f32.mrf.mxu3 }
 0x3c0   : > { %v6948_v12 = vadd.f32 %v3160_v42, %v6678_v57  ;;  %v1957_v44 = vpop.f32.mrf.mxu0  ;;  %v4305_v57 = vld [vmem:[%s8082_s3 + $0x30] sm:$0xf0] }
 0x3c1   : > { %v2286_v2 = vpop.f32.mrf.mxu1  ;;  %3219 = vmatpush.bf16.msra.mxu3 %v8551_v23  ;;  %v6964_v1 = vor.u32 %v4628_v21, %v4305_v57  ;;  %v6967_v54 = vadd.f32 %v1957_v44, %v6453_v63  ;;  %v4337_v42 = vld [vmem:[%s8082_s3 + $0x70] sm:$0xf0] }
 0x3c2   : > { %v6976_v25 = vadd.f32 %v2286_v2, %v6453_v63  ;;  %v7000_v2 = vor.u32 %v4636_v18, %v4337_v42 }
 0x3c3   : > { %1996 = vmatmul.bf16.gmra.mxu0 %v4619_v43  ;;  %8554 = vst [vmem:[#allocation202_spill] sm:$0xff] %v6964_v1 }
 0x3c4   : > { %2325 = vmatmul.bf16.gmra.mxu1 %v4619_v43  ;;  %8557 = vst [vmem:[#allocation123_spill] sm:$0xff] %v6976_v25 }
 0x3c5   : > { %3220 = vmatpush.bf16.msra.mxu3 %v8552_v52  ;;  %8559 = vst [vmem:[#allocation204_spill] sm:$0xff] %v7000_v2 }
 0x3c8   : > { %v1959_v50 = vpop.f32.mrf.mxu0 }
 0x3c9   : > { %v6970_v58 = vadd.f32 %v1959_v50, %v8555_v19  ;;  %v2288_v16 = vpop.f32.mrf.mxu1  ;;  %3221 = vmatpush.bf16.msra.mxu3 %v8556_v4  ;;  %v4621_v4 = vld [vmem:[%s8080_s1 + $0x1d8] sm:$0xff] }
 0x3ca   : > { %v6979_v33 = vadd.f32 %v2288_v16, %v8555_v19 }
 0x3cc   : > { %8558 = vst [vmem:[#allocation203_spill] sm:$0xff] %v6979_v33  ;;  %3222 = vmatmul.bf16.vlgmr.msra.gmra.mxu3 %v6964_v1 }
 0x3cf   : > { %v3174_v39 = vpop.f32.mrf.mxu2 }
 0x3d0   : > { %v6990_v53 = vadd.f32 %v3174_v39, %v6723_v29  ;;  %v1962_v63 = vpop.f32.mrf.mxu0 }
 0x3d1   : > { %v2291_v11 = vpop.f32.mrf.mxu1  ;;  %v7003_v29 = vadd.f32 %v1962_v63, %v6442_v36  ;;  %v4369_v63 = vld [vmem:[%s8082_s3 + $0xb0] sm:$0xf0] }
 0x3d2   : > { %v7009_v21 = vadd.f32 %v2291_v11, %v6442_v36 }
 0x3d3   : > { %2001 = vmatmul.bf16.gmra.mxu0 %v4620_v34 }
 0x3d4   : > { %2330 = vmatmul.bf16.gmra.mxu1 %v4620_v34  ;;  %8560 = vst [vmem:[#allocation205_spill] sm:$0xff] %v7009_v21 }
 0x3d7   : > { %v6998_v43 = vpop.f32.mrf.mxu2 }
 0x3d8   : > { %v1964_v44 = vpop.f32.mrf.mxu0 }
 0x3d9   : > { %v7006_v23 = vadd.f32 %v1964_v44, %v6417_v27  ;;  %v2293_v52 = vpop.f32.mrf.mxu1  ;;  %v8564_v44 = vld [vmem:[#allocation106_spill] sm:$0xff] }
 0x3da   : > { %v7012_v57 = vadd.f32 %v2293_v52, %v6417_v27  ;;  %v4644_v27 = vld [vmem:[%s8082_s3 + $0x94] sm:$0xf] }
 0x3db   : > { %v7033_v42 = vor.u32 %v4644_v27, %v4369_v63  ;;  %v4622_v63 = vld [vmem:[%s8080_s1 + $0x1e0] sm:$0xff] }
 0x3dc   : > { %8561 = vst [vmem:[#allocation206_spill] sm:$0xff] %v7012_v57  ;;  %3227 = vmatmul.bf16.gmra.mxu3 %v7000_v2  ;;  %v8579_v57 = vld [vmem:[#allocation88_spill] sm:$0xff] }
 0x3dd   : > { %8563 = vst [vmem:[#allocation208_spill] sm:$0xff] %v7033_v42 }
 0x3df   : > { %v3179_v16 = vpop.f32.mrf.mxu2 }
 0x3e0   : > { %v7023_v39 = vadd.f32 %v3179_v16, %v6759_v9  ;;  %v1967_v36 = vpop.f32.mrf.mxu0 }
 0x3e1   : > { %v2296_v34 = vpop.f32.mrf.mxu1  ;;  %v7036_v9 = vadd.f32 %v1967_v36, %v8564_v44 }
 0x3e3   : > { %2006 = vmatmul.bf16.gmra.mxu0 %v4621_v4 }
 0x3e4   : > { %2335 = vmatmul.bf16.gmra.mxu1 %v4621_v4  ;;  %v7042_v4 = vadd.f32 %v2296_v34, %v8564_v44  ;;  %v4652_v44 = vld [vmem:[%s8082_s3 + $0xd4] sm:$0xf] }
 0x3e6   : > { %8565 = vst [vmem:[#allocation106_spill] sm:$0xff] %v7042_v4 }
 0x3e7   : > { %v7031_v11 = vpop.f32.mrf.mxu2 }
 0x3e8   : > { %8562 = vst [vmem:[#allocation207_spill] sm:$0xff] %v7031_v11  ;;  %v1969_v18 = vpop.f32.mrf.mxu0 }
 0x3e9   : > { %v7039_v52 = vadd.f32 %v1969_v18, %v6415_v6  ;;  %v2298_v16 = vpop.f32.mrf.mxu1 }
 0x3ea   : > { %v7045_v3 = vadd.f32 %v2298_v16, %v6415_v6  ;;  %v4401_v16 = vld [vmem:[%s8082_s3 + $0xf0] sm:$0xf0] }
 0x3eb   : > { %v7070_v0 = vor.u32 %v4652_v44, %v4401_v16  ;;  %v4660_v44 = vld [vmem:[%s8082_s3 + $0x114] sm:$0xf] }
 0x3ec   : > { %8566 = vst [vmem:[#allocation209_spill] sm:$0xff] %v7045_v3  ;;  %3232 = vmatmul.bf16.gmra.mxu3 %v7033_v42  ;;  %v4433_v16 = vld [vmem:[%s8082_s3 + $0x130] sm:$0xf0] }
 0x3ed   : > { %8569 = vst [vmem:[#allocation212_spill] sm:$0xff] %v7070_v0  ;;  %v7091_v42 = vor.u32 %v4660_v44, %v4433_v16  ;;  %v4668_v44 = vld [vmem:[%s8082_s3 + $0x154] sm:$0xf] }
 0x3ee   : > { %v4465_v16 = vld [vmem:[%s8082_s3 + $0x170] sm:$0xf0] }
 0x3ef   : > { %v3184_v36 = vpop.f32.mrf.mxu2  ;;  %8571 = vst [vmem:[#allocation214_spill] sm:$0xff] %v7091_v42  ;;  %v7112_v48 = vor.u32 %v4668_v44, %v4465_v16  ;;  %v4676_v44 = vld [vmem:[%s8082_s3 + $0x194] sm:$0xf] }
 0x3f0   : > { %v7056_v18 = vadd.f32 %v3184_v36, %v6795_v14  ;;  %v7058_v34 = vpop.f32.mrf.mxu0  ;;  %v4497_v16 = vld [vmem:[%s8082_s3 + $0x1b0] sm:$0xf0] }
 0x3f1   : > { %v7060_v6 = vpop.f32.mrf.mxu1  ;;  %8573 = vst [vmem:[#allocation216_spill] sm:$0xff] %v7112_v48  ;;  %v7133_v20 = vor.u32 %v4676_v44, %v4497_v16  ;;  %v8580_v3 = vld [vmem:[#allocation104_spill] sm:$0xff] }
 0x3f2   : > { %8567 = vst [vmem:[#allocation210_spill] sm:$0xff] %v7060_v6 }
 0x3f3   : > { %2011 = vmatmul.bf16.gmra.mxu0 %v4622_v63  ;;  %8575 = vst [vmem:[#allocation218_spill] sm:$0xff] %v7133_v20 }
 0x3f4   : > { %2340 = vmatmul.bf16.gmra.mxu1 %v4622_v63  ;;  %v4623_v63 = vld [vmem:[%s8080_s1 + $0x1e8] sm:$0xff] }
 0x3f7   : > { %v7068_v19 = vpop.f32.mrf.mxu2 }
 0x3f8   : > { %8568 = vst [vmem:[#allocation211_spill] sm:$0xff] %v7068_v19  ;;  %v1974_v27 = vpop.f32.mrf.mxu0 }
 0x3f9   : > { %v7072_v14 = vpop.f32.mrf.mxu1 }
 0x3fc   : > { %3237 = vmatmul.bf16.gmra.mxu3 %v7070_v0 }
 0x3ff   : > { %v3189_v36 = vpop.f32.mrf.mxu2 }
 0x400   : > { %v7079_v47 = vadd.f32 %v3189_v36, %v6827_v22  ;;  %v1977_v35 = vpop.f32.mrf.mxu0 }
 0x401   : > { %v7081_v50 = vpop.f32.mrf.mxu1 }
 0x403   : > { %2016 = vmatmul.bf16.gmra.mxu0 %v4623_v63 }
 0x404   : > { %2345 = vmatmul.bf16.gmra.mxu1 %v4623_v63  ;;  %v4624_v63 = vld [vmem:[%s8080_s1 + $0x1f0] sm:$0xff] }
 0x407   : > { %v7089_v30 = vpop.f32.mrf.mxu2 }
 0x408   : > { %8570 = vst [vmem:[#allocation213_spill] sm:$0xff] %v7089_v30  ;;  %v1979_v0 = vpop.f32.mrf.mxu0 }
 0x409   : > { %v7093_v22 = vpop.f32.mrf.mxu1  ;;  %v1980_v15 = vadd.f32 %v1979_v0, %v6294_v55  ;;  %v4529_v0 = vld [vmem:[%s8082_s3 + $0x1f0] sm:$0xf0] }
 0x40c   : > { %3242 = vmatmul.bf16.gmra.mxu3 %v7091_v42 }
 0x40f   : > { %v3194_v36 = vpop.f32.mrf.mxu2 }
 0x410   : > { %v7100_v2 = vadd.f32 %v3194_v36, %v6852_v32  ;;  %v1982_v1 = vpop.f32.mrf.mxu0 }
 0x411   : > { %v7102_v41 = vpop.f32.mrf.mxu1  ;;  %v1983_v13 = vadd.f32 %v1982_v1, %v8579_v57 }
 0x413   : > { %2021 = vmatmul.bf16.gmra.mxu0 %v4624_v63 }
 0x414   : > { %2350 = vmatmul.bf16.gmra.mxu1 %v4624_v63  ;;  %v4625_v63 = vld [vmem:[%s8080_s1 + $0x1f8] sm:$0xff] }
 0x417   : > { %v7110_v42 = vpop.f32.mrf.mxu2 }
 0x418   : > { %8572 = vst [vmem:[#allocation215_spill] sm:$0xff] %v7110_v42  ;;  %v1984_v10 = vpop.f32.mrf.mxu0 }
 0x419   : > { %v7114_v32 = vpop.f32.mrf.mxu1 }
 0x41c   : > { %3247 = vmatmul.bf16.gmra.mxu3 %v7112_v48 }
 0x41f   : > { %v3199_v36 = vpop.f32.mrf.mxu2 }
 0x420   : > { %v7121_v56 = vadd.f32 %v3199_v36, %v6877_v31  ;;  %v1987_v30 = vpop.f32.mrf.mxu0  ;;  %v8576_v31 = vld [vmem:[#allocation111_spill] sm:$0xff] }
 0x421   : > { %v7123_v19 = vpop.f32.mrf.mxu1  ;;  %v1988_v36 = vadd.f32 %v1987_v30, %v8576_v31 }
 0x423   : > { %2026 = vmatmul.bf16.gmra.mxu0 %v4625_v63 }
 0x424   : > { %2355 = vmatmul.bf16.gmra.mxu1 %v4625_v63  ;;  %v8578_v63 = vld [vmem:[#allocation125_spill] sm:$0xff] }
 0x425   : > { %v1985_v11 = vadd.f32 %v1984_v10, %v8578_v63  ;;  %v1975_v10 = vadd.f32 %v1974_v27, %v8580_v3 }
 0x427   : > { %v7131_v48 = vpop.f32.mrf.mxu2 }
 0x428   : > { %8574 = vst [vmem:[#allocation217_spill] sm:$0xff] %v7131_v48  ;;  %v1989_v42 = vpop.f32.mrf.mxu0  ;;  %v2469_v48 = vpack.c.bf16 %v1985_v11, %v1983_v13  ;;  %v4684_v13 = vld [vmem:[%s8082_s3 + $0x1d4] sm:$0xf]  ;;  %v8585_v11 = vld [vmem:[#allocation131_spill] sm:$0xff] }
 0x429   : > { %v1990_v25 = vadd.f32 %v1989_v42, %v8577_v46  ;;  %v7137_v33 = vpop.f32.mrf.mxu1  ;;  %v1978_v42 = vadd.f32 %v1977_v35, %v6309_v28 }
 0x42b   : > { %v2471_v21 = vpack.c.bf16 %v1990_v25, %v1988_v36  ;;  %v2467_v25 = vpack.c.bf16 %v1980_v15, %v1978_v42  ;;  %v8581_v36 = vld [vmem:[#allocation133_spill] sm:$0xff] }
 0x42c   : > { %3252 = vmatmul.bf16.gmra.mxu3 %v7133_v20  ;;  %v1973_v20 = vadd.f32 %v7058_v34, %v8581_v36 }
 0x42d   : > { %3263 = vmatpush.bf16.msrb.mxu2 %v2471_v21  ;;  %v8584_v21 = vld [vmem:[#allocation163_spill] sm:$0xff] }
 0x42f   : > { %v3204_v4 = vpop.f32.mrf.mxu2 }
 0x430   : > { %v7144_v44 = vadd.f32 %v3204_v4, %v6907_v59  ;;  %v1992_v30 = vpop.f32.mrf.mxu0  ;;  %v2465_v59 = vpack.c.bf16 %v1975_v10, %v1973_v20  ;;  %v4343_v10 = vld [vmem:[%s8082_s3 + $0x58] sm:$0xf] }
 0x431   : > { %v2321_v16 = vpop.f32.mrf.mxu1  ;;  %3264 = vmatpush.bf16.msrb.mxu2 %v2469_v48  ;;  %v7158_v48 = vor.u32 %v4684_v13, %v4529_v0  ;;  %v7161_v15 = vadd.f32 %v1992_v30, %v8584_v21  ;;  %v8588_v30 = vpack.c.bf16 %v7039_v52, %v7036_v9  ;;  %v4633_v9 = vld [vmem:[%s8082_s3 + $0x34] sm:$0xf0] }
 0x432   : > { %v7167_v34 = vadd.f32 %v2321_v16, %v8584_v21  ;;  %v4311_v21 = vld [vmem:[%s8082_s3 + $0x18] sm:$0xf] }
 0x433   : > { %8583 = vst [vmem:[#allocation86_spill] sm:$0xff] %v7158_v48 }
 0x434   : > { %8586 = vst [vmem:[#allocation125_spill] sm:$0xff] %v7167_v34 }
 0x435   : > { %3265 = vmatpush.bf16.msrb.mxu2 %v2467_v25 }
 0x437   : > { %v7156_v1 = vpop.f32.mrf.mxu2 }
 0x438   : > { %8582 = vst [vmem:[#allocation111_spill] sm:$0xff] %v7156_v1  ;;  %v1994_v35 = vpop.f32.mrf.mxu0 }
 0x439   : > { %v7164_v4 = vadd.f32 %v1994_v35, %v8585_v11  ;;  %v2323_v27 = vpop.f32.mrf.mxu1  ;;  %3266 = vmatpush.bf16.msrb.mxu2 %v2465_v59  ;;  %v8589_v59 = vpack.c.bf16 %v7006_v23, %v7003_v29  ;;  %v8590_v35 = vpack.c.bf16 %v6970_v58, %v6967_v54  ;;  %v8594_v23 = vld [vmem:[#allocation158_spill] sm:$0xff]  ;;  %v8595_v58 = vpack.c.bf16 %v6928_v60, %v6925_v5  ;;  %v8601_v5 = vld [vmem:[#allocation15_spill] sm:$0xff] }
 0x43a   : > { %v7170_v42 = vadd.f32 %v2323_v27, %v8585_v11  ;;  %v7197_v11 = vor.u32 %v4633_v9, %v4311_v21  ;;  %v8593_v27 = vld [vmem:[#allocation162_spill] sm:$0xff]  ;;  %v8599_v21 = vld [vmem:[#allocation16_spill] sm:$0xff] }
 0x43b   : > { %v8602_v60 = vld [vmem:[#allocation14_spill] sm:$0xff] }
 0x43c   : > { %8587 = vst [vmem:[#allocation88_spill] sm:$0xff] %v7170_v42  ;;  %3257 = vmatmul.bf16.gmra.mxu3 %v7158_v48 }
 0x43d   : > { %3267 = vmatpush.bf16.msrb.mxu2 %v8588_v30  ;;  %8592 = vst [vmem:[#allocation163_spill] sm:$0xff] %v7197_v11 }
 0x43f   : > { %v3209_v25 = vpop.f32.mrf.mxu2 }
 0x440   : > { %v7181_v13 = vadd.f32 %v3209_v25, %v6948_v12  ;;  %v1997_v16 = vpop.f32.mrf.mxu0  ;;  %v7195_v12 = vpop.f32.mrf.mxu3 }
 0x441   : > { %v2326_v0 = vpop.f32.mrf.mxu1  ;;  %3268 = vmatpush.bf16.msrb.mxu2 %v8589_v59  ;;  %8591 = vst [vmem:[#allocation104_spill] sm:$0xff] %v7195_v12  ;;  %v7200_v29 = vadd.f32 %v1997_v16, %v8593_v27  ;;  %v8611_v16 = vld [vmem:[#allocation116_spill] sm:$0xff] }
 0x442   : > { %v7209_v25 = vadd.f32 %v2326_v0, %v8593_v27 }
 0x444   : > { %8596 = vst [vmem:[#allocation131_spill] sm:$0xff] %v7209_v25 }
 0x445   : > { %3269 = vmatpush.bf16.msrb.mxu2 %v8590_v35  ;;  %v8598_v35 = vld [vmem:[#allocation17_spill] sm:$0xff] }
 0x446   : > { %v8600_v9 = vpack.c.bf16 %v8598_v35, %v8599_v21  ;;  %v8604_v35 = vld [vmem:[#allocation13_spill] sm:$0xff]  ;;  %v8605_v21 = vld [vmem:[#allocation12_spill] sm:$0xff] }
 0x448   : > { %v1999_v52 = vpop.f32.mrf.mxu0 }
 0x449   : > { %v7203_v30 = vadd.f32 %v1999_v52, %v8594_v23  ;;  %v2328_v54 = vpop.f32.mrf.mxu1  ;;  %3270 = vmatpush.bf16.msrb.mxu2 %v8595_v58  ;;  %v8603_v58 = vpack.c.bf16 %v8601_v5, %v8602_v60  ;;  %v4641_v52 = vld [vmem:[%s8082_s3 + $0x74] sm:$0xf0]  ;;  %v8607_v5 = vld [vmem:[#allocation11_spill] sm:$0xff]  ;;  %v8608_v60 = vld [vmem:[#allocation10_spill] sm:$0xff] }
 0x44a   : > { %v7212_v59 = vadd.f32 %v2328_v54, %v8594_v23  ;;  %v7242_v20 = vor.u32 %v4641_v52, %v4343_v10  ;;  %v4375_v52 = vld [vmem:[%s8082_s3 + $0x98] sm:$0xf] }
 0x44b   : > { %v4649_v10 = vld [vmem:[%s8082_s3 + $0xb4] sm:$0xf0] }
 0x44c   : > { %8597 = vst [vmem:[#allocation162_spill] sm:$0xff] %v7212_v59  ;;  %3271 = vmatmul.bf16.vlgmr.msrb.gmra.mxu2 %v7197_v11 }
 0x44d   : > { %3361 = vmatpush.bf16.msra.mxu2 %v8600_v9  ;;  %v8606_v9 = vpack.c.bf16 %v8604_v35, %v8605_v21  ;;  %8610 = vst [vmem:[#allocation158_spill] sm:$0xff] %v7242_v20  ;;  %v8612_v21 = vld [vmem:[#allocation156_spill] sm:$0xff] }
 0x44f   : > { %v3223_v0 = vpop.f32.mrf.mxu3 }
 0x450   : > { %v7226_v27 = vadd.f32 %v3223_v0, %v6990_v53  ;;  %v2002_v23 = vpop.f32.mrf.mxu0 }
 0x451   : > { %3362 = vmatpush.bf16.msra.mxu2 %v8603_v58  ;;  %v2331_v54 = vpop.f32.mrf.mxu1  ;;  %v8609_v58 = vpack.c.bf16 %v8607_v5, %v8608_v60  ;;  %v7245_v35 = vadd.f32 %v2002_v23, %v8611_v16  ;;  %v8615_v5 = vld [vmem:[#allocation9_spill] sm:$0xff]  ;;  %v8616_v60 = vld [vmem:[#allocation8_spill] sm:$0xff]  ;;  %v8618_v23 = vld [vmem:[#allocation7_spill] sm:$0xff] }
 0x452   : > { %v7251_v11 = vadd.f32 %v2331_v54, %v8611_v16 }
 0x454   : > { %8613 = vst [vmem:[#allocation17_spill] sm:$0xff] %v7251_v11  ;;  %v8633_v11 = vld [vmem:[#allocation113_spill] sm:$0xff] }
 0x455   : > { %3363 = vmatpush.bf16.msra.mxu2 %v8606_v9 }
 0x457   : > { %v7240_v53 = vpop.f32.mrf.mxu3 }
 0x458   : > { %v2004_v0 = vpop.f32.mrf.mxu0 }
 0x459   : > { %3364 = vmatpush.bf16.msra.mxu2 %v8609_v58  ;;  %v7248_v9 = vadd.f32 %v2004_v0, %v8612_v21  ;;  %v2333_v48 = vpop.f32.mrf.mxu1  ;;  %v8617_v58 = vpack.c.bf16 %v8615_v5, %v8616_v60  ;;  %v8619_v0 = vld [vmem:[#allocation6_spill] sm:$0xff]  ;;  %v8621_v5 = vld [vmem:[#allocation5_spill] sm:$0xff]  ;;  %v8622_v60 = vld [vmem:[#allocation3_spill] sm:$0xff] }
 0x45a   : > { %v7254_v34 = vadd.f32 %v2333_v48, %v8612_v21  ;;  %v8620_v42 = vpack.c.bf16 %v8618_v23, %v8619_v0  ;;  %v8624_v23 = vld [vmem:[#allocation2_spill] sm:$0xff] }
 0x45c   : > { %8614 = vst [vmem:[#allocation16_spill] sm:$0xff] %v7254_v34  ;;  %3276 = vmatmul.bf16.gmra.mxu2 %v7242_v20  ;;  %v8629_v20 = vld [vmem:[#allocation63_spill] sm:$0xff] }
 0x45d   : > { %3365 = vmatpush.bf16.msra.mxu2 %v8617_v58  ;;  %v8623_v58 = vpack.c.bf16 %v8621_v5, %v8622_v60  ;;  %v7287_v60 = vor.u32 %v4649_v10, %v4375_v52  ;;  %v8650_v52 = vld [vmem:[#allocation42_spill] sm:$0xff] }
 0x45f   : > { %v3228_v16 = vpop.f32.mrf.mxu3  ;;  %8631 = vst [vmem:[#allocation14_spill] sm:$0xff] %v7287_v60 }
 0x460   : > { %v7268_v48 = vadd.f32 %v3228_v16, %v7023_v39  ;;  %v2007_v54 = vpop.f32.mrf.mxu0  ;;  %v8628_v16 = vld [vmem:[#allocation65_spill] sm:$0xff] }
 0x461   : > { %3366 = vmatpush.bf16.msra.mxu2 %v8620_v42  ;;  %v2336_v21 = vpop.f32.mrf.mxu1  ;;  %v8625_v42 = vld [vmem:[#allocation4_spill] sm:$0xff]  ;;  %v8630_v25 = vpack.c.bf16 %v8628_v16, %v8629_v20  ;;  %v8640_v16 = vld [vmem:[#allocation53_spill] sm:$0xff] }
 0x462   : > { %v8626_v0 = vpack.c.bf16 %v8624_v23, %v8625_v42  ;;  %v8637_v42 = vld [vmem:[#allocation59_spill] sm:$0xff] }
 0x465   : > { %3367 = vmatpush.bf16.msra.mxu2 %v8623_v58  ;;  %v8632_v58 = vld [vmem:[#allocation147_spill] sm:$0xff] }
 0x466   : > { %v7290_v59 = vadd.f32 %v2007_v54, %v8632_v58  ;;  %v7296_v1 = vadd.f32 %v2336_v21, %v8632_v58  ;;  %v8643_v58 = vld [vmem:[#allocation49_spill] sm:$0xff] }
 0x467   : > { %v7282_v39 = vpop.f32.mrf.mxu3 }
 0x468   : > { %8627 = vst [vmem:[#allocation15_spill] sm:$0xff] %v7282_v39  ;;  %v2009_v5 = vpop.f32.mrf.mxu0 }
 0x469   : > { %3368 = vmatpush.bf16.msra.mxu2 %v8626_v0  ;;  %v7293_v34 = vadd.f32 %v2009_v5, %v8633_v11  ;;  %v2338_v12 = vpop.f32.mrf.mxu1  ;;  %8634 = vst [vmem:[#allocation13_spill] sm:$0xff] %v7296_v1  ;;  %v8639_v0 = vld [vmem:[#allocation54_spill] sm:$0xff] }
 0x46a   : > { %v7299_v23 = vadd.f32 %v2338_v12, %v8633_v11  ;;  %v8641_v21 = vpack.c.bf16 %v8639_v0, %v8640_v16  ;;  %v8642_v5 = vld [vmem:[#allocation50_spill] sm:$0xff]  ;;  %v8647_v16 = vld [vmem:[#allocation45_spill] sm:$0xff] }
 0x46b   : > { %v8644_v20 = vpack.c.bf16 %v8642_v5, %v8643_v58  ;;  %v8646_v0 = vld [vmem:[#allocation46_spill] sm:$0xff]  ;;  %v8651_v5 = vld [vmem:[#allocation41_spill] sm:$0xff] }
 0x46c   : > { %8635 = vst [vmem:[#allocation12_spill] sm:$0xff] %v7299_v23  ;;  %3281 = vmatmul.bf16.gmra.mxu2 %v7287_v60  ;;  %v8653_v60 = vld [vmem:[#allocation39_spill] sm:$0xff]  ;;  %v8654_v1 = vld [vmem:[#allocation38_spill] sm:$0xff] }
 0x46d   : > { %3459 = vmatpush.bf16.msrb.mxu2 %v8630_v25  ;;  %v8636_v25 = vld [vmem:[#allocation60_spill] sm:$0xff]  ;;  %v8655_v23 = vpack.c.bf16 %v8653_v60, %v8654_v1 }
 0x46e   : > { %v8638_v10 = vpack.c.bf16 %v8636_v25, %v8637_v42  ;;  %v4407_v25 = vld [vmem:[%s8082_s3 + $0xd8] sm:$0xf] }
 0x46f   : > { %v3233_v54 = vpop.f32.mrf.mxu3  ;;  %v4657_v42 = vld [vmem:[%s8082_s3 + $0xf4] sm:$0xf0] }
 0x470   : > { %v7313_v12 = vadd.f32 %v3233_v54, %v7056_v18  ;;  %v2012_v11 = vpop.f32.mrf.mxu0  ;;  %v7329_v54 = vor.u32 %v4657_v42, %v4407_v25  ;;  %v4665_v25 = vld [vmem:[%s8082_s3 + $0x134] sm:$0xf0] }
 0x471   : > { %3460 = vmatpush.bf16.msrb.mxu2 %v8638_v10 }
 0x472   : > { %8649 = vst [vmem:[#allocation10_spill] sm:$0xff] %v7329_v54 }
 0x475   : > { %3461 = vmatpush.bf16.msrb.mxu2 %v8641_v21  ;;  %v8648_v21 = vpack.c.bf16 %v8646_v0, %v8647_v16  ;;  %v8656_v0 = vld [vmem:[#allocation36_spill] sm:$0xff]  ;;  %v8657_v16 = vld [vmem:[#allocation35_spill] sm:$0xff] }
 0x477   : > { %v7324_v10 = vpop.f32.mrf.mxu3 }
 0x478   : > { %8645 = vst [vmem:[#allocation11_spill] sm:$0xff] %v7324_v10  ;;  %v2014_v18 = vpop.f32.mrf.mxu0 }
 0x479   : > { %3462 = vmatpush.bf16.msrb.mxu2 %v8644_v20  ;;  %v8652_v20 = vpack.c.bf16 %v8650_v52, %v8651_v5  ;;  %v4439_v52 = vld [vmem:[%s8082_s3 + $0x118] sm:$0xf] }
 0x47a   : > { %v7352_v60 = vor.u32 %v4665_v25, %v4439_v52 }
 0x47c   : > { %3286 = vmatmul.bf16.gmra.mxu2 %v7329_v54  ;;  %8660 = vst [vmem:[#allocation156_spill] sm:$0xff] %v7352_v60 }
 0x47d   : > { %3463 = vmatpush.bf16.msrb.mxu2 %v8648_v21  ;;  %v8658_v21 = vpack.c.bf16 %v8656_v0, %v8657_v16 }
 0x47f   : > { %v3238_v58 = vpop.f32.mrf.mxu3 }
 0x480   : > { %v7339_v10 = vadd.f32 %v3238_v58, %v7079_v47  ;;  %v2017_v39 = vpop.f32.mrf.mxu0  ;;  %v4673_v58 = vld [vmem:[%s8082_s3 + $0x174] sm:$0xf0] }
 0x481   : > { %3464 = vmatpush.bf16.msrb.mxu2 %v8652_v20  ;;  %v4471_v20 = vld [vmem:[%s8082_s3 + $0x158] sm:$0xf] }
 0x485   : > { %3465 = vmatpush.bf16.msrb.mxu2 %v8655_v23 }
 0x487   : > { %v7350_v42 = vpop.f32.mrf.mxu3 }
 0x488   : > { %8659 = vst [vmem:[#allocation116_spill] sm:$0xff] %v7350_v42  ;;  %v2019_v1 = vpop.f32.mrf.mxu0  ;;  %v8665_v42 = vld [vmem:[#allocation115_spill] sm:$0xff] }
 0x489   : > { %3466 = vmatpush.bf16.msrb.mxu2 %v8658_v21  ;;  %v7366_v21 = vor.u32 %v4673_v58, %v4471_v20  ;;  %v8664_v58 = vld [vmem:[#allocation120_spill] sm:$0xff]  ;;  %v2020_v37 = vadd.f32 %v2019_v1, %v8668_v17 }
 0x48b   : > { %8662 = vst [vmem:[#allocation8_spill] sm:$0xff] %v7366_v21 }
 0x48c   : > { %3291 = vmatmul.bf16.gmra.mxu2 %v7352_v60  ;;  %v4681_v60 = vld [vmem:[%s8082_s3 + $0x1b4] sm:$0xf0] }
 0x48f   : > { %v3243_v47 = vpop.f32.mrf.mxu3 }
 0x490   : > { %v7356_v23 = vadd.f32 %v3243_v47, %v7100_v2  ;;  %v2022_v5 = vpop.f32.mrf.mxu0  ;;  %v4503_v47 = vld [vmem:[%s8082_s3 + $0x198] sm:$0xf] }
 0x491   : > { %v7380_v20 = vor.u32 %v4681_v60, %v4503_v47  ;;  %v2023_v26 = vadd.f32 %v2022_v5, %v8667_v7  ;;  %v8669_v60 = vld [vmem:[#allocation99_spill] sm:$0xff]  ;;  %v4629_v5 = vld [vmem:[%s8082_s3 + $0x1c] sm:$0xf] }
 0x492   : > { %v2018_v47 = vadd.f32 %v2017_v39, %v8669_v60 }
 0x497   : > { %v7364_v0 = vpop.f32.mrf.mxu3 }
 0x498   : > { %8661 = vst [vmem:[#allocation9_spill] sm:$0xff] %v7364_v0  ;;  %v2024_v16 = vpop.f32.mrf.mxu0 }
 0x49c   : > { %3296 = vmatmul.bf16.gmra.mxu2 %v7366_v21 }
 0x49f   : > { %v3248_v52 = vpop.f32.mrf.mxu3 }
 0x4a0   : > { %v7370_v2 = vadd.f32 %v3248_v52, %v7121_v56  ;;  %v2027_v25 = vpop.f32.mrf.mxu0  ;;  %v8666_v56 = vld [vmem:[#allocation96_spill] sm:$0xff] }
 0x4a1   : > { %v2028_v21 = vadd.f32 %v2027_v25, %v8664_v58  ;;  %v2025_v52 = vadd.f32 %v2024_v16, %v8666_v56  ;;  %v8670_v25 = vld [vmem:[#allocation139_spill] sm:$0xff]  ;;  %v2483_v58 = vpack.c.bf16 %v2020_v37, %v2018_v47  ;;  %v8672_v37 = vpack.c.bf16 %v7293_v34, %v7290_v59  ;;  %v4313_v34 = vld [vmem:[%s8082_s3 + $0x38] sm:$0xf0]  ;;  %v7423_v59 = vpop.f32.mrf.mxu2  ;;  %v8682_v47 = vld [vmem:[#allocation30_spill] sm:$0xff] }
 0x4a2   : > { %v8671_v16 = vld [vmem:[#allocation143_spill] sm:$0xff] }
 0x4a3   : > { %v2485_v6 = vpack.c.bf16 %v2025_v52, %v2023_v26  ;;  %v4689_v26 = vld [vmem:[%s8082_s3 + $0x1f4] sm:$0xf0]  ;;  %v8681_v52 = vld [vmem:[#allocation31_spill] sm:$0xff] }
 0x4a7   : > { %v7378_v54 = vpop.f32.mrf.mxu3 }
 0x4a8   : > { %8663 = vst [vmem:[#allocation7_spill] sm:$0xff] %v7378_v54  ;;  %v2029_v0 = vpop.f32.mrf.mxu0 }
 0x4a9   : > { %v2030_v62 = vadd.f32 %v2029_v0, %v8665_v42  ;;  %v2015_v0 = vadd.f32 %v2014_v18, %v8670_v25  ;;  %v8674_v18 = vpack.c.bf16 %v7203_v30, %v7200_v29  ;;  %v8679_v30 = vld [vmem:[#allocation34_spill] sm:$0xff] }
 0x4ab   : > { %v2487_v61 = vpack.c.bf16 %v2030_v62, %v2028_v21  ;;  %v2013_v62 = vadd.f32 %v2012_v11, %v8671_v16  ;;  %v8673_v11 = vpack.c.bf16 %v7248_v9, %v7245_v35  ;;  %v8675_v35 = vpack.c.bf16 %v7164_v4, %v7161_v15  ;;  %v8676_v9 = vld [vmem:[#allocation33_spill] sm:$0xff]  ;;  %v8677_v21 = vld [vmem:[#allocation32_spill] sm:$0xff]  ;;  %v8684_v4 = vld [vmem:[#allocation182_spill] sm:$0xff] }
 0x4ac   : > { %3301 = vmatmul.bf16.gmra.mxu2 %v7380_v20  ;;  %v8678_v29 = vpack.c.bf16 %v8676_v9, %v8677_v21 }
 0x4ad   : > { %3312 = vmatpush.bf16.msrb.mxu3 %v2487_v61  ;;  %v4535_v61 = vld [vmem:[%s8082_s3 + $0x1d8] sm:$0xf]  ;;  %v2481_v1 = vpack.c.bf16 %v2015_v0, %v2013_v62  ;;  %v8683_v0 = vpack.c.bf16 %v8681_v52, %v8682_v47  ;;  %v8700_v47 = vld [vmem:[#allocation24_spill] sm:$0xff] }
 0x4ae   : > { %v8699_v52 = vld [vmem:[#allocation25_spill] sm:$0xff] }
 0x4af   : > { %v3253_v36 = vpop.f32.mrf.mxu3 }
 0x4b0   : > { %v7389_v54 = vadd.f32 %v3253_v36, %v7144_v44  ;;  %v7402_v36 = vor.u32 %v4689_v26, %v4535_v61  ;;  %v8685_v61 = vld [vmem:[#allocation181_spill] sm:$0xff] }
 0x4b1   : > { %3313 = vmatpush.bf16.msrb.mxu3 %v2485_v6  ;;  %v8686_v26 = vpack.c.bf16 %v8684_v4, %v8685_v61  ;;  %v8703_v4 = vld [vmem:[#allocation161_spill] sm:$0xff]  ;;  %v8704_v61 = vld [vmem:[#allocation159_spill] sm:$0xff] }
 0x4b5   : > { %3314 = vmatpush.bf16.msrb.mxu3 %v2483_v58  ;;  %v8680_v58 = vpack.c.bf16 %v6622_v40, %v6619_v8  ;;  %v4637_v8 = vld [vmem:[%s8082_s3 + $0x5c] sm:$0xf] }
 0x4b7   : > { %v7400_v44 = vpop.f32.mrf.mxu3 }
 0x4b9   : > { %3315 = vmatpush.bf16.msrb.mxu3 %v2481_v1  ;;  %v8687_v1 = vld [vmem:[#allocation29_spill] sm:$0xff] }
 0x4bc   : > { %3306 = vmatmul.bf16.gmra.mxu2 %v7402_v36 }
 0x4bd   : > { %3316 = vmatpush.bf16.msrb.mxu3 %v8672_v37  ;;  %v8688_v37 = vld [vmem:[#allocation28_spill] sm:$0xff] }
 0x4bf   : > { %v3258_v6 = vpop.f32.mrf.mxu3 }
 0x4c0   : > { %v7409_v39 = vadd.f32 %v3258_v6, %v7181_v13  ;;  %v7425_v13 = vor.u32 %v4629_v5, %v4313_v34  ;;  %v8689_v6 = vpack.c.bf16 %v8687_v1, %v8688_v37  ;;  %v8693_v5 = vld [vmem:[#allocation27_spill] sm:$0xff]  ;;  %v8694_v34 = vld [vmem:[#allocation26_spill] sm:$0xff] }
 0x4c1   : > { %3317 = vmatpush.bf16.msrb.mxu3 %v8673_v11  ;;  %v8690_v11 = vld [vmem:[#allocation174_spill] sm:$0xff]  ;;  %v8706_v1 = vld [vmem:[#allocation23_spill] sm:$0xff] }
 0x4c2   : > { %v8707_v37 = vld [vmem:[#allocation22_spill] sm:$0xff] }
 0x4c5   : > { %3318 = vmatpush.bf16.msrb.mxu3 %v8674_v18  ;;  %v8691_v18 = vld [vmem:[#allocation173_spill] sm:$0xff] }
 0x4c6   : > { %v8692_v40 = vpack.c.bf16 %v8690_v11, %v8691_v18 }
 0x4c9   : > { %3319 = vmatpush.bf16.msrb.mxu3 %v8675_v35  ;;  %v8695_v35 = vpack.c.bf16 %v8693_v5, %v8694_v34  ;;  %v8712_v5 = vld [vmem:[#allocation21_spill] sm:$0xff]  ;;  %v8713_v34 = vld [vmem:[#allocation20_spill] sm:$0xff] }
 0x4cc   : > { %3320 = vmatmul.bf16.vlgmr.msrb.gmra.mxu3 %v7425_v13  ;;  %3369 = vmatmul.bf16.vlgmr.msra.gmra.mxu2 %v8679_v30  ;;  %v8697_v30 = vld [vmem:[#allocation166_spill] sm:$0xff] }
 0x4cd   : > { %3410 = vmatpush.bf16.msra.mxu3 %v8678_v29  ;;  %3557 = vmatpush.bf16.msra.mxu2 %v8680_v58  ;;  %v8696_v29 = vld [vmem:[#allocation167_spill] sm:$0xff] }
 0x4ce   : > { %v8698_v58 = vpack.c.bf16 %v8696_v29, %v8697_v30  ;;  %v8715_v29 = vld [vmem:[#allocation148_spill] sm:$0xff]  ;;  %v8716_v30 = vld [vmem:[#allocation145_spill] sm:$0xff] }
 0x4cf   : > { %v3272_v62 = vpop.f32.mrf.mxu2 }
 0x4d0   : > { %v7442_v15 = vadd.f32 %v3272_v62, %v7226_v27  ;;  %v4345_v27 = vld [vmem:[%s8082_s3 + $0x78] sm:$0xf0] }
 0x4d1   : > { %3411 = vmatpush.bf16.msra.mxu3 %v8683_v0  ;;  %3558 = vmatpush.bf16.msra.mxu2 %v8686_v26  ;;  %v7464_v21 = vor.u32 %v4637_v8, %v4345_v27  ;;  %v8701_v0 = vpack.c.bf16 %v8699_v52, %v8700_v47  ;;  %v8702_v62 = vld [vmem:[#allocation37_spill] sm:$0xff]  ;;  %v8705_v26 = vpack.c.bf16 %v8703_v4, %v8704_v61  ;;  %v8718_v47 = vld [vmem:[#allocation19_spill] sm:$0xff] }
 0x4d2   : > { %v8710_v8 = vld [vmem:[#allocation153_spill] sm:$0xff] }
 0x4d3   : > { %v4645_v52 = vld [vmem:[%s8082_s3 + $0x9c] sm:$0xf] }
 0x4d4   : > { %v8721_v61 = vld [vmem:[#allocation129_spill] sm:$0xff] }
 0x4d5   : > { %3412 = vmatpush.bf16.msra.mxu3 %v8689_v6  ;;  %3559 = vmatpush.bf16.msra.mxu2 %v8692_v40  ;;  %v8708_v6 = vpack.c.bf16 %v8706_v1, %v8707_v37  ;;  %v8709_v40 = vld [vmem:[#allocation155_spill] sm:$0xff] }
 0x4d6   : > { %v8711_v27 = vpack.c.bf16 %v8709_v40, %v8710_v8  ;;  %v8727_v8 = vld [vmem:[#allocation119_spill] sm:$0xff] }
 0x4d7   : > { %v7462_v9 = vpop.f32.mrf.mxu2 }
 0x4d9   : > { %3413 = vmatpush.bf16.msra.mxu3 %v8695_v35  ;;  %3560 = vmatpush.bf16.msra.mxu2 %v8698_v58  ;;  %v8714_v35 = vpack.c.bf16 %v8712_v5, %v8713_v34  ;;  %v8717_v58 = vpack.c.bf16 %v8715_v29, %v8716_v30  ;;  %v8730_v34 = vld [vmem:[#allocation40_spill] sm:$0xff]  ;;  %v8731_v29 = vld [vmem:[#allocation110_spill] sm:$0xff]  ;;  %v8732_v30 = vld [vmem:[#allocation107_spill] sm:$0xff] }
 0x4dc   : > { %3325 = vmatmul.bf16.gmra.mxu3 %v7464_v21  ;;  %3374 = vmatmul.bf16.gmra.mxu2 %v8702_v62 }
 0x4dd   : > { %3414 = vmatpush.bf16.msra.mxu3 %v8701_v0  ;;  %3561 = vmatpush.bf16.msra.mxu2 %v8705_v26  ;;  %v8719_v0 = vld [vmem:[#allocation18_spill] sm:$0xff]  ;;  %v8722_v26 = vld [vmem:[#allocation127_spill] sm:$0xff] }
 0x4de   : > { %v8720_v62 = vpack.c.bf16 %v8718_v47, %v8719_v0  ;;  %v8723_v1 = vpack.c.bf16 %v8721_v61, %v8722_v26  ;;  %v8735_v47 = vld [vmem:[#allocation100_spill] sm:$0xff]  ;;  %v4409_v61 = vld [vmem:[%s8082_s3 + $0xf8] sm:$0xf0] }
 0x4df   : > { %v3277_v11 = vpop.f32.mrf.mxu2 }
 0x4e0   : > { %v7481_v18 = vadd.f32 %v3277_v11, %v7268_v48  ;;  %v4377_v48 = vld [vmem:[%s8082_s3 + $0xb8] sm:$0xf0]  ;;  %v8725_v11 = vld [vmem:[#allocation135_spill] sm:$0xff] }
 0x4e1   : > { %3415 = vmatpush.bf16.msra.mxu3 %v8708_v6  ;;  %3562 = vmatpush.bf16.msra.mxu2 %v8711_v27  ;;  %v7506_v37 = vor.u32 %v4645_v52, %v4377_v48  ;;  %v8724_v6 = vld [vmem:[#allocation137_spill] sm:$0xff]  ;;  %v8734_v48 = vld [vmem:[#allocation102_spill] sm:$0xff] }
 0x4e2   : > { %v8726_v40 = vpack.c.bf16 %v8724_v6, %v8725_v11  ;;  %v8728_v27 = vld [vmem:[#allocation117_spill] sm:$0xff]  ;;  %v8736_v0 = vpack.c.bf16 %v8734_v48, %v8735_v47  ;;  %v8747_v48 = vld [vmem:[#allocation71_spill] sm:$0xff]  ;;  %v8748_v47 = vld [vmem:[#allocation68_spill] sm:$0xff] }
 0x4e3   : > { %v8729_v5 = vpack.c.bf16 %v8727_v8, %v8728_v27  ;;  %v8738_v6 = vld [vmem:[#allocation89_spill] sm:$0xff]  ;;  %v8741_v8 = vld [vmem:[#allocation83_spill] sm:$0xff] }
 0x4e5   : > { %3416 = vmatpush.bf16.msra.mxu3 %v8714_v35  ;;  %3563 = vmatpush.bf16.msra.mxu2 %v8717_v58  ;;  %v8733_v58 = vpack.c.bf16 %v8731_v29, %v8732_v30  ;;  %v8745_v29 = vld [vmem:[#allocation75_spill] sm:$0xff] }
 0x4e7   : > { %v7501_v4 = vpop.f32.mrf.mxu2 }
 0x4e9   : > { %3417 = vmatpush.bf16.msra.mxu3 %v8720_v62  ;;  %3564 = vmatpush.bf16.msra.mxu2 %v8726_v40  ;;  %v4653_v62 = vld [vmem:[%s8082_s3 + $0xdc] sm:$0xf] }
 0x4ea   : > { %v8740_v40 = vld [vmem:[#allocation85_spill] sm:$0xff] }
 0x4eb   : > { %v8742_v27 = vpack.c.bf16 %v8740_v40, %v8741_v8  ;;  %v4669_v8 = vld [vmem:[%s8082_s3 + $0x15c] sm:$0xf] }
 0x4ec   : > { %3330 = vmatmul.bf16.gmra.mxu3 %v7506_v37  ;;  %3379 = vmatmul.bf16.gmra.mxu2 %v8730_v34 }
 0x4ed   : > { %3508 = vmatpush.bf16.msrb.mxu3 %v8723_v1  ;;  %v8737_v1 = vld [vmem:[#allocation91_spill] sm:$0xff] }
 0x4ee   : > { %v8739_v11 = vpack.c.bf16 %v8737_v1, %v8738_v6 }
 0x4ef   : > { %v3282_v35 = vpop.f32.mrf.mxu2 }
 0x4f0   : > { %v7520_v52 = vadd.f32 %v3282_v35, %v7313_v12  ;;  %v7536_v12 = vor.u32 %v4653_v62, %v4409_v61  ;;  %v8744_v35 = vld [vmem:[#allocation77_spill] sm:$0xff] }
 0x4f1   : > { %3509 = vmatpush.bf16.msrb.mxu3 %v8729_v5  ;;  %v8743_v5 = vld [vmem:[#allocation43_spill] sm:$0xff]  ;;  %v8746_v30 = vpack.c.bf16 %v8744_v35, %v8745_v29  ;;  %v4661_v62 = vld [vmem:[%s8082_s3 + $0x11c] sm:$0xf] }
 0x4f2   : > { %v4441_v61 = vld [vmem:[%s8082_s3 + $0x138] sm:$0xf0]  ;;  %v8752_v35 = vld [vmem:[#allocation51_spill] sm:$0xff] }
 0x4f3   : > { %v7560_v6 = vor.u32 %v4661_v62, %v4441_v61  ;;  %v8754_v62 = vld [vmem:[#allocation55_spill] sm:$0xff] }
 0x4f5   : > { %3510 = vmatpush.bf16.msrb.mxu3 %v8733_v58 }
 0x4f7   : > { %v7531_v26 = vpop.f32.mrf.mxu2 }
 0x4f9   : > { %3511 = vmatpush.bf16.msrb.mxu3 %v8736_v0  ;;  %v8749_v0 = vpack.c.bf16 %v8747_v48, %v8748_v47  ;;  %v4505_v48 = vld [vmem:[%s8082_s3 + $0x1b8] sm:$0xf0] }
 0x4fc   : > { %3335 = vmatmul.bf16.gmra.mxu3 %v7536_v12  ;;  %3384 = vmatmul.bf16.gmra.mxu2 %v8743_v5 }
 0x4fd   : > { %3512 = vmatpush.bf16.msrb.mxu3 %v8739_v11 }
 0x4ff   : > { %v3287_v34 = vpop.f32.mrf.mxu2 }
 0x500   : > { %v7547_v58 = vadd.f32 %v3287_v34, %v7339_v10  ;;  %v8750_v10 = vld [vmem:[#allocation47_spill] sm:$0xff] }
 0x501   : > { %3513 = vmatpush.bf16.msrb.mxu3 %v8742_v27  ;;  %v4473_v27 = vld [vmem:[%s8082_s3 + $0x178] sm:$0xf0] }
 0x502   : > { %v7575_v34 = vor.u32 %v4669_v8, %v4473_v27 }
 0x504   : > { %8751 = vst [vmem:[#allocation6_spill] sm:$0xff] %v7575_v34 }
 0x505   : > { %3514 = vmatpush.bf16.msrb.mxu3 %v8746_v30  ;;  %v4677_v30 = vld [vmem:[%s8082_s3 + $0x19c] sm:$0xf] }
 0x507   : > { %v7558_v1 = vpop.f32.mrf.mxu2 }
 0x509   : > { %3515 = vmatpush.bf16.msrb.mxu3 %v8749_v0  ;;  %v7590_v0 = vor.u32 %v4677_v30, %v4505_v48  ;;  %v8757_v30 = vld [vmem:[#allocation168_spill] sm:$0xff]  ;;  %v8758_v48 = vld [vmem:[#allocation70_spill] sm:$0xff] }
 0x50b   : > { %8753 = vst [vmem:[#allocation5_spill] sm:$0xff] %v7590_v0 }
 0x50c   : > { %3340 = vmatmul.bf16.gmra.mxu3 %v7560_v6  ;;  %3389 = vmatmul.bf16.gmra.mxu2 %v8750_v10  ;;  %v4685_v10 = vld [vmem:[%s8082_s3 + $0x1dc] sm:$0xf] }
 0x50f   : > { %v3292_v11 = vpop.f32.mrf.mxu2 }
 0x510   : > { %v7565_v40 = vadd.f32 %v3292_v11, %v7356_v23  ;;  %v4537_v11 = vld [vmem:[%s8082_s3 + $0x1f8] sm:$0xf0] }
 0x511   : > { %v7605_v27 = vor.u32 %v4685_v10, %v4537_v11  ;;  %v2317_v10 = vadd.f32 %v7123_v19, %v8576_v31  ;;  %v8759_v11 = vld [vmem:[#allocation94_spill] sm:$0xff]  ;;  %v8763_v19 = vld [vmem:[#allocation151_spill] sm:$0xff]  ;;  %v2309_v31 = vadd.f32 %v7093_v22, %v6294_v55  ;;  %v8764_v55 = vpack.c.bf16 %v6868_v38, %v6865_v24 }
 0x512   : > { %v8766_v22 = vld [vmem:[#allocation210_spill] sm:$0xff] }
 0x513   : > { %8755 = vst [vmem:[#allocation3_spill] sm:$0xff] %v7605_v27  ;;  %v8768_v38 = vld [vmem:[#allocation78_spill] sm:$0xff] }
 0x517   : > { %v7573_v5 = vpop.f32.mrf.mxu2 }
 0x51c   : > { %3345 = vmatmul.bf16.gmra.mxu3 %v7575_v34  ;;  %3394 = vmatmul.bf16.gmra.mxu2 %v8752_v35  ;;  %v8756_v35 = vld [vmem:[#allocation61_spill] sm:$0xff] }
 0x51f   : > { %v3297_v29 = vpop.f32.mrf.mxu2 }
 0x520   : > { %v7580_v23 = vadd.f32 %v3297_v29, %v7370_v2 }
 0x527   : > { %v7588_v47 = vpop.f32.mrf.mxu2 }
 0x52c   : > { %3350 = vmatmul.bf16.gmra.mxu3 %v7590_v0  ;;  %3399 = vmatmul.bf16.gmra.mxu2 %v8754_v62  ;;  %v2981_v62 = vadd.f32 %v8758_v48, %v8757_v30  ;;  %v7616_v0 = vpop.f32.mrf.mxu3  ;;  %v8761_v48 = vld [vmem:[#allocation76_spill] sm:$0xff] }
 0x52f   : > { %v3302_v61 = vpop.f32.mrf.mxu2 }
 0x530   : > { %v7595_v2 = vadd.f32 %v3302_v61, %v7389_v54  ;;  %v2319_v61 = vadd.f32 %v7137_v33, %v8577_v46  ;;  %v2312_v46 = vadd.f32 %v7102_v41, %v8579_v57  ;;  %v8762_v33 = vpack.c.bf16 %v6895_v49, %v6892_v45 }
 0x531   : > { %v2307_v41 = vadd.f32 %v7081_v50, %v6309_v28  ;;  %v2304_v45 = vadd.f32 %v7072_v14, %v8580_v3  ;;  %v8765_v50 = vld [vmem:[#allocation133_spill] sm:$0xff]  ;;  %v3755_v14 = vld [vmem:[%s7631_s20 + $0x10] sm:$0xff] }
 0x533   : > { %v2468_v57 = vpack.c.bf16 %v2309_v31, %v2307_v41  ;;  %v8779_v41 = vld [vmem:[#allocation69_spill] sm:$0xff] }
 0x537   : > { %v7603_v8 = vpop.f32.mrf.mxu2 }
 0x53c   : > { %3355 = vmatmul.bf16.gmra.mxu3 %v7605_v27  ;;  %3404 = vmatmul.bf16.gmra.mxu2 %v8756_v35  ;;  %v3030_v35 = vadd.f32 %v8759_v11, %v2981_v62  ;;  %v8760_v27 = vld [vmem:[#allocation44_spill] sm:$0xff]  ;;  %v3753_v62 = vld [vmem:[%s7631_s20] sm:$0xff] }
 0x53f   : > { %v3307_v29 = vpop.f32.mrf.mxu2 }
 0x540   : > { %v7610_v54 = vadd.f32 %v3307_v29, %v7409_v39  ;;  %v2314_v39 = vadd.f32 %v7114_v32, %v8578_v63  ;;  %v2472_v29 = vpack.c.bf16 %v2319_v61, %v2317_v10  ;;  %v3079_v32 = vadd.f32 %v8763_v19, %v3030_v35  ;;  %v8767_v35 = vld [vmem:[#allocation74_spill] sm:$0xff]  ;;  %v8772_v19 = vld [vmem:[#allocation80_spill] sm:$0xff] }
 0x541   : > { %v8769_v24 = vpack.c.bf16 %v8767_v35, %v8768_v38  ;;  %v8785_v35 = vld [vmem:[#allocation82_spill] sm:$0xff] }
 0x542   : > { %v2470_v63 = vpack.c.bf16 %v2314_v39, %v2312_v46  ;;  %v3128_v10 = vadd.f32 %v6733_v51, %v3079_v32  ;;  %v8770_v39 = vld [vmem:[#allocation175_spill] sm:$0xff]  ;;  %v8773_v32 = vld [vmem:[#allocation114_spill] sm:$0xff] }
 0x543   : > { %v8774_v31 = vpack.c.bf16 %v8772_v19, %v8773_v32 }
 0x544   : > { %v3177_v49 = vadd.f32 %v6998_v43, %v3128_v10  ;;  %v8776_v10 = vld [vmem:[#allocation48_spill] sm:$0xff] }
 0x546   : > { %v3226_v28 = vadd.f32 %v7240_v53, %v3177_v49  ;;  %v8781_v49 = vld [vmem:[#allocation209_spill] sm:$0xff] }
 0x547   : > { %v7618_v34 = vpop.f32.mrf.mxu2 }
 0x54c   : > { %3418 = vmatmul.bf16.vlgmr.msra.gmra.mxu3 %v8760_v27  ;;  %3467 = vmatmul.bf16.vlgmr.msrb.gmra.mxu2 %v8761_v48  ;;  %v3275_v48 = vadd.f32 %v7462_v9, %v3226_v28  ;;  %v8777_v9 = vld [vmem:[#allocation84_spill] sm:$0xff] }
 0x54d   : > { %3606 = vmatpush.bf16.msra.mxu3 %v8762_v33  ;;  %3655 = vmatpush.bf16.msrb.mxu2 %v2472_v29  ;;  %v8771_v29 = vld [vmem:[#allocation79_spill] sm:$0xff] }
 0x54e   : > { %v2986_v43 = vadd.f32 %v8771_v29, %v8770_v39  ;;  %v8786_v29 = vld [vmem:[#allocation98_spill] sm:$0xff] }
 0x54f   : > { %v3321_v27 = vpop.f32.mrf.mxu3  ;;  %v7642_v61 = vpop.f32.mrf.mxu2 }
 0x550   : > { %v3322_v11 = vadd.f32 %v3321_v27, %v7442_v15  ;;  %v2302_v15 = vadd.f32 %v8766_v22, %v8765_v50  ;;  %v3757_v22 = vld [vmem:[%s7631_s20 + $0x20] sm:$0xff] }
 0x551   : > { %3607 = vmatpush.bf16.msra.mxu3 %v8764_v55  ;;  %3656 = vmatpush.bf16.msrb.mxu2 %v2470_v63  ;;  %v8775_v63 = vld [vmem:[#allocation103_spill] sm:$0xff] }
 0x552   : > { %v3785_v51 = vadd.f32 %v3753_v62, %v3322_v11  ;;  %v2466_v46 = vpack.c.bf16 %v2304_v45, %v2302_v15  ;;  %v3035_v27 = vadd.f32 %v8775_v63, %v2986_v43  ;;  %v8778_v11 = vld [vmem:[#allocation92_spill] sm:$0xff]  ;;  %v8787_v43 = vld [vmem:[#allocation95_spill] sm:$0xff] }
 0x553   : > { %v8780_v55 = vpack.c.bf16 %v8778_v11, %v8779_v41  ;;  %v8800_v41 = vld [vmem:[#allocation140_spill] sm:$0xff] }
 0x554   : > { %3817 = vst [vmem:[%s7651_s26] sm:$0xff] %v3785_v51  ;;  %v8782_v51 = vld [vmem:[#allocation106_spill] sm:$0xff] }
 0x555   : > { %3608 = vmatpush.bf16.msra.mxu3 %v8769_v24  ;;  %3657 = vmatpush.bf16.msrb.mxu2 %v2468_v57  ;;  %v8783_v45 = vpack.c.bf16 %v8781_v49, %v8782_v51  ;;  %v8784_v57 = vld [vmem:[#allocation157_spill] sm:$0xff] }
 0x556   : > { %v3084_v28 = vadd.f32 %v8784_v57, %v3035_v27  ;;  %v8794_v27 = vld [vmem:[#allocation194_spill] sm:$0xff]  ;;  %v3759_v57 = vld [vmem:[%s7631_s20 + $0x30] sm:$0xff] }
 0x557   : > { %v3323_v3 = vpop.f32.mrf.mxu3  ;;  %v7670_v53 = vpop.f32.mrf.mxu2 }
 0x558   : > { %v3324_v33 = vadd.f32 %v3323_v3, %v3275_v48  ;;  %v3133_v38 = vadd.f32 %v8785_v35, %v3084_v28  ;;  %v8788_v48 = vpack.c.bf16 %v8786_v29, %v8787_v43  ;;  %v8790_v3 = vld [vmem:[#allocation205_spill] sm:$0xff]  ;;  %v8806_v29 = vld [vmem:[#allocation126_spill] sm:$0xff] }
 0x559   : > { %3609 = vmatpush.bf16.msra.mxu3 %v8774_v31  ;;  %3658 = vmatpush.bf16.msrb.mxu2 %v2466_v46  ;;  %v8789_v46 = vld [vmem:[#allocation206_spill] sm:$0xff]  ;;  %v8793_v31 = vld [vmem:[#allocation15_spill] sm:$0xff]  ;;  %v8803_v35 = vld [vmem:[#allocation189_spill] sm:$0xff] }
 0x55a   : > { %v3787_v62 = vadd.f32 %v3755_v14, %v3324_v33  ;;  %v8791_v14 = vpack.c.bf16 %v8789_v46, %v8790_v3  ;;  %v8792_v33 = vld [vmem:[#allocation207_spill] sm:$0xff] }
 0x55b   : > { %v3182_v19 = vadd.f32 %v8792_v33, %v3133_v38  ;;  %v8811_v33 = vld [vmem:[#allocation164_spill] sm:$0xff] }
 0x55c   : > { %3819 = vst [vmem:[%s7651_s26 + $0x10] sm:$0xff] %v3787_v62  ;;  %3423 = vmatmul.bf16.gmra.mxu3 %v8776_v10  ;;  %3472 = vmatmul.bf16.gmra.mxu2 %v8777_v9  ;;  %v8795_v62 = vld [vmem:[#allocation193_spill] sm:$0xff]  ;;  %v8798_v9 = vld [vmem:[#allocation123_spill] sm:$0xff] }
 0x55d   : > { %3610 = vmatpush.bf16.msra.mxu3 %v8780_v55  ;;  %3659 = vmatpush.bf16.msrb.mxu2 %v8783_v45  ;;  %v3231_v63 = vadd.f32 %v8793_v31, %v3182_v19  ;;  %v8796_v10 = vpack.c.bf16 %v8794_v27, %v8795_v62  ;;  %v8801_v55 = vld [vmem:[#allocation87_spill] sm:$0xff]  ;;  %v3761_v31 = vld [vmem:[%s7631_s20 + $0x40] sm:$0xff]  ;;  %v8812_v27 = vld [vmem:[#allocation105_spill] sm:$0xff] }
 0x55e   : > { %v2991_v49 = vadd.f32 %v8801_v55, %v8800_v41  ;;  %v8814_v55 = vld [vmem:[#allocation11_spill] sm:$0xff] }
 0x55f   : > { %v3326_v50 = vpop.f32.mrf.mxu3  ;;  %v7687_v15 = vpop.f32.mrf.mxu2  ;;  %v3280_v51 = vadd.f32 %v7501_v4, %v3231_v63  ;;  %v8809_v4 = vld [vmem:[#allocation52_spill] sm:$0xff] }
 0x560   : > { %v3327_v24 = vadd.f32 %v3326_v50, %v7481_v18  ;;  %v8797_v18 = vld [vmem:[#allocation203_spill] sm:$0xff] }
 0x561   : > { %3611 = vmatpush.bf16.msra.mxu3 %v8788_v48  ;;  %3660 = vmatpush.bf16.msrb.mxu2 %v8791_v14  ;;  %v8799_v11 = vpack.c.bf16 %v8797_v18, %v8798_v9  ;;  %v8808_v48 = vld [vmem:[#allocation112_spill] sm:$0xff]  ;;  %v8810_v14 = vld [vmem:[#allocation90_spill] sm:$0xff]  ;;  %v8813_v18 = vld [vmem:[#allocation211_spill] sm:$0xff] }
 0x562   : > { %v3789_v32 = vadd.f32 %v3757_v22, %v3327_v24  ;;  %v8802_v22 = vld [vmem:[#allocation190_spill] sm:$0xff]  ;;  %v8805_v24 = vld [vmem:[#allocation200_spill] sm:$0xff]  ;;  %v3040_v46 = vadd.f32 %v8808_v48, %v2991_v49  ;;  %v8818_v48 = vld [vmem:[#allocation57_spill] sm:$0xff] }
 0x563   : > { %v8804_v38 = vpack.c.bf16 %v8802_v22, %v8803_v35  ;;  %v8807_v43 = vpack.c.bf16 %v8805_v24, %v8806_v29  ;;  %v8815_v22 = vld [vmem:[#allocation176_spill] sm:$0xff]  ;;  %v8816_v35 = vld [vmem:[#allocation97_spill] sm:$0xff] }
 0x564   : > { %3821 = vst [vmem:[%s7651_s26 + $0x20] sm:$0xff] %v3789_v32  ;;  %v3089_v19 = vadd.f32 %v8811_v33, %v3040_v46  ;;  %v8819_v46 = vld [vmem:[#allocation101_spill] sm:$0xff]  ;;  %v3765_v33 = vld [vmem:[%s7631_s20 + $0x60] sm:$0xff] }
 0x565   : > { %3612 = vmatpush.bf16.msra.mxu3 %v8796_v10  ;;  %3661 = vmatpush.bf16.msrb.mxu2 %v8799_v11 }
 0x566   : > { %v3138_v62 = vadd.f32 %v8812_v27, %v3089_v19 }
 0x567   : > { %v3328_v45 = vpop.f32.mrf.mxu3  ;;  %v7710_v28 = vpop.f32.mrf.mxu2 }
 0x568   : > { %v3329_v50 = vadd.f32 %v3328_v45, %v3280_v51  ;;  %v3187_v9 = vadd.f32 %v8813_v18, %v3138_v62  ;;  %v8822_v62 = vld [vmem:[#allocation213_spill] sm:$0xff] }
 0x569   : > { %3613 = vmatpush.bf16.msra.mxu3 %v8804_v38  ;;  %3662 = vmatpush.bf16.msrb.mxu2 %v8807_v43  ;;  %v2996_v38 = vadd.f32 %v8816_v35, %v8815_v22  ;;  %v8825_v35 = vld [vmem:[#allocation109_spill] sm:$0xff] }
 0x56a   : > { %v3791_v3 = vadd.f32 %v3759_v57, %v3329_v50  ;;  %v3236_v49 = vadd.f32 %v8814_v55, %v3187_v9  ;;  %v3763_v57 = vld [vmem:[%s7631_s20 + $0x50] sm:$0xff] }
 0x56b   : > { %v8823_v9 = vld [vmem:[#allocation116_spill] sm:$0xff] }
 0x56c   : > { %3823 = vst [vmem:[%s7651_s26 + $0x30] sm:$0xff] %v3791_v3  ;;  %3428 = vmatmul.bf16.gmra.mxu3 %v8809_v4  ;;  %3477 = vmatmul.bf16.gmra.mxu2 %v8810_v14  ;;  %v3285_v51 = vadd.f32 %v7531_v26, %v3236_v49  ;;  %v8820_v3 = vld [vmem:[#allocation171_spill] sm:$0xff]  ;;  %v7742_v4 = vpop.f32.mrf.mxu1 }
 0x56f   : > { %v3331_v32 = vpop.f32.mrf.mxu3  ;;  %v7724_v63 = vpop.f32.mrf.mxu2 }
 0x570   : > { %v3332_v10 = vadd.f32 %v3331_v32, %v7520_v52  ;;  %v8817_v52 = vld [vmem:[#allocation122_spill] sm:$0xff] }
 0x571   : > { %v3045_v43 = vadd.f32 %v8817_v52, %v2996_v38  ;;  %v8821_v32 = vld [vmem:[#allocation66_spill] sm:$0xff] }
 0x572   : > { %v3793_v11 = vadd.f32 %v3761_v31, %v3332_v10  ;;  %v8826_v52 = vld [vmem:[#allocation130_spill] sm:$0xff] }
 0x573   : > { %v3094_v26 = vadd.f32 %v8820_v3, %v3045_v43 }
 0x574   : > { %3825 = vst [vmem:[%s7651_s26 + $0x40] sm:$0xff] %v3793_v11 }
 0x575   : > { %v3143_v31 = vadd.f32 %v8821_v32, %v3094_v26  ;;  %v8830_v32 = vld [vmem:[#allocation198_spill] sm:$0xff] }
 0x577   : > { %v3333_v45 = vpop.f32.mrf.mxu3  ;;  %v7733_v50 = vpop.f32.mrf.mxu2  ;;  %v3192_v10 = vadd.f32 %v8822_v62, %v3143_v31  ;;  %v8831_v62 = vld [vmem:[#allocation215_spill] sm:$0xff] }
 0x578   : > { %v3334_v24 = vadd.f32 %v3333_v45, %v3285_v51  ;;  %v3767_v51 = vld [vmem:[%s7631_s20 + $0x70] sm:$0xff] }
 0x579   : > { %v3241_v11 = vadd.f32 %v8823_v9, %v3192_v10 }
 0x57a   : > { %v3795_v29 = vadd.f32 %v3763_v57, %v3334_v24  ;;  %v8824_v57 = vld [vmem:[#allocation183_spill] sm:$0xff]  ;;  %v7758_v24 = vpop.f32.mrf.mxu1 }
 0x57b   : > { %v3290_v55 = vadd.f32 %v7558_v1, %v3241_v11  ;;  %v3001_v38 = vadd.f32 %v8825_v35, %v8824_v57  ;;  %v8829_v1 = vld [vmem:[#allocation178_spill] sm:$0xff]  ;;  %v8832_v11 = vld [vmem:[#allocation9_spill] sm:$0xff]  ;;  %v3771_v35 = vld [vmem:[%s7631_s20 + $0x90] sm:$0xff] }
 0x57c   : > { %3827 = vst [vmem:[%s7651_s26 + $0x50] sm:$0xff] %v3795_v29  ;;  %3433 = vmatmul.bf16.gmra.mxu3 %v8818_v48  ;;  %3482 = vmatmul.bf16.gmra.mxu2 %v8819_v46  ;;  %v8827_v48 = vld [vmem:[#allocation62_spill] sm:$0xff]  ;;  %v8828_v46 = vld [vmem:[#allocation108_spill] sm:$0xff] }
 0x57d   : > { %v3050_v43 = vadd.f32 %v8826_v52, %v3001_v38 }
 0x57f   : > { %v3336_v14 = vpop.f32.mrf.mxu3  ;;  %v7745_v19 = vpop.f32.mrf.mxu2  ;;  %v3099_v3 = vadd.f32 %v8829_v1, %v3050_v43 }
 0x580   : > { %v3337_v27 = vadd.f32 %v3336_v14, %v7547_v58  ;;  %v3769_v14 = vld [vmem:[%s7631_s20 + $0x80] sm:$0xff] }
 0x581   : > { %v3148_v31 = vadd.f32 %v8830_v32, %v3099_v3  ;;  %v8836_v3 = vld [vmem:[#allocation67_spill] sm:$0xff] }
 0x582   : > { %v3797_v18 = vadd.f32 %v3765_v33, %v3337_v27 }
 0x583   : > { %v3197_v10 = vadd.f32 %v8831_v62, %v3148_v31  ;;  %v3773_v31 = vld [vmem:[%s7631_s20 + $0xa0] sm:$0xff] }
 0x584   : > { %3829 = vst [vmem:[%s7651_s26 + $0x60] sm:$0xff] %v3797_v18  ;;  %v7771_v18 = vpop.f32.mrf.mxu1  ;;  %v8839_v62 = vld [vmem:[#allocation58_spill] sm:$0xff] }
 0x587   : > { %v3338_v49 = vpop.f32.mrf.mxu3  ;;  %v7754_v45 = vpop.f32.mrf.mxu2 }
 0x588   : > { %v3339_v29 = vadd.f32 %v3338_v49, %v3290_v55  ;;  %v3246_v55 = vadd.f32 %v8832_v11, %v3197_v10  ;;  %v8840_v11 = vld [vmem:[#allocation217_spill] sm:$0xff] }
 0x58a   : > { %v3799_v58 = vadd.f32 %v3767_v51, %v3339_v29  ;;  %v3295_v49 = vadd.f32 %v7573_v5, %v3246_v55  ;;  %v8833_v29 = vld [vmem:[#allocation149_spill] sm:$0xff]  ;;  %v8838_v5 = vld [vmem:[#allocation184_spill] sm:$0xff] }
 0x58c   : > { %3831 = vst [vmem:[%s7651_s26 + $0x70] sm:$0xff] %v3799_v58  ;;  %3438 = vmatmul.bf16.gmra.mxu3 %v8827_v48  ;;  %3487 = vmatmul.bf16.gmra.mxu2 %v8828_v46  ;;  %v8834_v58 = vld [vmem:[#allocation121_spill] sm:$0xff]  ;;  %v7782_v1 = vpop.f32.mrf.mxu1 }
 0x58d   : > { %v3006_v52 = vadd.f32 %v8834_v58, %v8833_v29  ;;  %v8835_v48 = vld [vmem:[#allocation141_spill] sm:$0xff]  ;;  %v7796_v58 = vpop.permute.xlu0 %2636 }
 0x58f   : > { %v3341_v26 = vpop.f32.mrf.mxu3  ;;  %v7766_v33 = vpop.f32.mrf.mxu2  ;;  %v3055_v46 = vadd.f32 %v8835_v48, %v3006_v52  ;;  %v3775_v48 = vld [vmem:[%s7631_s20 + $0xb0] sm:$0xff] }
 0x590   : > { %v3342_v27 = vadd.f32 %v3341_v26, %v7565_v40  ;;  %v8837_v26 = vld [vmem:[#allocation118_spill] sm:$0xff] }
 0x592   : > { %v3801_v9 = vadd.f32 %v3769_v14, %v3342_v27  ;;  %v3104_v14 = vadd.f32 %v8838_v5, %v3055_v46 }
 0x594   : > { %3833 = vst [vmem:[%s7651_s26 + $0x80] sm:$0xff] %v3801_v9  ;;  %v3153_v10 = vadd.f32 %v8839_v62, %v3104_v14  ;;  %v2351_v52 = vpop.f32.mrf.mxu1  ;;  %v8843_v14 = vld [vmem:[#allocation150_spill] sm:$0xff]  ;;  %v8845_v62 = vld [vmem:[#allocation128_spill] sm:$0xff] }
 0x596   : > { %v3202_v55 = vadd.f32 %v8840_v11, %v3153_v10  ;;  %v8846_v10 = vld [vmem:[#allocation187_spill] sm:$0xff]  ;;  %v3777_v11 = vld [vmem:[%s7631_s20 + $0xc0] sm:$0xff] }
 0x597   : > { %v3343_v51 = vpop.f32.mrf.mxu3  ;;  %v7777_v38 = vpop.f32.mrf.mxu2 }
 0x598   : > { %v3344_v43 = vadd.f32 %v3343_v51, %v3295_v49  ;;  %v8841_v51 = vld [vmem:[#allocation7_spill] sm:$0xff] }
 0x59a   : > { %v3803_v40 = vadd.f32 %v3771_v35, %v3344_v43  ;;  %v3251_v35 = vadd.f32 %v8841_v51, %v3202_v55 }
 0x59c   : > { %3835 = vst [vmem:[%s7651_s26 + $0x90] sm:$0xff] %v3803_v40  ;;  %3443 = vmatmul.bf16.gmra.mxu3 %v8836_v3  ;;  %3492 = vmatmul.bf16.gmra.mxu2 %v8837_v26  ;;  %v3300_v43 = vadd.f32 %v7588_v47, %v3251_v35  ;;  %v8842_v3 = vld [vmem:[#allocation132_spill] sm:$0xff]  ;;  %v2353_v35 = vpop.f32.mrf.mxu1 }
 0x59d   : > { %v3011_v26 = vadd.f32 %v8842_v3, %v7796_v58 }
 0x59f   : > { %v3346_v32 = vpop.f32.mrf.mxu3  ;;  %v7789_v27 = vpop.f32.mrf.mxu2 }
 0x5a0   : > { %v3347_v9 = vadd.f32 %v3346_v32, %v7580_v23  ;;  %v3060_v32 = vadd.f32 %v8843_v14, %v3011_v26 }
 0x5a2   : > { %v3805_v49 = vadd.f32 %v3773_v31, %v3347_v9  ;;  %v8844_v31 = vld [vmem:[#allocation72_spill] sm:$0xff]  ;;  %v3109_v47 = vadd.f32 %v8846_v10, %v3060_v32 }
 0x5a3   : > { %v3779_v32 = vld [vmem:[%s7631_s20 + $0xd0] sm:$0xff] }
 0x5a4   : > { %3837 = vst [vmem:[%s7651_s26 + $0xa0] sm:$0xff] %v3805_v49  ;;  %v8847_v49 = vld [vmem:[#allocation64_spill] sm:$0xff] }
 0x5a5   : > { %v3158_v51 = vadd.f32 %v8847_v49, %v3109_v47 }
 0x5a7   : > { %v3348_v40 = vpop.f32.mrf.mxu3  ;;  %v7800_v46 = vpop.f32.mrf.mxu2 }
 0x5a8   : > { %v3349_v23 = vadd.f32 %v3348_v40, %v3300_v43  ;;  %v8848_v40 = vld [vmem:[#allocation111_spill] sm:$0xff] }
 0x5aa   : > { %v3807_v5 = vadd.f32 %v3775_v48, %v3349_v23  ;;  %v3207_v48 = vadd.f32 %v8848_v40, %v3158_v51  ;;  %v7817_v23 = vpop.permute.xlu2 %2646  ;;  %v8852_v51 = vld [vmem:[#allocation136_spill] sm:$0xff] }
 0x5ac   : > { %3839 = vst [vmem:[%s7651_s26 + $0xb0] sm:$0xff] %v3807_v5  ;;  %3448 = vmatmul.bf16.gmra.mxu3 %v8844_v31  ;;  %3497 = vmatmul.bf16.gmra.mxu2 %v8845_v62  ;;  %v3256_v26 = vadd.f32 %v7400_v44, %v3207_v48  ;;  %v8849_v62 = vld [vmem:[#allocation142_spill] sm:$0xff]  ;;  %v8851_v44 = vld [vmem:[#allocation81_spill] sm:$0xff] }
 0x5ad   : > { %v3016_v10 = vadd.f32 %v8849_v62, %v7817_v23  ;;  %v3781_v48 = vld [vmem:[%s7631_s20 + $0xe0] sm:$0xff] }
 0x5ae   : > { %v3305_v5 = vadd.f32 %v7603_v8, %v3256_v26  ;;  %v8853_v8 = vld [vmem:[#allocation201_spill] sm:$0xff]  ;;  %v8854_v26 = vld [vmem:[#allocation104_spill] sm:$0xff] }
 0x5af   : > { %v3351_v9 = vpop.f32.mrf.mxu3  ;;  %v7810_v55 = vpop.f32.mrf.mxu2 }
 0x5b0   : > { %v3352_v43 = vadd.f32 %v3351_v9, %v7595_v2  ;;  %v2356_v2 = vpop.f32.mrf.mxu1 }
 0x5b2   : > { %v3809_v3 = vadd.f32 %v3777_v11, %v3352_v43  ;;  %v8850_v11 = vld [vmem:[#allocation191_spill] sm:$0xff] }
 0x5b3   : > { %v3065_v49 = vadd.f32 %v8850_v11, %v3016_v10 }
 0x5b4   : > { %3841 = vst [vmem:[%s7651_s26 + $0xc0] sm:$0xff] %v3809_v3 }
 0x5b5   : > { %v3114_v43 = vadd.f32 %v8853_v8, %v3065_v49 }
 0x5b7   : > { %v3353_v14 = vpop.f32.mrf.mxu3  ;;  %v7821_v31 = vpop.f32.mrf.mxu2  ;;  %v3163_v62 = vadd.f32 %v8854_v26, %v3114_v43  ;;  %v8855_v43 = vld [vmem:[#allocation120_spill] sm:$0xff] }
 0x5b8   : > { %v3354_v47 = vadd.f32 %v3353_v14, %v3305_v5  ;;  %v2358_v10 = vpop.f32.mrf.mxu1  ;;  %v2357_v26 = vadd.f32 %v2356_v2, %v8855_v43  ;;  %v8865_v43 = vld [vmem:[#allocation16_spill] sm:$0xff] }
 0x5b9   : > { %v3212_v14 = vadd.f32 %v7423_v59, %v3163_v62  ;;  %v2359_v11 = vadd.f32 %v2358_v10, %v8665_v42  ;;  %v8858_v42 = vld [vmem:[#allocation169_spill] sm:$0xff] }
 0x5ba   : > { %v3811_v9 = vadd.f32 %v3779_v32, %v3354_v47  ;;  %v3371_v62 = vadd.f32 %v7642_v61, %v8858_v42  ;;  %v2342_v61 = vadd.f32 %v7742_v4, %v8671_v16  ;;  %v8864_v16 = vld [vmem:[#allocation134_spill] sm:$0xff] }
 0x5bb   : > { %v3261_v47 = vadd.f32 %v7616_v0, %v3212_v14  ;;  %v2488_v59 = vpack.c.bf16 %v2359_v11, %v2357_v26  ;;  %v8857_v0 = vld [vmem:[#allocation192_spill] sm:$0xff]  ;;  %v3376_v4 = vadd.f32 %v7687_v15, %v8864_v16  ;;  %v8866_v26 = vld [vmem:[#allocation17_spill] sm:$0xff] }
 0x5bc   : > { %3843 = vst [vmem:[%s7651_s26 + $0xd0] sm:$0xff] %v3811_v9  ;;  %3453 = vmatmul.bf16.gmra.mxu3 %v8851_v44  ;;  %3502 = vmatmul.bf16.gmra.mxu2 %v8852_v51  ;;  %v3783_v44 = vld [vmem:[%s7631_s20 + $0xf0] sm:$0xff] }
 0x5bd   : > { %v3310_v9 = vadd.f32 %v7618_v34, %v3261_v47  ;;  %v2352_v34 = vadd.f32 %v2351_v52, %v8667_v7  ;;  %v2344_v7 = vadd.f32 %v7758_v24, %v8670_v25  ;;  %v8861_v25 = vld [vmem:[#allocation12_spill] sm:$0xff]  ;;  %v8862_v24 = vld [vmem:[#allocation13_spill] sm:$0xff] }
 0x5be   : > { %v8871_v15 = vld [vmem:[#allocation88_spill] sm:$0xff] }
 0x5bf   : > { %v3356_v40 = vpop.f32.mrf.mxu3  ;;  %v7831_v3 = vpop.f32.mrf.mxu2 }
 0x5c0   : > { %v3357_v5 = vadd.f32 %v3356_v40, %v7610_v54  ;;  %v2354_v40 = vadd.f32 %v2353_v35, %v8666_v56  ;;  %v2347_v56 = vadd.f32 %v7771_v18, %v8669_v60  ;;  %v8859_v18 = vld [vmem:[#allocation154_spill] sm:$0xff] }
 0x5c2   : > { %v3813_v32 = vadd.f32 %v3781_v48, %v3357_v5  ;;  %v8856_v48 = vld [vmem:[#allocation146_spill] sm:$0xff]  ;;  %v2349_v5 = vadd.f32 %v7782_v1, %v8668_v17  ;;  %v2486_v14 = vpack.c.bf16 %v2354_v40, %v2352_v34  ;;  %v3373_v17 = vadd.f32 %v7670_v53, %v8757_v30 }
 0x5c3   : > { %v2482_v1 = vpack.c.bf16 %v2344_v7, %v2342_v61  ;;  %v3378_v34 = vadd.f32 %v7710_v28, %v8770_v39  ;;  %v8876_v7 = vld [vmem:[#allocation170_spill] sm:$0xff]  ;;  %v3383_v28 = vadd.f32 %v7733_v50, %v8800_v41  ;;  %v3388_v41 = vadd.f32 %v7754_v45, %v8815_v22 }
 0x5c4   : > { %3845 = vst [vmem:[%s7651_s26 + $0xe0] sm:$0xff] %v3813_v32  ;;  %v2484_v52 = vpack.c.bf16 %v2349_v5, %v2347_v56  ;;  %v8875_v56 = vld [vmem:[#allocation196_spill] sm:$0xff]  ;;  %v3393_v22 = vadd.f32 %v7777_v38, %v8824_v57  ;;  %v3398_v57 = vadd.f32 %v7800_v46, %v8833_v29  ;;  %v3403_v29 = vadd.f32 %v7821_v31, %v7796_v58 }
 0x5c7   : > { %v3358_v49 = vpop.f32.mrf.mxu3  ;;  %v7841_v51 = vpop.f32.mrf.mxu2 }
 0x5c8   : > { %v3359_v8 = vadd.f32 %v3358_v49, %v3310_v9  ;;  %v8860_v49 = vld [vmem:[#allocation195_spill] sm:$0xff]  ;;  %v3408_v58 = vadd.f32 %v7841_v51, %v7817_v23  ;;  %v8894_v51 = vld [vmem:[#allocation204_spill] sm:$0xff] }
 0x5ca   : > { %v3815_v54 = vadd.f32 %v3783_v44, %v3359_v8  ;;  %v8863_v44 = vpack.c.bf16 %v8861_v25, %v8862_v24  ;;  %v8878_v25 = vld [vmem:[#allocation93_spill] sm:$0xff] }
 0x5cb   : > { %v8879_v24 = vld [vmem:[#allocation177_spill] sm:$0xff] }
 0x5cc   : > { %3847 = vst [vmem:[%s7651_s26 + $0xf0] sm:$0xff] %v3815_v54  ;;  %3516 = vmatmul.bf16.vlgmr.msrb.gmra.mxu3 %v8856_v48  ;;  %3565 = vmatmul.bf16.vlgmr.msra.gmra.mxu2 %v8857_v0  ;;  %v8867_v54 = vpack.c.bf16 %v8865_v43, %v8866_v26  ;;  %v8869_v48 = vld [vmem:[#allocation131_spill] sm:$0xff]  ;;  %v8880_v26 = vld [vmem:[#allocation172_spill] sm:$0xff] }
 0x5cd   : > { %3704 = vmatpush.bf16.msrb.mxu3 %v2488_v59  ;;  %v8868_v59 = vld [vmem:[#allocation162_spill] sm:$0xff] }
 0x5ce   : > { %v8870_v0 = vpack.c.bf16 %v8868_v59, %v8869_v48  ;;  %v8882_v59 = vld [vmem:[#allocation144_spill] sm:$0xff] }
 0x5cf   : > { %v3419_v2 = vpop.f32.mrf.mxu3  ;;  %v3468_v32 = vpop.f32.mrf.mxu2 }
 0x5d0   : > { %v3420_v10 = vadd.f32 %v3419_v2, %v3371_v62 }
 0x5d1   : > { %3705 = vmatpush.bf16.msrb.mxu3 %v2486_v14  ;;  %v8872_v14 = vld [vmem:[#allocation125_spill] sm:$0xff] }
 0x5d2   : > { %v7855_v35 = vadd.f32 %v3468_v32, %v3420_v10  ;;  %v8873_v2 = vpack.c.bf16 %v8871_v15, %v8872_v14  ;;  %v8874_v10 = vld [vmem:[#allocation160_spill] sm:$0xff]  ;;  %v8883_v14 = vld [vmem:[#allocation179_spill] sm:$0xff] }
 0x5d5   : > { %3706 = vmatpush.bf16.msrb.mxu3 %v2484_v52  ;;  %v3381_v52 = vadd.f32 %v7724_v63, %v8876_v7  ;;  %v3386_v63 = vadd.f32 %v7745_v19, %v8879_v24  ;;  %v3391_v19 = vadd.f32 %v7766_v33, %v8882_v59 }
 0x5d7   : > { %v3421_v47 = vpop.f32.mrf.mxu3  ;;  %v3470_v9 = vpop.f32.mrf.mxu2 }
 0x5d8   : > { %v3422_v11 = vadd.f32 %v3421_v47, %v3373_v17 }
 0x5d9   : > { %3707 = vmatpush.bf16.msrb.mxu3 %v2482_v1 }
 0x5da   : > { %v7863_v60 = vadd.f32 %v3470_v9, %v3422_v11 }
 0x5dc   : > { %3521 = vmatmul.bf16.gmra.mxu3 %v8859_v18  ;;  %3570 = vmatmul.bf16.gmra.mxu2 %v8860_v49  ;;  %v8877_v49 = vld [vmem:[#allocation165_spill] sm:$0xff] }
 0x5dd   : > { %3708 = vmatpush.bf16.msrb.mxu3 %v8863_v44 }
 0x5df   : > { %v3424_v8 = vpop.f32.mrf.mxu3  ;;  %v3473_v30 = vpop.f32.mrf.mxu2 }
 0x5e0   : > { %v3425_v53 = vadd.f32 %v3424_v8, %v3376_v4 }
 0x5e1   : > { %3709 = vmatpush.bf16.msrb.mxu3 %v8867_v54  ;;  %v8881_v54 = vld [vmem:[#allocation197_spill] sm:$0xff] }
 0x5e2   : > { %v7875_v40 = vadd.f32 %v3473_v30, %v3425_v53 }
 0x5e5   : > { %3710 = vmatpush.bf16.msrb.mxu3 %v8870_v0 }
 0x5e7   : > { %v3426_v42 = vpop.f32.mrf.mxu3  ;;  %v3475_v62 = vpop.f32.mrf.mxu2 }
 0x5e8   : > { %v3427_v5 = vadd.f32 %v3426_v42, %v3378_v34 }
 0x5e9   : > { %3711 = vmatpush.bf16.msrb.mxu3 %v8873_v2  ;;  %v8884_v2 = vld [vmem:[#allocation199_spill] sm:$0xff] }
 0x5ea   : > { %v7885_v32 = vadd.f32 %v3475_v62, %v3427_v5 }
 0x5ec   : > { %3526 = vmatmul.bf16.gmra.mxu3 %v8874_v10  ;;  %3575 = vmatmul.bf16.gmra.mxu2 %v8875_v56  ;;  %v8885_v10 = vld [vmem:[#allocation180_spill] sm:$0xff] }
 0x5ed   : > { %v3396_v33 = vadd.f32 %v7789_v27, %v8885_v10 }
 0x5ef   : > { %v3429_v61 = vpop.f32.mrf.mxu3  ;;  %v3478_v17 = vpop.f32.mrf.mxu2 }
 0x5f0   : > { %v3430_v1 = vadd.f32 %v3429_v61, %v3381_v52 }
 0x5f2   : > { %v7891_v39 = vadd.f32 %v3478_v17, %v3430_v1 }
 0x5f7   : > { %v3431_v47 = vpop.f32.mrf.mxu3  ;;  %v3480_v9 = vpop.f32.mrf.mxu2 }
 0x5f8   : > { %v3432_v11 = vadd.f32 %v3431_v47, %v3383_v28  ;;  %v8886_v47 = vld [vmem:[#allocation185_spill] sm:$0xff] }
 0x5fa   : > { %v7895_v18 = vadd.f32 %v3480_v9, %v3432_v11  ;;  %v8887_v9 = vld [vmem:[#allocation73_spill] sm:$0xff]  ;;  %v8888_v11 = vld [vmem:[#allocation186_spill] sm:$0xff] }
 0x5fb   : > { %v3401_v27 = vadd.f32 %v7810_v55, %v8888_v11 }
 0x5fc   : > { %3531 = vmatmul.bf16.gmra.mxu3 %v8877_v49  ;;  %3580 = vmatmul.bf16.gmra.mxu2 %v8878_v25 }
 0x5ff   : > { %v3434_v44 = vpop.f32.mrf.mxu3  ;;  %v3483_v16 = vpop.f32.mrf.mxu2 }
 0x600   : > { %v3435_v4 = vadd.f32 %v3434_v44, %v3386_v63 }
 0x602   : > { %v7901_v8 = vadd.f32 %v3483_v16, %v3435_v4 }
 0x607   : > { %v3436_v50 = vpop.f32.mrf.mxu3  ;;  %v3485_v30 = vpop.f32.mrf.mxu2 }
 0x608   : > { %v3437_v53 = vadd.f32 %v3436_v50, %v3388_v41  ;;  %v8889_v41 = vld [vmem:[#allocation188_spill] sm:$0xff] }
 0x609   : > { %v8890_v50 = vld [vmem:[#allocation56_spill] sm:$0xff] }
 0x60a   : > { %v7905_v43 = vadd.f32 %v3485_v30, %v3437_v53  ;;  %v8891_v30 = vld [vmem:[#allocation152_spill] sm:$0xff] }
 0x60b   : > { %v3406_v55 = vadd.f32 %v7831_v3, %v8891_v30 }
 0x60c   : > { %3536 = vmatmul.bf16.gmra.mxu3 %v8880_v26  ;;  %3585 = vmatmul.bf16.gmra.mxu2 %v8881_v54 }
 0x60f   : > { %v3439_v48 = vpop.f32.mrf.mxu3  ;;  %v3488_v0 = vpop.f32.mrf.mxu2 }
 0x610   : > { %v3440_v34 = vadd.f32 %v3439_v48, %v3391_v19 }
 0x612   : > { %v7911_v42 = vadd.f32 %v3488_v0, %v3440_v34  ;;  %v8892_v34 = vld [vmem:[#allocation202_spill] sm:$0xff] }
 0x617   : > { %v3441_v45 = vpop.f32.mrf.mxu3  ;;  %v3490_v62 = vpop.f32.mrf.mxu2 }
 0x618   : > { %v3442_v5 = vadd.f32 %v3441_v45, %v3393_v22  ;;  %v8893_v22 = vld [vmem:[#allocation163_spill] sm:$0xff] }
 0x61a   : > { %v7915_v15 = vadd.f32 %v3490_v62, %v3442_v5 }
 0x61c   : > { %3541 = vmatmul.bf16.gmra.mxu3 %v8883_v14  ;;  %3590 = vmatmul.bf16.gmra.mxu2 %v8884_v2 }
 0x61f   : > { %v3444_v56 = vpop.f32.mrf.mxu3  ;;  %v3493_v7 = vpop.f32.mrf.mxu2 }
 0x620   : > { %v3445_v52 = vadd.f32 %v3444_v56, %v3396_v33  ;;  %v8895_v33 = vld [vmem:[#allocation158_spill] sm:$0xff] }
 0x622   : > { %v7921_v61 = vadd.f32 %v3493_v7, %v3445_v52 }
 0x627   : > { %v3446_v38 = vpop.f32.mrf.mxu3  ;;  %v3495_v17 = vpop.f32.mrf.mxu2 }
 0x628   : > { %v3447_v1 = vadd.f32 %v3446_v38, %v3398_v57 }
 0x62a   : > { %v7925_v28 = vadd.f32 %v3495_v17, %v3447_v1 }
 0x62c   : > { %3546 = vmatmul.bf16.gmra.mxu3 %v8886_v47  ;;  %3595 = vmatmul.bf16.gmra.mxu2 %v8887_v9  ;;  %v8896_v47 = vld [vmem:[#allocation208_spill] sm:$0xff] }
 0x62f   : > { %v3449_v49 = vpop.f32.mrf.mxu3  ;;  %v3498_v25 = vpop.f32.mrf.mxu2 }
 0x630   : > { %v3450_v24 = vadd.f32 %v3449_v49, %v3401_v27 }
 0x632   : > { %v7931_v63 = vadd.f32 %v3498_v25, %v3450_v24 }
 0x637   : > { %v3451_v46 = vpop.f32.mrf.mxu3  ;;  %v3500_v44 = vpop.f32.mrf.mxu2 }
 0x638   : > { %v3452_v16 = vadd.f32 %v3451_v46, %v3403_v29  ;;  %v8898_v46 = vld [vmem:[#allocation212_spill] sm:$0xff] }
 0x63a   : > { %v7935_v4 = vadd.f32 %v3500_v44, %v3452_v16 }
 0x63c   : > { %3551 = vmatmul.bf16.gmra.mxu3 %v8889_v41  ;;  %3600 = vmatmul.bf16.gmra.mxu2 %v8890_v50 }
 0x63f   : > { %v3454_v53 = vpop.f32.mrf.mxu3  ;;  %v3503_v26 = vpop.f32.mrf.mxu2 }
 0x640   : > { %v3455_v54 = vadd.f32 %v3454_v53, %v3406_v55 }
 0x642   : > { %v7941_v59 = vadd.f32 %v3503_v26, %v3455_v54  ;;  %v8900_v26 = vld [vmem:[#allocation214_spill] sm:$0xff]  ;;  %v8901_v54 = vld [vmem:[#allocation156_spill] sm:$0xff] }
 0x647   : > { %v3456_v31 = vpop.f32.mrf.mxu3  ;;  %v3505_v19 = vpop.f32.mrf.mxu2 }
 0x648   : > { %v3457_v48 = vadd.f32 %v3456_v31, %v3408_v58 }
 0x64a   : > { %v7945_v0 = vadd.f32 %v3505_v19, %v3457_v48 }
 0x64c   : > { %3614 = vmatmul.bf16.vlgmr.msra.gmra.mxu3 %v8892_v34  ;;  %3663 = vmatmul.bf16.vlgmr.msrb.gmra.mxu2 %v8893_v22 }
 0x64f   : > { %v3517_v45 = vpop.f32.mrf.mxu3  ;;  %v3566_v62 = vpop.f32.mrf.mxu2 }
 0x650   : > { %v3518_v3 = vadd.f32 %v3517_v45, %v7855_v35  ;;  %v8902_v45 = vld [vmem:[#allocation216_spill] sm:$0xff] }
 0x652   : > { %v7950_v5 = vadd.f32 %v3566_v62, %v3518_v3  ;;  %v8903_v62 = vld [vmem:[#allocation8_spill] sm:$0xff] }
 0x657   : > { %v3519_v14 = vpop.f32.mrf.mxu3  ;;  %v3568_v2 = vpop.f32.mrf.mxu2 }
 0x658   : > { %v3520_v10 = vadd.f32 %v3519_v14, %v7863_v60  ;;  %v8897_v60 = vld [vmem:[#allocation14_spill] sm:$0xff] }
 0x65a   : > { %v7953_v23 = vadd.f32 %v3568_v2, %v3520_v10 }
 0x65c   : > { %3619 = vmatmul.bf16.gmra.mxu3 %v8894_v51  ;;  %3668 = vmatmul.bf16.gmra.mxu2 %v8895_v33 }
 0x65f   : > { %v3522_v56 = vpop.f32.mrf.mxu3  ;;  %v3571_v7 = vpop.f32.mrf.mxu2 }
 0x660   : > { %v3523_v52 = vadd.f32 %v3522_v56, %v7875_v40  ;;  %v8904_v56 = vld [vmem:[#allocation218_spill] sm:$0xff] }
 0x662   : > { %v7958_v57 = vadd.f32 %v3571_v7, %v3523_v52 }
 0x667   : > { %v3524_v38 = vpop.f32.mrf.mxu3  ;;  %v3573_v35 = vpop.f32.mrf.mxu2 }
 0x668   : > { %v3525_v17 = vadd.f32 %v3524_v38, %v7885_v32  ;;  %v8899_v32 = vld [vmem:[#allocation10_spill] sm:$0xff] }
 0x66a   : > { %v7961_v1 = vadd.f32 %v3573_v35, %v3525_v17 }
 0x66c   : > { %3624 = vmatmul.bf16.gmra.mxu3 %v8896_v47  ;;  %3673 = vmatmul.bf16.gmra.mxu2 %v8897_v60  ;;  %v8905_v60 = vld [vmem:[#allocation86_spill] sm:$0xff] }
 0x66f   : > { %v3527_v9 = vpop.f32.mrf.mxu3  ;;  %v3576_v11 = vpop.f32.mrf.mxu2 }
 0x670   : > { %v3528_v27 = vadd.f32 %v3527_v9, %v7891_v39 }
 0x672   : > { %v7966_v49 = vadd.f32 %v3576_v11, %v3528_v27 }
 0x677   : > { %v3529_v25 = vpop.f32.mrf.mxu3  ;;  %v3578_v40 = vpop.f32.mrf.mxu2 }
 0x678   : > { %v3530_v24 = vadd.f32 %v3529_v25, %v7895_v18 }
 0x67a   : > { %v7969_v29 = vadd.f32 %v3578_v40, %v3530_v24 }
 0x67c   : > { %3629 = vmatmul.bf16.gmra.mxu3 %v8898_v46  ;;  %3678 = vmatmul.bf16.gmra.mxu2 %v8899_v32 }
 0x67f   : > { %v3532_v44 = vpop.f32.mrf.mxu3  ;;  %v3581_v16 = vpop.f32.mrf.mxu2 }
 0x680   : > { %v3533_v41 = vadd.f32 %v3532_v44, %v7901_v8 }
 0x682   : > { %v3582_v50 = vadd.f32 %v3581_v16, %v3533_v41 }
 0x687   : > { %v3534_v30 = vpop.f32.mrf.mxu3  ;;  %v3583_v55 = vpop.f32.mrf.mxu2 }
 0x688   : > { %v3535_v39 = vadd.f32 %v3534_v30, %v7905_v43 }
 0x68a   : > { %v3584_v53 = vadd.f32 %v3583_v55, %v3535_v39 }
 0x68c   : > { %3634 = vmatmul.bf16.gmra.mxu3 %v8900_v26  ;;  %3683 = vmatmul.bf16.gmra.mxu2 %v8901_v54 }
 0x68f   : > { %v3537_v18 = vpop.f32.mrf.mxu3  ;;  %v3586_v58 = vpop.f32.mrf.mxu2 }
 0x690   : > { %v3538_v31 = vadd.f32 %v3537_v18, %v7911_v42 }
 0x692   : > { %v3587_v19 = vadd.f32 %v3586_v58, %v3538_v31 }
 0x697   : > { %v3539_v48 = vpop.f32.mrf.mxu3  ;;  %v3588_v34 = vpop.f32.mrf.mxu2 }
 0x698   : > { %v3540_v22 = vadd.f32 %v3539_v48, %v7915_v15  ;;  %v8908_v48 = vld [vmem:[#allocation3_spill] sm:$0xff] }
 0x69a   : > { %v3589_v8 = vadd.f32 %v3588_v34, %v3540_v22 }
 0x69c   : > { %3639 = vmatmul.bf16.gmra.mxu3 %v8902_v45  ;;  %3688 = vmatmul.bf16.gmra.mxu2 %v8903_v62 }
 0x69f   : > { %v3542_v43 = vpop.f32.mrf.mxu3  ;;  %v3591_v3 = vpop.f32.mrf.mxu2 }
 0x6a0   : > { %v3543_v14 = vadd.f32 %v3542_v43, %v7921_v61 }
 0x6a2   : > { %v3592_v2 = vadd.f32 %v3591_v3, %v3543_v14 }
 0x6a7   : > { %v3544_v10 = vpop.f32.mrf.mxu3  ;;  %v3593_v51 = vpop.f32.mrf.mxu2 }
 0x6a8   : > { %v3545_v33 = vadd.f32 %v3544_v10, %v7925_v28 }
 0x6aa   : > { %v3594_v42 = vadd.f32 %v3593_v51, %v3545_v33 }
 0x6ac   : > { %3644 = vmatmul.bf16.gmra.mxu3 %v8904_v56  ;;  %3693 = vmatmul.bf16.gmra.mxu2 %v7380_v20 }
 0x6af   : > { %v3547_v15 = vpop.f32.mrf.mxu3  ;;  %v3596_v7 = vpop.f32.mrf.mxu2 }
 0x6b0   : > { %v3548_v52 = vadd.f32 %v3547_v15, %v7931_v63  ;;  %v3756_v15 = vld [vmem:[%s7631_s20 + $0x18] sm:$0xff] }
 0x6b2   : > { %v3597_v38 = vadd.f32 %v3596_v7, %v3548_v52 }
 0x6b7   : > { %v3549_v35 = vpop.f32.mrf.mxu3  ;;  %v3598_v17 = vpop.f32.mrf.mxu2 }
 0x6b8   : > { %v3550_v47 = vadd.f32 %v3549_v35, %v7935_v4 }
 0x6ba   : > { %v3599_v61 = vadd.f32 %v3598_v17, %v3550_v47  ;;  %v3758_v47 = vld [vmem:[%s7631_s20 + $0x28] sm:$0xff] }
 0x6bc   : > { %3649 = vmatmul.bf16.gmra.mxu3 %v8905_v60  ;;  %3698 = vmatmul.bf16.gmra.mxu2 %v7402_v36 }
 0x6bf   : > { %v3552_v28 = vpop.f32.mrf.mxu3  ;;  %v3601_v9 = vpop.f32.mrf.mxu2 }
 0x6c0   : > { %v3553_v11 = vadd.f32 %v3552_v28, %v7941_v59 }
 0x6c2   : > { %v3602_v27 = vadd.f32 %v3601_v9, %v3553_v11  ;;  %v3760_v11 = vld [vmem:[%s7631_s20 + $0x38] sm:$0xff] }
 0x6c7   : > { %v3554_v20 = vpop.f32.mrf.mxu3  ;;  %v3603_v25 = vpop.f32.mrf.mxu2 }
 0x6c8   : > { %v3555_v40 = vadd.f32 %v3554_v20, %v7945_v0 }
 0x6ca   : > { %v3604_v63 = vadd.f32 %v3603_v25, %v3555_v40 }
 0x6cc   : > { %3712 = vmatmul.bf16.vlgmr.msrb.gmra.mxu3 %v7425_v13 }
 0x6cf   : > { %v3615_v24 = vpop.f32.mrf.mxu3 }
 0x6d0   : > { %v3616_v4 = vadd.f32 %v3615_v24, %v7950_v5  ;;  %v3762_v24 = vld [vmem:[%s7631_s20 + $0x48] sm:$0xff] }
 0x6d7   : > { %v3617_v46 = vpop.f32.mrf.mxu3 }
 0x6d8   : > { %v3618_v32 = vadd.f32 %v3617_v46, %v7953_v23 }
 0x6dc   : > { %3717 = vmatmul.bf16.gmra.mxu3 %v7464_v21 }
 0x6df   : > { %v3620_v36 = vpop.f32.mrf.mxu3 }
 0x6e0   : > { %v3621_v44 = vadd.f32 %v3620_v36, %v7958_v57 }
 0x6e7   : > { %v3622_v59 = vpop.f32.mrf.mxu3 }
 0x6e8   : > { %v3623_v16 = vadd.f32 %v3622_v59, %v7961_v1  ;;  %v3764_v59 = vld [vmem:[%s7631_s20 + $0x58] sm:$0xff] }
 0x6ec   : > { %3722 = vmatmul.bf16.gmra.mxu3 %v7506_v37 }
 0x6ef   : > { %v3625_v0 = vpop.f32.mrf.mxu3 }
 0x6f0   : > { %v3626_v41 = vadd.f32 %v3625_v0, %v7966_v49  ;;  %v8906_v49 = vld [vmem:[#allocation6_spill] sm:$0xff] }
 0x6f7   : > { %v3627_v13 = vpop.f32.mrf.mxu3 }
 0x6f8   : > { %v8000_v30 = vadd.f32 %v3627_v13, %v7969_v29 }
 0x6fc   : > { %3727 = vmatmul.bf16.gmra.mxu3 %v7536_v12 }
 0x6ff   : > { %v3630_v5 = vpop.f32.mrf.mxu3 }
 0x700   : > { %v8003_v23 = vadd.f32 %v3630_v5, %v3582_v50  ;;  %v8907_v50 = vld [vmem:[#allocation5_spill] sm:$0xff] }
 0x707   : > { %v3632_v21 = vpop.f32.mrf.mxu3 }
 0x708   : > { %v8005_v55 = vadd.f32 %v3632_v21, %v3584_v53  ;;  %v3664_v53 = vpop.f32.mrf.mxu2  ;;  %v3766_v21 = vld [vmem:[%s7631_s20 + $0x68] sm:$0xff] }
 0x709   : > { %v3665_v3 = vadd.f32 %v3664_v53, %v3616_v4 }
 0x70c   : > { %3732 = vmatmul.bf16.gmra.mxu3 %v7560_v6 }
 0x70f   : > { %v3635_v57 = vpop.f32.mrf.mxu3 }
 0x710   : > { %v8008_v1 = vadd.f32 %v3635_v57, %v3587_v19  ;;  %v3666_v58 = vpop.f32.mrf.mxu2 }
 0x717   : > { %v3637_v37 = vpop.f32.mrf.mxu3 }
 0x718   : > { %v8010_v39 = vadd.f32 %v3637_v37, %v3589_v8  ;;  %v3669_v8 = vpop.f32.mrf.mxu2 }
 0x71c   : > { %3737 = vmatmul.bf16.gmra.mxu3 %v8906_v49 }
 0x71f   : > { %v3640_v29 = vpop.f32.mrf.mxu3 }
 0x720   : > { %v8013_v26 = vadd.f32 %v3640_v29, %v3592_v2  ;;  %v3671_v43 = vpop.f32.mrf.mxu2  ;;  %v3754_v2 = vld [vmem:[%s7631_s20 + $0x8] sm:$0xff] }
 0x721   : > { %v3672_v28 = vadd.f32 %v3671_v43, %v3623_v16 }
 0x727   : > { %v3642_v12 = vpop.f32.mrf.mxu3 }
 0x728   : > { %v8015_v54 = vadd.f32 %v3642_v12, %v3594_v42  ;;  %v3674_v33 = vpop.f32.mrf.mxu2  ;;  %v3667_v42 = vadd.f32 %v3666_v58, %v3618_v32  ;;  %v3768_v12 = vld [vmem:[%s7631_s20 + $0x78] sm:$0xff]  ;;  %v3770_v58 = vld [vmem:[%s7631_s20 + $0x88] sm:$0xff] }
 0x729   : > { %v3675_v40 = vadd.f32 %v3674_v33, %v3626_v41 }
 0x72c   : > { %3742 = vmatmul.bf16.gmra.mxu3 %v8907_v50 }
 0x72f   : > { %v3645_v18 = vpop.f32.mrf.mxu3 }
 0x730   : > { %v8018_v6 = vadd.f32 %v3645_v18, %v3597_v38  ;;  %v3670_v38 = vadd.f32 %v3669_v8, %v3621_v44  ;;  %v3676_v35 = vpop.f32.mrf.mxu2 }
 0x731   : > { %v3677_v36 = vadd.f32 %v3676_v35, %v8000_v30 }
 0x737   : > { %v3647_v31 = vpop.f32.mrf.mxu3 }
 0x738   : > { %v8020_v19 = vadd.f32 %v3647_v31, %v3599_v61  ;;  %v3679_v20 = vpop.f32.mrf.mxu2 }
 0x739   : > { %v3680_v41 = vadd.f32 %v3679_v20, %v8003_v23 }
 0x73c   : > { %3747 = vmatmul.bf16.gmra.mxu3 %v8908_v48 }
 0x73f   : > { %v3650_v34 = vpop.f32.mrf.mxu3 }
 0x740   : > { %v8023_v22 = vadd.f32 %v3650_v34, %v3602_v27  ;;  %v3681_v32 = vpop.f32.mrf.mxu2 }
 0x741   : > { %v3682_v49 = vadd.f32 %v3681_v32, %v8005_v55 }
 0x747   : > { %v3652_v45 = vpop.f32.mrf.mxu3 }
 0x748   : > { %v8025_v62 = vadd.f32 %v3652_v45, %v3604_v63  ;;  %v3684_v13 = vpop.f32.mrf.mxu2  ;;  %v3772_v45 = vld [vmem:[%s7631_s20 + $0x98] sm:$0xff] }
 0x749   : > { %v3685_v18 = vadd.f32 %v3684_v13, %v8008_v1 }
 0x74f   : > { %v3713_v14 = vpop.f32.mrf.mxu3 }
 0x750   : > { %v3714_v10 = vadd.f32 %v3713_v14, %v3665_v3  ;;  %v3686_v30 = vpop.f32.mrf.mxu2 }
 0x751   : > { %v3687_v55 = vadd.f32 %v3686_v30, %v8010_v39 }
 0x752   : > { %v3786_v51 = vadd.f32 %v3754_v2, %v3714_v10  ;;  %v3774_v10 = vld [vmem:[%s7631_s20 + $0xa8] sm:$0xff] }
 0x754   : > { %3818 = vst [vmem:[%s7651_s26 + $0x8] sm:$0xff] %v3786_v51 }
 0x757   : > { %v3715_v56 = vpop.f32.mrf.mxu3 }
 0x758   : > { %v3716_v7 = vadd.f32 %v3715_v56, %v3667_v42  ;;  %v3689_v48 = vpop.f32.mrf.mxu2 }
 0x759   : > { %v3690_v1 = vadd.f32 %v3689_v48, %v8013_v26 }
 0x75a   : > { %v3788_v52 = vadd.f32 %v3756_v15, %v3716_v7  ;;  %v3776_v15 = vld [vmem:[%s7631_s20 + $0xb8] sm:$0xff] }
 0x75c   : > { %3820 = vst [vmem:[%s7651_s26 + $0x18] sm:$0xff] %v3788_v52 }
 0x75f   : > { %v3718_v17 = vpop.f32.mrf.mxu3 }
 0x760   : > { %v3719_v61 = vadd.f32 %v3718_v17, %v3670_v38  ;;  %v3691_v14 = vpop.f32.mrf.mxu2  ;;  %v3778_v17 = vld [vmem:[%s7631_s20 + $0xc8] sm:$0xff] }
 0x761   : > { %v3692_v39 = vadd.f32 %v3691_v14, %v8015_v54 }
 0x762   : > { %v3790_v60 = vadd.f32 %v3758_v47, %v3719_v61 }
 0x764   : > { %3822 = vst [vmem:[%s7651_s26 + $0x28] sm:$0xff] %v3790_v60 }
 0x767   : > { %v3720_v9 = vpop.f32.mrf.mxu3 }
 0x768   : > { %v3721_v27 = vadd.f32 %v3720_v9, %v3672_v28  ;;  %v3694_v42 = vpop.f32.mrf.mxu2  ;;  %v3780_v28 = vld [vmem:[%s7631_s20 + $0xd8] sm:$0xff] }
 0x769   : > { %v3695_v38 = vadd.f32 %v3694_v42, %v8018_v6 }
 0x76a   : > { %v3792_v25 = vadd.f32 %v3760_v11, %v3721_v27 }
 0x76c   : > { %3824 = vst [vmem:[%s7651_s26 + $0x38] sm:$0xff] %v3792_v25  ;;  %v3782_v25 = vld [vmem:[%s7631_s20 + $0xe8] sm:$0xff] }
 0x76f   : > { %v3723_v63 = vpop.f32.mrf.mxu3 }
 0x770   : > { %v3724_v4 = vadd.f32 %v3723_v63, %v3675_v40  ;;  %v3696_v26 = vpop.f32.mrf.mxu2 }
 0x771   : > { %v3697_v60 = vadd.f32 %v3696_v26, %v8020_v19  ;;  %v3784_v19 = vld [vmem:[%s7631_s20 + $0xf8] sm:$0xff] }
 0x772   : > { %v3794_v46 = vadd.f32 %v3762_v24, %v3724_v4 }
 0x774   : > { %3826 = vst [vmem:[%s7651_s26 + $0x48] sm:$0xff] %v3794_v46 }
 0x777   : > { %v3725_v44 = vpop.f32.mrf.mxu3 }
 0x778   : > { %v3726_v16 = vadd.f32 %v3725_v44, %v3677_v36  ;;  %v3699_v11 = vpop.f32.mrf.mxu2 }
 0x779   : > { %v3700_v6 = vadd.f32 %v3699_v11, %v8023_v22 }
 0x77a   : > { %v3796_v0 = vadd.f32 %v3764_v59, %v3726_v16 }
 0x77c   : > { %3828 = vst [vmem:[%s7651_s26 + $0x58] sm:$0xff] %v3796_v0 }
 0x77f   : > { %v3728_v5 = vpop.f32.mrf.mxu3 }
 0x780   : > { %v3729_v57 = vadd.f32 %v3728_v5, %v3680_v41  ;;  %v3701_v24 = vpop.f32.mrf.mxu2 }
 0x781   : > { %v3702_v4 = vadd.f32 %v3701_v24, %v8025_v62 }
 0x782   : > { %v3798_v37 = vadd.f32 %v3766_v21, %v3729_v57 }
 0x784   : > { %3830 = vst [vmem:[%s7651_s26 + $0x68] sm:$0xff] %v3798_v37 }
 0x787   : > { %v3730_v29 = vpop.f32.mrf.mxu3 }
 0x788   : > { %v3731_v50 = vadd.f32 %v3730_v29, %v3682_v49 }
 0x78a   : > { %v3800_v53 = vadd.f32 %v3768_v12, %v3731_v50 }
 0x78c   : > { %3832 = vst [vmem:[%s7651_s26 + $0x78] sm:$0xff] %v3800_v53 }
 0x78f   : > { %v3733_v23 = vpop.f32.mrf.mxu3 }
 0x790   : > { %v3734_v31 = vadd.f32 %v3733_v23, %v3685_v18 }
 0x792   : > { %v3802_v34 = vadd.f32 %v3770_v58, %v3734_v31 }
 0x794   : > { %3834 = vst [vmem:[%s7651_s26 + $0x88] sm:$0xff] %v3802_v34 }
 0x797   : > { %v3735_v8 = vpop.f32.mrf.mxu3 }
 0x798   : > { %v3736_v43 = vadd.f32 %v3735_v8, %v3687_v55 }
 0x79a   : > { %v3804_v3 = vadd.f32 %v3772_v45, %v3736_v43 }
 0x79c   : > { %3836 = vst [vmem:[%s7651_s26 + $0x98] sm:$0xff] %v3804_v3 }
 0x79f   : > { %v3738_v2 = vpop.f32.mrf.mxu3 }
 0x7a0   : > { %v3739_v51 = vadd.f32 %v3738_v2, %v3690_v1 }
 0x7a2   : > { %v3806_v33 = vadd.f32 %v3774_v10, %v3739_v51 }
 0x7a4   : > { %3838 = vst [vmem:[%s7651_s26 + $0xa8] sm:$0xff] %v3806_v33 }
 0x7a7   : > { %v3740_v56 = vpop.f32.mrf.mxu3 }
 0x7a8   : > { %v3741_v7 = vadd.f32 %v3740_v56, %v3692_v39 }
 0x7aa   : > { %v3808_v52 = vadd.f32 %v3776_v15, %v3741_v7 }
 0x7ac   : > { %3840 = vst [vmem:[%s7651_s26 + $0xb8] sm:$0xff] %v3808_v52 }
 0x7af   : > { %v3743_v35 = vpop.f32.mrf.mxu3 }
 0x7b0   : > { %v3744_v47 = vadd.f32 %v3743_v35, %v3695_v38 }
 0x7b2   : > { %v3810_v61 = vadd.f32 %v3778_v17, %v3744_v47 }
 0x7b4   : > { %3842 = vst [vmem:[%s7651_s26 + $0xc8] sm:$0xff] %v3810_v61 }
 0x7b7   : > { %v3745_v54 = vpop.f32.mrf.mxu3 }
 0x7b8   : > { %v3746_v9 = vadd.f32 %v3745_v54, %v3697_v60 }
 0x7ba   : > { %v3812_v27 = vadd.f32 %v3780_v28, %v3746_v9 }
 0x7bc   : > { %3844 = vst [vmem:[%s7651_s26 + $0xd8] sm:$0xff] %v3812_v27 }
 0x7bf   : > { %v3748_v20 = vpop.f32.mrf.mxu3 }
 0x7c0   : > { %v3749_v40 = vadd.f32 %v3748_v20, %v3700_v6 }
 0x7c2   : > { %v3814_v63 = vadd.f32 %v3782_v25, %v3749_v40 }
 0x7c4   : > { %3846 = vst [vmem:[%s7651_s26 + $0xe8] sm:$0xff] %v3814_v63 }
 0x7c7   : > { %v3750_v46 = vpop.f32.mrf.mxu3 }
 0x7c8   : > { %v3751_v32 = vadd.f32 %v3750_v46, %v3702_v4 }
 0x7ca   : > { %v3816_v36 = vadd.f32 %v3784_v19, %v3751_v32 }
 0x7cc   : > { %3848 = vst [vmem:[%s7651_s26 + $0xf8] sm:$0xff] %v3816_v36 }
 0x7cd PF: > { %s16_s23 = sadd.s32 1, %s4740_s23   ;;  %s8909_s21 = smov %s4736_s22 }
 0x7ce   : > { %p13_p5 = scmp.ge.s32.totalorder %s16_s23, 4   ;;  %s8910_s22 = smov %s8912_s24 }
 0x7d0   :  { %15 = sbr.rel (!%p13_p5) target bundleno = 2 (0x2), region = 77 }

</bundles_post_ra>
